<compile_context>
chip_gen: v6e
topology: v6e:2x2x1
jax: 0.10.0
libtpu: 0.0.40
codegen_flags: <defaults>
</compile_context>

<pallas_src>
import functools

import jax
import jax.numpy as jnp
from jax.experimental import pallas as pl
from jax.experimental.pallas import tpu as pltpu


# ----------------------------------------------------------------------------
# Kernel
# ----------------------------------------------------------------------------
def crop_lstm_kernel(x_ref, w_ih_ref, w_hh_ref, b_ref,
                     w1_ref, b1_ref, w2_ref, b2_ref,
                     out_ref, seq_ref, gx_ref, *, T, B, HP, L):
    """Refs:
      x_ref   : (T*B, HP)      time-major, feature-padded input
      w_ih_ref: (L, HP, 4*HP)  fused input->gates weights, gate order (i,f,o,g)
      w_hh_ref: (L, HP, 4*HP)  fused hidden->gates weights
      b_ref   : (L, 1, 4*HP)   fused gate bias (bias_ih + bias_hh)
      w1_ref  : (HP, HP), b1_ref: (1, HP)
      w2_ref  : (HP, O),  b2_ref: (1, O)
      out_ref : (B, O)
      seq_ref : (T*B, HP)      scratch: per-layer output sequence
      gx_ref  : (T*B, 4*HP)    scratch: hoisted input projection (+bias)
    """
    h_last = jnp.zeros((B, HP), jnp.float32)

    for l in range(L):                                   # static layer loop
        # --- hoisted input projection for all timesteps at once (bias folded)
        x_seq = x_ref[...] if l == 0 else seq_ref[...]   # (T*B, HP)
        gx_ref[...] = (
            jnp.dot(x_seq, w_ih_ref[l], preferred_element_type=jnp.float32)
            + b_ref[l])

        w_hh_l = w_hh_ref[l]                             # (HP, 4*HP) load once
        write_seq = l < L - 1                            # last layer: only h

        def step(t, carry, w_hh_l=w_hh_l, write_seq=write_seq):
            h, c = carry
            row = t * B
            gates = gx_ref[pl.ds(row, B), :] + jnp.dot(
                h, w_hh_l, preferred_element_type=jnp.float32)   # (B, 4*HP)

            sig = jax.nn.sigmoid(gates[:, :3 * HP])       # i | f | o (one EUP pass)
            i_g = sig[:, 0 * HP:1 * HP]
            f_g = sig[:, 1 * HP:2 * HP]
            o_g = sig[:, 2 * HP:3 * HP]
            g_g = jnp.tanh(gates[:, 3 * HP:])             # g

            c_new = f_g * c + i_g * g_g
            h_new = o_g * jnp.tanh(c_new)
            if write_seq:
                seq_ref[pl.ds(row, B), :] = h_new         # next layer's input
            return (h_new, c_new)

        h0 = jnp.zeros((B, HP), jnp.float32)
        c0 = jnp.zeros((B, HP), jnp.float32)
        h_last, _ = jax.lax.fori_loop(0, T, step, (h0, c0), unroll=True)

    # Feed-forward head on the last timestep of the top layer.
    z = jnp.dot(h_last, w1_ref[...], preferred_element_type=jnp.float32) + b1_ref[...]
    z = jnp.maximum(z, 0.0)
    out = jnp.dot(z, w2_ref[...], preferred_element_type=jnp.float32) + b2_ref[...]
    out_ref[...] = out.astype(out_ref.dtype)


# ----------------------------------------------------------------------------
# Wrapper: pad / fuse params and call the kernel
# ----------------------------------------------------------------------------
_GATE_ORDER = (0, 1, 3, 2)   # kernel order (i, f, o, g) from PyTorch (i, f, g, o)


def pack_params(params, HP):
    """Build padded, gate-fused, (in,out)-transposed tensors for the kernel."""
    w_ih_list, w_hh_list, b_list = params["w_ih"], params["w_hh"], params["b"]
    w1, b1, w2, b2 = params["w1"], params["b1"], params["w2"], params["b2"]
    L = len(w_ih_list)
    H = w1.shape[0]
    O = w2.shape[1]

    def pack_cat(w_full):                       # w_full: (4H, in_dim) torch layout
        in_dim = w_full.shape[1]
        out = jnp.zeros((HP, 4 * HP), jnp.float32)
        for dst, src in enumerate(_GATE_ORDER):
            blk = w_full[src * H:(src + 1) * H, :].T          # (in_dim, H)
            out = out.at[:in_dim, dst * HP:dst * HP + H].set(blk)
        return out

    def pack_bias(b_full):                      # (4H,)
        out = jnp.zeros((1, 4 * HP), jnp.float32)
        for dst, src in enumerate(_GATE_ORDER):
            out = out.at[0, dst * HP:dst * HP + H].set(b_full[src * H:(src + 1) * H])
        return out

    w_ih = jnp.stack([pack_cat(w_ih_list[l]) for l in range(L)])    # (L, HP, 4HP)
    w_hh = jnp.stack([pack_cat(w_hh_list[l]) for l in range(L)])    # (L, HP, 4HP)
    b = jnp.stack([pack_bias(b_list[l]) for l in range(L)])         # (L, 1, 4HP)

    w1p = jnp.zeros((HP, HP), jnp.float32).at[:H, :H].set(w1)
    b1p = jnp.zeros((1, HP), jnp.float32).at[0, :H].set(b1)
    w2p = jnp.zeros((HP, O), jnp.float32).at[:H, :].set(w2)
    b2p = b2.reshape(1, O).astype(jnp.float32)
    return w_ih, w_hh, b, w1p, b1p, w2p, b2p


def crop_lstm_forward(x, params, hp=128):
    """x: (B, T, input_size) float32 -> (B, output_size) float32."""
    B, T, D = x.shape
    O = params["w2"].shape[1]
    L = len(params["w_ih"])
    HP = hp

    packed = pack_params(params, HP)

    # time-major, feature-padded, flattened input: row t*B + b  <->  (t, b)
    x_tm = jnp.transpose(x.astype(jnp.float32), (1, 0, 2)).reshape(T * B, D)
    x_pad = jnp.zeros((T * B, HP), jnp.float32).at[:, :D].set(x_tm)

    vmem = pl.BlockSpec(memory_space=pltpu.MemorySpace.VMEM)
    kernel = functools.partial(crop_lstm_kernel, T=T, B=B, HP=HP, L=L)
    return pl.pallas_call(
        kernel,
        out_shape=jax.ShapeDtypeStruct((B, O), jnp.float32),
        in_specs=[vmem] * 8,
        out_specs=vmem,
        scratch_shapes=[
            pltpu.VMEM((T * B, HP), jnp.float32),       # per-layer output seq
            pltpu.VMEM((T * B, 4 * HP), jnp.float32),   # hoisted input projection
        ],
    )(x_pad, *packed)


# ----------------------------------------------------------------------------
# Synthetic init mimicking the PyTorch module's __init__ (logical, unpadded)
# ----------------------------------------------------------------------------
def init_params(key, input_size=52, hidden_size=104, num_layers=4, output_size=4):
    H, L, O = hidden_size, num_layers, output_size
    keys = jax.random.split(key, 2 * L + 4)
    w_ih_list, w_hh_list, b_list = [], [], []
    for l in range(L):
        in_dim = input_size if l == 0 else H
        # xavier_uniform on weight_ih (4H, in_dim)
        limit = (6.0 / (4 * H + in_dim)) ** 0.5
        w_ih_full = jax.random.uniform(keys[2 * l], (4 * H, in_dim),
                                       jnp.float32, -limit, limit)
        # orthogonal on weight_hh (4H, H) via QR
        a = jax.random.normal(keys[2 * l + 1], (4 * H, H), jnp.float32)
        q, r = jnp.linalg.qr(a)
        w_hh_full = q * jnp.sign(jnp.diagonal(r))[None, :]
        w_ih_list.append(w_ih_full)                    # torch (out, in), gates (i,f,g,o)
        w_hh_list.append(w_hh_full)
        b_list.append(jnp.zeros((4 * H,), jnp.float32))  # bias_ih + bias_hh = 0

    k1, k2, k3, k4 = keys[2 * L:2 * L + 4]
    lim1 = 1.0 / (H ** 0.5)
    w1 = jax.random.uniform(k1, (H, H), jnp.float32, -lim1, lim1)   # (in, out)
    b1 = jax.random.uniform(k2, (H,), jnp.float32, -lim1, lim1)
    w2 = jax.random.uniform(k3, (H, O), jnp.float32, -lim1, lim1)   # (in, out)
    b2 = jax.random.uniform(k4, (O,), jnp.float32, -lim1, lim1)
    return dict(w_ih=w_ih_list, w_hh=w_hh_list, b=b_list,
                w1=w1, b1=b1, w2=w2, b2=b2)


# ----------------------------------------------------------------------------
# Pure-JAX reference mirroring the PyTorch forward
# ----------------------------------------------------------------------------
def crop_lstm_reference(x, params):
    B, T, D = x.shape
    H = params["w1"].shape[0]
    L = len(params["w_ih"])
    seq = x.astype(jnp.float32)
    h = jnp.zeros((B, H), jnp.float32)
    for l in range(L):
        Wih, Whh, bb = params["w_ih"][l], params["w_hh"][l], params["b"][l]
        h = jnp.zeros((B, H), jnp.float32)
        c = jnp.zeros((B, H), jnp.float32)
        outs = []
        for t in range(T):
            x_t = seq[:, t, :]
            gates = x_t @ Wih.T + h @ Whh.T + bb
            i = jax.nn.sigmoid(gates[:, 0 * H:1 * H])
            f = jax.nn.sigmoid(gates[:, 1 * H:2 * H])
            g = jnp.tanh(gates[:, 2 * H:3 * H])
            o = jax.nn.sigmoid(gates[:, 3 * H:4 * H])
            c = f * c + i * g
            h = o * jnp.tanh(c)
            outs.append(h)
        seq = jnp.stack(outs, axis=1)
    z = jnp.maximum(h @ params["w1"] + params["b1"], 0.0)
    return z @ params["w2"] + params["b2"]


if __name__ == "__main__":
    key = jax.random.PRNGKey(0)
    k_param, k_x = jax.random.split(key)

    B, T = 2, 8
    INPUT, HIDDEN, LAYERS, OUTPUT = 52, 104, 4, 4

    params = init_params(k_param, INPUT, HIDDEN, LAYERS, OUTPUT)
    x = jax.random.normal(k_x, (B, T, INPUT), jnp.float32)

    out = jax.block_until_ready(crop_lstm_forward(x, params))
    ref = jax.block_until_ready(crop_lstm_reference(x, params))

    assert out.shape == (B, OUTPUT)
    assert jnp.allclose(out, ref, rtol=1e-3, atol=1e-3), (out, ref)

    print("KERNEL_OK")
</pallas_src>

<mosaic_0001>
module attributes {stable_mosaic.version = 11 : i64} {
  func.func @crop_lstm_kernel(%arg0: memref<16x128xf32, #tpu.memory_space<vmem>>, %arg1: memref<4x128x512xf32, #tpu.memory_space<vmem>>, %arg2: memref<4x128x512xf32, #tpu.memory_space<vmem>>, %arg3: memref<4x1x512xf32, #tpu.memory_space<vmem>>, %arg4: memref<128x128xf32, #tpu.memory_space<vmem>>, %arg5: memref<1x128xf32, #tpu.memory_space<vmem>>, %arg6: memref<128x4xf32, #tpu.memory_space<vmem>>, %arg7: memref<1x4xf32, #tpu.memory_space<vmem>>, %arg8: memref<2x4xf32, #tpu.memory_space<vmem>>, %arg9: memref<16x128xf32, #tpu.memory_space<vmem>>, %arg10: memref<16x512xf32, #tpu.memory_space<vmem>>) attributes {dimension_semantics = [], scalar_prefetch = 0 : i64, scratch_operands = 2 : i64, tpu.core_type = #tpu.core_type<tc>} {
    %c0 = arith.constant 0 : index
    %c0_0 = arith.constant 0 : index
    %0 = vector.load %arg0[%c0, %c0_0] : memref<16x128xf32, #tpu.memory_space<vmem>>, vector<16x128xf32>
    %c0_1 = arith.constant 0 : index
    %c0_2 = arith.constant 0 : index
    %c0_3 = arith.constant 0 : index
    %1 = vector.load %arg1[%c0_1, %c0_2, %c0_3] : memref<4x128x512xf32, #tpu.memory_space<vmem>>, vector<1x128x512xf32>
    %2 = vector.shape_cast %1 : vector<1x128x512xf32> to vector<128x512xf32>
    %cst = arith.constant dense<0.000000e+00> : vector<16x512xf32>
    %3 = tpu.matmul %0, %2, %cst {dimension_numbers = #tpu.dot_dimension_numbers<[1], [0], [0], [1], [0, 0, 1, 1], [], []>} : vector<16x128xf32>, vector<128x512xf32>, vector<16x512xf32> -> vector<16x512xf32>
    %c0_4 = arith.constant 0 : index
    %c0_5 = arith.constant 0 : index
    %c0_6 = arith.constant 0 : index
    %4 = vector.load %arg3[%c0_4, %c0_5, %c0_6] : memref<4x1x512xf32, #tpu.memory_space<vmem>>, vector<1x1x512xf32>
    %5 = vector.shape_cast %4 : vector<1x1x512xf32> to vector<1x512xf32>
    %6 = vector.broadcast %5 : vector<1x512xf32> to vector<16x512xf32>
    %7 = arith.addf %3, %6 : vector<16x512xf32>
    %c0_7 = arith.constant 0 : index
    %c0_8 = arith.constant 0 : index
    %8 = vector.load %arg10[%c0_7, %c0_8] : memref<16x512xf32, #tpu.memory_space<vmem>>, vector<16x512xf32>
    tpu.vector_store %arg10[%c0_7, %c0_8], %7 {strides = array<i32>} : memref<16x512xf32, #tpu.memory_space<vmem>>, vector<16x512xf32>,
    %c0_9 = arith.constant 0 : index
    %c0_10 = arith.constant 0 : index
    %c0_11 = arith.constant 0 : index
    %9 = vector.load %arg2[%c0_9, %c0_10, %c0_11] : memref<4x128x512xf32, #tpu.memory_space<vmem>>, vector<1x128x512xf32>
    %10 = vector.shape_cast %9 : vector<1x128x512xf32> to vector<128x512xf32>
    %cst_12 = arith.constant 0.000000e+00 : f32
    %11 = vector.broadcast %cst_12 : f32 to vector<2x128xf32>
    %cst_13 = arith.constant 0.000000e+00 : f32
    %12 = vector.broadcast %cst_13 : f32 to vector<2x128xf32>
    %c0_i32 = arith.constant 0 : i32
    %c2_i32 = arith.constant 2 : i32
    %13 = arith.muli %c0_i32, %c2_i32 : i32
    %14 = arith.index_cast %13 : i32 to index
    %c0_14 = arith.constant 0 : index
    %15 = vector.load %arg10[%14, %c0_14] : memref<16x512xf32, #tpu.memory_space<vmem>>, vector<2x512xf32>
    %cst_15 = arith.constant dense<0.000000e+00> : vector<2x512xf32>
    %16 = tpu.matmul %11, %10, %cst_15 {dimension_numbers = #tpu.dot_dimension_numbers<[1], [0], [0], [1], [0, 0, 1, 1], [], []>} : vector<2x128xf32>, vector<128x512xf32>, vector<2x512xf32> -> vector<2x512xf32>
    %17 = arith.addf %15, %16 : vector<2x512xf32>
    %18 = vector.extract_strided_slice %17 {offsets = [0, 0], sizes = [2, 384], strides = [1, 1]} : vector<2x512xf32> to vector<2x384xf32>
    %19 = arith.negf %18 : vector<2x384xf32>
    %20 = math.exp %19 : vector<2x384xf32>
    %cst_16 = arith.constant 1.000000e+00 : f32
    %21 = vector.broadcast %cst_16 : f32 to vector<2x384xf32>
    %22 = arith.addf %21, %20 : vector<2x384xf32>
    %23 = arith.divf %21, %22 : vector<2x384xf32>
    %24 = vector.extract_strided_slice %23 {offsets = [0, 0], sizes = [2, 128], strides = [1, 1]} : vector<2x384xf32> to vector<2x128xf32>
    %25 = vector.extract_strided_slice %23 {offsets = [0, 128], sizes = [2, 128], strides = [1, 1]} : vector<2x384xf32> to vector<2x128xf32>
    %26 = vector.extract_strided_slice %23 {offsets = [0, 256], sizes = [2, 128], strides = [1, 1]} : vector<2x384xf32> to vector<2x128xf32>
    %27 = vector.extract_strided_slice %17 {offsets = [0, 384], sizes = [2, 128], strides = [1, 1]} : vector<2x512xf32> to vector<2x128xf32>
    %28 = math.tanh %27 : vector<2x128xf32>
    %29 = arith.mulf %25, %12 : vector<2x128xf32>
    %30 = arith.mulf %24, %28 : vector<2x128xf32>
    %31 = arith.addf %29, %30 : vector<2x128xf32>
    %32 = math.tanh %31 : vector<2x128xf32>
    %33 = arith.mulf %26, %32 : vector<2x128xf32>
    %34 = arith.index_cast %13 : i32 to index
    %c0_17 = arith.constant 0 : index
    %35 = vector.load %arg9[%34, %c0_17] : memref<16x128xf32, #tpu.memory_space<vmem>>, vector<2x128xf32>
    tpu.vector_store %arg9[%34, %c0_17], %33 {strides = array<i32>} : memref<16x128xf32, #tpu.memory_space<vmem>>, vector<2x128xf32>,
    %c1_i32 = arith.constant 1 : i32
    %c2_i32_18 = arith.constant 2 : i32
    %36 = arith.muli %c1_i32, %c2_i32_18 : i32
    %37 = arith.index_cast %36 : i32 to index
    %c0_19 = arith.constant 0 : index
    %38 = vector.load %arg10[%37, %c0_19] : memref<16x512xf32, #tpu.memory_space<vmem>>, vector<2x512xf32>
    %cst_20 = arith.constant dense<0.000000e+00> : vector<2x512xf32>
    %39 = tpu.matmul %33, %10, %cst_20 {dimension_numbers = #tpu.dot_dimension_numbers<[1], [0], [0], [1], [0, 0, 1, 1], [], []>} : vector<2x128xf32>, vector<128x512xf32>, vector<2x512xf32> -> vector<2x512xf32>
    %40 = arith.addf %38, %39 : vector<2x512xf32>
    %41 = vector.extract_strided_slice %40 {offsets = [0, 0], sizes = [2, 384], strides = [1, 1]} : vector<2x512xf32> to vector<2x384xf32>
    %42 = arith.negf %41 : vector<2x384xf32>
    %43 = math.exp %42 : vector<2x384xf32>
    %cst_21 = arith.constant 1.000000e+00 : f32
    %44 = vector.broadcast %cst_21 : f32 to vector<2x384xf32>
    %45 = arith.addf %44, %43 : vector<2x384xf32>
    %46 = arith.divf %44, %45 : vector<2x384xf32>
    %47 = vector.extract_strided_slice %46 {offsets = [0, 0], sizes = [2, 128], strides = [1, 1]} : vector<2x384xf32> to vector<2x128xf32>
    %48 = vector.extract_strided_slice %46 {offsets = [0, 128], sizes = [2, 128], strides = [1, 1]} : vector<2x384xf32> to vector<2x128xf32>
    %49 = vector.extract_strided_slice %46 {offsets = [0, 256], sizes = [2, 128], strides = [1, 1]} : vector<2x384xf32> to vector<2x128xf32>
    %50 = vector.extract_strided_slice %40 {offsets = [0, 384], sizes = [2, 128], strides = [1, 1]} : vector<2x512xf32> to vector<2x128xf32>
    %51 = math.tanh %50 : vector<2x128xf32>
    %52 = arith.mulf %48, %31 : vector<2x128xf32>
    %53 = arith.mulf %47, %51 : vector<2x128xf32>
    %54 = arith.addf %52, %53 : vector<2x128xf32>
    %55 = math.tanh %54 : vector<2x128xf32>
    %56 = arith.mulf %49, %55 : vector<2x128xf32>
    %57 = arith.index_cast %36 : i32 to index
    %c0_22 = arith.constant 0 : index
    %58 = vector.load %arg9[%57, %c0_22] : memref<16x128xf32, #tpu.memory_space<vmem>>, vector<2x128xf32>
    tpu.vector_store %arg9[%57, %c0_22], %56 {strides = array<i32>} : memref<16x128xf32, #tpu.memory_space<vmem>>, vector<2x128xf32>,
    %c2_i32_23 = arith.constant 2 : i32
    %c2_i32_24 = arith.constant 2 : i32
    %59 = arith.muli %c2_i32_23, %c2_i32_24 : i32
    %60 = arith.index_cast %59 : i32 to index
    %c0_25 = arith.constant 0 : index
    %61 = vector.load %arg10[%60, %c0_25] : memref<16x512xf32, #tpu.memory_space<vmem>>, vector<2x512xf32>
    %cst_26 = arith.constant dense<0.000000e+00> : vector<2x512xf32>
    %62 = tpu.matmul %56, %10, %cst_26 {dimension_numbers = #tpu.dot_dimension_numbers<[1], [0], [0], [1], [0, 0, 1, 1], [], []>} : vector<2x128xf32>, vector<128x512xf32>, vector<2x512xf32> -> vector<2x512xf32>
    %63 = arith.addf %61, %62 : vector<2x512xf32>
    %64 = vector.extract_strided_slice %63 {offsets = [0, 0], sizes = [2, 384], strides = [1, 1]} : vector<2x512xf32> to vector<2x384xf32>
    %65 = arith.negf %64 : vector<2x384xf32>
    %66 = math.exp %65 : vector<2x384xf32>
    %cst_27 = arith.constant 1.000000e+00 : f32
    %67 = vector.broadcast %cst_27 : f32 to vector<2x384xf32>
    %68 = arith.addf %67, %66 : vector<2x384xf32>
    %69 = arith.divf %67, %68 : vector<2x384xf32>
    %70 = vector.extract_strided_slice %69 {offsets = [0, 0], sizes = [2, 128], strides = [1, 1]} : vector<2x384xf32> to vector<2x128xf32>
    %71 = vector.extract_strided_slice %69 {offsets = [0, 128], sizes = [2, 128], strides = [1, 1]} : vector<2x384xf32> to vector<2x128xf32>
    %72 = vector.extract_strided_slice %69 {offsets = [0, 256], sizes = [2, 128], strides = [1, 1]} : vector<2x384xf32> to vector<2x128xf32>
    %73 = vector.extract_strided_slice %63 {offsets = [0, 384], sizes = [2, 128], strides = [1, 1]} : vector<2x512xf32> to vector<2x128xf32>
    %74 = math.tanh %73 : vector<2x128xf32>
    %75 = arith.mulf %71, %54 : vector<2x128xf32>
    %76 = arith.mulf %70, %74 : vector<2x128xf32>
    %77 = arith.addf %75, %76 : vector<2x128xf32>
    %78 = math.tanh %77 : vector<2x128xf32>
    %79 = arith.mulf %72, %78 : vector<2x128xf32>
    %80 = arith.index_cast %59 : i32 to index
    %c0_28 = arith.constant 0 : index
    %81 = vector.load %arg9[%80, %c0_28] : memref<16x128xf32, #tpu.memory_space<vmem>>, vector<2x128xf32>
    tpu.vector_store %arg9[%80, %c0_28], %79 {strides = array<i32>} : memref<16x128xf32, #tpu.memory_space<vmem>>, vector<2x128xf32>,
    %c3_i32 = arith.constant 3 : i32
    %c2_i32_29 = arith.constant 2 : i32
    %82 = arith.muli %c3_i32, %c2_i32_29 : i32
    %83 = arith.index_cast %82 : i32 to index
    %c0_30 = arith.constant 0 : index
    %84 = vector.load %arg10[%83, %c0_30] : memref<16x512xf32, #tpu.memory_space<vmem>>, vector<2x512xf32>
    %cst_31 = arith.constant dense<0.000000e+00> : vector<2x512xf32>
    %85 = tpu.matmul %79, %10, %cst_31 {dimension_numbers = #tpu.dot_dimension_numbers<[1], [0], [0], [1], [0, 0, 1, 1], [], []>} : vector<2x128xf32>, vector<128x512xf32>, vector<2x512xf32> -> vector<2x512xf32>
    %86 = arith.addf %84, %85 : vector<2x512xf32>
    %87 = vector.extract_strided_slice %86 {offsets = [0, 0], sizes = [2, 384], strides = [1, 1]} : vector<2x512xf32> to vector<2x384xf32>
    %88 = arith.negf %87 : vector<2x384xf32>
    %89 = math.exp %88 : vector<2x384xf32>
    %cst_32 = arith.constant 1.000000e+00 : f32
    %90 = vector.broadcast %cst_32 : f32 to vector<2x384xf32>
    %91 = arith.addf %90, %89 : vector<2x384xf32>
    %92 = arith.divf %90, %91 : vector<2x384xf32>
    %93 = vector.extract_strided_slice %92 {offsets = [0, 0], sizes = [2, 128], strides = [1, 1]} : vector<2x384xf32> to vector<2x128xf32>
    %94 = vector.extract_strided_slice %92 {offsets = [0, 128], sizes = [2, 128], strides = [1, 1]} : vector<2x384xf32> to vector<2x128xf32>
    %95 = vector.extract_strided_slice %92 {offsets = [0, 256], sizes = [2, 128], strides = [1, 1]} : vector<2x384xf32> to vector<2x128xf32>
    %96 = vector.extract_strided_slice %86 {offsets = [0, 384], sizes = [2, 128], strides = [1, 1]} : vector<2x512xf32> to vector<2x128xf32>
    %97 = math.tanh %96 : vector<2x128xf32>
    %98 = arith.mulf %94, %77 : vector<2x128xf32>
    %99 = arith.mulf %93, %97 : vector<2x128xf32>
    %100 = arith.addf %98, %99 : vector<2x128xf32>
    %101 = math.tanh %100 : vector<2x128xf32>
    %102 = arith.mulf %95, %101 : vector<2x128xf32>
    %103 = arith.index_cast %82 : i32 to index
    %c0_33 = arith.constant 0 : index
    %104 = vector.load %arg9[%103, %c0_33] : memref<16x128xf32, #tpu.memory_space<vmem>>, vector<2x128xf32>
    tpu.vector_store %arg9[%103, %c0_33], %102 {strides = array<i32>} : memref<16x128xf32, #tpu.memory_space<vmem>>, vector<2x128xf32>,
    %c4_i32 = arith.constant 4 : i32
    %c2_i32_34 = arith.constant 2 : i32
    %105 = arith.muli %c4_i32, %c2_i32_34 : i32
    %106 = arith.index_cast %105 : i32 to index
    %c0_35 = arith.constant 0 : index
    %107 = vector.load %arg10[%106, %c0_35] : memref<16x512xf32, #tpu.memory_space<vmem>>, vector<2x512xf32>
    %cst_36 = arith.constant dense<0.000000e+00> : vector<2x512xf32>
    %108 = tpu.matmul %102, %10, %cst_36 {dimension_numbers = #tpu.dot_dimension_numbers<[1], [0], [0], [1], [0, 0, 1, 1], [], []>} : vector<2x128xf32>, vector<128x512xf32>, vector<2x512xf32> -> vector<2x512xf32>
    %109 = arith.addf %107, %108 : vector<2x512xf32>
    %110 = vector.extract_strided_slice %109 {offsets = [0, 0], sizes = [2, 384], strides = [1, 1]} : vector<2x512xf32> to vector<2x384xf32>
    %111 = arith.negf %110 : vector<2x384xf32>
    %112 = math.exp %111 : vector<2x384xf32>
    %cst_37 = arith.constant 1.000000e+00 : f32
    %113 = vector.broadcast %cst_37 : f32 to vector<2x384xf32>
    %114 = arith.addf %113, %112 : vector<2x384xf32>
    %115 = arith.divf %113, %114 : vector<2x384xf32>
    %116 = vector.extract_strided_slice %115 {offsets = [0, 0], sizes = [2, 128], strides = [1, 1]} : vector<2x384xf32> to vector<2x128xf32>
    %117 = vector.extract_strided_slice %115 {offsets = [0, 128], sizes = [2, 128], strides = [1, 1]} : vector<2x384xf32> to vector<2x128xf32>
    %118 = vector.extract_strided_slice %115 {offsets = [0, 256], sizes = [2, 128], strides = [1, 1]} : vector<2x384xf32> to vector<2x128xf32>
    %119 = vector.extract_strided_slice %109 {offsets = [0, 384], sizes = [2, 128], strides = [1, 1]} : vector<2x512xf32> to vector<2x128xf32>
    %120 = math.tanh %119 : vector<2x128xf32>
    %121 = arith.mulf %117, %100 : vector<2x128xf32>
    %122 = arith.mulf %116, %120 : vector<2x128xf32>
    %123 = arith.addf %121, %122 : vector<2x128xf32>
    %124 = math.tanh %123 : vector<2x128xf32>
    %125 = arith.mulf %118, %124 : vector<2x128xf32>
    %126 = arith.index_cast %105 : i32 to index
    %c0_38 = arith.constant 0 : index
    %127 = vector.load %arg9[%126, %c0_38] : memref<16x128xf32, #tpu.memory_space<vmem>>, vector<2x128xf32>
    tpu.vector_store %arg9[%126, %c0_38], %125 {strides = array<i32>} : memref<16x128xf32, #tpu.memory_space<vmem>>, vector<2x128xf32>,
    %c5_i32 = arith.constant 5 : i32
    %c2_i32_39 = arith.constant 2 : i32
    %128 = arith.muli %c5_i32, %c2_i32_39 : i32
    %129 = arith.index_cast %128 : i32 to index
    %c0_40 = arith.constant 0 : index
    %130 = vector.load %arg10[%129, %c0_40] : memref<16x512xf32, #tpu.memory_space<vmem>>, vector<2x512xf32>
    %cst_41 = arith.constant dense<0.000000e+00> : vector<2x512xf32>
    %131 = tpu.matmul %125, %10, %cst_41 {dimension_numbers = #tpu.dot_dimension_numbers<[1], [0], [0], [1], [0, 0, 1, 1], [], []>} : vector<2x128xf32>, vector<128x512xf32>, vector<2x512xf32> -> vector<2x512xf32>
    %132 = arith.addf %130, %131 : vector<2x512xf32>
    %133 = vector.extract_strided_slice %132 {offsets = [0, 0], sizes = [2, 384], strides = [1, 1]} : vector<2x512xf32> to vector<2x384xf32>
    %134 = arith.negf %133 : vector<2x384xf32>
    %135 = math.exp %134 : vector<2x384xf32>
    %cst_42 = arith.constant 1.000000e+00 : f32
    %136 = vector.broadcast %cst_42 : f32 to vector<2x384xf32>
    %137 = arith.addf %136, %135 : vector<2x384xf32>
    %138 = arith.divf %136, %137 : vector<2x384xf32>
    %139 = vector.extract_strided_slice %138 {offsets = [0, 0], sizes = [2, 128], strides = [1, 1]} : vector<2x384xf32> to vector<2x128xf32>
    %140 = vector.extract_strided_slice %138 {offsets = [0, 128], sizes = [2, 128], strides = [1, 1]} : vector<2x384xf32> to vector<2x128xf32>
    %141 = vector.extract_strided_slice %138 {offsets = [0, 256], sizes = [2, 128], strides = [1, 1]} : vector<2x384xf32> to vector<2x128xf32>
    %142 = vector.extract_strided_slice %132 {offsets = [0, 384], sizes = [2, 128], strides = [1, 1]} : vector<2x512xf32> to vector<2x128xf32>
    %143 = math.tanh %142 : vector<2x128xf32>
    %144 = arith.mulf %140, %123 : vector<2x128xf32>
    %145 = arith.mulf %139, %143 : vector<2x128xf32>
    %146 = arith.addf %144, %145 : vector<2x128xf32>
    %147 = math.tanh %146 : vector<2x128xf32>
    %148 = arith.mulf %141, %147 : vector<2x128xf32>
    %149 = arith.index_cast %128 : i32 to index
    %c0_43 = arith.constant 0 : index
    %150 = vector.load %arg9[%149, %c0_43] : memref<16x128xf32, #tpu.memory_space<vmem>>, vector<2x128xf32>
    tpu.vector_store %arg9[%149, %c0_43], %148 {strides = array<i32>} : memref<16x128xf32, #tpu.memory_space<vmem>>, vector<2x128xf32>,
    %c6_i32 = arith.constant 6 : i32
    %c2_i32_44 = arith.constant 2 : i32
    %151 = arith.muli %c6_i32, %c2_i32_44 : i32
    %152 = arith.index_cast %151 : i32 to index
    %c0_45 = arith.constant 0 : index
    %153 = vector.load %arg10[%152, %c0_45] : memref<16x512xf32, #tpu.memory_space<vmem>>, vector<2x512xf32>
    %cst_46 = arith.constant dense<0.000000e+00> : vector<2x512xf32>
    %154 = tpu.matmul %148, %10, %cst_46 {dimension_numbers = #tpu.dot_dimension_numbers<[1], [0], [0], [1], [0, 0, 1, 1], [], []>} : vector<2x128xf32>, vector<128x512xf32>, vector<2x512xf32> -> vector<2x512xf32>
    %155 = arith.addf %153, %154 : vector<2x512xf32>
    %156 = vector.extract_strided_slice %155 {offsets = [0, 0], sizes = [2, 384], strides = [1, 1]} : vector<2x512xf32> to vector<2x384xf32>
    %157 = arith.negf %156 : vector<2x384xf32>
    %158 = math.exp %157 : vector<2x384xf32>
    %cst_47 = arith.constant 1.000000e+00 : f32
    %159 = vector.broadcast %cst_47 : f32 to vector<2x384xf32>
    %160 = arith.addf %159, %158 : vector<2x384xf32>
    %161 = arith.divf %159, %160 : vector<2x384xf32>
    %162 = vector.extract_strided_slice %161 {offsets = [0, 0], sizes = [2, 128], strides = [1, 1]} : vector<2x384xf32> to vector<2x128xf32>
    %163 = vector.extract_strided_slice %161 {offsets = [0, 128], sizes = [2, 128], strides = [1, 1]} : vector<2x384xf32> to vector<2x128xf32>
    %164 = vector.extract_strided_slice %161 {offsets = [0, 256], sizes = [2, 128], strides = [1, 1]} : vector<2x384xf32> to vector<2x128xf32>
    %165 = vector.extract_strided_slice %155 {offsets = [0, 384], sizes = [2, 128], strides = [1, 1]} : vector<2x512xf32> to vector<2x128xf32>
    %166 = math.tanh %165 : vector<2x128xf32>
    %167 = arith.mulf %163, %146 : vector<2x128xf32>
    %168 = arith.mulf %162, %166 : vector<2x128xf32>
    %169 = arith.addf %167, %168 : vector<2x128xf32>
    %170 = math.tanh %169 : vector<2x128xf32>
    %171 = arith.mulf %164, %170 : vector<2x128xf32>
    %172 = arith.index_cast %151 : i32 to index
    %c0_48 = arith.constant 0 : index
    %173 = vector.load %arg9[%172, %c0_48] : memref<16x128xf32, #tpu.memory_space<vmem>>, vector<2x128xf32>
    tpu.vector_store %arg9[%172, %c0_48], %171 {strides = array<i32>} : memref<16x128xf32, #tpu.memory_space<vmem>>, vector<2x128xf32>,
    %c7_i32 = arith.constant 7 : i32
    %c2_i32_49 = arith.constant 2 : i32
    %174 = arith.muli %c7_i32, %c2_i32_49 : i32
    %175 = arith.index_cast %174 : i32 to index
    %c0_50 = arith.constant 0 : index
    %176 = vector.load %arg10[%175, %c0_50] : memref<16x512xf32, #tpu.memory_space<vmem>>, vector<2x512xf32>
    %cst_51 = arith.constant dense<0.000000e+00> : vector<2x512xf32>
    %177 = tpu.matmul %171, %10, %cst_51 {dimension_numbers = #tpu.dot_dimension_numbers<[1], [0], [0], [1], [0, 0, 1, 1], [], []>} : vector<2x128xf32>, vector<128x512xf32>, vector<2x512xf32> -> vector<2x512xf32>
    %178 = arith.addf %176, %177 : vector<2x512xf32>
    %179 = vector.extract_strided_slice %178 {offsets = [0, 0], sizes = [2, 384], strides = [1, 1]} : vector<2x512xf32> to vector<2x384xf32>
    %180 = arith.negf %179 : vector<2x384xf32>
    %181 = math.exp %180 : vector<2x384xf32>
    %cst_52 = arith.constant 1.000000e+00 : f32
    %182 = vector.broadcast %cst_52 : f32 to vector<2x384xf32>
    %183 = arith.addf %182, %181 : vector<2x384xf32>
    %184 = arith.divf %182, %183 : vector<2x384xf32>
    %185 = vector.extract_strided_slice %184 {offsets = [0, 0], sizes = [2, 128], strides = [1, 1]} : vector<2x384xf32> to vector<2x128xf32>
    %186 = vector.extract_strided_slice %184 {offsets = [0, 128], sizes = [2, 128], strides = [1, 1]} : vector<2x384xf32> to vector<2x128xf32>
    %187 = vector.extract_strided_slice %184 {offsets = [0, 256], sizes = [2, 128], strides = [1, 1]} : vector<2x384xf32> to vector<2x128xf32>
    %188 = vector.extract_strided_slice %178 {offsets = [0, 384], sizes = [2, 128], strides = [1, 1]} : vector<2x512xf32> to vector<2x128xf32>
    %189 = math.tanh %188 : vector<2x128xf32>
    %190 = arith.mulf %186, %169 : vector<2x128xf32>
    %191 = arith.mulf %185, %189 : vector<2x128xf32>
    %192 = arith.addf %190, %191 : vector<2x128xf32>
    %193 = math.tanh %192 : vector<2x128xf32>
    %194 = arith.mulf %187, %193 : vector<2x128xf32>
    %195 = arith.index_cast %174 : i32 to index
    %c0_53 = arith.constant 0 : index
    %196 = vector.load %arg9[%195, %c0_53] : memref<16x128xf32, #tpu.memory_space<vmem>>, vector<2x128xf32>
    tpu.vector_store %arg9[%195, %c0_53], %194 {strides = array<i32>} : memref<16x128xf32, #tpu.memory_space<vmem>>, vector<2x128xf32>,
    %c8_i32 = arith.constant 8 : i32
    %c0_54 = arith.constant 0 : index
    %c0_55 = arith.constant 0 : index
    %197 = vector.load %arg9[%c0_54, %c0_55] : memref<16x128xf32, #tpu.memory_space<vmem>>, vector<16x128xf32>
    %c1 = arith.constant 1 : index
    %c0_56 = arith.constant 0 : index
    %c0_57 = arith.constant 0 : index
    %198 = vector.load %arg1[%c1, %c0_56, %c0_57] : memref<4x128x512xf32, #tpu.memory_space<vmem>>, vector<1x128x512xf32>
    %199 = vector.shape_cast %198 : vector<1x128x512xf32> to vector<128x512xf32>
    %cst_58 = arith.constant dense<0.000000e+00> : vector<16x512xf32>
    %200 = tpu.matmul %197, %199, %cst_58 {dimension_numbers = #tpu.dot_dimension_numbers<[1], [0], [0], [1], [0, 0, 1, 1], [], []>} : vector<16x128xf32>, vector<128x512xf32>, vector<16x512xf32> -> vector<16x512xf32>
    %c1_59 = arith.constant 1 : index
    %c0_60 = arith.constant 0 : index
    %c0_61 = arith.constant 0 : index
    %201 = vector.load %arg3[%c1_59, %c0_60, %c0_61] : memref<4x1x512xf32, #tpu.memory_space<vmem>>, vector<1x1x512xf32>
    %202 = vector.shape_cast %201 : vector<1x1x512xf32> to vector<1x512xf32>
    %203 = vector.broadcast %202 : vector<1x512xf32> to vector<16x512xf32>
    %204 = arith.addf %200, %203 : vector<16x512xf32>
    %c0_62 = arith.constant 0 : index
    %c0_63 = arith.constant 0 : index
    %205 = vector.load %arg10[%c0_62, %c0_63] : memref<16x512xf32, #tpu.memory_space<vmem>>, vector<16x512xf32>
    tpu.vector_store %arg10[%c0_62, %c0_63], %204 {strides = array<i32>} : memref<16x512xf32, #tpu.memory_space<vmem>>, vector<16x512xf32>,
    %c1_64 = arith.constant 1 : index
    %c0_65 = arith.constant 0 : index
    %c0_66 = arith.constant 0 : index
    %206 = vector.load %arg2[%c1_64, %c0_65, %c0_66] : memref<4x128x512xf32, #tpu.memory_space<vmem>>, vector<1x128x512xf32>
    %207 = vector.shape_cast %206 : vector<1x128x512xf32> to vector<128x512xf32>
    %cst_67 = arith.constant 0.000000e+00 : f32
    %208 = vector.broadcast %cst_67 : f32 to vector<2x128xf32>
    %cst_68 = arith.constant 0.000000e+00 : f32
    %209 = vector.broadcast %cst_68 : f32 to vector<2x128xf32>
    %c0_i32_69 = arith.constant 0 : i32
    %c2_i32_70 = arith.constant 2 : i32
    %210 = arith.muli %c0_i32_69, %c2_i32_70 : i32
    %211 = arith.index_cast %210 : i32 to index
    %c0_71 = arith.constant 0 : index
    %212 = vector.load %arg10[%211, %c0_71] : memref<16x512xf32, #tpu.memory_space<vmem>>, vector<2x512xf32>
    %cst_72 = arith.constant dense<0.000000e+00> : vector<2x512xf32>
    %213 = tpu.matmul %208, %207, %cst_72 {dimension_numbers = #tpu.dot_dimension_numbers<[1], [0], [0], [1], [0, 0, 1, 1], [], []>} : vector<2x128xf32>, vector<128x512xf32>, vector<2x512xf32> -> vector<2x512xf32>
    %214 = arith.addf %212, %213 : vector<2x512xf32>
    %215 = vector.extract_strided_slice %214 {offsets = [0, 0], sizes = [2, 384], strides = [1, 1]} : vector<2x512xf32> to vector<2x384xf32>
    %216 = arith.negf %215 : vector<2x384xf32>
    %217 = math.exp %216 : vector<2x384xf32>
    %cst_73 = arith.constant 1.000000e+00 : f32
    %218 = vector.broadcast %cst_73 : f32 to vector<2x384xf32>
    %219 = arith.addf %218, %217 : vector<2x384xf32>
    %220 = arith.divf %218, %219 : vector<2x384xf32>
    %221 = vector.extract_strided_slice %220 {offsets = [0, 0], sizes = [2, 128], strides = [1, 1]} : vector<2x384xf32> to vector<2x128xf32>
    %222 = vector.extract_strided_slice %220 {offsets = [0, 128], sizes = [2, 128], strides = [1, 1]} : vector<2x384xf32> to vector<2x128xf32>
    %223 = vector.extract_strided_slice %220 {offsets = [0, 256], sizes = [2, 128], strides = [1, 1]} : vector<2x384xf32> to vector<2x128xf32>
    %224 = vector.extract_strided_slice %214 {offsets = [0, 384], sizes = [2, 128], strides = [1, 1]} : vector<2x512xf32> to vector<2x128xf32>
    %225 = math.tanh %224 : vector<2x128xf32>
    %226 = arith.mulf %222, %209 : vector<2x128xf32>
    %227 = arith.mulf %221, %225 : vector<2x128xf32>
    %228 = arith.addf %226, %227 : vector<2x128xf32>
    %229 = math.tanh %228 : vector<2x128xf32>
    %230 = arith.mulf %223, %229 : vector<2x128xf32>
    %231 = arith.index_cast %210 : i32 to index
    %c0_74 = arith.constant 0 : index
    %232 = vector.load %arg9[%231, %c0_74] : memref<16x128xf32, #tpu.memory_space<vmem>>, vector<2x128xf32>
    tpu.vector_store %arg9[%231, %c0_74], %230 {strides = array<i32>} : memref<16x128xf32, #tpu.memory_space<vmem>>, vector<2x128xf32>,
    %c1_i32_75 = arith.constant 1 : i32
    %c2_i32_76 = arith.constant 2 : i32
    %233 = arith.muli %c1_i32_75, %c2_i32_76 : i32
    %234 = arith.index_cast %233 : i32 to index
    %c0_77 = arith.constant 0 : index
    %235 = vector.load %arg10[%234, %c0_77] : memref<16x512xf32, #tpu.memory_space<vmem>>, vector<2x512xf32>
    %cst_78 = arith.constant dense<0.000000e+00> : vector<2x512xf32>
    %236 = tpu.matmul %230, %207, %cst_78 {dimension_numbers = #tpu.dot_dimension_numbers<[1], [0], [0], [1], [0, 0, 1, 1], [], []>} : vector<2x128xf32>, vector<128x512xf32>, vector<2x512xf32> -> vector<2x512xf32>
    %237 = arith.addf %235, %236 : vector<2x512xf32>
    %238 = vector.extract_strided_slice %237 {offsets = [0, 0], sizes = [2, 384], strides = [1, 1]} : vector<2x512xf32> to vector<2x384xf32>
    %239 = arith.negf %238 : vector<2x384xf32>
    %240 = math.exp %239 : vector<2x384xf32>
    %cst_79 = arith.constant 1.000000e+00 : f32
    %241 = vector.broadcast %cst_79 : f32 to vector<2x384xf32>
    %242 = arith.addf %241, %240 : vector<2x384xf32>
    %243 = arith.divf %241, %242 : vector<2x384xf32>
    %244 = vector.extract_strided_slice %243 {offsets = [0, 0], sizes = [2, 128], strides = [1, 1]} : vector<2x384xf32> to vector<2x128xf32>
    %245 = vector.extract_strided_slice %243 {offsets = [0, 128], sizes = [2, 128], strides = [1, 1]} : vector<2x384xf32> to vector<2x128xf32>
    %246 = vector.extract_strided_slice %243 {offsets = [0, 256], sizes = [2, 128], strides = [1, 1]} : vector<2x384xf32> to vector<2x128xf32>
    %247 = vector.extract_strided_slice %237 {offsets = [0, 384], sizes = [2, 128], strides = [1, 1]} : vector<2x512xf32> to vector<2x128xf32>
    %248 = math.tanh %247 : vector<2x128xf32>
    %249 = arith.mulf %245, %228 : vector<2x128xf32>
    %250 = arith.mulf %244, %248 : vector<2x128xf32>
    %251 = arith.addf %249, %250 : vector<2x128xf32>
    %252 = math.tanh %251 : vector<2x128xf32>
    %253 = arith.mulf %246, %252 : vector<2x128xf32>
    %254 = arith.index_cast %233 : i32 to index
    %c0_80 = arith.constant 0 : index
    %255 = vector.load %arg9[%254, %c0_80] : memref<16x128xf32, #tpu.memory_space<vmem>>, vector<2x128xf32>
    tpu.vector_store %arg9[%254, %c0_80], %253 {strides = array<i32>} : memref<16x128xf32, #tpu.memory_space<vmem>>, vector<2x128xf32>,
    %c2_i32_81 = arith.constant 2 : i32
    %c2_i32_82 = arith.constant 2 : i32
    %256 = arith.muli %c2_i32_81, %c2_i32_82 : i32
    %257 = arith.index_cast %256 : i32 to index
    %c0_83 = arith.constant 0 : index
    %258 = vector.load %arg10[%257, %c0_83] : memref<16x512xf32, #tpu.memory_space<vmem>>, vector<2x512xf32>
    %cst_84 = arith.constant dense<0.000000e+00> : vector<2x512xf32>
    %259 = tpu.matmul %253, %207, %cst_84 {dimension_numbers = #tpu.dot_dimension_numbers<[1], [0], [0], [1], [0, 0, 1, 1], [], []>} : vector<2x128xf32>, vector<128x512xf32>, vector<2x512xf32> -> vector<2x512xf32>
    %260 = arith.addf %258, %259 : vector<2x512xf32>
    %261 = vector.extract_strided_slice %260 {offsets = [0, 0], sizes = [2, 384], strides = [1, 1]} : vector<2x512xf32> to vector<2x384xf32>
    %262 = arith.negf %261 : vector<2x384xf32>
    %263 = math.exp %262 : vector<2x384xf32>
    %cst_85 = arith.constant 1.000000e+00 : f32
    %264 = vector.broadcast %cst_85 : f32 to vector<2x384xf32>
    %265 = arith.addf %264, %263 : vector<2x384xf32>
    %266 = arith.divf %264, %265 : vector<2x384xf32>
    %267 = vector.extract_strided_slice %266 {offsets = [0, 0], sizes = [2, 128], strides = [1, 1]} : vector<2x384xf32> to vector<2x128xf32>
    %268 = vector.extract_strided_slice %266 {offsets = [0, 128], sizes = [2, 128], strides = [1, 1]} : vector<2x384xf32> to vector<2x128xf32>
    %269 = vector.extract_strided_slice %266 {offsets = [0, 256], sizes = [2, 128], strides = [1, 1]} : vector<2x384xf32> to vector<2x128xf32>
    %270 = vector.extract_strided_slice %260 {offsets = [0, 384], sizes = [2, 128], strides = [1, 1]} : vector<2x512xf32> to vector<2x128xf32>
    %271 = math.tanh %270 : vector<2x128xf32>
    %272 = arith.mulf %268, %251 : vector<2x128xf32>
    %273 = arith.mulf %267, %271 : vector<2x128xf32>
    %274 = arith.addf %272, %273 : vector<2x128xf32>
    %275 = math.tanh %274 : vector<2x128xf32>
    %276 = arith.mulf %269, %275 : vector<2x128xf32>
    %277 = arith.index_cast %256 : i32 to index
    %c0_86 = arith.constant 0 : index
    %278 = vector.load %arg9[%277, %c0_86] : memref<16x128xf32, #tpu.memory_space<vmem>>, vector<2x128xf32>
    tpu.vector_store %arg9[%277, %c0_86], %276 {strides = array<i32>} : memref<16x128xf32, #tpu.memory_space<vmem>>, vector<2x128xf32>,
    %c3_i32_87 = arith.constant 3 : i32
    %c2_i32_88 = arith.constant 2 : i32
    %279 = arith.muli %c3_i32_87, %c2_i32_88 : i32
    %280 = arith.index_cast %279 : i32 to index
    %c0_89 = arith.constant 0 : index
    %281 = vector.load %arg10[%280, %c0_89] : memref<16x512xf32, #tpu.memory_space<vmem>>, vector<2x512xf32>
    %cst_90 = arith.constant dense<0.000000e+00> : vector<2x512xf32>
    %282 = tpu.matmul %276, %207, %cst_90 {dimension_numbers = #tpu.dot_dimension_numbers<[1], [0], [0], [1], [0, 0, 1, 1], [], []>} : vector<2x128xf32>, vector<128x512xf32>, vector<2x512xf32> -> vector<2x512xf32>
    %283 = arith.addf %281, %282 : vector<2x512xf32>
    %284 = vector.extract_strided_slice %283 {offsets = [0, 0], sizes = [2, 384], strides = [1, 1]} : vector<2x512xf32> to vector<2x384xf32>
    %285 = arith.negf %284 : vector<2x384xf32>
    %286 = math.exp %285 : vector<2x384xf32>
    %cst_91 = arith.constant 1.000000e+00 : f32
    %287 = vector.broadcast %cst_91 : f32 to vector<2x384xf32>
    %288 = arith.addf %287, %286 : vector<2x384xf32>
    %289 = arith.divf %287, %288 : vector<2x384xf32>
    %290 = vector.extract_strided_slice %289 {offsets = [0, 0], sizes = [2, 128], strides = [1, 1]} : vector<2x384xf32> to vector<2x128xf32>
    %291 = vector.extract_strided_slice %289 {offsets = [0, 128], sizes = [2, 128], strides = [1, 1]} : vector<2x384xf32> to vector<2x128xf32>
    %292 = vector.extract_strided_slice %289 {offsets = [0, 256], sizes = [2, 128], strides = [1, 1]} : vector<2x384xf32> to vector<2x128xf32>
    %293 = vector.extract_strided_slice %283 {offsets = [0, 384], sizes = [2, 128], strides = [1, 1]} : vector<2x512xf32> to vector<2x128xf32>
    %294 = math.tanh %293 : vector<2x128xf32>
    %295 = arith.mulf %291, %274 : vector<2x128xf32>
    %296 = arith.mulf %290, %294 : vector<2x128xf32>
    %297 = arith.addf %295, %296 : vector<2x128xf32>
    %298 = math.tanh %297 : vector<2x128xf32>
    %299 = arith.mulf %292, %298 : vector<2x128xf32>
    %300 = arith.index_cast %279 : i32 to index
    %c0_92 = arith.constant 0 : index
    %301 = vector.load %arg9[%300, %c0_92] : memref<16x128xf32, #tpu.memory_space<vmem>>, vector<2x128xf32>
    tpu.vector_store %arg9[%300, %c0_92], %299 {strides = array<i32>} : memref<16x128xf32, #tpu.memory_space<vmem>>, vector<2x128xf32>,
    %c4_i32_93 = arith.constant 4 : i32
    %c2_i32_94 = arith.constant 2 : i32
    %302 = arith.muli %c4_i32_93, %c2_i32_94 : i32
    %303 = arith.index_cast %302 : i32 to index
    %c0_95 = arith.constant 0 : index
    %304 = vector.load %arg10[%303, %c0_95] : memref<16x512xf32, #tpu.memory_space<vmem>>, vector<2x512xf32>
    %cst_96 = arith.constant dense<0.000000e+00> : vector<2x512xf32>
    %305 = tpu.matmul %299, %207, %cst_96 {dimension_numbers = #tpu.dot_dimension_numbers<[1], [0], [0], [1], [0, 0, 1, 1], [], []>} : vector<2x128xf32>, vector<128x512xf32>, vector<2x512xf32> -> vector<2x512xf32>
    %306 = arith.addf %304, %305 : vector<2x512xf32>
    %307 = vector.extract_strided_slice %306 {offsets = [0, 0], sizes = [2, 384], strides = [1, 1]} : vector<2x512xf32> to vector<2x384xf32>
    %308 = arith.negf %307 : vector<2x384xf32>
    %309 = math.exp %308 : vector<2x384xf32>
    %cst_97 = arith.constant 1.000000e+00 : f32
    %310 = vector.broadcast %cst_97 : f32 to vector<2x384xf32>
    %311 = arith.addf %310, %309 : vector<2x384xf32>
    %312 = arith.divf %310, %311 : vector<2x384xf32>
    %313 = vector.extract_strided_slice %312 {offsets = [0, 0], sizes = [2, 128], strides = [1, 1]} : vector<2x384xf32> to vector<2x128xf32>
    %314 = vector.extract_strided_slice %312 {offsets = [0, 128], sizes = [2, 128], strides = [1, 1]} : vector<2x384xf32> to vector<2x128xf32>
    %315 = vector.extract_strided_slice %312 {offsets = [0, 256], sizes = [2, 128], strides = [1, 1]} : vector<2x384xf32> to vector<2x128xf32>
    %316 = vector.extract_strided_slice %306 {offsets = [0, 384], sizes = [2, 128], strides = [1, 1]} : vector<2x512xf32> to vector<2x128xf32>
    %317 = math.tanh %316 : vector<2x128xf32>
    %318 = arith.mulf %314, %297 : vector<2x128xf32>
    %319 = arith.mulf %313, %317 : vector<2x128xf32>
    %320 = arith.addf %318, %319 : vector<2x128xf32>
    %321 = math.tanh %320 : vector<2x128xf32>
    %322 = arith.mulf %315, %321 : vector<2x128xf32>
    %323 = arith.index_cast %302 : i32 to index
    %c0_98 = arith.constant 0 : index
    %324 = vector.load %arg9[%323, %c0_98] : memref<16x128xf32, #tpu.memory_space<vmem>>, vector<2x128xf32>
    tpu.vector_store %arg9[%323, %c0_98], %322 {strides = array<i32>} : memref<16x128xf32, #tpu.memory_space<vmem>>, vector<2x128xf32>,
    %c5_i32_99 = arith.constant 5 : i32
    %c2_i32_100 = arith.constant 2 : i32
    %325 = arith.muli %c5_i32_99, %c2_i32_100 : i32
    %326 = arith.index_cast %325 : i32 to index
    %c0_101 = arith.constant 0 : index
    %327 = vector.load %arg10[%326, %c0_101] : memref<16x512xf32, #tpu.memory_space<vmem>>, vector<2x512xf32>
    %cst_102 = arith.constant dense<0.000000e+00> : vector<2x512xf32>
    %328 = tpu.matmul %322, %207, %cst_102 {dimension_numbers = #tpu.dot_dimension_numbers<[1], [0], [0], [1], [0, 0, 1, 1], [], []>} : vector<2x128xf32>, vector<128x512xf32>, vector<2x512xf32> -> vector<2x512xf32>
    %329 = arith.addf %327, %328 : vector<2x512xf32>
    %330 = vector.extract_strided_slice %329 {offsets = [0, 0], sizes = [2, 384], strides = [1, 1]} : vector<2x512xf32> to vector<2x384xf32>
    %331 = arith.negf %330 : vector<2x384xf32>
    %332 = math.exp %331 : vector<2x384xf32>
    %cst_103 = arith.constant 1.000000e+00 : f32
    %333 = vector.broadcast %cst_103 : f32 to vector<2x384xf32>
    %334 = arith.addf %333, %332 : vector<2x384xf32>
    %335 = arith.divf %333, %334 : vector<2x384xf32>
    %336 = vector.extract_strided_slice %335 {offsets = [0, 0], sizes = [2, 128], strides = [1, 1]} : vector<2x384xf32> to vector<2x128xf32>
    %337 = vector.extract_strided_slice %335 {offsets = [0, 128], sizes = [2, 128], strides = [1, 1]} : vector<2x384xf32> to vector<2x128xf32>
    %338 = vector.extract_strided_slice %335 {offsets = [0, 256], sizes = [2, 128], strides = [1, 1]} : vector<2x384xf32> to vector<2x128xf32>
    %339 = vector.extract_strided_slice %329 {offsets = [0, 384], sizes = [2, 128], strides = [1, 1]} : vector<2x512xf32> to vector<2x128xf32>
    %340 = math.tanh %339 : vector<2x128xf32>
    %341 = arith.mulf %337, %320 : vector<2x128xf32>
    %342 = arith.mulf %336, %340 : vector<2x128xf32>
    %343 = arith.addf %341, %342 : vector<2x128xf32>
    %344 = math.tanh %343 : vector<2x128xf32>
    %345 = arith.mulf %338, %344 : vector<2x128xf32>
    %346 = arith.index_cast %325 : i32 to index
    %c0_104 = arith.constant 0 : index
    %347 = vector.load %arg9[%346, %c0_104] : memref<16x128xf32, #tpu.memory_space<vmem>>, vector<2x128xf32>
    tpu.vector_store %arg9[%346, %c0_104], %345 {strides = array<i32>} : memref<16x128xf32, #tpu.memory_space<vmem>>, vector<2x128xf32>,
    %c6_i32_105 = arith.constant 6 : i32
    %c2_i32_106 = arith.constant 2 : i32
    %348 = arith.muli %c6_i32_105, %c2_i32_106 : i32
    %349 = arith.index_cast %348 : i32 to index
    %c0_107 = arith.constant 0 : index
    %350 = vector.load %arg10[%349, %c0_107] : memref<16x512xf32, #tpu.memory_space<vmem>>, vector<2x512xf32>
    %cst_108 = arith.constant dense<0.000000e+00> : vector<2x512xf32>
    %351 = tpu.matmul %345, %207, %cst_108 {dimension_numbers = #tpu.dot_dimension_numbers<[1], [0], [0], [1], [0, 0, 1, 1], [], []>} : vector<2x128xf32>, vector<128x512xf32>, vector<2x512xf32> -> vector<2x512xf32>
    %352 = arith.addf %350, %351 : vector<2x512xf32>
    %353 = vector.extract_strided_slice %352 {offsets = [0, 0], sizes = [2, 384], strides = [1, 1]} : vector<2x512xf32> to vector<2x384xf32>
    %354 = arith.negf %353 : vector<2x384xf32>
    %355 = math.exp %354 : vector<2x384xf32>
    %cst_109 = arith.constant 1.000000e+00 : f32
    %356 = vector.broadcast %cst_109 : f32 to vector<2x384xf32>
    %357 = arith.addf %356, %355 : vector<2x384xf32>
    %358 = arith.divf %356, %357 : vector<2x384xf32>
    %359 = vector.extract_strided_slice %358 {offsets = [0, 0], sizes = [2, 128], strides = [1, 1]} : vector<2x384xf32> to vector<2x128xf32>
    %360 = vector.extract_strided_slice %358 {offsets = [0, 128], sizes = [2, 128], strides = [1, 1]} : vector<2x384xf32> to vector<2x128xf32>
    %361 = vector.extract_strided_slice %358 {offsets = [0, 256], sizes = [2, 128], strides = [1, 1]} : vector<2x384xf32> to vector<2x128xf32>
    %362 = vector.extract_strided_slice %352 {offsets = [0, 384], sizes = [2, 128], strides = [1, 1]} : vector<2x512xf32> to vector<2x128xf32>
    %363 = math.tanh %362 : vector<2x128xf32>
    %364 = arith.mulf %360, %343 : vector<2x128xf32>
    %365 = arith.mulf %359, %363 : vector<2x128xf32>
    %366 = arith.addf %364, %365 : vector<2x128xf32>
    %367 = math.tanh %366 : vector<2x128xf32>
    %368 = arith.mulf %361, %367 : vector<2x128xf32>
    %369 = arith.index_cast %348 : i32 to index
    %c0_110 = arith.constant 0 : index
    %370 = vector.load %arg9[%369, %c0_110] : memref<16x128xf32, #tpu.memory_space<vmem>>, vector<2x128xf32>
    tpu.vector_store %arg9[%369, %c0_110], %368 {strides = array<i32>} : memref<16x128xf32, #tpu.memory_space<vmem>>, vector<2x128xf32>,
    %c7_i32_111 = arith.constant 7 : i32
    %c2_i32_112 = arith.constant 2 : i32
    %371 = arith.muli %c7_i32_111, %c2_i32_112 : i32
    %372 = arith.index_cast %371 : i32 to index
    %c0_113 = arith.constant 0 : index
    %373 = vector.load %arg10[%372, %c0_113] : memref<16x512xf32, #tpu.memory_space<vmem>>, vector<2x512xf32>
    %cst_114 = arith.constant dense<0.000000e+00> : vector<2x512xf32>
    %374 = tpu.matmul %368, %207, %cst_114 {dimension_numbers = #tpu.dot_dimension_numbers<[1], [0], [0], [1], [0, 0, 1, 1], [], []>} : vector<2x128xf32>, vector<128x512xf32>, vector<2x512xf32> -> vector<2x512xf32>
    %375 = arith.addf %373, %374 : vector<2x512xf32>
    %376 = vector.extract_strided_slice %375 {offsets = [0, 0], sizes = [2, 384], strides = [1, 1]} : vector<2x512xf32> to vector<2x384xf32>
    %377 = arith.negf %376 : vector<2x384xf32>
    %378 = math.exp %377 : vector<2x384xf32>
    %cst_115 = arith.constant 1.000000e+00 : f32
    %379 = vector.broadcast %cst_115 : f32 to vector<2x384xf32>
    %380 = arith.addf %379, %378 : vector<2x384xf32>
    %381 = arith.divf %379, %380 : vector<2x384xf32>
    %382 = vector.extract_strided_slice %381 {offsets = [0, 0], sizes = [2, 128], strides = [1, 1]} : vector<2x384xf32> to vector<2x128xf32>
    %383 = vector.extract_strided_slice %381 {offsets = [0, 128], sizes = [2, 128], strides = [1, 1]} : vector<2x384xf32> to vector<2x128xf32>
    %384 = vector.extract_strided_slice %381 {offsets = [0, 256], sizes = [2, 128], strides = [1, 1]} : vector<2x384xf32> to vector<2x128xf32>
    %385 = vector.extract_strided_slice %375 {offsets = [0, 384], sizes = [2, 128], strides = [1, 1]} : vector<2x512xf32> to vector<2x128xf32>
    %386 = math.tanh %385 : vector<2x128xf32>
    %387 = arith.mulf %383, %366 : vector<2x128xf32>
    %388 = arith.mulf %382, %386 : vector<2x128xf32>
    %389 = arith.addf %387, %388 : vector<2x128xf32>
    %390 = math.tanh %389 : vector<2x128xf32>
    %391 = arith.mulf %384, %390 : vector<2x128xf32>
    %392 = arith.index_cast %371 : i32 to index
    %c0_116 = arith.constant 0 : index
    %393 = vector.load %arg9[%392, %c0_116] : memref<16x128xf32, #tpu.memory_space<vmem>>, vector<2x128xf32>
    tpu.vector_store %arg9[%392, %c0_116], %391 {strides = array<i32>} : memref<16x128xf32, #tpu.memory_space<vmem>>, vector<2x128xf32>,
    %c8_i32_117 = arith.constant 8 : i32
    %c0_118 = arith.constant 0 : index
    %c0_119 = arith.constant 0 : index
    %394 = vector.load %arg9[%c0_118, %c0_119] : memref<16x128xf32, #tpu.memory_space<vmem>>, vector<16x128xf32>
    %c2 = arith.constant 2 : index
    %c0_120 = arith.constant 0 : index
    %c0_121 = arith.constant 0 : index
    %395 = vector.load %arg1[%c2, %c0_120, %c0_121] : memref<4x128x512xf32, #tpu.memory_space<vmem>>, vector<1x128x512xf32>
    %396 = vector.shape_cast %395 : vector<1x128x512xf32> to vector<128x512xf32>
    %cst_122 = arith.constant dense<0.000000e+00> : vector<16x512xf32>
    %397 = tpu.matmul %394, %396, %cst_122 {dimension_numbers = #tpu.dot_dimension_numbers<[1], [0], [0], [1], [0, 0, 1, 1], [], []>} : vector<16x128xf32>, vector<128x512xf32>, vector<16x512xf32> -> vector<16x512xf32>
    %c2_123 = arith.constant 2 : index
    %c0_124 = arith.constant 0 : index
    %c0_125 = arith.constant 0 : index
    %398 = vector.load %arg3[%c2_123, %c0_124, %c0_125] : memref<4x1x512xf32, #tpu.memory_space<vmem>>, vector<1x1x512xf32>
    %399 = vector.shape_cast %398 : vector<1x1x512xf32> to vector<1x512xf32>
    %400 = vector.broadcast %399 : vector<1x512xf32> to vector<16x512xf32>
    %401 = arith.addf %397, %400 : vector<16x512xf32>
    %c0_126 = arith.constant 0 : index
    %c0_127 = arith.constant 0 : index
    %402 = vector.load %arg10[%c0_126, %c0_127] : memref<16x512xf32, #tpu.memory_space<vmem>>, vector<16x512xf32>
    tpu.vector_store %arg10[%c0_126, %c0_127], %401 {strides = array<i32>} : memref<16x512xf32, #tpu.memory_space<vmem>>, vector<16x512xf32>,
    %c2_128 = arith.constant 2 : index
    %c0_129 = arith.constant 0 : index
    %c0_130 = arith.constant 0 : index
    %403 = vector.load %arg2[%c2_128, %c0_129, %c0_130] : memref<4x128x512xf32, #tpu.memory_space<vmem>>, vector<1x128x512xf32>
    %404 = vector.shape_cast %403 : vector<1x128x512xf32> to vector<128x512xf32>
    %cst_131 = arith.constant 0.000000e+00 : f32
    %405 = vector.broadcast %cst_131 : f32 to vector<2x128xf32>
    %cst_132 = arith.constant 0.000000e+00 : f32
    %406 = vector.broadcast %cst_132 : f32 to vector<2x128xf32>
    %c0_i32_133 = arith.constant 0 : i32
    %c2_i32_134 = arith.constant 2 : i32
    %407 = arith.muli %c0_i32_133, %c2_i32_134 : i32
    %408 = arith.index_cast %407 : i32 to index
    %c0_135 = arith.constant 0 : index
    %409 = vector.load %arg10[%408, %c0_135] : memref<16x512xf32, #tpu.memory_space<vmem>>, vector<2x512xf32>
    %cst_136 = arith.constant dense<0.000000e+00> : vector<2x512xf32>
    %410 = tpu.matmul %405, %404, %cst_136 {dimension_numbers = #tpu.dot_dimension_numbers<[1], [0], [0], [1], [0, 0, 1, 1], [], []>} : vector<2x128xf32>, vector<128x512xf32>, vector<2x512xf32> -> vector<2x512xf32>
    %411 = arith.addf %409, %410 : vector<2x512xf32>
    %412 = vector.extract_strided_slice %411 {offsets = [0, 0], sizes = [2, 384], strides = [1, 1]} : vector<2x512xf32> to vector<2x384xf32>
    %413 = arith.negf %412 : vector<2x384xf32>
    %414 = math.exp %413 : vector<2x384xf32>
    %cst_137 = arith.constant 1.000000e+00 : f32
    %415 = vector.broadcast %cst_137 : f32 to vector<2x384xf32>
    %416 = arith.addf %415, %414 : vector<2x384xf32>
    %417 = arith.divf %415, %416 : vector<2x384xf32>
    %418 = vector.extract_strided_slice %417 {offsets = [0, 0], sizes = [2, 128], strides = [1, 1]} : vector<2x384xf32> to vector<2x128xf32>
    %419 = vector.extract_strided_slice %417 {offsets = [0, 128], sizes = [2, 128], strides = [1, 1]} : vector<2x384xf32> to vector<2x128xf32>
    %420 = vector.extract_strided_slice %417 {offsets = [0, 256], sizes = [2, 128], strides = [1, 1]} : vector<2x384xf32> to vector<2x128xf32>
    %421 = vector.extract_strided_slice %411 {offsets = [0, 384], sizes = [2, 128], strides = [1, 1]} : vector<2x512xf32> to vector<2x128xf32>
    %422 = math.tanh %421 : vector<2x128xf32>
    %423 = arith.mulf %419, %406 : vector<2x128xf32>
    %424 = arith.mulf %418, %422 : vector<2x128xf32>
    %425 = arith.addf %423, %424 : vector<2x128xf32>
    %426 = math.tanh %425 : vector<2x128xf32>
    %427 = arith.mulf %420, %426 : vector<2x128xf32>
    %428 = arith.index_cast %407 : i32 to index
    %c0_138 = arith.constant 0 : index
    %429 = vector.load %arg9[%428, %c0_138] : memref<16x128xf32, #tpu.memory_space<vmem>>, vector<2x128xf32>
    tpu.vector_store %arg9[%428, %c0_138], %427 {strides = array<i32>} : memref<16x128xf32, #tpu.memory_space<vmem>>, vector<2x128xf32>,
    %c1_i32_139 = arith.constant 1 : i32
    %c2_i32_140 = arith.constant 2 : i32
    %430 = arith.muli %c1_i32_139, %c2_i32_140 : i32
    %431 = arith.index_cast %430 : i32 to index
    %c0_141 = arith.constant 0 : index
    %432 = vector.load %arg10[%431, %c0_141] : memref<16x512xf32, #tpu.memory_space<vmem>>, vector<2x512xf32>
    %cst_142 = arith.constant dense<0.000000e+00> : vector<2x512xf32>
    %433 = tpu.matmul %427, %404, %cst_142 {dimension_numbers = #tpu.dot_dimension_numbers<[1], [0], [0], [1], [0, 0, 1, 1], [], []>} : vector<2x128xf32>, vector<128x512xf32>, vector<2x512xf32> -> vector<2x512xf32>
    %434 = arith.addf %432, %433 : vector<2x512xf32>
    %435 = vector.extract_strided_slice %434 {offsets = [0, 0], sizes = [2, 384], strides = [1, 1]} : vector<2x512xf32> to vector<2x384xf32>
    %436 = arith.negf %435 : vector<2x384xf32>
    %437 = math.exp %436 : vector<2x384xf32>
    %cst_143 = arith.constant 1.000000e+00 : f32
    %438 = vector.broadcast %cst_143 : f32 to vector<2x384xf32>
    %439 = arith.addf %438, %437 : vector<2x384xf32>
    %440 = arith.divf %438, %439 : vector<2x384xf32>
    %441 = vector.extract_strided_slice %440 {offsets = [0, 0], sizes = [2, 128], strides = [1, 1]} : vector<2x384xf32> to vector<2x128xf32>
    %442 = vector.extract_strided_slice %440 {offsets = [0, 128], sizes = [2, 128], strides = [1, 1]} : vector<2x384xf32> to vector<2x128xf32>
    %443 = vector.extract_strided_slice %440 {offsets = [0, 256], sizes = [2, 128], strides = [1, 1]} : vector<2x384xf32> to vector<2x128xf32>
    %444 = vector.extract_strided_slice %434 {offsets = [0, 384], sizes = [2, 128], strides = [1, 1]} : vector<2x512xf32> to vector<2x128xf32>
    %445 = math.tanh %444 : vector<2x128xf32>
    %446 = arith.mulf %442, %425 : vector<2x128xf32>
    %447 = arith.mulf %441, %445 : vector<2x128xf32>
    %448 = arith.addf %446, %447 : vector<2x128xf32>
    %449 = math.tanh %448 : vector<2x128xf32>
    %450 = arith.mulf %443, %449 : vector<2x128xf32>
    %451 = arith.index_cast %430 : i32 to index
    %c0_144 = arith.constant 0 : index
    %452 = vector.load %arg9[%451, %c0_144] : memref<16x128xf32, #tpu.memory_space<vmem>>, vector<2x128xf32>
    tpu.vector_store %arg9[%451, %c0_144], %450 {strides = array<i32>} : memref<16x128xf32, #tpu.memory_space<vmem>>, vector<2x128xf32>,
    %c2_i32_145 = arith.constant 2 : i32
    %c2_i32_146 = arith.constant 2 : i32
    %453 = arith.muli %c2_i32_145, %c2_i32_146 : i32
    %454 = arith.index_cast %453 : i32 to index
    %c0_147 = arith.constant 0 : index
    %455 = vector.load %arg10[%454, %c0_147] : memref<16x512xf32, #tpu.memory_space<vmem>>, vector<2x512xf32>
    %cst_148 = arith.constant dense<0.000000e+00> : vector<2x512xf32>
    %456 = tpu.matmul %450, %404, %cst_148 {dimension_numbers = #tpu.dot_dimension_numbers<[1], [0], [0], [1], [0, 0, 1, 1], [], []>} : vector<2x128xf32>, vector<128x512xf32>, vector<2x512xf32> -> vector<2x512xf32>
    %457 = arith.addf %455, %456 : vector<2x512xf32>
    %458 = vector.extract_strided_slice %457 {offsets = [0, 0], sizes = [2, 384], strides = [1, 1]} : vector<2x512xf32> to vector<2x384xf32>
    %459 = arith.negf %458 : vector<2x384xf32>
    %460 = math.exp %459 : vector<2x384xf32>
    %cst_149 = arith.constant 1.000000e+00 : f32
    %461 = vector.broadcast %cst_149 : f32 to vector<2x384xf32>
    %462 = arith.addf %461, %460 : vector<2x384xf32>
    %463 = arith.divf %461, %462 : vector<2x384xf32>
    %464 = vector.extract_strided_slice %463 {offsets = [0, 0], sizes = [2, 128], strides = [1, 1]} : vector<2x384xf32> to vector<2x128xf32>
    %465 = vector.extract_strided_slice %463 {offsets = [0, 128], sizes = [2, 128], strides = [1, 1]} : vector<2x384xf32> to vector<2x128xf32>
    %466 = vector.extract_strided_slice %463 {offsets = [0, 256], sizes = [2, 128], strides = [1, 1]} : vector<2x384xf32> to vector<2x128xf32>
    %467 = vector.extract_strided_slice %457 {offsets = [0, 384], sizes = [2, 128], strides = [1, 1]} : vector<2x512xf32> to vector<2x128xf32>
    %468 = math.tanh %467 : vector<2x128xf32>
    %469 = arith.mulf %465, %448 : vector<2x128xf32>
    %470 = arith.mulf %464, %468 : vector<2x128xf32>
    %471 = arith.addf %469, %470 : vector<2x128xf32>
    %472 = math.tanh %471 : vector<2x128xf32>
    %473 = arith.mulf %466, %472 : vector<2x128xf32>
    %474 = arith.index_cast %453 : i32 to index
    %c0_150 = arith.constant 0 : index
    %475 = vector.load %arg9[%474, %c0_150] : memref<16x128xf32, #tpu.memory_space<vmem>>, vector<2x128xf32>
    tpu.vector_store %arg9[%474, %c0_150], %473 {strides = array<i32>} : memref<16x128xf32, #tpu.memory_space<vmem>>, vector<2x128xf32>,
    %c3_i32_151 = arith.constant 3 : i32
    %c2_i32_152 = arith.constant 2 : i32
    %476 = arith.muli %c3_i32_151, %c2_i32_152 : i32
    %477 = arith.index_cast %476 : i32 to index
    %c0_153 = arith.constant 0 : index
    %478 = vector.load %arg10[%477, %c0_153] : memref<16x512xf32, #tpu.memory_space<vmem>>, vector<2x512xf32>
    %cst_154 = arith.constant dense<0.000000e+00> : vector<2x512xf32>
    %479 = tpu.matmul %473, %404, %cst_154 {dimension_numbers = #tpu.dot_dimension_numbers<[1], [0], [0], [1], [0, 0, 1, 1], [], []>} : vector<2x128xf32>, vector<128x512xf32>, vector<2x512xf32> -> vector<2x512xf32>
    %480 = arith.addf %478, %479 : vector<2x512xf32>
    %481 = vector.extract_strided_slice %480 {offsets = [0, 0], sizes = [2, 384], strides = [1, 1]} : vector<2x512xf32> to vector<2x384xf32>
    %482 = arith.negf %481 : vector<2x384xf32>
    %483 = math.exp %482 : vector<2x384xf32>
    %cst_155 = arith.constant 1.000000e+00 : f32
    %484 = vector.broadcast %cst_155 : f32 to vector<2x384xf32>
    %485 = arith.addf %484, %483 : vector<2x384xf32>
    %486 = arith.divf %484, %485 : vector<2x384xf32>
    %487 = vector.extract_strided_slice %486 {offsets = [0, 0], sizes = [2, 128], strides = [1, 1]} : vector<2x384xf32> to vector<2x128xf32>
    %488 = vector.extract_strided_slice %486 {offsets = [0, 128], sizes = [2, 128], strides = [1, 1]} : vector<2x384xf32> to vector<2x128xf32>
    %489 = vector.extract_strided_slice %486 {offsets = [0, 256], sizes = [2, 128], strides = [1, 1]} : vector<2x384xf32> to vector<2x128xf32>
    %490 = vector.extract_strided_slice %480 {offsets = [0, 384], sizes = [2, 128], strides = [1, 1]} : vector<2x512xf32> to vector<2x128xf32>
    %491 = math.tanh %490 : vector<2x128xf32>
    %492 = arith.mulf %488, %471 : vector<2x128xf32>
    %493 = arith.mulf %487, %491 : vector<2x128xf32>
    %494 = arith.addf %492, %493 : vector<2x128xf32>
    %495 = math.tanh %494 : vector<2x128xf32>
    %496 = arith.mulf %489, %495 : vector<2x128xf32>
    %497 = arith.index_cast %476 : i32 to index
    %c0_156 = arith.constant 0 : index
    %498 = vector.load %arg9[%497, %c0_156] : memref<16x128xf32, #tpu.memory_space<vmem>>, vector<2x128xf32>
    tpu.vector_store %arg9[%497, %c0_156], %496 {strides = array<i32>} : memref<16x128xf32, #tpu.memory_space<vmem>>, vector<2x128xf32>,
    %c4_i32_157 = arith.constant 4 : i32
    %c2_i32_158 = arith.constant 2 : i32
    %499 = arith.muli %c4_i32_157, %c2_i32_158 : i32
    %500 = arith.index_cast %499 : i32 to index
    %c0_159 = arith.constant 0 : index
    %501 = vector.load %arg10[%500, %c0_159] : memref<16x512xf32, #tpu.memory_space<vmem>>, vector<2x512xf32>
    %cst_160 = arith.constant dense<0.000000e+00> : vector<2x512xf32>
    %502 = tpu.matmul %496, %404, %cst_160 {dimension_numbers = #tpu.dot_dimension_numbers<[1], [0], [0], [1], [0, 0, 1, 1], [], []>} : vector<2x128xf32>, vector<128x512xf32>, vector<2x512xf32> -> vector<2x512xf32>
    %503 = arith.addf %501, %502 : vector<2x512xf32>
    %504 = vector.extract_strided_slice %503 {offsets = [0, 0], sizes = [2, 384], strides = [1, 1]} : vector<2x512xf32> to vector<2x384xf32>
    %505 = arith.negf %504 : vector<2x384xf32>
    %506 = math.exp %505 : vector<2x384xf32>
    %cst_161 = arith.constant 1.000000e+00 : f32
    %507 = vector.broadcast %cst_161 : f32 to vector<2x384xf32>
    %508 = arith.addf %507, %506 : vector<2x384xf32>
    %509 = arith.divf %507, %508 : vector<2x384xf32>
    %510 = vector.extract_strided_slice %509 {offsets = [0, 0], sizes = [2, 128], strides = [1, 1]} : vector<2x384xf32> to vector<2x128xf32>
    %511 = vector.extract_strided_slice %509 {offsets = [0, 128], sizes = [2, 128], strides = [1, 1]} : vector<2x384xf32> to vector<2x128xf32>
    %512 = vector.extract_strided_slice %509 {offsets = [0, 256], sizes = [2, 128], strides = [1, 1]} : vector<2x384xf32> to vector<2x128xf32>
    %513 = vector.extract_strided_slice %503 {offsets = [0, 384], sizes = [2, 128], strides = [1, 1]} : vector<2x512xf32> to vector<2x128xf32>
    %514 = math.tanh %513 : vector<2x128xf32>
    %515 = arith.mulf %511, %494 : vector<2x128xf32>
    %516 = arith.mulf %510, %514 : vector<2x128xf32>
    %517 = arith.addf %515, %516 : vector<2x128xf32>
    %518 = math.tanh %517 : vector<2x128xf32>
    %519 = arith.mulf %512, %518 : vector<2x128xf32>
    %520 = arith.index_cast %499 : i32 to index
    %c0_162 = arith.constant 0 : index
    %521 = vector.load %arg9[%520, %c0_162] : memref<16x128xf32, #tpu.memory_space<vmem>>, vector<2x128xf32>
    tpu.vector_store %arg9[%520, %c0_162], %519 {strides = array<i32>} : memref<16x128xf32, #tpu.memory_space<vmem>>, vector<2x128xf32>,
    %c5_i32_163 = arith.constant 5 : i32
    %c2_i32_164 = arith.constant 2 : i32
    %522 = arith.muli %c5_i32_163, %c2_i32_164 : i32
    %523 = arith.index_cast %522 : i32 to index
    %c0_165 = arith.constant 0 : index
    %524 = vector.load %arg10[%523, %c0_165] : memref<16x512xf32, #tpu.memory_space<vmem>>, vector<2x512xf32>
    %cst_166 = arith.constant dense<0.000000e+00> : vector<2x512xf32>
    %525 = tpu.matmul %519, %404, %cst_166 {dimension_numbers = #tpu.dot_dimension_numbers<[1], [0], [0], [1], [0, 0, 1, 1], [], []>} : vector<2x128xf32>, vector<128x512xf32>, vector<2x512xf32> -> vector<2x512xf32>
    %526 = arith.addf %524, %525 : vector<2x512xf32>
    %527 = vector.extract_strided_slice %526 {offsets = [0, 0], sizes = [2, 384], strides = [1, 1]} : vector<2x512xf32> to vector<2x384xf32>
    %528 = arith.negf %527 : vector<2x384xf32>
    %529 = math.exp %528 : vector<2x384xf32>
    %cst_167 = arith.constant 1.000000e+00 : f32
    %530 = vector.broadcast %cst_167 : f32 to vector<2x384xf32>
    %531 = arith.addf %530, %529 : vector<2x384xf32>
    %532 = arith.divf %530, %531 : vector<2x384xf32>
    %533 = vector.extract_strided_slice %532 {offsets = [0, 0], sizes = [2, 128], strides = [1, 1]} : vector<2x384xf32> to vector<2x128xf32>
    %534 = vector.extract_strided_slice %532 {offsets = [0, 128], sizes = [2, 128], strides = [1, 1]} : vector<2x384xf32> to vector<2x128xf32>
    %535 = vector.extract_strided_slice %532 {offsets = [0, 256], sizes = [2, 128], strides = [1, 1]} : vector<2x384xf32> to vector<2x128xf32>
    %536 = vector.extract_strided_slice %526 {offsets = [0, 384], sizes = [2, 128], strides = [1, 1]} : vector<2x512xf32> to vector<2x128xf32>
    %537 = math.tanh %536 : vector<2x128xf32>
    %538 = arith.mulf %534, %517 : vector<2x128xf32>
    %539 = arith.mulf %533, %537 : vector<2x128xf32>
    %540 = arith.addf %538, %539 : vector<2x128xf32>
    %541 = math.tanh %540 : vector<2x128xf32>
    %542 = arith.mulf %535, %541 : vector<2x128xf32>
    %543 = arith.index_cast %522 : i32 to index
    %c0_168 = arith.constant 0 : index
    %544 = vector.load %arg9[%543, %c0_168] : memref<16x128xf32, #tpu.memory_space<vmem>>, vector<2x128xf32>
    tpu.vector_store %arg9[%543, %c0_168], %542 {strides = array<i32>} : memref<16x128xf32, #tpu.memory_space<vmem>>, vector<2x128xf32>,
    %c6_i32_169 = arith.constant 6 : i32
    %c2_i32_170 = arith.constant 2 : i32
    %545 = arith.muli %c6_i32_169, %c2_i32_170 : i32
    %546 = arith.index_cast %545 : i32 to index
    %c0_171 = arith.constant 0 : index
    %547 = vector.load %arg10[%546, %c0_171] : memref<16x512xf32, #tpu.memory_space<vmem>>, vector<2x512xf32>
    %cst_172 = arith.constant dense<0.000000e+00> : vector<2x512xf32>
    %548 = tpu.matmul %542, %404, %cst_172 {dimension_numbers = #tpu.dot_dimension_numbers<[1], [0], [0], [1], [0, 0, 1, 1], [], []>} : vector<2x128xf32>, vector<128x512xf32>, vector<2x512xf32> -> vector<2x512xf32>
    %549 = arith.addf %547, %548 : vector<2x512xf32>
    %550 = vector.extract_strided_slice %549 {offsets = [0, 0], sizes = [2, 384], strides = [1, 1]} : vector<2x512xf32> to vector<2x384xf32>
    %551 = arith.negf %550 : vector<2x384xf32>
    %552 = math.exp %551 : vector<2x384xf32>
    %cst_173 = arith.constant 1.000000e+00 : f32
    %553 = vector.broadcast %cst_173 : f32 to vector<2x384xf32>
    %554 = arith.addf %553, %552 : vector<2x384xf32>
    %555 = arith.divf %553, %554 : vector<2x384xf32>
    %556 = vector.extract_strided_slice %555 {offsets = [0, 0], sizes = [2, 128], strides = [1, 1]} : vector<2x384xf32> to vector<2x128xf32>
    %557 = vector.extract_strided_slice %555 {offsets = [0, 128], sizes = [2, 128], strides = [1, 1]} : vector<2x384xf32> to vector<2x128xf32>
    %558 = vector.extract_strided_slice %555 {offsets = [0, 256], sizes = [2, 128], strides = [1, 1]} : vector<2x384xf32> to vector<2x128xf32>
    %559 = vector.extract_strided_slice %549 {offsets = [0, 384], sizes = [2, 128], strides = [1, 1]} : vector<2x512xf32> to vector<2x128xf32>
    %560 = math.tanh %559 : vector<2x128xf32>
    %561 = arith.mulf %557, %540 : vector<2x128xf32>
    %562 = arith.mulf %556, %560 : vector<2x128xf32>
    %563 = arith.addf %561, %562 : vector<2x128xf32>
    %564 = math.tanh %563 : vector<2x128xf32>
    %565 = arith.mulf %558, %564 : vector<2x128xf32>
    %566 = arith.index_cast %545 : i32 to index
    %c0_174 = arith.constant 0 : index
    %567 = vector.load %arg9[%566, %c0_174] : memref<16x128xf32, #tpu.memory_space<vmem>>, vector<2x128xf32>
    tpu.vector_store %arg9[%566, %c0_174], %565 {strides = array<i32>} : memref<16x128xf32, #tpu.memory_space<vmem>>, vector<2x128xf32>,
    %c7_i32_175 = arith.constant 7 : i32
    %c2_i32_176 = arith.constant 2 : i32
    %568 = arith.muli %c7_i32_175, %c2_i32_176 : i32
    %569 = arith.index_cast %568 : i32 to index
    %c0_177 = arith.constant 0 : index
    %570 = vector.load %arg10[%569, %c0_177] : memref<16x512xf32, #tpu.memory_space<vmem>>, vector<2x512xf32>
    %cst_178 = arith.constant dense<0.000000e+00> : vector<2x512xf32>
    %571 = tpu.matmul %565, %404, %cst_178 {dimension_numbers = #tpu.dot_dimension_numbers<[1], [0], [0], [1], [0, 0, 1, 1], [], []>} : vector<2x128xf32>, vector<128x512xf32>, vector<2x512xf32> -> vector<2x512xf32>
    %572 = arith.addf %570, %571 : vector<2x512xf32>
    %573 = vector.extract_strided_slice %572 {offsets = [0, 0], sizes = [2, 384], strides = [1, 1]} : vector<2x512xf32> to vector<2x384xf32>
    %574 = arith.negf %573 : vector<2x384xf32>
    %575 = math.exp %574 : vector<2x384xf32>
    %cst_179 = arith.constant 1.000000e+00 : f32
    %576 = vector.broadcast %cst_179 : f32 to vector<2x384xf32>
    %577 = arith.addf %576, %575 : vector<2x384xf32>
    %578 = arith.divf %576, %577 : vector<2x384xf32>
    %579 = vector.extract_strided_slice %578 {offsets = [0, 0], sizes = [2, 128], strides = [1, 1]} : vector<2x384xf32> to vector<2x128xf32>
    %580 = vector.extract_strided_slice %578 {offsets = [0, 128], sizes = [2, 128], strides = [1, 1]} : vector<2x384xf32> to vector<2x128xf32>
    %581 = vector.extract_strided_slice %578 {offsets = [0, 256], sizes = [2, 128], strides = [1, 1]} : vector<2x384xf32> to vector<2x128xf32>
    %582 = vector.extract_strided_slice %572 {offsets = [0, 384], sizes = [2, 128], strides = [1, 1]} : vector<2x512xf32> to vector<2x128xf32>
    %583 = math.tanh %582 : vector<2x128xf32>
    %584 = arith.mulf %580, %563 : vector<2x128xf32>
    %585 = arith.mulf %579, %583 : vector<2x128xf32>
    %586 = arith.addf %584, %585 : vector<2x128xf32>
    %587 = math.tanh %586 : vector<2x128xf32>
    %588 = arith.mulf %581, %587 : vector<2x128xf32>
    %589 = arith.index_cast %568 : i32 to index
    %c0_180 = arith.constant 0 : index
    %590 = vector.load %arg9[%589, %c0_180] : memref<16x128xf32, #tpu.memory_space<vmem>>, vector<2x128xf32>
    tpu.vector_store %arg9[%589, %c0_180], %588 {strides = array<i32>} : memref<16x128xf32, #tpu.memory_space<vmem>>, vector<2x128xf32>,
    %c8_i32_181 = arith.constant 8 : i32
    %c0_182 = arith.constant 0 : index
    %c0_183 = arith.constant 0 : index
    %591 = vector.load %arg9[%c0_182, %c0_183] : memref<16x128xf32, #tpu.memory_space<vmem>>, vector<16x128xf32>
    %c3 = arith.constant 3 : index
    %c0_184 = arith.constant 0 : index
    %c0_185 = arith.constant 0 : index
    %592 = vector.load %arg1[%c3, %c0_184, %c0_185] : memref<4x128x512xf32, #tpu.memory_space<vmem>>, vector<1x128x512xf32>
    %593 = vector.shape_cast %592 : vector<1x128x512xf32> to vector<128x512xf32>
    %cst_186 = arith.constant dense<0.000000e+00> : vector<16x512xf32>
    %594 = tpu.matmul %591, %593, %cst_186 {dimension_numbers = #tpu.dot_dimension_numbers<[1], [0], [0], [1], [0, 0, 1, 1], [], []>} : vector<16x128xf32>, vector<128x512xf32>, vector<16x512xf32> -> vector<16x512xf32>
    %c3_187 = arith.constant 3 : index
    %c0_188 = arith.constant 0 : index
    %c0_189 = arith.constant 0 : index
    %595 = vector.load %arg3[%c3_187, %c0_188, %c0_189] : memref<4x1x512xf32, #tpu.memory_space<vmem>>, vector<1x1x512xf32>
    %596 = vector.shape_cast %595 : vector<1x1x512xf32> to vector<1x512xf32>
    %597 = vector.broadcast %596 : vector<1x512xf32> to vector<16x512xf32>
    %598 = arith.addf %594, %597 : vector<16x512xf32>
    %c0_190 = arith.constant 0 : index
    %c0_191 = arith.constant 0 : index
    %599 = vector.load %arg10[%c0_190, %c0_191] : memref<16x512xf32, #tpu.memory_space<vmem>>, vector<16x512xf32>
    tpu.vector_store %arg10[%c0_190, %c0_191], %598 {strides = array<i32>} : memref<16x512xf32, #tpu.memory_space<vmem>>, vector<16x512xf32>,
    %c3_192 = arith.constant 3 : index
    %c0_193 = arith.constant 0 : index
    %c0_194 = arith.constant 0 : index
    %600 = vector.load %arg2[%c3_192, %c0_193, %c0_194] : memref<4x128x512xf32, #tpu.memory_space<vmem>>, vector<1x128x512xf32>
    %601 = vector.shape_cast %600 : vector<1x128x512xf32> to vector<128x512xf32>
    %cst_195 = arith.constant 0.000000e+00 : f32
    %602 = vector.broadcast %cst_195 : f32 to vector<2x128xf32>
    %cst_196 = arith.constant 0.000000e+00 : f32
    %603 = vector.broadcast %cst_196 : f32 to vector<2x128xf32>
    %c0_i32_197 = arith.constant 0 : i32
    %c2_i32_198 = arith.constant 2 : i32
    %604 = arith.muli %c0_i32_197, %c2_i32_198 : i32
    %605 = arith.index_cast %604 : i32 to index
    %c0_199 = arith.constant 0 : index
    %606 = vector.load %arg10[%605, %c0_199] : memref<16x512xf32, #tpu.memory_space<vmem>>, vector<2x512xf32>
    %cst_200 = arith.constant dense<0.000000e+00> : vector<2x512xf32>
    %607 = tpu.matmul %602, %601, %cst_200 {dimension_numbers = #tpu.dot_dimension_numbers<[1], [0], [0], [1], [0, 0, 1, 1], [], []>} : vector<2x128xf32>, vector<128x512xf32>, vector<2x512xf32> -> vector<2x512xf32>
    %608 = arith.addf %606, %607 : vector<2x512xf32>
    %609 = vector.extract_strided_slice %608 {offsets = [0, 0], sizes = [2, 384], strides = [1, 1]} : vector<2x512xf32> to vector<2x384xf32>
    %610 = arith.negf %609 : vector<2x384xf32>
    %611 = math.exp %610 : vector<2x384xf32>
    %cst_201 = arith.constant 1.000000e+00 : f32
    %612 = vector.broadcast %cst_201 : f32 to vector<2x384xf32>
    %613 = arith.addf %612, %611 : vector<2x384xf32>
    %614 = arith.divf %612, %613 : vector<2x384xf32>
    %615 = vector.extract_strided_slice %614 {offsets = [0, 0], sizes = [2, 128], strides = [1, 1]} : vector<2x384xf32> to vector<2x128xf32>
    %616 = vector.extract_strided_slice %614 {offsets = [0, 128], sizes = [2, 128], strides = [1, 1]} : vector<2x384xf32> to vector<2x128xf32>
    %617 = vector.extract_strided_slice %614 {offsets = [0, 256], sizes = [2, 128], strides = [1, 1]} : vector<2x384xf32> to vector<2x128xf32>
    %618 = vector.extract_strided_slice %608 {offsets = [0, 384], sizes = [2, 128], strides = [1, 1]} : vector<2x512xf32> to vector<2x128xf32>
    %619 = math.tanh %618 : vector<2x128xf32>
    %620 = arith.mulf %616, %603 : vector<2x128xf32>
    %621 = arith.mulf %615, %619 : vector<2x128xf32>
    %622 = arith.addf %620, %621 : vector<2x128xf32>
    %623 = math.tanh %622 : vector<2x128xf32>
    %624 = arith.mulf %617, %623 : vector<2x128xf32>
    %c1_i32_202 = arith.constant 1 : i32
    %c2_i32_203 = arith.constant 2 : i32
    %625 = arith.muli %c1_i32_202, %c2_i32_203 : i32
    %626 = arith.index_cast %625 : i32 to index
    %c0_204 = arith.constant 0 : index
    %627 = vector.load %arg10[%626, %c0_204] : memref<16x512xf32, #tpu.memory_space<vmem>>, vector<2x512xf32>
    %cst_205 = arith.constant dense<0.000000e+00> : vector<2x512xf32>
    %628 = tpu.matmul %624, %601, %cst_205 {dimension_numbers = #tpu.dot_dimension_numbers<[1], [0], [0], [1], [0, 0, 1, 1], [], []>} : vector<2x128xf32>, vector<128x512xf32>, vector<2x512xf32> -> vector<2x512xf32>
    %629 = arith.addf %627, %628 : vector<2x512xf32>
    %630 = vector.extract_strided_slice %629 {offsets = [0, 0], sizes = [2, 384], strides = [1, 1]} : vector<2x512xf32> to vector<2x384xf32>
    %631 = arith.negf %630 : vector<2x384xf32>
    %632 = math.exp %631 : vector<2x384xf32>
    %cst_206 = arith.constant 1.000000e+00 : f32
    %633 = vector.broadcast %cst_206 : f32 to vector<2x384xf32>
    %634 = arith.addf %633, %632 : vector<2x384xf32>
    %635 = arith.divf %633, %634 : vector<2x384xf32>
    %636 = vector.extract_strided_slice %635 {offsets = [0, 0], sizes = [2, 128], strides = [1, 1]} : vector<2x384xf32> to vector<2x128xf32>
    %637 = vector.extract_strided_slice %635 {offsets = [0, 128], sizes = [2, 128], strides = [1, 1]} : vector<2x384xf32> to vector<2x128xf32>
    %638 = vector.extract_strided_slice %635 {offsets = [0, 256], sizes = [2, 128], strides = [1, 1]} : vector<2x384xf32> to vector<2x128xf32>
    %639 = vector.extract_strided_slice %629 {offsets = [0, 384], sizes = [2, 128], strides = [1, 1]} : vector<2x512xf32> to vector<2x128xf32>
    %640 = math.tanh %639 : vector<2x128xf32>
    %641 = arith.mulf %637, %622 : vector<2x128xf32>
    %642 = arith.mulf %636, %640 : vector<2x128xf32>
    %643 = arith.addf %641, %642 : vector<2x128xf32>
    %644 = math.tanh %643 : vector<2x128xf32>
    %645 = arith.mulf %638, %644 : vector<2x128xf32>
    %c2_i32_207 = arith.constant 2 : i32
    %c2_i32_208 = arith.constant 2 : i32
    %646 = arith.muli %c2_i32_207, %c2_i32_208 : i32
    %647 = arith.index_cast %646 : i32 to index
    %c0_209 = arith.constant 0 : index
    %648 = vector.load %arg10[%647, %c0_209] : memref<16x512xf32, #tpu.memory_space<vmem>>, vector<2x512xf32>
    %cst_210 = arith.constant dense<0.000000e+00> : vector<2x512xf32>
    %649 = tpu.matmul %645, %601, %cst_210 {dimension_numbers = #tpu.dot_dimension_numbers<[1], [0], [0], [1], [0, 0, 1, 1], [], []>} : vector<2x128xf32>, vector<128x512xf32>, vector<2x512xf32> -> vector<2x512xf32>
    %650 = arith.addf %648, %649 : vector<2x512xf32>
    %651 = vector.extract_strided_slice %650 {offsets = [0, 0], sizes = [2, 384], strides = [1, 1]} : vector<2x512xf32> to vector<2x384xf32>
    %652 = arith.negf %651 : vector<2x384xf32>
    %653 = math.exp %652 : vector<2x384xf32>
    %cst_211 = arith.constant 1.000000e+00 : f32
    %654 = vector.broadcast %cst_211 : f32 to vector<2x384xf32>
    %655 = arith.addf %654, %653 : vector<2x384xf32>
    %656 = arith.divf %654, %655 : vector<2x384xf32>
    %657 = vector.extract_strided_slice %656 {offsets = [0, 0], sizes = [2, 128], strides = [1, 1]} : vector<2x384xf32> to vector<2x128xf32>
    %658 = vector.extract_strided_slice %656 {offsets = [0, 128], sizes = [2, 128], strides = [1, 1]} : vector<2x384xf32> to vector<2x128xf32>
    %659 = vector.extract_strided_slice %656 {offsets = [0, 256], sizes = [2, 128], strides = [1, 1]} : vector<2x384xf32> to vector<2x128xf32>
    %660 = vector.extract_strided_slice %650 {offsets = [0, 384], sizes = [2, 128], strides = [1, 1]} : vector<2x512xf32> to vector<2x128xf32>
    %661 = math.tanh %660 : vector<2x128xf32>
    %662 = arith.mulf %658, %643 : vector<2x128xf32>
    %663 = arith.mulf %657, %661 : vector<2x128xf32>
    %664 = arith.addf %662, %663 : vector<2x128xf32>
    %665 = math.tanh %664 : vector<2x128xf32>
    %666 = arith.mulf %659, %665 : vector<2x128xf32>
    %c3_i32_212 = arith.constant 3 : i32
    %c2_i32_213 = arith.constant 2 : i32
    %667 = arith.muli %c3_i32_212, %c2_i32_213 : i32
    %668 = arith.index_cast %667 : i32 to index
    %c0_214 = arith.constant 0 : index
    %669 = vector.load %arg10[%668, %c0_214] : memref<16x512xf32, #tpu.memory_space<vmem>>, vector<2x512xf32>
    %cst_215 = arith.constant dense<0.000000e+00> : vector<2x512xf32>
    %670 = tpu.matmul %666, %601, %cst_215 {dimension_numbers = #tpu.dot_dimension_numbers<[1], [0], [0], [1], [0, 0, 1, 1], [], []>} : vector<2x128xf32>, vector<128x512xf32>, vector<2x512xf32> -> vector<2x512xf32>
    %671 = arith.addf %669, %670 : vector<2x512xf32>
    %672 = vector.extract_strided_slice %671 {offsets = [0, 0], sizes = [2, 384], strides = [1, 1]} : vector<2x512xf32> to vector<2x384xf32>
    %673 = arith.negf %672 : vector<2x384xf32>
    %674 = math.exp %673 : vector<2x384xf32>
    %cst_216 = arith.constant 1.000000e+00 : f32
    %675 = vector.broadcast %cst_216 : f32 to vector<2x384xf32>
    %676 = arith.addf %675, %674 : vector<2x384xf32>
    %677 = arith.divf %675, %676 : vector<2x384xf32>
    %678 = vector.extract_strided_slice %677 {offsets = [0, 0], sizes = [2, 128], strides = [1, 1]} : vector<2x384xf32> to vector<2x128xf32>
    %679 = vector.extract_strided_slice %677 {offsets = [0, 128], sizes = [2, 128], strides = [1, 1]} : vector<2x384xf32> to vector<2x128xf32>
    %680 = vector.extract_strided_slice %677 {offsets = [0, 256], sizes = [2, 128], strides = [1, 1]} : vector<2x384xf32> to vector<2x128xf32>
    %681 = vector.extract_strided_slice %671 {offsets = [0, 384], sizes = [2, 128], strides = [1, 1]} : vector<2x512xf32> to vector<2x128xf32>
    %682 = math.tanh %681 : vector<2x128xf32>
    %683 = arith.mulf %679, %664 : vector<2x128xf32>
    %684 = arith.mulf %678, %682 : vector<2x128xf32>
    %685 = arith.addf %683, %684 : vector<2x128xf32>
    %686 = math.tanh %685 : vector<2x128xf32>
    %687 = arith.mulf %680, %686 : vector<2x128xf32>
    %c4_i32_217 = arith.constant 4 : i32
    %c2_i32_218 = arith.constant 2 : i32
    %688 = arith.muli %c4_i32_217, %c2_i32_218 : i32
    %689 = arith.index_cast %688 : i32 to index
    %c0_219 = arith.constant 0 : index
    %690 = vector.load %arg10[%689, %c0_219] : memref<16x512xf32, #tpu.memory_space<vmem>>, vector<2x512xf32>
    %cst_220 = arith.constant dense<0.000000e+00> : vector<2x512xf32>
    %691 = tpu.matmul %687, %601, %cst_220 {dimension_numbers = #tpu.dot_dimension_numbers<[1], [0], [0], [1], [0, 0, 1, 1], [], []>} : vector<2x128xf32>, vector<128x512xf32>, vector<2x512xf32> -> vector<2x512xf32>
    %692 = arith.addf %690, %691 : vector<2x512xf32>
    %693 = vector.extract_strided_slice %692 {offsets = [0, 0], sizes = [2, 384], strides = [1, 1]} : vector<2x512xf32> to vector<2x384xf32>
    %694 = arith.negf %693 : vector<2x384xf32>
    %695 = math.exp %694 : vector<2x384xf32>
    %cst_221 = arith.constant 1.000000e+00 : f32
    %696 = vector.broadcast %cst_221 : f32 to vector<2x384xf32>
    %697 = arith.addf %696, %695 : vector<2x384xf32>
    %698 = arith.divf %696, %697 : vector<2x384xf32>
    %699 = vector.extract_strided_slice %698 {offsets = [0, 0], sizes = [2, 128], strides = [1, 1]} : vector<2x384xf32> to vector<2x128xf32>
    %700 = vector.extract_strided_slice %698 {offsets = [0, 128], sizes = [2, 128], strides = [1, 1]} : vector<2x384xf32> to vector<2x128xf32>
    %701 = vector.extract_strided_slice %698 {offsets = [0, 256], sizes = [2, 128], strides = [1, 1]} : vector<2x384xf32> to vector<2x128xf32>
    %702 = vector.extract_strided_slice %692 {offsets = [0, 384], sizes = [2, 128], strides = [1, 1]} : vector<2x512xf32> to vector<2x128xf32>
    %703 = math.tanh %702 : vector<2x128xf32>
    %704 = arith.mulf %700, %685 : vector<2x128xf32>
    %705 = arith.mulf %699, %703 : vector<2x128xf32>
    %706 = arith.addf %704, %705 : vector<2x128xf32>
    %707 = math.tanh %706 : vector<2x128xf32>
    %708 = arith.mulf %701, %707 : vector<2x128xf32>
    %c5_i32_222 = arith.constant 5 : i32
    %c2_i32_223 = arith.constant 2 : i32
    %709 = arith.muli %c5_i32_222, %c2_i32_223 : i32
    %710 = arith.index_cast %709 : i32 to index
    %c0_224 = arith.constant 0 : index
    %711 = vector.load %arg10[%710, %c0_224] : memref<16x512xf32, #tpu.memory_space<vmem>>, vector<2x512xf32>
    %cst_225 = arith.constant dense<0.000000e+00> : vector<2x512xf32>
    %712 = tpu.matmul %708, %601, %cst_225 {dimension_numbers = #tpu.dot_dimension_numbers<[1], [0], [0], [1], [0, 0, 1, 1], [], []>} : vector<2x128xf32>, vector<128x512xf32>, vector<2x512xf32> -> vector<2x512xf32>
    %713 = arith.addf %711, %712 : vector<2x512xf32>
    %714 = vector.extract_strided_slice %713 {offsets = [0, 0], sizes = [2, 384], strides = [1, 1]} : vector<2x512xf32> to vector<2x384xf32>
    %715 = arith.negf %714 : vector<2x384xf32>
    %716 = math.exp %715 : vector<2x384xf32>
    %cst_226 = arith.constant 1.000000e+00 : f32
    %717 = vector.broadcast %cst_226 : f32 to vector<2x384xf32>
    %718 = arith.addf %717, %716 : vector<2x384xf32>
    %719 = arith.divf %717, %718 : vector<2x384xf32>
    %720 = vector.extract_strided_slice %719 {offsets = [0, 0], sizes = [2, 128], strides = [1, 1]} : vector<2x384xf32> to vector<2x128xf32>
    %721 = vector.extract_strided_slice %719 {offsets = [0, 128], sizes = [2, 128], strides = [1, 1]} : vector<2x384xf32> to vector<2x128xf32>
    %722 = vector.extract_strided_slice %719 {offsets = [0, 256], sizes = [2, 128], strides = [1, 1]} : vector<2x384xf32> to vector<2x128xf32>
    %723 = vector.extract_strided_slice %713 {offsets = [0, 384], sizes = [2, 128], strides = [1, 1]} : vector<2x512xf32> to vector<2x128xf32>
    %724 = math.tanh %723 : vector<2x128xf32>
    %725 = arith.mulf %721, %706 : vector<2x128xf32>
    %726 = arith.mulf %720, %724 : vector<2x128xf32>
    %727 = arith.addf %725, %726 : vector<2x128xf32>
    %728 = math.tanh %727 : vector<2x128xf32>
    %729 = arith.mulf %722, %728 : vector<2x128xf32>
    %c6_i32_227 = arith.constant 6 : i32
    %c2_i32_228 = arith.constant 2 : i32
    %730 = arith.muli %c6_i32_227, %c2_i32_228 : i32
    %731 = arith.index_cast %730 : i32 to index
    %c0_229 = arith.constant 0 : index
    %732 = vector.load %arg10[%731, %c0_229] : memref<16x512xf32, #tpu.memory_space<vmem>>, vector<2x512xf32>
    %cst_230 = arith.constant dense<0.000000e+00> : vector<2x512xf32>
    %733 = tpu.matmul %729, %601, %cst_230 {dimension_numbers = #tpu.dot_dimension_numbers<[1], [0], [0], [1], [0, 0, 1, 1], [], []>} : vector<2x128xf32>, vector<128x512xf32>, vector<2x512xf32> -> vector<2x512xf32>
    %734 = arith.addf %732, %733 : vector<2x512xf32>
    %735 = vector.extract_strided_slice %734 {offsets = [0, 0], sizes = [2, 384], strides = [1, 1]} : vector<2x512xf32> to vector<2x384xf32>
    %736 = arith.negf %735 : vector<2x384xf32>
    %737 = math.exp %736 : vector<2x384xf32>
    %cst_231 = arith.constant 1.000000e+00 : f32
    %738 = vector.broadcast %cst_231 : f32 to vector<2x384xf32>
    %739 = arith.addf %738, %737 : vector<2x384xf32>
    %740 = arith.divf %738, %739 : vector<2x384xf32>
    %741 = vector.extract_strided_slice %740 {offsets = [0, 0], sizes = [2, 128], strides = [1, 1]} : vector<2x384xf32> to vector<2x128xf32>
    %742 = vector.extract_strided_slice %740 {offsets = [0, 128], sizes = [2, 128], strides = [1, 1]} : vector<2x384xf32> to vector<2x128xf32>
    %743 = vector.extract_strided_slice %740 {offsets = [0, 256], sizes = [2, 128], strides = [1, 1]} : vector<2x384xf32> to vector<2x128xf32>
    %744 = vector.extract_strided_slice %734 {offsets = [0, 384], sizes = [2, 128], strides = [1, 1]} : vector<2x512xf32> to vector<2x128xf32>
    %745 = math.tanh %744 : vector<2x128xf32>
    %746 = arith.mulf %742, %727 : vector<2x128xf32>
    %747 = arith.mulf %741, %745 : vector<2x128xf32>
    %748 = arith.addf %746, %747 : vector<2x128xf32>
    %749 = math.tanh %748 : vector<2x128xf32>
    %750 = arith.mulf %743, %749 : vector<2x128xf32>
    %c7_i32_232 = arith.constant 7 : i32
    %c2_i32_233 = arith.constant 2 : i32
    %751 = arith.muli %c7_i32_232, %c2_i32_233 : i32
    %752 = arith.index_cast %751 : i32 to index
    %c0_234 = arith.constant 0 : index
    %753 = vector.load %arg10[%752, %c0_234] : memref<16x512xf32, #tpu.memory_space<vmem>>, vector<2x512xf32>
    %cst_235 = arith.constant dense<0.000000e+00> : vector<2x512xf32>
    %754 = tpu.matmul %750, %601, %cst_235 {dimension_numbers = #tpu.dot_dimension_numbers<[1], [0], [0], [1], [0, 0, 1, 1], [], []>} : vector<2x128xf32>, vector<128x512xf32>, vector<2x512xf32> -> vector<2x512xf32>
    %755 = arith.addf %753, %754 : vector<2x512xf32>
    %756 = vector.extract_strided_slice %755 {offsets = [0, 0], sizes = [2, 384], strides = [1, 1]} : vector<2x512xf32> to vector<2x384xf32>
    %757 = arith.negf %756 : vector<2x384xf32>
    %758 = math.exp %757 : vector<2x384xf32>
    %cst_236 = arith.constant 1.000000e+00 : f32
    %759 = vector.broadcast %cst_236 : f32 to vector<2x384xf32>
    %760 = arith.addf %759, %758 : vector<2x384xf32>
    %761 = arith.divf %759, %760 : vector<2x384xf32>
    %762 = vector.extract_strided_slice %761 {offsets = [0, 0], sizes = [2, 128], strides = [1, 1]} : vector<2x384xf32> to vector<2x128xf32>
    %763 = vector.extract_strided_slice %761 {offsets = [0, 128], sizes = [2, 128], strides = [1, 1]} : vector<2x384xf32> to vector<2x128xf32>
    %764 = vector.extract_strided_slice %761 {offsets = [0, 256], sizes = [2, 128], strides = [1, 1]} : vector<2x384xf32> to vector<2x128xf32>
    %765 = vector.extract_strided_slice %755 {offsets = [0, 384], sizes = [2, 128], strides = [1, 1]} : vector<2x512xf32> to vector<2x128xf32>
    %766 = math.tanh %765 : vector<2x128xf32>
    %767 = arith.mulf %763, %748 : vector<2x128xf32>
    %768 = arith.mulf %762, %766 : vector<2x128xf32>
    %769 = arith.addf %767, %768 : vector<2x128xf32>
    %770 = math.tanh %769 : vector<2x128xf32>
    %771 = arith.mulf %764, %770 : vector<2x128xf32>
    %c8_i32_237 = arith.constant 8 : i32
    %c0_238 = arith.constant 0 : index
    %c0_239 = arith.constant 0 : index
    %772 = vector.load %arg4[%c0_238, %c0_239] : memref<128x128xf32, #tpu.memory_space<vmem>>, vector<128x128xf32>
    %cst_240 = arith.constant dense<0.000000e+00> : vector<2x128xf32>
    %773 = tpu.matmul %771, %772, %cst_240 {dimension_numbers = #tpu.dot_dimension_numbers<[1], [0], [0], [1], [0, 0, 1, 1], [], []>} : vector<2x128xf32>, vector<128x128xf32>, vector<2x128xf32> -> vector<2x128xf32>
    %c0_241 = arith.constant 0 : index
    %c0_242 = arith.constant 0 : index
    %774 = vector.load %arg5[%c0_241, %c0_242] : memref<1x128xf32, #tpu.memory_space<vmem>>, vector<1x128xf32>
    %775 = vector.broadcast %774 : vector<1x128xf32> to vector<2x128xf32>
    %776 = arith.addf %773, %775 : vector<2x128xf32>
    %cst_243 = arith.constant 0.000000e+00 : f32
    %777 = vector.broadcast %cst_243 : f32 to vector<2x128xf32>
    %778 = arith.maximumf %776, %777 : vector<2x128xf32>
    %c0_244 = arith.constant 0 : index
    %c0_245 = arith.constant 0 : index
    %779 = vector.load %arg6[%c0_244, %c0_245] : memref<128x4xf32, #tpu.memory_space<vmem>>, vector<128x4xf32>
    %cst_246 = arith.constant dense<0.000000e+00> : vector<2x4xf32>
    %780 = tpu.matmul %778, %779, %cst_246 {dimension_numbers = #tpu.dot_dimension_numbers<[1], [0], [0], [1], [0, 0, 1, 1], [], []>} : vector<2x128xf32>, vector<128x4xf32>, vector<2x4xf32> -> vector<2x4xf32>
    %c0_247 = arith.constant 0 : index
    %c0_248 = arith.constant 0 : index
    %781 = vector.load %arg7[%c0_247, %c0_248] : memref<1x4xf32, #tpu.memory_space<vmem>>, vector<1x4xf32>
    %782 = vector.broadcast %781 : vector<1x4xf32> to vector<2x4xf32>
    %783 = arith.addf %780, %782 : vector<2x4xf32>
    %c0_249 = arith.constant 0 : index
    %c0_250 = arith.constant 0 : index
    %784 = vector.load %arg8[%c0_249, %c0_250] : memref<2x4xf32, #tpu.memory_space<vmem>>, vector<2x4xf32>
    tpu.vector_store %arg8[%c0_249, %c0_250], %783 {strides = array<i32>} : memref<2x4xf32, #tpu.memory_space<vmem>>, vector<2x4xf32>,
    return
  }
}

</mosaic_0001>

<bundles_post_ra>
// kernel: tpu_custom_call.1
= control target key start
LH: loop header
LB: loop body
LE: loop exit
PB: predicated region body
PF: predicated region fallthrough
CT: control target
= control target key end

     0   :  { %13 = vsyncpa [#allocation5], 0  ;;  %s12233_s0 = inlined_call_operand.hbm [shape: f32[16,128], index: 0, kind: input, shape index: {}]   ;;  %s12234_s1 = inlined_call_operand.hbm [shape: f32[4,128,512], index: 1, kind: input, shape index: {}]   ;;  %s12235_s2 = inlined_call_operand.hbm [shape: f32[4,128,512], index: 2, kind: input, shape index: {}]   ;;  %s12236_s3 = inlined_call_operand.hbm [shape: f32[4,1,512], index: 3, kind: input, shape index: {}]   ;;  %s12237_s4 = inlined_call_operand.vmem [shape: f32[128,128], index: 4, kind: input, shape index: {}]   ;;  %s12238_s5 = inlined_call_operand.vmem [shape: f32[1,128], index: 5, kind: input, shape index: {}]   ;;  %s12239_s6 = inlined_call_operand.vmem [shape: f32[128,4], index: 6, kind: input, shape index: {}]   ;;  %s12240_s7 = inlined_call_operand.vmem [shape: f32[1,4], index: 7, kind: input, shape index: {}]   ;;  %s12241_s8 = inlined_call_operand.hbm [shape: f32[2,4], index: 8, kind: output, shape index: {}]  }
   0x1   :  { %14 = vsyncpa [#allocation8], 0 }
   0x2   :  { %15 = vsyncpa [#allocation11], 0 }
   0x3   :  { %16 = vsyncpa [#allocation6], 0  ;;  %s8674_s27 = smov [#allocation7]  }
   0x4   :  { %s34_s28 = sshll.u32 %s8674_s27, 4  ;;  %s35_s28 = int_to_ptr.vmem [resolvable:$true] %s34_s28 }
   0x5   :  { %s8574_s29 = scalar_lea.vmem %s35_s28, 32768  ;;  %p8579_p1 = scmp.lt.s32.totalorder %s35_s28, %s35_s28 }
   0x6   :  { %p8575_p0 = scmp.ne.s32.totalorder %s35_s28, %s8574_s29  ;;  %p8580_p2 = scmp.lt.s32.totalorder %s8574_s29, %s8574_s29 }
   0x8   :  { %p8581_p3 = por %p8580_p2, %p8579_p1 }
   0xa   :  { %p8582_p4 = pnand %p8581_p3, %p8575_p0 }
   0xc   :  { %8585 = shalt.err (!%p8582_p4)
}
   0xd   :  { %s8675_s30 = smov 512   ;;  %s8676_s9 = smov 32  }
   0xe   :  { %40 = dma.hbm_to_vmem [thread:$0]  %s12234_s1, 32768, %s35_s28, [#allocation8], %s8675_s30, %s8675_s30, %s8676_s9  }
   0xf   :  { %s8677_s12 = smov [#allocation4]  }
  0x10   :  { %s22_s13 = sshll.u32 %s8677_s12, 4  ;;  %s23_s13 = int_to_ptr.vmem [resolvable:$true] %s22_s13 }
  0x11   :  { %s8594_s14 = scalar_lea.vmem %s23_s13, 256  ;;  %p8599_p6 = scmp.lt.s32.totalorder %s23_s13, %s23_s13 }
  0x12   :  { %p8595_p5 = scmp.ne.s32.totalorder %s23_s13, %s8594_s14  ;;  %p8600_p7 = scmp.lt.s32.totalorder %s8594_s14, %s8594_s14 }
  0x14   :  { %p8601_p8 = por %p8600_p7, %p8599_p6 }
  0x16   :  { %p8602_p9 = pnand %p8601_p8, %p8595_p5 }
  0x18   :  { %8605 = shalt.err (!%p8602_p9)
}
  0x19   :  { %s8678_s15 = smov 128   ;;  %s8679_s16 = smov 8  }
  0x1a   :  { %28 = dma.hbm_to_vmem [thread:$0]  %s12233_s0, 256, %s23_s13, [#allocation5], %s8678_s15, %s8678_s15, %s8679_s16  }
  0x1b   :  { %s8680_s19 = smov [#allocation9]   ;;  %s8681_s21 = smov [#allocation10]  }
  0x1c   :  { %s46_s20 = sshll.u32 %s8680_s19, 4  ;;  %s58_s1 = sshll.u32 %s8681_s21, 4  ;;  %s47_s20 = int_to_ptr.vmem [resolvable:$true] %s46_s20  ;;  %s59_s1 = int_to_ptr.vmem [resolvable:$true] %s58_s1 }
  0x1d   :  { %s8614_s22 = scalar_lea.vmem %s47_s20, 32768  ;;  %p8619_p11 = scmp.lt.s32.totalorder %s47_s20, %s47_s20 }
  0x1e   :  { %p8615_p10 = scmp.ne.s32.totalorder %s47_s20, %s8614_s22  ;;  %p8620_p12 = scmp.lt.s32.totalorder %s8614_s22, %s8614_s22 }
  0x20   :  { %p8621_p13 = por %p8620_p12, %p8619_p11 }
  0x22   :  { %p8622_p0 = pnand %p8621_p13, %p8615_p10 }
  0x24   :  { %8625 = shalt.err (!%p8622_p0)
}
  0x25   :  { %52 = dma.hbm_to_vmem [thread:$0]  %s12235_s2, 32768, %s47_s20, [#allocation8], %s8675_s30, %s8675_s30, %s8676_s9  }
  0x26   :  { %s8634_s0 = scalar_lea.vmem %s59_s1, 256  ;;  %p8639_p2 = scmp.lt.s32.totalorder %s59_s1, %s59_s1 }
  0x27   :  { %p8635_p1 = scmp.ne.s32.totalorder %s59_s1, %s8634_s0  ;;  %p8640_p3 = scmp.lt.s32.totalorder %s8634_s0, %s8634_s0 }
  0x29   :  { %p8641_p4 = por %p8640_p3, %p8639_p2 }
  0x2b   :  { %p8642_p5 = pnand %p8641_p4, %p8635_p1 }
  0x2d   :  { %8645 = shalt.err (!%p8642_p5)
}
  0x2e   :  { %s8682_s25 = smov 64   ;;  %s8683_s26 = smov 4  }
  0x2f   :  { %64 = dma.hbm_to_vmem [thread:$0]  %s12236_s3, 256, %s59_s1, [#allocation11], %s8682_s25, %s8682_s25, %s8683_s26  }
  0x30   :  { %8666 = dma.done.wait [#allocation5], 256  }
  0x31   :  { %8667 = vsyncadd [#allocation5], 4294967040 }
  0x32   :  { %8668 = dma.done.wait [#allocation8], 65536  }
  0x33   :  { %8669 = vsyncadd [#allocation8], 4294901760 }
  0x34   :  { %8670 = dma.done.wait [#allocation11], 256  }
  0x35   :  { %8671 = vsyncadd [#allocation11], 4294967040  ;;  %v12244_v0 = vmov 0.0   ;;  %v148_v1 = vld [vmem:[#allocation7 + $0x1e8] sm:$0xff]  ;;  %v150_v2 = vld [vmem:[#allocation7 + $0x1f8] sm:$0xff]  ;;  %vm8685_vm0 = vmmov 0  }
  0x36   :  { %237 = vmatprep.mubr.f32.mxu0 %v12244_v0  ;;  %314 = vmatprep.mubr.f32.mxu1 %v12244_v0  ;;  %v147_v3 = vld [vmem:[#allocation7 + $0x1e0] sm:$0xff]  ;;  %v149_v4 = vld [vmem:[#allocation7 + $0x1f0] sm:$0xff]  ;;  %v144_v5 = vld [vmem:[#allocation7 + $0x1c8] sm:$0xff]  ;;  %s8686_s19 = smov [#allocation12]   ;;  %vm7564_vm1 = vcmask 25600  }
  0x37   :  { %173 = vmatprep.subr.mxu0 %v148_v1  ;;  %250 = vmatprep.subr.mxu1 %v150_v2  ;;  %v146_v6 = vld [vmem:[#allocation7 + $0x1d8] sm:$0xff]  ;;  %v143_v7 = vld [vmem:[#allocation7 + $0x1c0] sm:$0xff]  ;;  %v145_v8 = vld [vmem:[#allocation7 + $0x1d0] sm:$0xff]  ;;  %s7572_s20 = sshll.u32 %s8686_s19, 4  ;;  %s7573_s20 = int_to_ptr.vmem [resolvable:$true] %s7572_s20 }
  0x38   :  { %174 = vmatpush1.msra.mxu0 %v147_v3  ;;  %251 = vmatpush1.msra.mxu1 %v149_v4  ;;  %v140_v9 = vld [vmem:[#allocation7 + $0x1a8] sm:$0xff]  ;;  %v142_v10 = vld [vmem:[#allocation7 + $0x1b8] sm:$0xff]  ;;  %v139_v11 = vld [vmem:[#allocation7 + $0x1a0] sm:$0xff]  ;;  %p8651_p7 = scmp.lt.s32.totalorder %s7573_s20, %s7573_s20 }
  0x39   :  { %175 = vmatprep.subr.mxu0 %v144_v5  ;;  %252 = vmatprep.subr.mxu1 %v146_v6  ;;  %v141_v12 = vld [vmem:[#allocation7 + $0x1b0] sm:$0xff]  ;;  %v136_v13 = vld [vmem:[#allocation7 + $0x188] sm:$0xff]  ;;  %v138_v14 = vld [vmem:[#allocation7 + $0x198] sm:$0xff] }
  0x3a   :  { %176 = vmatpush1.msra.mxu0 %v143_v7  ;;  %253 = vmatpush1.msra.mxu1 %v145_v8  ;;  %v135_v15 = vld [vmem:[#allocation7 + $0x180] sm:$0xff]  ;;  %v137_v16 = vld [vmem:[#allocation7 + $0x190] sm:$0xff]  ;;  %v132_v17 = vld [vmem:[#allocation7 + $0x168] sm:$0xff] }
  0x3b   :  { %177 = vmatprep.subr.mxu0 %v140_v9  ;;  %254 = vmatprep.subr.mxu1 %v142_v10  ;;  %v134_v18 = vld [vmem:[#allocation7 + $0x178] sm:$0xff]  ;;  %v131_v19 = vld [vmem:[#allocation7 + $0x160] sm:$0xff]  ;;  %v133_v20 = vld [vmem:[#allocation7 + $0x170] sm:$0xff] }
  0x3c   :  { %178 = vmatpush1.msra.mxu0 %v139_v11  ;;  %255 = vmatpush1.msra.mxu1 %v141_v12  ;;  %v128_v21 = vld [vmem:[#allocation7 + $0x148] sm:$0xff]  ;;  %v130_v22 = vld [vmem:[#allocation7 + $0x158] sm:$0xff]  ;;  %v127_v23 = vld [vmem:[#allocation7 + $0x140] sm:$0xff] }
  0x3d   :  { %179 = vmatprep.subr.mxu0 %v136_v13  ;;  %256 = vmatprep.subr.mxu1 %v138_v14  ;;  %v129_v24 = vld [vmem:[#allocation7 + $0x150] sm:$0xff]  ;;  %v124_v25 = vld [vmem:[#allocation7 + $0x128] sm:$0xff]  ;;  %v126_v26 = vld [vmem:[#allocation7 + $0x138] sm:$0xff] }
  0x3e   :  { %180 = vmatpush1.msra.mxu0 %v135_v15  ;;  %257 = vmatpush1.msra.mxu1 %v137_v16  ;;  %v123_v27 = vld [vmem:[#allocation7 + $0x120] sm:$0xff]  ;;  %v125_v28 = vld [vmem:[#allocation7 + $0x130] sm:$0xff]  ;;  %v120_v29 = vld [vmem:[#allocation7 + $0x108] sm:$0xff] }
  0x3f   :  { %181 = vmatprep.subr.mxu0 %v132_v17  ;;  %258 = vmatprep.subr.mxu1 %v134_v18  ;;  %v122_v30 = vld [vmem:[#allocation7 + $0x118] sm:$0xff]  ;;  %v119_v31 = vld [vmem:[#allocation7 + $0x100] sm:$0xff]  ;;  %v121_v32 = vld [vmem:[#allocation7 + $0x110] sm:$0xff] }
  0x40   :  { %182 = vmatpush1.msra.mxu0 %v131_v19  ;;  %259 = vmatpush1.msra.mxu1 %v133_v20  ;;  %v116_v33 = vld [vmem:[#allocation7 + $0xe8] sm:$0xff]  ;;  %v118_v34 = vld [vmem:[#allocation7 + $0xf8] sm:$0xff]  ;;  %v115_v35 = vld [vmem:[#allocation7 + $0xe0] sm:$0xff] }
  0x41   :  { %183 = vmatprep.subr.mxu0 %v128_v21  ;;  %260 = vmatprep.subr.mxu1 %v130_v22  ;;  %v117_v36 = vld [vmem:[#allocation7 + $0xf0] sm:$0xff]  ;;  %v112_v37 = vld [vmem:[#allocation7 + $0xc8] sm:$0xff]  ;;  %v114_v38 = vld [vmem:[#allocation7 + $0xd8] sm:$0xff] }
  0x42   :  { %184 = vmatpush1.msra.mxu0 %v127_v23  ;;  %261 = vmatpush1.msra.mxu1 %v129_v24  ;;  %v111_v39 = vld [vmem:[#allocation7 + $0xc0] sm:$0xff]  ;;  %v113_v40 = vld [vmem:[#allocation7 + $0xd0] sm:$0xff]  ;;  %v108_v41 = vld [vmem:[#allocation7 + $0xa8] sm:$0xff] }
  0x43   :  { %185 = vmatprep.subr.mxu0 %v124_v25  ;;  %262 = vmatprep.subr.mxu1 %v126_v26  ;;  %v110_v42 = vld [vmem:[#allocation7 + $0xb8] sm:$0xff]  ;;  %v107_v43 = vld [vmem:[#allocation7 + $0xa0] sm:$0xff]  ;;  %v109_v44 = vld [vmem:[#allocation7 + $0xb0] sm:$0xff] }
  0x44   :  { %186 = vmatpush1.msra.mxu0 %v123_v27  ;;  %263 = vmatpush1.msra.mxu1 %v125_v28  ;;  %v104_v45 = vld [vmem:[#allocation7 + $0x88] sm:$0xff]  ;;  %v106_v46 = vld [vmem:[#allocation7 + $0x98] sm:$0xff]  ;;  %v103_v47 = vld [vmem:[#allocation7 + $0x80] sm:$0xff] }
  0x45   :  { %187 = vmatprep.subr.mxu0 %v120_v29  ;;  %264 = vmatprep.subr.mxu1 %v122_v30  ;;  %v105_v48 = vld [vmem:[#allocation7 + $0x90] sm:$0xff]  ;;  %v100_v49 = vld [vmem:[#allocation7 + $0x68] sm:$0xff]  ;;  %v102_v50 = vld [vmem:[#allocation7 + $0x78] sm:$0xff] }
  0x46   :  { %188 = vmatpush1.msra.mxu0 %v119_v31  ;;  %265 = vmatpush1.msra.mxu1 %v121_v32  ;;  %v99_v51 = vld [vmem:[#allocation7 + $0x60] sm:$0xff]  ;;  %v101_v52 = vld [vmem:[#allocation7 + $0x70] sm:$0xff]  ;;  %v96_v53 = vld [vmem:[#allocation7 + $0x48] sm:$0xff] }
  0x47   :  { %189 = vmatprep.subr.mxu0 %v116_v33  ;;  %266 = vmatprep.subr.mxu1 %v118_v34  ;;  %v98_v54 = vld [vmem:[#allocation7 + $0x58] sm:$0xff]  ;;  %v95_v55 = vld [vmem:[#allocation7 + $0x40] sm:$0xff]  ;;  %v97_v56 = vld [vmem:[#allocation7 + $0x50] sm:$0xff] }
  0x48   :  { %190 = vmatpush1.msra.mxu0 %v115_v35  ;;  %267 = vmatpush1.msra.mxu1 %v117_v36  ;;  %v92_v57 = vld [vmem:[#allocation7 + $0x28] sm:$0xff]  ;;  %v94_v58 = vld [vmem:[#allocation7 + $0x38] sm:$0xff]  ;;  %v91_v59 = vld [vmem:[#allocation7 + $0x20] sm:$0xff] }
  0x49   :  { %191 = vmatprep.subr.mxu0 %v112_v37  ;;  %268 = vmatprep.subr.mxu1 %v114_v38  ;;  %v93_v60 = vld [vmem:[#allocation7 + $0x30] sm:$0xff]  ;;  %v88_v61 = vld [vmem:[#allocation7 + $0x8] sm:$0xff]  ;;  %v90_v62 = vld [vmem:[#allocation7 + $0x18] sm:$0xff] }
  0x4a   :  { %192 = vmatpush1.msra.mxu0 %v111_v39  ;;  %269 = vmatpush1.msra.mxu1 %v113_v40  ;;  %v87_v63 = vld [vmem:[#allocation7] sm:$0xff]  ;;  %v89_v1 = vld [vmem:[#allocation7 + $0x10] sm:$0xff]  ;;  %v8752_v3 = vld [vmem:[#allocation9 + $0x1e8] sm:$0xff] }
  0x4b   :  { %193 = vmatprep.subr.mxu0 %v108_v41  ;;  %270 = vmatprep.subr.mxu1 %v110_v42  ;;  %v85_v2 = vld [vmem:[#allocation4] sm:$0xff]  ;;  %12613 = vst [vmem:[#allocation17_spill] sm:$0xff] %v8752_v3  ;;  %v8754_v4 = vld [vmem:[#allocation9 + $0x1f8] sm:$0xff]  ;;  %v8756_v5 = vld [vmem:[#allocation9 + $0x1e0] sm:$0xff] }
  0x4c   :  { %194 = vmatpush1.msra.mxu0 %v107_v43  ;;  %271 = vmatpush1.msra.mxu1 %v109_v44  ;;  %12614 = vst [vmem:[#allocation18_spill] sm:$0xff] %v8754_v4  ;;  %v8758_v6 = vld [vmem:[#allocation9 + $0x1f0] sm:$0xff]  ;;  %v8761_v7 = vld [vmem:[#allocation9 + $0x1c8] sm:$0xff]  ;;  %v8763_v8 = vld [vmem:[#allocation9 + $0x1d8] sm:$0xff] }
  0x4d   :  { %195 = vmatprep.subr.mxu0 %v104_v45  ;;  %272 = vmatprep.subr.mxu1 %v106_v46  ;;  %v8766_v9 = vld [vmem:[#allocation9 + $0x1c0] sm:$0xff]  ;;  %v8768_v10 = vld [vmem:[#allocation9 + $0x1d0] sm:$0xff]  ;;  %v8772_v11 = vld [vmem:[#allocation9 + $0x1a8] sm:$0xff] }
  0x4e   :  { %196 = vmatpush1.msra.mxu0 %v103_v47  ;;  %273 = vmatpush1.msra.mxu1 %v105_v48  ;;  %v8774_v12 = vld [vmem:[#allocation9 + $0x1b8] sm:$0xff]  ;;  %v8778_v13 = vld [vmem:[#allocation9 + $0x1a0] sm:$0xff]  ;;  %v8780_v14 = vld [vmem:[#allocation9 + $0x1b0] sm:$0xff] }
  0x4f   :  { %197 = vmatprep.subr.mxu0 %v100_v49  ;;  %274 = vmatprep.subr.mxu1 %v102_v50  ;;  %v8784_v15 = vld [vmem:[#allocation9 + $0x188] sm:$0xff]  ;;  %v8786_v16 = vld [vmem:[#allocation9 + $0x198] sm:$0xff]  ;;  %v8790_v17 = vld [vmem:[#allocation9 + $0x180] sm:$0xff] }
  0x50   :  { %198 = vmatpush1.msra.mxu0 %v99_v51  ;;  %275 = vmatpush1.msra.mxu1 %v101_v52  ;;  %v8792_v18 = vld [vmem:[#allocation9 + $0x190] sm:$0xff]  ;;  %v8796_v19 = vld [vmem:[#allocation9 + $0x168] sm:$0xff]  ;;  %v8798_v20 = vld [vmem:[#allocation9 + $0x178] sm:$0xff] }
  0x51   :  { %199 = vmatprep.subr.mxu0 %v96_v53  ;;  %276 = vmatprep.subr.mxu1 %v98_v54  ;;  %v8802_v21 = vld [vmem:[#allocation9 + $0x160] sm:$0xff]  ;;  %v8804_v22 = vld [vmem:[#allocation9 + $0x170] sm:$0xff]  ;;  %v8808_v23 = vld [vmem:[#allocation9 + $0x148] sm:$0xff] }
  0x52   :  { %200 = vmatpush1.msra.mxu0 %v95_v55  ;;  %277 = vmatpush1.msra.mxu1 %v97_v56  ;;  %v8810_v24 = vld [vmem:[#allocation9 + $0x158] sm:$0xff]  ;;  %v8814_v25 = vld [vmem:[#allocation9 + $0x140] sm:$0xff]  ;;  %v8816_v26 = vld [vmem:[#allocation9 + $0x150] sm:$0xff] }
  0x53   :  { %201 = vmatprep.subr.mxu0 %v92_v57  ;;  %278 = vmatprep.subr.mxu1 %v94_v58  ;;  %v8820_v27 = vld [vmem:[#allocation9 + $0x128] sm:$0xff]  ;;  %v8822_v28 = vld [vmem:[#allocation9 + $0x138] sm:$0xff]  ;;  %v8826_v29 = vld [vmem:[#allocation9 + $0x120] sm:$0xff] }
  0x54   :  { %202 = vmatpush1.msra.mxu0 %v91_v59  ;;  %279 = vmatpush1.msra.mxu1 %v93_v60  ;;  %v8828_v30 = vld [vmem:[#allocation9 + $0x130] sm:$0xff]  ;;  %v8832_v31 = vld [vmem:[#allocation9 + $0x108] sm:$0xff]  ;;  %v8834_v32 = vld [vmem:[#allocation9 + $0x118] sm:$0xff] }
  0x55   :  { %203 = vmatprep.subr.mxu0 %v88_v61  ;;  %280 = vmatprep.subr.mxu1 %v90_v62  ;;  %v8838_v33 = vld [vmem:[#allocation9 + $0x100] sm:$0xff]  ;;  %v8840_v34 = vld [vmem:[#allocation9 + $0x110] sm:$0xff]  ;;  %v8844_v35 = vld [vmem:[#allocation9 + $0xe8] sm:$0xff] }
  0x56   :  { %204 = vmatpush1.msra.mxu0 %v87_v63  ;;  %281 = vmatpush1.msra.mxu1 %v89_v1  ;;  %v8846_v36 = vld [vmem:[#allocation9 + $0xf8] sm:$0xff]  ;;  %v8850_v37 = vld [vmem:[#allocation9 + $0xe0] sm:$0xff]  ;;  %v8852_v38 = vld [vmem:[#allocation9 + $0xf0] sm:$0xff] }
  0x57   :  { %238 = vmatmul.mubr.f32.vlgmr.msra.gmra.mxu0 %v85_v2  ;;  %403 = vmatprep.subr.mxu0 %v8752_v3  ;;  %v8856_v39 = vld [vmem:[#allocation9 + $0xc8] sm:$0xff]  ;;  %v8858_v40 = vld [vmem:[#allocation9 + $0xd8] sm:$0xff]  ;;  %v8862_v41 = vld [vmem:[#allocation9 + $0xc0] sm:$0xff] }
  0x58   :  { %474 = vmatprep.subr.mxu1 %v8754_v4  ;;  %315 = vmatmul.mubr.f32.vlgmr.msra.gmra.mxu1 %v85_v2  ;;  %v8864_v42 = vld [vmem:[#allocation9 + $0xd0] sm:$0xff]  ;;  %v8868_v43 = vld [vmem:[#allocation9 + $0xa8] sm:$0xff]  ;;  %v8870_v44 = vld [vmem:[#allocation9 + $0xb8] sm:$0xff] }
  0x59   :  { %404 = vmatpush1.msra.mxu0 %v8756_v5  ;;  %475 = vmatpush1.msra.mxu1 %v8758_v6  ;;  %v8874_v45 = vld [vmem:[#allocation9 + $0xa0] sm:$0xff]  ;;  %v8876_v46 = vld [vmem:[#allocation9 + $0xb0] sm:$0xff]  ;;  %v8880_v47 = vld [vmem:[#allocation9 + $0x88] sm:$0xff] }
  0x5a   :  { %405 = vmatprep.subr.mxu0 %v8761_v7  ;;  %476 = vmatprep.subr.mxu1 %v8763_v8  ;;  %12615 = vst [vmem:[#allocation19_spill] sm:$0xff] %v8880_v47  ;;  %v8882_v48 = vld [vmem:[#allocation9 + $0x98] sm:$0xff]  ;;  %v8886_v49 = vld [vmem:[#allocation9 + $0x80] sm:$0xff]  ;;  %v8888_v50 = vld [vmem:[#allocation9 + $0x90] sm:$0xff] }
  0x5b   :  { %406 = vmatpush1.msra.mxu0 %v8766_v9  ;;  %477 = vmatpush1.msra.mxu1 %v8768_v10  ;;  %12616 = vst [vmem:[#allocation20_spill] sm:$0xff] %v8882_v48  ;;  %12617 = vst [vmem:[#allocation21_spill] sm:$0xff] %v8886_v49  ;;  %v8892_v51 = vld [vmem:[#allocation9 + $0x68] sm:$0xff]  ;;  %v8894_v52 = vld [vmem:[#allocation9 + $0x78] sm:$0xff] }
  0x5c   :  { %407 = vmatprep.subr.mxu0 %v8772_v11  ;;  %478 = vmatprep.subr.mxu1 %v8774_v12  ;;  %12618 = vst [vmem:[#allocation22_spill] sm:$0xff] %v8888_v50  ;;  %12619 = vst [vmem:[#allocation23_spill] sm:$0xff] %v8892_v51  ;;  %v8898_v53 = vld [vmem:[#allocation9 + $0x60] sm:$0xff]  ;;  %v8902_v54 = vld [vmem:[#allocation9 + $0x70] sm:$0xff] }
  0x5d   :  { %408 = vmatpush1.msra.mxu0 %v8778_v13  ;;  %479 = vmatpush1.msra.mxu1 %v8780_v14  ;;  %12620 = vst [vmem:[#allocation24_spill] sm:$0xff] %v8894_v52  ;;  %12621 = vst [vmem:[#allocation25_spill] sm:$0xff] %v8898_v53  ;;  %v86_v55 = vld [vmem:[#allocation4 + $0x8] sm:$0xff]  ;;  %v8906_v56 = vld [vmem:[#allocation9 + $0x48] sm:$0xff] }
  0x5e   :  { %409 = vmatprep.subr.mxu0 %v8784_v15  ;;  %480 = vmatprep.subr.mxu1 %v8786_v16  ;;  %12622 = vst [vmem:[#allocation26_spill] sm:$0xff] %v8902_v54  ;;  %12623 = vst [vmem:[#allocation27_spill] sm:$0xff] %v8906_v56  ;;  %v8908_v57 = vld [vmem:[#allocation9 + $0x58] sm:$0xff]  ;;  %v8912_v58 = vld [vmem:[#allocation9 + $0x40] sm:$0xff] }
  0x5f   :  { %410 = vmatpush1.msra.mxu0 %v8790_v17  ;;  %481 = vmatpush1.msra.mxu1 %v8792_v18  ;;  %12624 = vst [vmem:[#allocation28_spill] sm:$0xff] %v8908_v57  ;;  %12625 = vst [vmem:[#allocation29_spill] sm:$0xff] %v8912_v58  ;;  %v8915_v59 = vld [vmem:[#allocation9 + $0x50] sm:$0xff]  ;;  %v8917_v60 = vld [vmem:[#allocation9 + $0x28] sm:$0xff] }
  0x60   :  { %411 = vmatprep.subr.mxu0 %v8796_v19  ;;  %482 = vmatprep.subr.mxu1 %v8798_v20  ;;  %12626 = vst [vmem:[#allocation30_spill] sm:$0xff] %v8915_v59  ;;  %12627 = vst [vmem:[#allocation31_spill] sm:$0xff] %v8917_v60  ;;  %v8921_v61 = vld [vmem:[#allocation9 + $0x38] sm:$0xff]  ;;  %v8925_v62 = vld [vmem:[#allocation9 + $0x20] sm:$0xff] }
  0x61   :  { %412 = vmatpush1.msra.mxu0 %v8802_v21  ;;  %483 = vmatpush1.msra.mxu1 %v8804_v22  ;;  %12628 = vst [vmem:[#allocation32_spill] sm:$0xff] %v8921_v61  ;;  %12629 = vst [vmem:[#allocation33_spill] sm:$0xff] %v8925_v62  ;;  %v8927_v63 = vld [vmem:[#allocation9 + $0x30] sm:$0xff]  ;;  %v8931_v1 = vld [vmem:[#allocation9 + $0x8] sm:$0xff] }
  0x62   :  { %413 = vmatprep.subr.mxu0 %v8808_v23  ;;  %484 = vmatprep.subr.mxu1 %v8810_v24  ;;  %12630 = vst [vmem:[#allocation34_spill] sm:$0xff] %v8927_v63  ;;  %12631 = vst [vmem:[#allocation35_spill] sm:$0xff] %v8931_v1  ;;  %v8933_v2 = vld [vmem:[#allocation9 + $0x18] sm:$0xff] }
  0x63   :  { %414 = vmatpush1.msra.mxu0 %v8814_v25  ;;  %485 = vmatpush1.msra.mxu1 %v8816_v26  ;;  %12632 = vst [vmem:[#allocation36_spill] sm:$0xff] %v8933_v2 }
  0x64   :  { %415 = vmatprep.subr.mxu0 %v8820_v27  ;;  %486 = vmatprep.subr.mxu1 %v8822_v28 }
  0x65   :  { %416 = vmatpush1.msra.mxu0 %v8826_v29  ;;  %487 = vmatpush1.msra.mxu1 %v8828_v30 }
  0x66   :  { %417 = vmatprep.subr.mxu0 %v8832_v31  ;;  %488 = vmatprep.subr.mxu1 %v8834_v32 }
  0x67   :  { %418 = vmatpush1.msra.mxu0 %v8838_v33  ;;  %489 = vmatpush1.msra.mxu1 %v8840_v34 }
  0x68   :  { %419 = vmatprep.subr.mxu0 %v8844_v35  ;;  %490 = vmatprep.subr.mxu1 %v8846_v36 }
  0x69   :  { %420 = vmatpush1.msra.mxu0 %v8850_v37  ;;  %491 = vmatpush1.msra.mxu1 %v8852_v38 }
  0x6a   :  { %421 = vmatprep.subr.mxu0 %v8856_v39  ;;  %492 = vmatprep.subr.mxu1 %v8858_v40 }
  0x6b   :  { %422 = vmatpush1.msra.mxu0 %v8862_v41  ;;  %493 = vmatpush1.msra.mxu1 %v8864_v42 }
  0x6c   :  { %423 = vmatprep.subr.mxu0 %v8868_v43  ;;  %494 = vmatprep.subr.mxu1 %v8870_v44 }
  0x6d   :  { %424 = vmatpush1.msra.mxu0 %v8874_v45  ;;  %495 = vmatpush1.msra.mxu1 %v8876_v46 }
  0x6e   :  { %425 = vmatprep.subr.mxu0 %v8880_v47  ;;  %496 = vmatprep.subr.mxu1 %v8882_v48 }
  0x6f   :  { %426 = vmatpush1.msra.mxu0 %v8886_v49  ;;  %497 = vmatpush1.msra.mxu1 %v8888_v50 }
  0x70   :  { %427 = vmatprep.subr.mxu0 %v8892_v51  ;;  %498 = vmatprep.subr.mxu1 %v8894_v52 }
  0x71   :  { %243 = vmatprep.mubr.f32.mxu0 %v12244_v0  ;;  %428 = vmatpush1.msra.mxu0 %v8898_v53 }
  0x72   :  { %499 = vmatpush1.msra.mxu1 %v8902_v54  ;;  %244 = vmatmul.mubr.f32.gmra.mxu0 %v86_v55 }
  0x73   :  { %429 = vmatprep.subr.mxu0 %v8906_v56  ;;  %500 = vmatprep.subr.mxu1 %v8908_v57  ;;  %v8936_v57 = vld [vmem:[#allocation9] sm:$0xff] }
  0x74   :  { %320 = vmatprep.mubr.f32.mxu1 %v12244_v0  ;;  %430 = vmatpush1.msra.mxu0 %v8912_v58  ;;  %12633 = vst [vmem:[#allocation37_spill] sm:$0xff] %v8936_v57  ;;  %v8940_v0 = vld [vmem:[#allocation9 + $0x10] sm:$0xff] }
  0x75   :  { %501 = vmatpush1.msra.mxu1 %v8915_v59  ;;  %431 = vmatprep.subr.mxu0 %v8917_v60  ;;  %12634 = vst [vmem:[#allocation38_spill] sm:$0xff] %v8940_v0  ;;  %v12635_v60 = vmov 0.0  }
  0x76   :  { %321 = vmatmul.mubr.f32.gmra.mxu1 %v86_v55  ;;  %502 = vmatprep.subr.mxu1 %v8921_v61  ;;  %v12636_v55 = vld [vmem:[#allocation28_spill] sm:$0xff] }
  0x77   :  { %432 = vmatpush1.msra.mxu0 %v8925_v62  ;;  %503 = vmatpush1.msra.mxu1 %v8927_v63 }
  0x78   :  { %433 = vmatprep.subr.mxu0 %v8931_v1  ;;  %504 = vmatprep.subr.mxu1 %v8933_v2 }
  0x79   :  { %434 = vmatpush1.msra.mxu0 %v8936_v57  ;;  %467 = vmatprep.mubr.f32.mxu0 %v12635_v60 }
  0x7a   :  { %505 = vmatpush1.msra.mxu1 %v8940_v0  ;;  %538 = vmatprep.mubr.f32.mxu1 %v12635_v60 }
  0x7b   :  { %468 = vmatmul.mubr.f32.vlgmr.msra.gmra.mxu0 %v12635_v60  ;;  %539 = vmatmul.mubr.f32.vlgmr.msra.gmra.mxu1 %v12635_v60 }
  0x7c   :  { %578 = vmatprep.subr.mxu0 %v8752_v3  ;;  %649 = vmatprep.subr.mxu1 %v8754_v4 }
  0x7d   :  { %579 = vmatpush1.msra.mxu0 %v8756_v5  ;;  %650 = vmatpush1.msra.mxu1 %v8758_v6 }
  0x7e   :  { %580 = vmatprep.subr.mxu0 %v8761_v7  ;;  %651 = vmatprep.subr.mxu1 %v8763_v8 }
  0x7f   :  { %581 = vmatpush1.msra.mxu0 %v8766_v9  ;;  %652 = vmatpush1.msra.mxu1 %v8768_v10 }
  0x80   :  { %582 = vmatprep.subr.mxu0 %v8772_v11  ;;  %653 = vmatprep.subr.mxu1 %v8774_v12 }
  0x81   :  { %583 = vmatpush1.msra.mxu0 %v8778_v13  ;;  %654 = vmatpush1.msra.mxu1 %v8780_v14 }
  0x82   :  { %584 = vmatprep.subr.mxu0 %v8784_v15  ;;  %655 = vmatprep.subr.mxu1 %v8786_v16 }
  0x83   :  { %585 = vmatpush1.msra.mxu0 %v8790_v17  ;;  %656 = vmatpush1.msra.mxu1 %v8792_v18 }
  0x84   :  { %586 = vmatprep.subr.mxu0 %v8796_v19  ;;  %657 = vmatprep.subr.mxu1 %v8798_v20 }
  0x85   :  { %587 = vmatpush1.msra.mxu0 %v8802_v21  ;;  %658 = vmatpush1.msra.mxu1 %v8804_v22 }
  0x86   :  { %588 = vmatprep.subr.mxu0 %v8808_v23  ;;  %659 = vmatprep.subr.mxu1 %v8810_v24 }
  0x87   :  { %589 = vmatpush1.msra.mxu0 %v8814_v25  ;;  %660 = vmatpush1.msra.mxu1 %v8816_v26 }
  0x88   :  { %590 = vmatprep.subr.mxu0 %v8820_v27  ;;  %661 = vmatprep.subr.mxu1 %v8822_v28 }
  0x89   :  { %591 = vmatpush1.msra.mxu0 %v8826_v29  ;;  %662 = vmatpush1.msra.mxu1 %v8828_v30 }
  0x8a   :  { %592 = vmatprep.subr.mxu0 %v8832_v31  ;;  %663 = vmatprep.subr.mxu1 %v8834_v32 }
  0x8b   :  { %593 = vmatpush1.msra.mxu0 %v8838_v33  ;;  %664 = vmatpush1.msra.mxu1 %v8840_v34 }
  0x8c   :  { %594 = vmatprep.subr.mxu0 %v8844_v35  ;;  %665 = vmatprep.subr.mxu1 %v8846_v36 }
  0x8d   :  { %595 = vmatpush1.msra.mxu0 %v8850_v37  ;;  %666 = vmatpush1.msra.mxu1 %v8852_v38 }
  0x8e   :  { %596 = vmatprep.subr.mxu0 %v8856_v39  ;;  %667 = vmatprep.subr.mxu1 %v8858_v40 }
  0x8f   :  { %597 = vmatpush1.msra.mxu0 %v8862_v41  ;;  %668 = vmatpush1.msra.mxu1 %v8864_v42 }
  0x90   :  { %598 = vmatprep.subr.mxu0 %v8868_v43  ;;  %669 = vmatprep.subr.mxu1 %v8870_v44 }
  0x91   :  { %599 = vmatpush1.msra.mxu0 %v8874_v45  ;;  %670 = vmatpush1.msra.mxu1 %v8876_v46 }
  0x92   :  { %600 = vmatprep.subr.mxu0 %v8880_v47  ;;  %671 = vmatprep.subr.mxu1 %v8882_v48  ;;  %v12637_v48 = vld [vmem:[#allocation31_spill] sm:$0xff] }
  0x93   :  { %601 = vmatpush1.msra.mxu0 %v8886_v49  ;;  %672 = vmatpush1.msra.mxu1 %v8888_v50 }
  0x94   :  { %602 = vmatprep.subr.mxu0 %v8892_v51  ;;  %673 = vmatprep.subr.mxu1 %v8894_v52 }
  0x95   :  { %603 = vmatpush1.msra.mxu0 %v8898_v53  ;;  %674 = vmatpush1.msra.mxu1 %v8902_v54 }
  0x96   :  { %604 = vmatprep.subr.mxu0 %v8906_v56  ;;  %675 = vmatprep.subr.mxu1 %v12636_v55 }
  0x97   :  { %605 = vmatpush1.msra.mxu0 %v8912_v58  ;;  %676 = vmatpush1.msra.mxu1 %v8915_v59 }
  0x98   :  { %606 = vmatprep.subr.mxu0 %v12637_v48  ;;  %677 = vmatprep.subr.mxu1 %v8921_v61  ;;  %v153_v61 = vlaneseq }
  0x99   :  { %607 = vmatpush1.msra.mxu0 %v8925_v62  ;;  %678 = vmatpush1.msra.mxu1 %v8927_v63  ;;  %v151_v63 = vld [vmem:[#allocation10] sm:$0xf] }
  0x9a   :  { %608 = vmatprep.subr.mxu0 %v8931_v1  ;;  %679 = vmatprep.subr.mxu1 %v8933_v2  ;;  %v154_v62 = vshrl.u32 %v153_v61, 7 }
  0x9b   :  { %609 = vmatpush1.msra.mxu0 %v8936_v57  ;;  %642 = vmatprep.mubr.f32.mxu0 %v12635_v60 }
  0x9c   :  { %680 = vmatpush1.msra.mxu1 %v8940_v0  ;;  %713 = vmatprep.mubr.f32.mxu1 %v12635_v60  ;;  %v9018_v48 = vsub.s32 0, %v154_v62  ;;  %v9020_v1 = vsub.s32 2, %v154_v62  ;;  %v9022_v2 = vsub.s32 1, %v154_v62  ;;  %v9024_v57 = vsub.s32 3, %v154_v62 }
  0x9d   :  { %771 = vmatprep.subr.mxu0 %v8752_v3  ;;  %842 = vmatprep.subr.mxu1 %v8754_v4 }
  0x9e   :  { %12638 = vst [vmem:[#allocation39_spill] sm:$0xff] %v9018_v48  ;;  %12639 = vst [vmem:[#allocation40_spill] sm:$0xff] %v9020_v1  ;;  %v156_v59 = vrot.slane %v151_v63, %v9018_v48  ;;  %v164_v0 = vrot.slane %v151_v63, %v9020_v1  ;;  %v160_v60 = vrot.slane %v151_v63, %v9022_v2 }
  0x9f   :  { %12640 = vst [vmem:[#allocation41_spill] sm:$0xff] %v9022_v2  ;;  %12641 = vst [vmem:[#allocation42_spill] sm:$0xff] %v9024_v57  ;;  %v168_v4 = vrot.slane %v151_v63, %v9024_v57 }
 0x117   :  { %v239_v3 = vpop.f32.mrf.mxu0 }
 0x118   :  { %v240_v58 = vadd.f32 %v239_v3, %v156_v59  ;;  %v316_v61 = vpop.f32.mrf.mxu1 }
 0x119   :  { %v241_v55 = vpop.f32.mrf.mxu0  ;;  %v317_v56 = vadd.f32 %v316_v61, %v164_v0 }
 0x11a   :  { %327 = vst [vmem:[#allocation3 + $0x28] sm:$0xff] %v240_v58  ;;  %v242_v54 = vadd.f32 %v241_v55, %v160_v60  ;;  %v318_v53 = vpop.f32.mrf.mxu1 }
 0x11b   :  { %329 = vst [vmem:[#allocation3 + $0x8] sm:$0xff] %v317_v56  ;;  %v319_v52 = vadd.f32 %v318_v53, %v168_v4 }
 0x11c   :  { %328 = vst [vmem:[#allocation3 + $0x10] sm:$0xff] %v242_v54 }
 0x11d   :  { %330 = vst [vmem:[#allocation3 + $0x18] sm:$0xff] %v319_v52 }
 0x121   :  { %v399_v61 = vld [vmem:[#allocation3 + $0x28] sm:$0x3] }
 0x123   :  { %v400_v57 = vld [vmem:[#allocation3 + $0x10] sm:$0x3] }
 0x132   :  { %v245_v62 = vpop.f32.mrf.mxu0 }
 0x133   :  { %v246_v48 = vadd.f32 %v245_v62, %v156_v59 }
 0x134   :  { %v247_v51 = vpop.f32.mrf.mxu0 }
 0x135   :  { %331 = vst [vmem:[#allocation3 + $0x20] sm:$0xff] %v246_v48  ;;  %v248_v1 = vadd.f32 %v247_v51, %v160_v60  ;;  %v401_v48 = vld [vmem:[#allocation3 + $0x8] sm:$0x3] }
 0x136   :  { %v322_v2 = vpop.f32.mrf.mxu1 }
 0x137   :  { %332 = vst [vmem:[#allocation3 + $0x38] sm:$0xff] %v248_v1  ;;  %v323_v50 = vadd.f32 %v322_v2, %v164_v0  ;;  %v402_v0 = vld [vmem:[#allocation3 + $0x18] sm:$0x3] }
 0x138   :  { %v324_v63 = vpop.f32.mrf.mxu1 }
 0x139   :  { %333 = vst [vmem:[#allocation3 + $0x30] sm:$0xff] %v323_v50  ;;  %v325_v3 = vadd.f32 %v324_v63, %v168_v4 }
 0x13b   :  { %334 = vst [vmem:[#allocation3] sm:$0xff] %v325_v3  ;;  %v469_v58 = vpop.f32.mrf.mxu0  ;;  %v540_v59 = vpop.f32.mrf.mxu1 }
 0x13c   :  { %v545_v55 = vadd.f32 %v469_v58, %v399_v61  ;;  %v547_v51 = vadd.f32 %v540_v59, %v401_v48 }
 0x13d   :  { %v471_v56 = vpop.f32.mrf.mxu0  ;;  %v542_v60 = vpop.f32.mrf.mxu1 }
 0x13e   :  { %v7583_v53 = vmul.f32 -1.442695, %v545_v55  ;;  %v546_v54 = vadd.f32 %v471_v56, %v400_v57  ;;  %v7585_v1 = vmul.f32 -1.442695, %v547_v51  ;;  %v548_v50 = vadd.f32 %v542_v60, %v402_v0  ;;  %v12642_v51 = vld [vmem:[#allocation20_spill] sm:$0xff]  ;;  %v12643_v60 = vld [vmem:[#allocation22_spill] sm:$0xff] }
 0x13f   :  { %v12645_v0 = vld [vmem:[#allocation24_spill] sm:$0xff] }
 0x140   :  { %7798 = vpow2.f32 %v7583_v53  ;;  %v7584_v52 = vmul.f32 -1.442695, %v546_v54 }
 0x142   :  { %7800 = vpow2.f32 %v7584_v52 }
 0x143   :  { %7802 = vpow2.f32 %v7585_v1  ;;  %v12644_v1 = vld [vmem:[#allocation23_spill] sm:$0xff] }
 0x14d   :  { %v7799_v2 = vpop.eup %7798 }
 0x14e   :  { %v558_v4 = vadd.f32 1.0, %v7799_v2  ;;  %v12646_v2 = vld [vmem:[#allocation25_spill] sm:$0xff] }
 0x14f   :  { %v7801_v62 = vpop.eup %7800 }
 0x150   :  { %7804 = vrcp.f32 %v558_v4  ;;  %v559_v63 = vadd.f32 1.0, %v7801_v62  ;;  %v7803_v3 = vpop.eup %7802  ;;  %v12648_v4 = vld [vmem:[#allocation27_spill] sm:$0xff]  ;;  %v12649_v62 = vld [vmem:[#allocation28_spill] sm:$0xff] }
 0x151   :  { %7806 = vtanh.f32 %v548_v50  ;;  %v560_v55 = vadd.f32 1.0, %v7803_v3  ;;  %v12647_v50 = vld [vmem:[#allocation26_spill] sm:$0xff] }
 0x152   :  { %7808 = vrcp.f32 %v559_v63  ;;  %v12650_v63 = vld [vmem:[#allocation29_spill] sm:$0xff]  ;;  %v12651_v3 = vld [vmem:[#allocation30_spill] sm:$0xff] }
 0x153   :  { %7810 = vrcp.f32 %v560_v55  ;;  %v12655_v55 = vld [vmem:[#allocation34_spill] sm:$0xff] }
 0x15d   :  { %v7805_v57 = vpop.eup %7804 }
 0x15e   :  { %v7807_v61 = vpop.eup %7806 }
 0x15f   :  { %v7809_v58 = vpop.eup %7808  ;;  %v569_v53 = vmul.f32 %v7807_v61, %v7805_v57  ;;  %v12652_v57 = vld [vmem:[#allocation31_spill] sm:$0xff]  ;;  %v12653_v61 = vld [vmem:[#allocation32_spill] sm:$0xff] }
 0x160   :  { %v568_v56 = vmul.f32 0.0, %v7809_v58  ;;  %v7811_v52 = vpop.eup %7810  ;;  %v12654_v58 = vld [vmem:[#allocation33_spill] sm:$0xff] }
 0x162   :  { %v9030_v54 = vadd.f32 %v569_v53, %v568_v56  ;;  %v12656_v56 = vld [vmem:[#allocation35_spill] sm:$0xff]  ;;  %v12657_v53 = vld [vmem:[#allocation36_spill] sm:$0xff] }
 0x164   :  { %7812 = vtanh.f32 %v9030_v54 }
 0x171   :  { %v7813_v59 = vpop.eup %7812 }
 0x172   :  { %v572_v48 = vmul.f32 %v7813_v59, %v7811_v52  ;;  %v12658_v52 = vld [vmem:[#allocation37_spill] sm:$0xff]  ;;  %v12659_v59 = vmov 0.0  }
 0x174   :  { %573 = vst [vmem:[#allocation2] sm:$0x3] %v572_v48  ;;  %643 = vmatmul.mubr.f32.vlgmr.msra.gmra.mxu0 %v572_v48  ;;  %714 = vmatmul.mubr.f32.vlgmr.msra.gmra.mxu1 %v572_v48  ;;  %v12660_v48 = vld [vmem:[#allocation38_spill] sm:$0xff] }
 0x175   :  { %772 = vmatpush1.msra.mxu0 %v8756_v5  ;;  %843 = vmatpush1.msra.mxu1 %v8758_v6 }
 0x176   :  { %773 = vmatprep.subr.mxu0 %v8761_v7  ;;  %844 = vmatprep.subr.mxu1 %v8763_v8 }
 0x177   :  { %774 = vmatpush1.msra.mxu0 %v8766_v9  ;;  %845 = vmatpush1.msra.mxu1 %v8768_v10 }
 0x178   :  { %775 = vmatprep.subr.mxu0 %v8772_v11  ;;  %846 = vmatprep.subr.mxu1 %v8774_v12 }
 0x179   :  { %776 = vmatpush1.msra.mxu0 %v8778_v13  ;;  %847 = vmatpush1.msra.mxu1 %v8780_v14 }
 0x17a   :  { %777 = vmatprep.subr.mxu0 %v8784_v15  ;;  %848 = vmatprep.subr.mxu1 %v8786_v16 }
 0x17b   :  { %778 = vmatpush1.msra.mxu0 %v8790_v17  ;;  %849 = vmatpush1.msra.mxu1 %v8792_v18 }
 0x17c   :  { %779 = vmatprep.subr.mxu0 %v8796_v19  ;;  %850 = vmatprep.subr.mxu1 %v8798_v20 }
 0x17d   :  { %780 = vmatpush1.msra.mxu0 %v8802_v21  ;;  %851 = vmatpush1.msra.mxu1 %v8804_v22 }
 0x17e   :  { %781 = vmatprep.subr.mxu0 %v8808_v23  ;;  %852 = vmatprep.subr.mxu1 %v8810_v24 }
 0x17f   :  { %782 = vmatpush1.msra.mxu0 %v8814_v25  ;;  %853 = vmatpush1.msra.mxu1 %v8816_v26 }
 0x180   :  { %783 = vmatprep.subr.mxu0 %v8820_v27  ;;  %854 = vmatprep.subr.mxu1 %v8822_v28 }
 0x181   :  { %784 = vmatpush1.msra.mxu0 %v8826_v29  ;;  %855 = vmatpush1.msra.mxu1 %v8828_v30 }
 0x182   :  { %785 = vmatprep.subr.mxu0 %v8832_v31  ;;  %856 = vmatprep.subr.mxu1 %v8834_v32 }
 0x183   :  { %786 = vmatpush1.msra.mxu0 %v8838_v33  ;;  %857 = vmatpush1.msra.mxu1 %v8840_v34 }
 0x184   :  { %787 = vmatprep.subr.mxu0 %v8844_v35  ;;  %858 = vmatprep.subr.mxu1 %v8846_v36 }
 0x185   :  { %788 = vmatpush1.msra.mxu0 %v8850_v37  ;;  %859 = vmatpush1.msra.mxu1 %v8852_v38 }
 0x186   :  { %789 = vmatprep.subr.mxu0 %v8856_v39  ;;  %860 = vmatprep.subr.mxu1 %v8858_v40 }
 0x187   :  { %790 = vmatpush1.msra.mxu0 %v8862_v41  ;;  %861 = vmatpush1.msra.mxu1 %v8864_v42 }
 0x188   :  { %791 = vmatprep.subr.mxu0 %v8868_v43  ;;  %862 = vmatprep.subr.mxu1 %v8870_v44 }
 0x189   :  { %792 = vmatpush1.msra.mxu0 %v8874_v45  ;;  %863 = vmatpush1.msra.mxu1 %v8876_v46 }
 0x18a   :  { %793 = vmatprep.subr.mxu0 %v8880_v47  ;;  %864 = vmatprep.subr.mxu1 %v12642_v51 }
 0x18b   :  { %794 = vmatpush1.msra.mxu0 %v8886_v49  ;;  %865 = vmatpush1.msra.mxu1 %v12643_v60 }
 0x18c   :  { %795 = vmatprep.subr.mxu0 %v12644_v1  ;;  %866 = vmatprep.subr.mxu1 %v12645_v0  ;;  %v576_v0 = vld [vmem:[#allocation3 + $0x8] sm:$0xc] }
 0x18d   :  { %796 = vmatpush1.msra.mxu0 %v12646_v2  ;;  %867 = vmatpush1.msra.mxu1 %v12647_v50 }
 0x18e   :  { %797 = vmatprep.subr.mxu0 %v12648_v4  ;;  %868 = vmatprep.subr.mxu1 %v12649_v62  ;;  %v575_v4 = vld [vmem:[#allocation3 + $0x10] sm:$0xc] }
 0x18f   :  { %798 = vmatpush1.msra.mxu0 %v12650_v63  ;;  %869 = vmatpush1.msra.mxu1 %v12651_v3  ;;  %v12661_v3 = vld [vmem:[#allocation17_spill] sm:$0xff]  ;;  %v574_v63 = vld [vmem:[#allocation3 + $0x28] sm:$0xc] }
 0x190   :  { %799 = vmatprep.subr.mxu0 %v12652_v57  ;;  %870 = vmatprep.subr.mxu1 %v12653_v61  ;;  %v12662_v57 = vld [vmem:[#allocation18_spill] sm:$0xff] }
 0x191   :  { %800 = vmatpush1.msra.mxu0 %v12654_v58  ;;  %871 = vmatpush1.msra.mxu1 %v12655_v55 }
 0x192   :  { %801 = vmatprep.subr.mxu0 %v12656_v56  ;;  %872 = vmatprep.subr.mxu1 %v12657_v53 }
 0x193   :  { %802 = vmatpush1.msra.mxu0 %v12658_v52  ;;  %835 = vmatprep.mubr.f32.mxu0 %v12659_v59 }
 0x194   :  { %873 = vmatpush1.msra.mxu1 %v12660_v48  ;;  %906 = vmatprep.mubr.f32.mxu1 %v12659_v59 }
 0x195   :  { %964 = vmatprep.subr.mxu0 %v12661_v3  ;;  %1035 = vmatprep.subr.mxu1 %v12662_v57  ;;  %v577_v57 = vld [vmem:[#allocation3 + $0x18] sm:$0xc] }
 0x234   :  { %v644_v61 = vpop.f32.mrf.mxu0  ;;  %v715_v52 = vpop.f32.mrf.mxu1 }
 0x235   :  { %v724_v58 = vrot.slane %v644_v61, 6  ;;  %v726_v48 = vrot.slane %v715_v52, 6  ;;  %v12667_v52 = vld [vmem:[#allocation23_spill] sm:$0xff] }
 0x236   :  { %v646_v55 = vpop.f32.mrf.mxu0  ;;  %v717_v59 = vpop.f32.mrf.mxu1 }
 0x237   :  { %v732_v62 = vadd.f32 %v724_v58, %v574_v63  ;;  %v725_v56 = vrot.slane %v646_v55, 6  ;;  %v734_v1 = vadd.f32 %v726_v48, %v576_v0  ;;  %v727_v3 = vrot.slane %v717_v59, 6  ;;  %v12668_v59 = vld [vmem:[#allocation24_spill] sm:$0xff]  ;;  %v12669_v48 = vld [vmem:[#allocation25_spill] sm:$0xff] }
 0x239   :  { %v7586_v53 = vmul.f32 -1.442695, %v732_v62  ;;  %v733_v50 = vadd.f32 %v725_v56, %v575_v4  ;;  %v7588_v60 = vmul.f32 -1.442695, %v734_v1  ;;  %v735_v61 = vadd.f32 %v727_v3, %v577_v57  ;;  %v12664_v3 = vld [vmem:[#allocation20_spill] sm:$0xff]  ;;  %v12665_v57 = vld [vmem:[#allocation21_spill] sm:$0xff] }
 0x23b   :  { %7814 = vpow2.f32 %v7586_v53  ;;  %v7587_v2 = vmul.f32 -1.442695, %v733_v50  ;;  %v12666_v53 = vld [vmem:[#allocation22_spill] sm:$0xff] }
 0x23d   :  { %7816 = vpow2.f32 %v7587_v2  ;;  %v756_v2 = vrot.slane %v9030_v54, 6  ;;  %v12663_v54 = vld [vmem:[#allocation19_spill] sm:$0xff] }
 0x23e   :  { %7818 = vpow2.f32 %v7588_v60 }
 0x248   :  { %v7815_v49 = vpop.eup %7814 }
 0x249   :  { %v745_v51 = vadd.f32 1.0, %v7815_v49 }
 0x24a   :  { %v7817_v47 = vpop.eup %7816 }
 0x24b   :  { %7820 = vrcp.f32 %v745_v51  ;;  %v746_v63 = vadd.f32 1.0, %v7817_v47  ;;  %v7819_v4 = vpop.eup %7818 }
 0x24c   :  { %7822 = vtanh.f32 %v735_v61  ;;  %v747_v55 = vadd.f32 1.0, %v7819_v4  ;;  %v12670_v61 = vld [vmem:[#allocation26_spill] sm:$0xff]  ;;  %v12672_v4 = vld [vmem:[#allocation28_spill] sm:$0xff] }
 0x24d   :  { %7824 = vrcp.f32 %v746_v63  ;;  %v12671_v63 = vld [vmem:[#allocation27_spill] sm:$0xff] }
 0x24e   :  { %7826 = vrcp.f32 %v747_v55  ;;  %v12677_v55 = vld [vmem:[#allocation33_spill] sm:$0xff] }
 0x258   :  { %v7821_v62 = vpop.eup %7820 }
 0x259   :  { %v7823_v50 = vpop.eup %7822 }
 0x25a   :  { %v7825_v58 = vpop.eup %7824  ;;  %v759_v56 = vmul.f32 %v7823_v50, %v7821_v62  ;;  %v12673_v62 = vld [vmem:[#allocation29_spill] sm:$0xff]  ;;  %v12674_v50 = vld [vmem:[#allocation30_spill] sm:$0xff] }
 0x25b   :  { %v758_v0 = vmul.f32 %v7825_v58, %v756_v2  ;;  %v7827_v49 = vpop.eup %7826  ;;  %v12675_v2 = vld [vmem:[#allocation31_spill] sm:$0xff]  ;;  %v12676_v58 = vld [vmem:[#allocation32_spill] sm:$0xff] }
 0x25d   :  { %v9100_v1 = vadd.f32 %v759_v56, %v758_v0  ;;  %v12678_v0 = vld [vmem:[#allocation34_spill] sm:$0xff]  ;;  %v12679_v56 = vld [vmem:[#allocation35_spill] sm:$0xff] }
 0x25f   :  { %7828 = vtanh.f32 %v9100_v1 }
 0x26c   :  { %v7829_v60 = vpop.eup %7828 }
 0x26d   :  { %v762_v51 = vmul.f32 %v7829_v60, %v7827_v49  ;;  %v12680_v49 = vld [vmem:[#allocation36_spill] sm:$0xff]  ;;  %v12681_v60 = vld [vmem:[#allocation37_spill] sm:$0xff] }
 0x26f   :  { %763 = vst [vmem:[#allocation2] sm:$0xc] %v762_v51  ;;  %v769_v47 = vrot.slane %v762_v51, 2  ;;  %v12682_v51 = vmov 0.0  }
 0x271   :  { %836 = vmatmul.mubr.f32.vlgmr.msra.gmra.mxu0 %v769_v47  ;;  %907 = vmatmul.mubr.f32.vlgmr.msra.gmra.mxu1 %v769_v47  ;;  %v12683_v47 = vld [vmem:[#allocation38_spill] sm:$0xff] }
 0x272   :  { %965 = vmatpush1.msra.mxu0 %v8756_v5  ;;  %1036 = vmatpush1.msra.mxu1 %v8758_v6 }
 0x273   :  { %966 = vmatprep.subr.mxu0 %v8761_v7  ;;  %1037 = vmatprep.subr.mxu1 %v8763_v8 }
 0x274   :  { %967 = vmatpush1.msra.mxu0 %v8766_v9  ;;  %1038 = vmatpush1.msra.mxu1 %v8768_v10 }
 0x275   :  { %968 = vmatprep.subr.mxu0 %v8772_v11  ;;  %1039 = vmatprep.subr.mxu1 %v8774_v12 }
 0x276   :  { %969 = vmatpush1.msra.mxu0 %v8778_v13  ;;  %1040 = vmatpush1.msra.mxu1 %v8780_v14 }
 0x277   :  { %970 = vmatprep.subr.mxu0 %v8784_v15  ;;  %1041 = vmatprep.subr.mxu1 %v8786_v16 }
 0x278   :  { %971 = vmatpush1.msra.mxu0 %v8790_v17  ;;  %1042 = vmatpush1.msra.mxu1 %v8792_v18 }
 0x279   :  { %972 = vmatprep.subr.mxu0 %v8796_v19  ;;  %1043 = vmatprep.subr.mxu1 %v8798_v20 }
 0x27a   :  { %973 = vmatpush1.msra.mxu0 %v8802_v21  ;;  %1044 = vmatpush1.msra.mxu1 %v8804_v22 }
 0x27b   :  { %974 = vmatprep.subr.mxu0 %v8808_v23  ;;  %1045 = vmatprep.subr.mxu1 %v8810_v24 }
 0x27c   :  { %975 = vmatpush1.msra.mxu0 %v8814_v25  ;;  %1046 = vmatpush1.msra.mxu1 %v8816_v26 }
 0x27d   :  { %976 = vmatprep.subr.mxu0 %v8820_v27  ;;  %1047 = vmatprep.subr.mxu1 %v8822_v28 }
 0x27e   :  { %977 = vmatpush1.msra.mxu0 %v8826_v29  ;;  %1048 = vmatpush1.msra.mxu1 %v8828_v30 }
 0x27f   :  { %978 = vmatprep.subr.mxu0 %v8832_v31  ;;  %1049 = vmatprep.subr.mxu1 %v8834_v32 }
 0x280   :  { %979 = vmatpush1.msra.mxu0 %v8838_v33  ;;  %1050 = vmatpush1.msra.mxu1 %v8840_v34 }
 0x281   :  { %980 = vmatprep.subr.mxu0 %v8844_v35  ;;  %1051 = vmatprep.subr.mxu1 %v8846_v36 }
 0x282   :  { %981 = vmatpush1.msra.mxu0 %v8850_v37  ;;  %1052 = vmatpush1.msra.mxu1 %v8852_v38 }
 0x283   :  { %982 = vmatprep.subr.mxu0 %v8856_v39  ;;  %1053 = vmatprep.subr.mxu1 %v8858_v40 }
 0x284   :  { %983 = vmatpush1.msra.mxu0 %v8862_v41  ;;  %1054 = vmatpush1.msra.mxu1 %v8864_v42 }
 0x285   :  { %984 = vmatprep.subr.mxu0 %v8868_v43  ;;  %1055 = vmatprep.subr.mxu1 %v8870_v44 }
 0x286   :  { %985 = vmatpush1.msra.mxu0 %v8874_v45  ;;  %1056 = vmatpush1.msra.mxu1 %v8876_v46 }
 0x287   :  { %986 = vmatprep.subr.mxu0 %v12663_v54  ;;  %1057 = vmatprep.subr.mxu1 %v12664_v3 }
 0x288   :  { %987 = vmatpush1.msra.mxu0 %v12665_v57  ;;  %1058 = vmatpush1.msra.mxu1 %v12666_v53 }
 0x289   :  { %988 = vmatprep.subr.mxu0 %v12667_v52  ;;  %1059 = vmatprep.subr.mxu1 %v12668_v59  ;;  %v766_v59 = vld [vmem:[#allocation3 + $0x8] sm:$0x30] }
 0x28a   :  { %989 = vmatpush1.msra.mxu0 %v12669_v48  ;;  %1060 = vmatpush1.msra.mxu1 %v12670_v61 }
 0x28b   :  { %990 = vmatprep.subr.mxu0 %v12671_v63  ;;  %1061 = vmatprep.subr.mxu1 %v12672_v4  ;;  %v765_v63 = vld [vmem:[#allocation3 + $0x10] sm:$0x30] }
 0x28c   :  { %991 = vmatpush1.msra.mxu0 %v12673_v62  ;;  %1062 = vmatpush1.msra.mxu1 %v12674_v50  ;;  %v12684_v50 = vld [vmem:[#allocation17_spill] sm:$0xff]  ;;  %v764_v62 = vld [vmem:[#allocation3 + $0x28] sm:$0x30] }
 0x28d   :  { %992 = vmatprep.subr.mxu0 %v12675_v2  ;;  %1063 = vmatprep.subr.mxu1 %v12676_v58  ;;  %v12685_v2 = vld [vmem:[#allocation18_spill] sm:$0xff] }
 0x28e   :  { %993 = vmatpush1.msra.mxu0 %v12677_v55  ;;  %1064 = vmatpush1.msra.mxu1 %v12678_v0 }
 0x28f   :  { %994 = vmatprep.subr.mxu0 %v12679_v56  ;;  %1065 = vmatprep.subr.mxu1 %v12680_v49 }
 0x290   :  { %995 = vmatpush1.msra.mxu0 %v12681_v60  ;;  %1028 = vmatprep.mubr.f32.mxu0 %v12682_v51 }
 0x291   :  { %1066 = vmatpush1.msra.mxu1 %v12683_v47  ;;  %1099 = vmatprep.mubr.f32.mxu1 %v12682_v51 }
 0x292   :  { %1157 = vmatprep.subr.mxu0 %v12684_v50  ;;  %1228 = vmatprep.subr.mxu1 %v12685_v2  ;;  %v767_v2 = vld [vmem:[#allocation3 + $0x18] sm:$0x30] }
 0x331   :  { %v837_v58 = vpop.f32.mrf.mxu0  ;;  %v908_v60 = vpop.f32.mrf.mxu1 }
 0x332   :  { %v917_v55 = vrot.slane %v837_v58, 4  ;;  %v919_v47 = vrot.slane %v908_v60, 4 }
 0x333   :  { %v839_v0 = vpop.f32.mrf.mxu0  ;;  %v910_v51 = vpop.f32.mrf.mxu1 }
 0x334   :  { %v925_v4 = vadd.f32 %v917_v55, %v764_v62  ;;  %v918_v56 = vrot.slane %v839_v0, 4  ;;  %v927_v52 = vadd.f32 %v919_v47, %v766_v59  ;;  %v920_v50 = vrot.slane %v910_v51, 4 }
 0x336   :  { %v7589_v49 = vmul.f32 -1.442695, %v925_v4  ;;  %v926_v61 = vadd.f32 %v918_v56, %v765_v63  ;;  %v7591_v53 = vmul.f32 -1.442695, %v927_v52  ;;  %v928_v58 = vadd.f32 %v920_v50, %v767_v2 }
 0x338   :  { %7830 = vpow2.f32 %v7589_v49  ;;  %v7590_v48 = vmul.f32 -1.442695, %v926_v61 }
 0x33a   :  { %7832 = vpow2.f32 %v7590_v48  ;;  %v949_v48 = vrot.slane %v9100_v1, 6 }
 0x33b   :  { %7834 = vpow2.f32 %v7591_v53 }
 0x345   :  { %v7831_v57 = vpop.eup %7830 }
 0x346   :  { %v938_v3 = vadd.f32 1.0, %v7831_v57 }
 0x347   :  { %v7833_v54 = vpop.eup %7832 }
 0x348   :  { %7836 = vrcp.f32 %v938_v3  ;;  %v939_v62 = vadd.f32 1.0, %v7833_v54  ;;  %v7835_v63 = vpop.eup %7834 }
 0x349   :  { %7838 = vtanh.f32 %v928_v58  ;;  %v940_v0 = vadd.f32 1.0, %v7835_v63 }
 0x34a   :  { %7840 = vrcp.f32 %v939_v62 }
 0x34b   :  { %7842 = vrcp.f32 %v940_v0 }
 0x355   :  { %v7837_v4 = vpop.eup %7836 }
 0x356   :  { %v7839_v61 = vpop.eup %7838 }
 0x357   :  { %v7841_v55 = vpop.eup %7840  ;;  %v952_v56 = vmul.f32 %v7839_v61, %v7837_v4 }
 0x358   :  { %v951_v59 = vmul.f32 %v7841_v55, %v949_v48  ;;  %v7843_v57 = vpop.eup %7842 }
 0x35a   :  { %v9170_v52 = vadd.f32 %v952_v56, %v951_v59 }
 0x35c   :  { %7844 = vtanh.f32 %v9170_v52  ;;  %v1142_v58 = vrot.slane %v9170_v52, 6  ;;  %v9250_v52 = vld [vmem:[#allocation9 + $0x1f0] sm:$0xff] }
 0x369   :  { %v7845_v53 = vpop.eup %7844 }
 0x36a   :  { %v955_v3 = vmul.f32 %v7845_v53, %v7843_v57  ;;  %v9247_v57 = vld [vmem:[#allocation9 + $0x1e0] sm:$0xff]  ;;  %v9253_v53 = vld [vmem:[#allocation9 + $0x1c8] sm:$0xff] }
 0x36c   :  { %956 = vst [vmem:[#allocation2] sm:$0x30] %v955_v3  ;;  %v962_v54 = vrot.slane %v955_v3, 4  ;;  %v9256_v3 = vld [vmem:[#allocation9 + $0x1d8] sm:$0xff] }
 0x36e   :  { %1029 = vmatmul.mubr.f32.vlgmr.msra.gmra.mxu0 %v962_v54  ;;  %1100 = vmatmul.mubr.f32.vlgmr.msra.gmra.mxu1 %v962_v54  ;;  %v9259_v54 = vld [vmem:[#allocation9 + $0x1c0] sm:$0xff] }
 0x36f   :  { %1158 = vmatpush1.msra.mxu0 %v8756_v5  ;;  %1229 = vmatpush1.msra.mxu1 %v8758_v6  ;;  %v12686_v5 = vld [vmem:[#allocation19_spill] sm:$0xff]  ;;  %v12687_v6 = vld [vmem:[#allocation20_spill] sm:$0xff] }
 0x370   :  { %1159 = vmatprep.subr.mxu0 %v8761_v7  ;;  %1230 = vmatprep.subr.mxu1 %v8763_v8  ;;  %v12688_v7 = vld [vmem:[#allocation21_spill] sm:$0xff]  ;;  %v12689_v8 = vld [vmem:[#allocation22_spill] sm:$0xff] }
 0x371   :  { %1160 = vmatpush1.msra.mxu0 %v8766_v9  ;;  %1231 = vmatpush1.msra.mxu1 %v8768_v10  ;;  %v12690_v9 = vld [vmem:[#allocation23_spill] sm:$0xff]  ;;  %v12691_v10 = vld [vmem:[#allocation24_spill] sm:$0xff] }
 0x372   :  { %1161 = vmatprep.subr.mxu0 %v8772_v11  ;;  %1232 = vmatprep.subr.mxu1 %v8774_v12  ;;  %v12692_v11 = vld [vmem:[#allocation25_spill] sm:$0xff]  ;;  %v12693_v12 = vld [vmem:[#allocation26_spill] sm:$0xff] }
 0x373   :  { %1162 = vmatpush1.msra.mxu0 %v8778_v13  ;;  %1233 = vmatpush1.msra.mxu1 %v8780_v14  ;;  %v12694_v13 = vld [vmem:[#allocation27_spill] sm:$0xff]  ;;  %v12695_v14 = vld [vmem:[#allocation28_spill] sm:$0xff] }
 0x374   :  { %1163 = vmatprep.subr.mxu0 %v8784_v15  ;;  %1234 = vmatprep.subr.mxu1 %v8786_v16  ;;  %v12696_v15 = vld [vmem:[#allocation29_spill] sm:$0xff]  ;;  %v12697_v16 = vld [vmem:[#allocation30_spill] sm:$0xff] }
 0x375   :  { %1164 = vmatpush1.msra.mxu0 %v8790_v17  ;;  %1235 = vmatpush1.msra.mxu1 %v8792_v18  ;;  %v12698_v17 = vld [vmem:[#allocation31_spill] sm:$0xff]  ;;  %v12699_v18 = vld [vmem:[#allocation32_spill] sm:$0xff] }
 0x376   :  { %1165 = vmatprep.subr.mxu0 %v8796_v19  ;;  %1236 = vmatprep.subr.mxu1 %v8798_v20  ;;  %v12700_v19 = vld [vmem:[#allocation33_spill] sm:$0xff]  ;;  %v12701_v20 = vld [vmem:[#allocation34_spill] sm:$0xff] }
 0x377   :  { %1166 = vmatpush1.msra.mxu0 %v8802_v21  ;;  %1237 = vmatpush1.msra.mxu1 %v8804_v22  ;;  %v12702_v21 = vld [vmem:[#allocation35_spill] sm:$0xff]  ;;  %v12703_v22 = vld [vmem:[#allocation36_spill] sm:$0xff] }
 0x378   :  { %1167 = vmatprep.subr.mxu0 %v8808_v23  ;;  %1238 = vmatprep.subr.mxu1 %v8810_v24  ;;  %v12704_v23 = vld [vmem:[#allocation37_spill] sm:$0xff]  ;;  %v12705_v24 = vmov 0.0  }
 0x379   :  { %1168 = vmatpush1.msra.mxu0 %v8814_v25  ;;  %1239 = vmatpush1.msra.mxu1 %v8816_v26  ;;  %v12706_v25 = vld [vmem:[#allocation38_spill] sm:$0xff]  ;;  %v9237_v26 = vld [vmem:[#allocation9 + $0x1e8] sm:$0xff] }
 0x37a   :  { %1169 = vmatprep.subr.mxu0 %v8820_v27  ;;  %1240 = vmatprep.subr.mxu1 %v8822_v28  ;;  %12707 = vst [vmem:[#allocation17_spill] sm:$0xff] %v9237_v26  ;;  %v9240_v27 = vld [vmem:[#allocation9 + $0x1f8] sm:$0xff] }
 0x37b   :  { %1170 = vmatpush1.msra.mxu0 %v8826_v29  ;;  %1241 = vmatpush1.msra.mxu1 %v8828_v30  ;;  %12708 = vst [vmem:[#allocation18_spill] sm:$0xff] %v9240_v27  ;;  %v957_v30 = vld [vmem:[#allocation3 + $0x28] sm:$0xc0] }
 0x37c   :  { %1171 = vmatprep.subr.mxu0 %v8832_v31  ;;  %1242 = vmatprep.subr.mxu1 %v8834_v32 }
 0x37d   :  { %1172 = vmatpush1.msra.mxu0 %v8838_v33  ;;  %1243 = vmatpush1.msra.mxu1 %v8840_v34  ;;  %v958_v34 = vld [vmem:[#allocation3 + $0x10] sm:$0xc0] }
 0x37e   :  { %1173 = vmatprep.subr.mxu0 %v8844_v35  ;;  %1244 = vmatprep.subr.mxu1 %v8846_v36 }
 0x37f   :  { %1174 = vmatpush1.msra.mxu0 %v8850_v37  ;;  %1245 = vmatpush1.msra.mxu1 %v8852_v38 }
 0x380   :  { %1175 = vmatprep.subr.mxu0 %v8856_v39  ;;  %1246 = vmatprep.subr.mxu1 %v8858_v40  ;;  %v959_v40 = vld [vmem:[#allocation3 + $0x8] sm:$0xc0] }
 0x381   :  { %1176 = vmatpush1.msra.mxu0 %v8862_v41  ;;  %1247 = vmatpush1.msra.mxu1 %v8864_v42 }
 0x382   :  { %1177 = vmatprep.subr.mxu0 %v8868_v43  ;;  %1248 = vmatprep.subr.mxu1 %v8870_v44 }
 0x383   :  { %1178 = vmatpush1.msra.mxu0 %v8874_v45  ;;  %1249 = vmatpush1.msra.mxu1 %v8876_v46  ;;  %v960_v45 = vld [vmem:[#allocation3 + $0x18] sm:$0xc0] }
 0x384   :  { %1179 = vmatprep.subr.mxu0 %v12686_v5  ;;  %1250 = vmatprep.subr.mxu1 %v12687_v6  ;;  %v9262_v5 = vld [vmem:[#allocation9 + $0x1d0] sm:$0xff]  ;;  %v9265_v6 = vld [vmem:[#allocation9 + $0x1a8] sm:$0xff] }
 0x385   :  { %1180 = vmatpush1.msra.mxu0 %v12688_v7  ;;  %1251 = vmatpush1.msra.mxu1 %v12689_v8  ;;  %v9268_v7 = vld [vmem:[#allocation9 + $0x1b8] sm:$0xff]  ;;  %v9271_v8 = vld [vmem:[#allocation9 + $0x1a0] sm:$0xff] }
 0x386   :  { %1181 = vmatprep.subr.mxu0 %v12690_v9  ;;  %1252 = vmatprep.subr.mxu1 %v12691_v10  ;;  %v9274_v9 = vld [vmem:[#allocation9 + $0x1b0] sm:$0xff]  ;;  %v9277_v10 = vld [vmem:[#allocation9 + $0x188] sm:$0xff] }
 0x387   :  { %1182 = vmatpush1.msra.mxu0 %v12692_v11  ;;  %1253 = vmatpush1.msra.mxu1 %v12693_v12  ;;  %v9280_v11 = vld [vmem:[#allocation9 + $0x198] sm:$0xff]  ;;  %v9283_v12 = vld [vmem:[#allocation9 + $0x180] sm:$0xff] }
 0x388   :  { %1183 = vmatprep.subr.mxu0 %v12694_v13  ;;  %1254 = vmatprep.subr.mxu1 %v12695_v14  ;;  %v9286_v13 = vld [vmem:[#allocation9 + $0x190] sm:$0xff]  ;;  %v9289_v14 = vld [vmem:[#allocation9 + $0x168] sm:$0xff] }
 0x389   :  { %1184 = vmatpush1.msra.mxu0 %v12696_v15  ;;  %1255 = vmatpush1.msra.mxu1 %v12697_v16  ;;  %v9292_v15 = vld [vmem:[#allocation9 + $0x178] sm:$0xff]  ;;  %v9295_v16 = vld [vmem:[#allocation9 + $0x160] sm:$0xff] }
 0x38a   :  { %1185 = vmatprep.subr.mxu0 %v12698_v17  ;;  %1256 = vmatprep.subr.mxu1 %v12699_v18  ;;  %v9298_v17 = vld [vmem:[#allocation9 + $0x170] sm:$0xff]  ;;  %v9301_v18 = vld [vmem:[#allocation9 + $0x148] sm:$0xff] }
 0x38b   :  { %1186 = vmatpush1.msra.mxu0 %v12700_v19  ;;  %1257 = vmatpush1.msra.mxu1 %v12701_v20  ;;  %v9304_v19 = vld [vmem:[#allocation9 + $0x158] sm:$0xff]  ;;  %v9307_v20 = vld [vmem:[#allocation9 + $0x140] sm:$0xff] }
 0x38c   :  { %1187 = vmatprep.subr.mxu0 %v12702_v21  ;;  %1258 = vmatprep.subr.mxu1 %v12703_v22  ;;  %v9310_v21 = vld [vmem:[#allocation9 + $0x150] sm:$0xff]  ;;  %v9313_v22 = vld [vmem:[#allocation9 + $0x128] sm:$0xff] }
 0x38d   :  { %1188 = vmatpush1.msra.mxu0 %v12704_v23  ;;  %1221 = vmatprep.mubr.f32.mxu0 %v12705_v24  ;;  %v9316_v23 = vld [vmem:[#allocation9 + $0x138] sm:$0xff] }
 0x38e   :  { %1259 = vmatpush1.msra.mxu1 %v12706_v25  ;;  %1292 = vmatprep.mubr.f32.mxu1 %v12705_v24  ;;  %v9319_v25 = vld [vmem:[#allocation9 + $0x120] sm:$0xff] }
 0x38f   :  { %1335 = vmatprep.subr.mxu0 %v9237_v26  ;;  %1406 = vmatprep.subr.mxu1 %v9240_v27 }
 0x42e   :  { %v1030_v28 = vpop.f32.mrf.mxu0  ;;  %v1101_v37 = vpop.f32.mrf.mxu1 }
 0x42f   :  { %v1110_v29 = vrot.slane %v1030_v28, 2  ;;  %v1112_v39 = vrot.slane %v1101_v37, 2  ;;  %v9322_v28 = vld [vmem:[#allocation9 + $0x130] sm:$0xff]  ;;  %v9349_v37 = vld [vmem:[#allocation9 + $0xc8] sm:$0xff] }
 0x430   :  { %v1032_v31 = vpop.f32.mrf.mxu0  ;;  %v1103_v41 = vpop.f32.mrf.mxu1 }
 0x431   :  { %v1118_v32 = vadd.f32 %v1110_v29, %v957_v30  ;;  %v1111_v33 = vrot.slane %v1032_v31, 2  ;;  %v1120_v42 = vadd.f32 %v1112_v39, %v959_v40  ;;  %v1113_v43 = vrot.slane %v1103_v41, 2  ;;  %v9325_v29 = vld [vmem:[#allocation9 + $0x108] sm:$0xff]  ;;  %v9328_v30 = vld [vmem:[#allocation9 + $0x118] sm:$0xff]  ;;  %v9331_v31 = vld [vmem:[#allocation9 + $0x100] sm:$0xff] }
 0x432   :  { %v9355_v39 = vld [vmem:[#allocation9 + $0xc0] sm:$0xff]  ;;  %v9358_v40 = vld [vmem:[#allocation9 + $0xd0] sm:$0xff]  ;;  %v9361_v41 = vld [vmem:[#allocation9 + $0xa8] sm:$0xff] }
 0x433   :  { %v7592_v35 = vmul.f32 -1.442695, %v1118_v32  ;;  %v1119_v36 = vadd.f32 %v1111_v33, %v958_v34  ;;  %v7594_v44 = vmul.f32 -1.442695, %v1120_v42  ;;  %v1121_v1 = vadd.f32 %v1113_v43, %v960_v45  ;;  %v9334_v32 = vld [vmem:[#allocation9 + $0x110] sm:$0xff]  ;;  %v9337_v33 = vld [vmem:[#allocation9 + $0xe8] sm:$0xff] }
 0x434   :  { %v9340_v34 = vld [vmem:[#allocation9 + $0xf8] sm:$0xff]  ;;  %v9367_v43 = vld [vmem:[#allocation9 + $0xa0] sm:$0xff]  ;;  %v9373_v45 = vld [vmem:[#allocation9 + $0x88] sm:$0xff] }
 0x435   :  { %7846 = vpow2.f32 %v7592_v35  ;;  %v7593_v38 = vmul.f32 -1.442695, %v1119_v36  ;;  %v9343_v35 = vld [vmem:[#allocation9 + $0xe0] sm:$0xff]  ;;  %v9346_v36 = vld [vmem:[#allocation9 + $0xf0] sm:$0xff]  ;;  %v9364_v42 = vld [vmem:[#allocation9 + $0xb8] sm:$0xff]  ;;  %12709 = vst [vmem:[#allocation19_spill] sm:$0xff] %v9373_v45 }
 0x437   :  { %7848 = vpow2.f32 %v7593_v38  ;;  %v9352_v38 = vld [vmem:[#allocation9 + $0xd8] sm:$0xff] }
 0x438   :  { %7850 = vpow2.f32 %v7594_v44  ;;  %v9370_v44 = vld [vmem:[#allocation9 + $0xb0] sm:$0xff] }
 0x442   :  { %v7847_v46 = vpop.eup %7846 }
 0x443   :  { %v1131_v49 = vadd.f32 1.0, %v7847_v46  ;;  %v9376_v46 = vld [vmem:[#allocation9 + $0x98] sm:$0xff] }
 0x444   :  { %v7849_v60 = vpop.eup %7848  ;;  %12710 = vst [vmem:[#allocation20_spill] sm:$0xff] %v9376_v46 }
 0x445   :  { %7852 = vrcp.f32 %v1131_v49  ;;  %v1132_v51 = vadd.f32 1.0, %v7849_v60  ;;  %v7851_v47 = vpop.eup %7850  ;;  %v9382_v49 = vld [vmem:[#allocation9 + $0x90] sm:$0xff]  ;;  %v9385_v60 = vld [vmem:[#allocation9 + $0x68] sm:$0xff] }
 0x446   :  { %7854 = vtanh.f32 %v1121_v1  ;;  %v1133_v63 = vadd.f32 1.0, %v7851_v47  ;;  %v9379_v1 = vld [vmem:[#allocation9 + $0x80] sm:$0xff]  ;;  %12712 = vst [vmem:[#allocation22_spill] sm:$0xff] %v9382_v49  ;;  %12713 = vst [vmem:[#allocation23_spill] sm:$0xff] %v9385_v60 }
 0x447   :  { %7856 = vrcp.f32 %v1132_v51  ;;  %12711 = vst [vmem:[#allocation21_spill] sm:$0xff] %v9379_v1  ;;  %v9388_v51 = vld [vmem:[#allocation9 + $0x78] sm:$0xff]  ;;  %v9391_v47 = vld [vmem:[#allocation9 + $0x60] sm:$0xff] }
 0x448   :  { %7858 = vrcp.f32 %v1133_v63  ;;  %12714 = vst [vmem:[#allocation24_spill] sm:$0xff] %v9388_v51  ;;  %12715 = vst [vmem:[#allocation25_spill] sm:$0xff] %v9391_v47  ;;  %v9406_v63 = vld [vmem:[#allocation9 + $0x50] sm:$0xff] }
 0x449   :  { %12720 = vst [vmem:[#allocation30_spill] sm:$0xff] %v9406_v63 }
 0x452   :  { %v7853_v50 = vpop.eup %7852 }
 0x453   :  { %v7855_v2 = vpop.eup %7854 }
 0x454   :  { %v7857_v62 = vpop.eup %7856  ;;  %v1145_v61 = vmul.f32 %v7855_v2, %v7853_v50  ;;  %v9394_v50 = vld [vmem:[#allocation9 + $0x70] sm:$0xff]  ;;  %v9397_v2 = vld [vmem:[#allocation9 + $0x48] sm:$0xff] }
 0x455   :  { %v1144_v4 = vmul.f32 %v7857_v62, %v1142_v58  ;;  %v7859_v55 = vpop.eup %7858  ;;  %12716 = vst [vmem:[#allocation26_spill] sm:$0xff] %v9394_v50  ;;  %12717 = vst [vmem:[#allocation27_spill] sm:$0xff] %v9397_v2  ;;  %v9400_v58 = vld [vmem:[#allocation9 + $0x58] sm:$0xff]  ;;  %v9403_v62 = vld [vmem:[#allocation9 + $0x40] sm:$0xff] }
 0x456   :  { %12718 = vst [vmem:[#allocation28_spill] sm:$0xff] %v9400_v58  ;;  %12719 = vst [vmem:[#allocation29_spill] sm:$0xff] %v9403_v62 }
 0x457   :  { %v9244_v48 = vadd.f32 %v1145_v61, %v1144_v4  ;;  %v9409_v4 = vld [vmem:[#allocation9 + $0x28] sm:$0xff]  ;;  %v9412_v61 = vld [vmem:[#allocation9 + $0x38] sm:$0xff] }
 0x458   :  { %12721 = vst [vmem:[#allocation31_spill] sm:$0xff] %v9409_v4  ;;  %12722 = vst [vmem:[#allocation32_spill] sm:$0xff] %v9412_v61 }
 0x459   :  { %7860 = vtanh.f32 %v9244_v48 }
 0x466   :  { %v7861_v0 = vpop.eup %7860 }
 0x467   :  { %v1148_v59 = vmul.f32 %v7861_v0, %v7859_v55  ;;  %v9415_v55 = vld [vmem:[#allocation9 + $0x20] sm:$0xff]  ;;  %v9418_v0 = vld [vmem:[#allocation9 + $0x30] sm:$0xff] }
 0x468   :  { %12723 = vst [vmem:[#allocation33_spill] sm:$0xff] %v9415_v55  ;;  %12724 = vst [vmem:[#allocation34_spill] sm:$0xff] %v9418_v0 }
 0x469   :  { %1149 = vst [vmem:[#allocation2] sm:$0xc0] %v1148_v59  ;;  %v1155_v56 = vrot.slane %v1148_v59, 6  ;;  %v9421_v59 = vld [vmem:[#allocation9 + $0x8] sm:$0xff] }
 0x46a   :  { %12725 = vst [vmem:[#allocation35_spill] sm:$0xff] %v9421_v59 }
 0x46b   :  { %1222 = vmatmul.mubr.f32.vlgmr.msra.gmra.mxu0 %v1155_v56  ;;  %1293 = vmatmul.mubr.f32.vlgmr.msra.gmra.mxu1 %v1155_v56  ;;  %v9424_v56 = vld [vmem:[#allocation9 + $0x18] sm:$0xff] }
 0x46c   :  { %1336 = vmatpush1.msra.mxu0 %v9247_v57  ;;  %1407 = vmatpush1.msra.mxu1 %v9250_v52  ;;  %12726 = vst [vmem:[#allocation36_spill] sm:$0xff] %v9424_v56 }
 0x46d   :  { %1337 = vmatprep.subr.mxu0 %v9253_v53  ;;  %1408 = vmatprep.subr.mxu1 %v9256_v3 }
 0x46e   :  { %1338 = vmatpush1.msra.mxu0 %v9259_v54  ;;  %1409 = vmatpush1.msra.mxu1 %v9262_v5 }
 0x46f   :  { %1339 = vmatprep.subr.mxu0 %v9265_v6  ;;  %1410 = vmatprep.subr.mxu1 %v9268_v7 }
 0x470   :  { %1340 = vmatpush1.msra.mxu0 %v9271_v8  ;;  %1411 = vmatpush1.msra.mxu1 %v9274_v9 }
 0x471   :  { %1341 = vmatprep.subr.mxu0 %v9277_v10  ;;  %1412 = vmatprep.subr.mxu1 %v9280_v11 }
 0x472   :  { %1342 = vmatpush1.msra.mxu0 %v9283_v12  ;;  %1413 = vmatpush1.msra.mxu1 %v9286_v13 }
 0x473   :  { %1343 = vmatprep.subr.mxu0 %v9289_v14  ;;  %1414 = vmatprep.subr.mxu1 %v9292_v15 }
 0x474   :  { %1344 = vmatpush1.msra.mxu0 %v9295_v16  ;;  %1415 = vmatpush1.msra.mxu1 %v9298_v17 }
 0x475   :  { %1345 = vmatprep.subr.mxu0 %v9301_v18  ;;  %1416 = vmatprep.subr.mxu1 %v9304_v19 }
 0x476   :  { %1346 = vmatpush1.msra.mxu0 %v9307_v20  ;;  %1417 = vmatpush1.msra.mxu1 %v9310_v21 }
 0x477   :  { %1347 = vmatprep.subr.mxu0 %v9313_v22  ;;  %1418 = vmatprep.subr.mxu1 %v9316_v23 }
 0x478   :  { %1348 = vmatpush1.msra.mxu0 %v9319_v25  ;;  %1419 = vmatpush1.msra.mxu1 %v9322_v28 }
 0x479   :  { %1349 = vmatprep.subr.mxu0 %v9325_v29  ;;  %1420 = vmatprep.subr.mxu1 %v9328_v30 }
 0x47a   :  { %1350 = vmatpush1.msra.mxu0 %v9331_v31  ;;  %1421 = vmatpush1.msra.mxu1 %v9334_v32 }
 0x47b   :  { %1351 = vmatprep.subr.mxu0 %v9337_v33  ;;  %1422 = vmatprep.subr.mxu1 %v9340_v34 }
 0x47c   :  { %1352 = vmatpush1.msra.mxu0 %v9343_v35  ;;  %1423 = vmatpush1.msra.mxu1 %v9346_v36 }
 0x47d   :  { %1353 = vmatprep.subr.mxu0 %v9349_v37  ;;  %1424 = vmatprep.subr.mxu1 %v9352_v38 }
 0x47e   :  { %1354 = vmatpush1.msra.mxu0 %v9355_v39  ;;  %1425 = vmatpush1.msra.mxu1 %v9358_v40 }
 0x47f   :  { %1355 = vmatprep.subr.mxu0 %v9361_v41  ;;  %1426 = vmatprep.subr.mxu1 %v9364_v42 }
 0x480   :  { %1356 = vmatpush1.msra.mxu0 %v9367_v43  ;;  %1427 = vmatpush1.msra.mxu1 %v9370_v44 }
 0x481   :  { %1357 = vmatprep.subr.mxu0 %v9373_v45  ;;  %1428 = vmatprep.subr.mxu1 %v9376_v46 }
 0x482   :  { %1358 = vmatpush1.msra.mxu0 %v9379_v1  ;;  %1429 = vmatpush1.msra.mxu1 %v9382_v49 }
 0x483   :  { %1359 = vmatprep.subr.mxu0 %v9385_v60  ;;  %1430 = vmatprep.subr.mxu1 %v9388_v51 }
 0x484   :  { %1360 = vmatpush1.msra.mxu0 %v9391_v47  ;;  %1431 = vmatpush1.msra.mxu1 %v9394_v50  ;;  %v1152_v50 = vld [vmem:[#allocation3 + $0x30] sm:$0x3] }
 0x485   :  { %1361 = vmatprep.subr.mxu0 %v9397_v2  ;;  %1432 = vmatprep.subr.mxu1 %v9400_v58 }
 0x486   :  { %1362 = vmatpush1.msra.mxu0 %v9403_v62  ;;  %1433 = vmatpush1.msra.mxu1 %v9406_v63 }
 0x487   :  { %1363 = vmatprep.subr.mxu0 %v9409_v4  ;;  %1434 = vmatprep.subr.mxu1 %v9412_v61  ;;  %v9427_v4 = vld [vmem:[#allocation9] sm:$0xff]  ;;  %v9431_v61 = vld [vmem:[#allocation9 + $0x10] sm:$0xff] }
 0x488   :  { %1364 = vmatpush1.msra.mxu0 %v9415_v55  ;;  %1435 = vmatpush1.msra.mxu1 %v9418_v0  ;;  %12727 = vst [vmem:[#allocation37_spill] sm:$0xff] %v9427_v4  ;;  %12728 = vst [vmem:[#allocation38_spill] sm:$0xff] %v9431_v61 }
 0x489   :  { %1365 = vmatprep.subr.mxu0 %v9421_v59  ;;  %1436 = vmatprep.subr.mxu1 %v9424_v56  ;;  %v1150_v59 = vld [vmem:[#allocation3 + $0x20] sm:$0x3]  ;;  %v1151_v56 = vld [vmem:[#allocation3 + $0x38] sm:$0x3] }
 0x48a   :  { %1366 = vmatpush1.msra.mxu0 %v9427_v4  ;;  %1399 = vmatprep.mubr.f32.mxu0 %v12705_v24 }
 0x48b   :  { %1437 = vmatpush1.msra.mxu1 %v9431_v61  ;;  %1470 = vmatprep.mubr.f32.mxu1 %v12705_v24  ;;  %v1153_v24 = vld [vmem:[#allocation3] sm:$0x3] }
 0x48c   :  { %1528 = vmatprep.subr.mxu0 %v9237_v26  ;;  %1599 = vmatprep.subr.mxu1 %v9240_v27 }
 0x52b   :  { %v1223_v0 = vpop.f32.mrf.mxu0  ;;  %v1294_v2 = vpop.f32.mrf.mxu1 }
 0x52c   :  { %v1299_v55 = vadd.f32 %v1223_v0, %v1150_v59  ;;  %v1301_v47 = vadd.f32 %v1294_v2, %v1152_v50 }
 0x52d   :  { %v1225_v63 = vpop.f32.mrf.mxu0  ;;  %v1296_v61 = vpop.f32.mrf.mxu1 }
 0x52e   :  { %v7595_v62 = vmul.f32 -1.442695, %v1299_v55  ;;  %v1300_v58 = vadd.f32 %v1225_v63, %v1151_v56  ;;  %v7597_v51 = vmul.f32 -1.442695, %v1301_v47  ;;  %v1302_v26 = vadd.f32 %v1296_v61, %v1153_v24  ;;  %v12733_v61 = vld [vmem:[#allocation26_spill] sm:$0xff]  ;;  %v12734_v56 = vld [vmem:[#allocation27_spill] sm:$0xff] }
 0x530   :  { %7862 = vpow2.f32 %v7595_v62  ;;  %v7596_v4 = vmul.f32 -1.442695, %v1300_v58  ;;  %v1323_v58 = vrot.slane %v9244_v48, 6  ;;  %v12731_v48 = vld [vmem:[#allocation24_spill] sm:$0xff] }
 0x532   :  { %7864 = vpow2.f32 %v7596_v4 }
 0x533   :  { %7866 = vpow2.f32 %v7597_v51  ;;  %v12732_v51 = vld [vmem:[#allocation25_spill] sm:$0xff] }
 0x53d   :  { %v7863_v60 = vpop.eup %7862 }
 0x53e   :  { %v1312_v49 = vadd.f32 1.0, %v7863_v60 }
 0x53f   :  { %v7865_v27 = vpop.eup %7864 }
 0x540   :  { %7868 = vrcp.f32 %v1312_v49  ;;  %v1313_v0 = vadd.f32 1.0, %v7865_v27  ;;  %v7867_v55 = vpop.eup %7866  ;;  %v12730_v27 = vld [vmem:[#allocation23_spill] sm:$0xff] }
 0x541   :  { %7870 = vtanh.f32 %v1302_v26  ;;  %v1314_v59 = vadd.f32 1.0, %v7867_v55  ;;  %v12729_v26 = vld [vmem:[#allocation22_spill] sm:$0xff]  ;;  %v12736_v55 = vld [vmem:[#allocation29_spill] sm:$0xff] }
 0x542   :  { %7872 = vrcp.f32 %v1313_v0  ;;  %v12735_v0 = vld [vmem:[#allocation28_spill] sm:$0xff] }
 0x543   :  { %7874 = vrcp.f32 %v1314_v59  ;;  %v12741_v59 = vld [vmem:[#allocation34_spill] sm:$0xff] }
 0x54d   :  { %v7869_v63 = vpop.eup %7868 }
 0x54e   :  { %v7871_v62 = vpop.eup %7870 }
 0x54f   :  { %v7873_v4 = vpop.eup %7872  ;;  %v1326_v2 = vmul.f32 %v7871_v62, %v7869_v63  ;;  %v12737_v63 = vld [vmem:[#allocation30_spill] sm:$0xff]  ;;  %v12738_v62 = vld [vmem:[#allocation31_spill] sm:$0xff] }
 0x550   :  { %v1325_v50 = vmul.f32 %v7873_v4, %v1323_v58  ;;  %v7875_v24 = vpop.eup %7874  ;;  %v12739_v58 = vld [vmem:[#allocation32_spill] sm:$0xff]  ;;  %v12740_v4 = vld [vmem:[#allocation33_spill] sm:$0xff] }
 0x552   :  { %v9438_v47 = vadd.f32 %v1326_v2, %v1325_v50  ;;  %v12742_v50 = vld [vmem:[#allocation35_spill] sm:$0xff]  ;;  %v12743_v2 = vld [vmem:[#allocation36_spill] sm:$0xff] }
 0x554   :  { %7876 = vtanh.f32 %v9438_v47 }
 0x561   :  { %v7877_v60 = vpop.eup %7876 }
 0x562   :  { %v1329_v49 = vmul.f32 %v7877_v60, %v7875_v24  ;;  %v12744_v24 = vld [vmem:[#allocation37_spill] sm:$0xff]  ;;  %v12745_v60 = vmov 0.0  }
 0x564   :  { %1330 = vst [vmem:[#allocation2 + $0x8] sm:$0x3] %v1329_v49  ;;  %1400 = vmatmul.mubr.f32.vlgmr.msra.gmra.mxu0 %v1329_v49  ;;  %1471 = vmatmul.mubr.f32.vlgmr.msra.gmra.mxu1 %v1329_v49  ;;  %v12746_v49 = vld [vmem:[#allocation38_spill] sm:$0xff] }
 0x565   :  { %1529 = vmatpush1.msra.mxu0 %v9247_v57  ;;  %1600 = vmatpush1.msra.mxu1 %v9250_v52 }
 0x566   :  { %1530 = vmatprep.subr.mxu0 %v9253_v53  ;;  %1601 = vmatprep.subr.mxu1 %v9256_v3 }
 0x567   :  { %1531 = vmatpush1.msra.mxu0 %v9259_v54  ;;  %1602 = vmatpush1.msra.mxu1 %v9262_v5 }
 0x568   :  { %1532 = vmatprep.subr.mxu0 %v9265_v6  ;;  %1603 = vmatprep.subr.mxu1 %v9268_v7 }
 0x569   :  { %1533 = vmatpush1.msra.mxu0 %v9271_v8  ;;  %1604 = vmatpush1.msra.mxu1 %v9274_v9 }
 0x56a   :  { %1534 = vmatprep.subr.mxu0 %v9277_v10  ;;  %1605 = vmatprep.subr.mxu1 %v9280_v11 }
 0x56b   :  { %1535 = vmatpush1.msra.mxu0 %v9283_v12  ;;  %1606 = vmatpush1.msra.mxu1 %v9286_v13 }
 0x56c   :  { %1536 = vmatprep.subr.mxu0 %v9289_v14  ;;  %1607 = vmatprep.subr.mxu1 %v9292_v15 }
 0x56d   :  { %1537 = vmatpush1.msra.mxu0 %v9295_v16  ;;  %1608 = vmatpush1.msra.mxu1 %v9298_v17 }
 0x56e   :  { %1538 = vmatprep.subr.mxu0 %v9301_v18  ;;  %1609 = vmatprep.subr.mxu1 %v9304_v19 }
 0x56f   :  { %1539 = vmatpush1.msra.mxu0 %v9307_v20  ;;  %1610 = vmatpush1.msra.mxu1 %v9310_v21 }
 0x570   :  { %1540 = vmatprep.subr.mxu0 %v9313_v22  ;;  %1611 = vmatprep.subr.mxu1 %v9316_v23 }
 0x571   :  { %1541 = vmatpush1.msra.mxu0 %v9319_v25  ;;  %1612 = vmatpush1.msra.mxu1 %v9322_v28 }
 0x572   :  { %1542 = vmatprep.subr.mxu0 %v9325_v29  ;;  %1613 = vmatprep.subr.mxu1 %v9328_v30 }
 0x573   :  { %1543 = vmatpush1.msra.mxu0 %v9331_v31  ;;  %1614 = vmatpush1.msra.mxu1 %v9334_v32 }
 0x574   :  { %1544 = vmatprep.subr.mxu0 %v9337_v33  ;;  %1615 = vmatprep.subr.mxu1 %v9340_v34 }
 0x575   :  { %1545 = vmatpush1.msra.mxu0 %v9343_v35  ;;  %1616 = vmatpush1.msra.mxu1 %v9346_v36 }
 0x576   :  { %1546 = vmatprep.subr.mxu0 %v9349_v37  ;;  %1617 = vmatprep.subr.mxu1 %v9352_v38 }
 0x577   :  { %1547 = vmatpush1.msra.mxu0 %v9355_v39  ;;  %1618 = vmatpush1.msra.mxu1 %v9358_v40 }
 0x578   :  { %1548 = vmatprep.subr.mxu0 %v9361_v41  ;;  %1619 = vmatprep.subr.mxu1 %v9364_v42 }
 0x579   :  { %1549 = vmatpush1.msra.mxu0 %v9367_v43  ;;  %1620 = vmatpush1.msra.mxu1 %v9370_v44 }
 0x57a   :  { %1550 = vmatprep.subr.mxu0 %v9373_v45  ;;  %1621 = vmatprep.subr.mxu1 %v9376_v46 }
 0x57b   :  { %1551 = vmatpush1.msra.mxu0 %v9379_v1  ;;  %1622 = vmatpush1.msra.mxu1 %v12729_v26 }
 0x57c   :  { %1552 = vmatprep.subr.mxu0 %v12730_v27  ;;  %1623 = vmatprep.subr.mxu1 %v12731_v48  ;;  %v1333_v48 = vld [vmem:[#allocation3 + $0x30] sm:$0xc] }
 0x57d   :  { %1553 = vmatpush1.msra.mxu0 %v12732_v51  ;;  %1624 = vmatpush1.msra.mxu1 %v12733_v61 }
 0x57e   :  { %1554 = vmatprep.subr.mxu0 %v12734_v56  ;;  %1625 = vmatprep.subr.mxu1 %v12735_v0  ;;  %v1332_v56 = vld [vmem:[#allocation3 + $0x38] sm:$0xc] }
 0x57f   :  { %1555 = vmatpush1.msra.mxu0 %v12736_v55  ;;  %1626 = vmatpush1.msra.mxu1 %v12737_v63  ;;  %v12747_v63 = vld [vmem:[#allocation17_spill] sm:$0xff] }
 0x580   :  { %1556 = vmatprep.subr.mxu0 %v12738_v62  ;;  %1627 = vmatprep.subr.mxu1 %v12739_v58  ;;  %v12748_v62 = vld [vmem:[#allocation18_spill] sm:$0xff]  ;;  %v1331_v55 = vld [vmem:[#allocation3 + $0x20] sm:$0xc] }
 0x581   :  { %1557 = vmatpush1.msra.mxu0 %v12740_v4  ;;  %1628 = vmatpush1.msra.mxu1 %v12741_v59 }
 0x582   :  { %1558 = vmatprep.subr.mxu0 %v12742_v50  ;;  %1629 = vmatprep.subr.mxu1 %v12743_v2 }
 0x583   :  { %1559 = vmatpush1.msra.mxu0 %v12744_v24  ;;  %1592 = vmatprep.mubr.f32.mxu0 %v12745_v60 }
 0x584   :  { %1630 = vmatpush1.msra.mxu1 %v12746_v49  ;;  %1663 = vmatprep.mubr.f32.mxu1 %v12745_v60 }
 0x585   :  { %1721 = vmatprep.subr.mxu0 %v12747_v63  ;;  %1792 = vmatprep.subr.mxu1 %v12748_v62  ;;  %v1334_v62 = vld [vmem:[#allocation3] sm:$0xc] }
 0x624   :  { %v1401_v58 = vpop.f32.mrf.mxu0  ;;  %v1472_v24 = vpop.f32.mrf.mxu1 }
 0x625   :  { %v1481_v4 = vrot.slane %v1401_v58, 6  ;;  %v1483_v49 = vrot.slane %v1472_v24, 6 }
 0x626   :  { %v1403_v59 = vpop.f32.mrf.mxu0  ;;  %v1474_v60 = vpop.f32.mrf.mxu1 }
 0x627   :  { %v1489_v0 = vadd.f32 %v1481_v4, %v1331_v55  ;;  %v1482_v50 = vrot.slane %v1403_v59, 6  ;;  %v1491_v27 = vadd.f32 %v1483_v49, %v1333_v48  ;;  %v1484_v63 = vrot.slane %v1474_v60, 6 }
 0x629   :  { %v7598_v2 = vmul.f32 -1.442695, %v1489_v0  ;;  %v1490_v61 = vadd.f32 %v1482_v50, %v1332_v56  ;;  %v7600_v26 = vmul.f32 -1.442695, %v1491_v27  ;;  %v1492_v58 = vadd.f32 %v1484_v63, %v1334_v62 }
 0x62b   :  { %7878 = vpow2.f32 %v7598_v2  ;;  %v7599_v51 = vmul.f32 -1.442695, %v1490_v61 }
 0x62d   :  { %7880 = vpow2.f32 %v7599_v51  ;;  %v1513_v51 = vrot.slane %v9438_v47, 6 }
 0x62e   :  { %7882 = vpow2.f32 %v7600_v26 }
 0x638   :  { %v7879_v1 = vpop.eup %7878 }
 0x639   :  { %v1502_v46 = vadd.f32 1.0, %v7879_v1 }
 0x63a   :  { %v7881_v45 = vpop.eup %7880 }
 0x63b   :  { %7884 = vrcp.f32 %v1502_v46  ;;  %v1503_v55 = vadd.f32 1.0, %v7881_v45  ;;  %v7883_v56 = vpop.eup %7882 }
 0x63c   :  { %7886 = vtanh.f32 %v1492_v58  ;;  %v1504_v59 = vadd.f32 1.0, %v7883_v56 }
 0x63d   :  { %7888 = vrcp.f32 %v1503_v55 }
 0x63e   :  { %7890 = vrcp.f32 %v1504_v59 }
 0x648   :  { %v7885_v0 = vpop.eup %7884 }
 0x649   :  { %v7887_v61 = vpop.eup %7886 }
 0x64a   :  { %v7889_v4 = vpop.eup %7888  ;;  %v1516_v50 = vmul.f32 %v7887_v61, %v7885_v0 }
 0x64b   :  { %v1515_v48 = vmul.f32 %v7889_v4, %v1513_v51  ;;  %v7891_v1 = vpop.eup %7890 }
 0x64d   :  { %v9508_v27 = vadd.f32 %v1516_v50, %v1515_v48 }
 0x64f   :  { %7892 = vtanh.f32 %v9508_v27  ;;  %v1706_v58 = vrot.slane %v9508_v27, 6  ;;  %v1966_v27 = vld [vmem:[#allocation7 + $0x3c0] sm:$0xff] }
 0x65c   :  { %v7893_v26 = vpop.eup %7892 }
 0x65d   :  { %v1519_v46 = vmul.f32 %v7893_v26, %v7891_v1  ;;  %v1970_v1 = vld [vmem:[#allocation7 + $0x3e0] sm:$0xff]  ;;  %v1972_v26 = vld [vmem:[#allocation7 + $0x3f0] sm:$0xff] }
 0x65f   :  { %1520 = vst [vmem:[#allocation2 + $0x8] sm:$0xc] %v1519_v46  ;;  %v1526_v45 = vrot.slane %v1519_v46, 2  ;;  %v1967_v46 = vld [vmem:[#allocation7 + $0x3c8] sm:$0xff] }
 0x661   :  { %1593 = vmatmul.mubr.f32.vlgmr.msra.gmra.mxu0 %v1526_v45  ;;  %1664 = vmatmul.mubr.f32.vlgmr.msra.gmra.mxu1 %v1526_v45  ;;  %v1969_v45 = vld [vmem:[#allocation7 + $0x3d8] sm:$0xff] }
 0x662   :  { %1722 = vmatpush1.msra.mxu0 %v9247_v57  ;;  %1793 = vmatpush1.msra.mxu1 %v9250_v52  ;;  %v12749_v57 = vld [vmem:[#allocation19_spill] sm:$0xff]  ;;  %v12750_v52 = vld [vmem:[#allocation20_spill] sm:$0xff] }
 0x663   :  { %1723 = vmatprep.subr.mxu0 %v9253_v53  ;;  %1794 = vmatprep.subr.mxu1 %v9256_v3  ;;  %v12751_v53 = vld [vmem:[#allocation21_spill] sm:$0xff]  ;;  %v12752_v3 = vld [vmem:[#allocation22_spill] sm:$0xff] }
 0x664   :  { %1724 = vmatpush1.msra.mxu0 %v9259_v54  ;;  %1795 = vmatpush1.msra.mxu1 %v9262_v5  ;;  %v12753_v54 = vld [vmem:[#allocation23_spill] sm:$0xff]  ;;  %v12754_v5 = vld [vmem:[#allocation24_spill] sm:$0xff] }
 0x665   :  { %1725 = vmatprep.subr.mxu0 %v9265_v6  ;;  %1796 = vmatprep.subr.mxu1 %v9268_v7  ;;  %v12755_v6 = vld [vmem:[#allocation25_spill] sm:$0xff]  ;;  %v12756_v7 = vld [vmem:[#allocation26_spill] sm:$0xff] }
 0x666   :  { %1726 = vmatpush1.msra.mxu0 %v9271_v8  ;;  %1797 = vmatpush1.msra.mxu1 %v9274_v9  ;;  %v12757_v8 = vld [vmem:[#allocation27_spill] sm:$0xff]  ;;  %v12758_v9 = vld [vmem:[#allocation28_spill] sm:$0xff] }
 0x667   :  { %1727 = vmatprep.subr.mxu0 %v9277_v10  ;;  %1798 = vmatprep.subr.mxu1 %v9280_v11  ;;  %v12759_v10 = vld [vmem:[#allocation29_spill] sm:$0xff]  ;;  %v12760_v11 = vld [vmem:[#allocation30_spill] sm:$0xff] }
 0x668   :  { %1728 = vmatpush1.msra.mxu0 %v9283_v12  ;;  %1799 = vmatpush1.msra.mxu1 %v9286_v13  ;;  %v12761_v12 = vld [vmem:[#allocation31_spill] sm:$0xff]  ;;  %v12762_v13 = vld [vmem:[#allocation32_spill] sm:$0xff] }
 0x669   :  { %1729 = vmatprep.subr.mxu0 %v9289_v14  ;;  %1800 = vmatprep.subr.mxu1 %v9292_v15  ;;  %v12763_v14 = vld [vmem:[#allocation33_spill] sm:$0xff]  ;;  %v12764_v15 = vld [vmem:[#allocation34_spill] sm:$0xff] }
 0x66a   :  { %1730 = vmatpush1.msra.mxu0 %v9295_v16  ;;  %1801 = vmatpush1.msra.mxu1 %v9298_v17  ;;  %v12765_v16 = vld [vmem:[#allocation35_spill] sm:$0xff]  ;;  %v12766_v17 = vld [vmem:[#allocation36_spill] sm:$0xff] }
 0x66b   :  { %1731 = vmatprep.subr.mxu0 %v9301_v18  ;;  %1802 = vmatprep.subr.mxu1 %v9304_v19  ;;  %v12767_v18 = vld [vmem:[#allocation37_spill] sm:$0xff]  ;;  %v12768_v19 = vld [vmem:[#allocation38_spill] sm:$0xff] }
 0x66c   :  { %1732 = vmatpush1.msra.mxu0 %v9307_v20  ;;  %1803 = vmatpush1.msra.mxu1 %v9310_v21  ;;  %v12769_v20 = vmov 0.0   ;;  %v1971_v21 = vld [vmem:[#allocation7 + $0x3e8] sm:$0xff] }
 0x66d   :  { %1733 = vmatprep.subr.mxu0 %v9313_v22  ;;  %1804 = vmatprep.subr.mxu1 %v9316_v23  ;;  %v1973_v22 = vld [vmem:[#allocation7 + $0x3f8] sm:$0xff] }
 0x66e   :  { %1734 = vmatpush1.msra.mxu0 %v9319_v25  ;;  %1805 = vmatpush1.msra.mxu1 %v9322_v28  ;;  %v1521_v28 = vld [vmem:[#allocation3 + $0x20] sm:$0x30] }
 0x66f   :  { %1735 = vmatprep.subr.mxu0 %v9325_v29  ;;  %1806 = vmatprep.subr.mxu1 %v9328_v30 }
 0x670   :  { %1736 = vmatpush1.msra.mxu0 %v9331_v31  ;;  %1807 = vmatpush1.msra.mxu1 %v9334_v32  ;;  %v1522_v32 = vld [vmem:[#allocation3 + $0x38] sm:$0x30] }
 0x671   :  { %1737 = vmatprep.subr.mxu0 %v9337_v33  ;;  %1808 = vmatprep.subr.mxu1 %v9340_v34 }
 0x672   :  { %1738 = vmatpush1.msra.mxu0 %v9343_v35  ;;  %1809 = vmatpush1.msra.mxu1 %v9346_v36 }
 0x673   :  { %1739 = vmatprep.subr.mxu0 %v9349_v37  ;;  %1810 = vmatprep.subr.mxu1 %v9352_v38  ;;  %v1523_v38 = vld [vmem:[#allocation3 + $0x30] sm:$0x30] }
 0x674   :  { %1740 = vmatpush1.msra.mxu0 %v9355_v39  ;;  %1811 = vmatpush1.msra.mxu1 %v9358_v40 }
 0x675   :  { %1741 = vmatprep.subr.mxu0 %v9361_v41  ;;  %1812 = vmatprep.subr.mxu1 %v9364_v42 }
 0x676   :  { %1742 = vmatpush1.msra.mxu0 %v9367_v43  ;;  %1813 = vmatpush1.msra.mxu1 %v9370_v44  ;;  %v1524_v43 = vld [vmem:[#allocation3] sm:$0x30] }
 0x677   :  { %1743 = vmatprep.subr.mxu0 %v12749_v57  ;;  %1814 = vmatprep.subr.mxu1 %v12750_v52  ;;  %v1968_v57 = vld [vmem:[#allocation7 + $0x3d0] sm:$0xff]  ;;  %v1963_v52 = vld [vmem:[#allocation7 + $0x3a8] sm:$0xff] }
 0x678   :  { %1744 = vmatpush1.msra.mxu0 %v12751_v53  ;;  %1815 = vmatpush1.msra.mxu1 %v12752_v3  ;;  %v1965_v53 = vld [vmem:[#allocation7 + $0x3b8] sm:$0xff]  ;;  %v1962_v3 = vld [vmem:[#allocation7 + $0x3a0] sm:$0xff] }
 0x679   :  { %1745 = vmatprep.subr.mxu0 %v12753_v54  ;;  %1816 = vmatprep.subr.mxu1 %v12754_v5  ;;  %v1964_v54 = vld [vmem:[#allocation7 + $0x3b0] sm:$0xff]  ;;  %v1959_v5 = vld [vmem:[#allocation7 + $0x388] sm:$0xff] }
 0x67a   :  { %1746 = vmatpush1.msra.mxu0 %v12755_v6  ;;  %1817 = vmatpush1.msra.mxu1 %v12756_v7  ;;  %v1961_v6 = vld [vmem:[#allocation7 + $0x398] sm:$0xff]  ;;  %v1958_v7 = vld [vmem:[#allocation7 + $0x380] sm:$0xff] }
 0x67b   :  { %1747 = vmatprep.subr.mxu0 %v12757_v8  ;;  %1818 = vmatprep.subr.mxu1 %v12758_v9  ;;  %v1960_v8 = vld [vmem:[#allocation7 + $0x390] sm:$0xff]  ;;  %v1955_v9 = vld [vmem:[#allocation7 + $0x368] sm:$0xff] }
 0x67c   :  { %1748 = vmatpush1.msra.mxu0 %v12759_v10  ;;  %1819 = vmatpush1.msra.mxu1 %v12760_v11  ;;  %v1957_v10 = vld [vmem:[#allocation7 + $0x378] sm:$0xff]  ;;  %v1954_v11 = vld [vmem:[#allocation7 + $0x360] sm:$0xff] }
 0x67d   :  { %1749 = vmatprep.subr.mxu0 %v12761_v12  ;;  %1820 = vmatprep.subr.mxu1 %v12762_v13  ;;  %v1956_v12 = vld [vmem:[#allocation7 + $0x370] sm:$0xff]  ;;  %v1951_v13 = vld [vmem:[#allocation7 + $0x348] sm:$0xff] }
 0x67e   :  { %1750 = vmatpush1.msra.mxu0 %v12763_v14  ;;  %1821 = vmatpush1.msra.mxu1 %v12764_v15  ;;  %v1953_v14 = vld [vmem:[#allocation7 + $0x358] sm:$0xff]  ;;  %v1950_v15 = vld [vmem:[#allocation7 + $0x340] sm:$0xff] }
 0x67f   :  { %1751 = vmatprep.subr.mxu0 %v12765_v16  ;;  %1822 = vmatprep.subr.mxu1 %v12766_v17  ;;  %v1952_v16 = vld [vmem:[#allocation7 + $0x350] sm:$0xff]  ;;  %v1947_v17 = vld [vmem:[#allocation7 + $0x328] sm:$0xff] }
 0x680   :  { %1752 = vmatpush1.msra.mxu0 %v12767_v18  ;;  %1823 = vmatpush1.msra.mxu1 %v12768_v19  ;;  %v1949_v18 = vld [vmem:[#allocation7 + $0x338] sm:$0xff]  ;;  %v1946_v19 = vld [vmem:[#allocation7 + $0x320] sm:$0xff] }
 0x681   :  { %1785 = vmatprep.mubr.f32.mxu0 %v12769_v20  ;;  %1856 = vmatprep.mubr.f32.mxu1 %v12769_v20 }
 0x682   :  { %1997 = vmatprep.subr.mxu0 %v1971_v21  ;;  %2074 = vmatprep.subr.mxu1 %v1973_v22  ;;  %v1948_v21 = vld [vmem:[#allocation7 + $0x330] sm:$0xff]  ;;  %v1943_v22 = vld [vmem:[#allocation7 + $0x308] sm:$0xff] }
 0x721   :  { %v1594_v23 = vpop.f32.mrf.mxu0  ;;  %v1665_v35 = vpop.f32.mrf.mxu1 }
 0x722   :  { %v1674_v25 = vrot.slane %v1594_v23, 4  ;;  %v1676_v37 = vrot.slane %v1665_v35, 4  ;;  %v1945_v23 = vld [vmem:[#allocation7 + $0x318] sm:$0xff]  ;;  %v1934_v35 = vld [vmem:[#allocation7 + $0x2c0] sm:$0xff] }
 0x723   :  { %v1596_v29 = vpop.f32.mrf.mxu0  ;;  %v1667_v39 = vpop.f32.mrf.mxu1 }
 0x724   :  { %v1682_v30 = vadd.f32 %v1674_v25, %v1521_v28  ;;  %v1675_v31 = vrot.slane %v1596_v29, 4  ;;  %v1684_v40 = vadd.f32 %v1676_v37, %v1523_v38  ;;  %v1677_v41 = vrot.slane %v1667_v39, 4  ;;  %v1942_v25 = vld [vmem:[#allocation7 + $0x300] sm:$0xff]  ;;  %v1944_v28 = vld [vmem:[#allocation7 + $0x310] sm:$0xff]  ;;  %v1939_v29 = vld [vmem:[#allocation7 + $0x2e8] sm:$0xff] }
 0x725   :  { %v1931_v37 = vld [vmem:[#allocation7 + $0x2a8] sm:$0xff]  ;;  %v1933_v38 = vld [vmem:[#allocation7 + $0x2b8] sm:$0xff]  ;;  %v1930_v39 = vld [vmem:[#allocation7 + $0x2a0] sm:$0xff] }
 0x726   :  { %v7601_v33 = vmul.f32 -1.442695, %v1682_v30  ;;  %v1683_v34 = vadd.f32 %v1675_v31, %v1522_v32  ;;  %v7603_v42 = vmul.f32 -1.442695, %v1684_v40  ;;  %v1685_v47 = vadd.f32 %v1677_v41, %v1524_v43  ;;  %v1941_v30 = vld [vmem:[#allocation7 + $0x2f8] sm:$0xff]  ;;  %v1938_v31 = vld [vmem:[#allocation7 + $0x2e0] sm:$0xff] }
 0x727   :  { %v1940_v32 = vld [vmem:[#allocation7 + $0x2f0] sm:$0xff]  ;;  %v1927_v41 = vld [vmem:[#allocation7 + $0x288] sm:$0xff]  ;;  %v1926_v43 = vld [vmem:[#allocation7 + $0x280] sm:$0xff] }
 0x728   :  { %7894 = vpow2.f32 %v7601_v33  ;;  %v7602_v36 = vmul.f32 -1.442695, %v1683_v34  ;;  %v1935_v33 = vld [vmem:[#allocation7 + $0x2c8] sm:$0xff]  ;;  %v1937_v34 = vld [vmem:[#allocation7 + $0x2d8] sm:$0xff]  ;;  %v1932_v40 = vld [vmem:[#allocation7 + $0x2b0] sm:$0xff] }
 0x72a   :  { %7896 = vpow2.f32 %v7602_v36  ;;  %v1936_v36 = vld [vmem:[#allocation7 + $0x2d0] sm:$0xff] }
 0x72b   :  { %7898 = vpow2.f32 %v7603_v42  ;;  %v1929_v42 = vld [vmem:[#allocation7 + $0x298] sm:$0xff] }
 0x735   :  { %v7895_v44 = vpop.eup %7894 }
 0x736   :  { %v1695_v2 = vadd.f32 1.0, %v7895_v44  ;;  %v1928_v44 = vld [vmem:[#allocation7 + $0x290] sm:$0xff] }
 0x737   :  { %v7897_v24 = vpop.eup %7896 }
 0x738   :  { %7900 = vrcp.f32 %v1695_v2  ;;  %v1696_v60 = vadd.f32 1.0, %v7897_v24  ;;  %v7899_v49 = vpop.eup %7898  ;;  %v1925_v2 = vld [vmem:[#allocation7 + $0x278] sm:$0xff]  ;;  %v1922_v24 = vld [vmem:[#allocation7 + $0x260] sm:$0xff] }
 0x739   :  { %7902 = vtanh.f32 %v1685_v47  ;;  %v1697_v56 = vadd.f32 1.0, %v7899_v49  ;;  %v1923_v47 = vld [vmem:[#allocation7 + $0x268] sm:$0xff] }
 0x73a   :  { %7904 = vrcp.f32 %v1696_v60  ;;  %v1924_v60 = vld [vmem:[#allocation7 + $0x270] sm:$0xff]  ;;  %v1919_v49 = vld [vmem:[#allocation7 + $0x248] sm:$0xff] }
 0x73b   :  { %7906 = vrcp.f32 %v1697_v56  ;;  %v1917_v56 = vld [vmem:[#allocation7 + $0x238] sm:$0xff] }
 0x745   :  { %v7901_v63 = vpop.eup %7900 }
 0x746   :  { %v7903_v62 = vpop.eup %7902 }
 0x747   :  { %v7905_v55 = vpop.eup %7904  ;;  %v1709_v61 = vmul.f32 %v7903_v62, %v7901_v63  ;;  %v1921_v63 = vld [vmem:[#allocation7 + $0x258] sm:$0xff]  ;;  %v1918_v62 = vld [vmem:[#allocation7 + $0x240] sm:$0xff] }
 0x748   :  { %v1708_v0 = vmul.f32 %v7905_v55, %v1706_v58  ;;  %v7907_v4 = vpop.eup %7906  ;;  %v1920_v58 = vld [vmem:[#allocation7 + $0x250] sm:$0xff]  ;;  %v1915_v55 = vld [vmem:[#allocation7 + $0x228] sm:$0xff] }
 0x74a   :  { %v9576_v51 = vadd.f32 %v1709_v61, %v1708_v0  ;;  %v1914_v0 = vld [vmem:[#allocation7 + $0x220] sm:$0xff]  ;;  %v1916_v61 = vld [vmem:[#allocation7 + $0x230] sm:$0xff] }
 0x74c   :  { %7908 = vtanh.f32 %v9576_v51 }
 0x759   :  { %v7909_v59 = vpop.eup %7908 }
 0x75a   :  { %v1712_v48 = vmul.f32 %v7909_v59, %v7907_v4  ;;  %v1911_v4 = vld [vmem:[#allocation7 + $0x208] sm:$0xff]  ;;  %v1913_v59 = vld [vmem:[#allocation7 + $0x218] sm:$0xff] }
 0x75c   :  { %1713 = vst [vmem:[#allocation2 + $0x8] sm:$0x30] %v1712_v48  ;;  %v1719_v50 = vrot.slane %v1712_v48, 4  ;;  %v1910_v48 = vld [vmem:[#allocation7 + $0x200] sm:$0xff] }
 0x75e   :  { %1786 = vmatmul.mubr.f32.vlgmr.msra.gmra.mxu0 %v1719_v50  ;;  %1857 = vmatmul.mubr.f32.vlgmr.msra.gmra.mxu1 %v1719_v50  ;;  %v1912_v50 = vld [vmem:[#allocation7 + $0x210] sm:$0xff] }
 0x75f   :  { %1998 = vmatpush1.msra.mxu0 %v1970_v1  ;;  %2075 = vmatpush1.msra.mxu1 %v1972_v26  ;;  %v1907_v1 = vld [vmem:[#allocation2] sm:$0xff]  ;;  %v9583_v26 = vld [vmem:[#allocation9 + $0x3e8] sm:$0xff] }
 0x760   :  { %1999 = vmatprep.subr.mxu0 %v1967_v46  ;;  %2076 = vmatprep.subr.mxu1 %v1969_v45  ;;  %12770 = vst [vmem:[#allocation17_spill] sm:$0xff] %v9583_v26  ;;  %v9585_v46 = vld [vmem:[#allocation9 + $0x3f8] sm:$0xff]  ;;  %v9589_v45 = vld [vmem:[#allocation9 + $0x3e0] sm:$0xff] }
 0x761   :  { %2000 = vmatpush1.msra.mxu0 %v1966_v27  ;;  %2077 = vmatpush1.msra.mxu1 %v1968_v57  ;;  %12771 = vst [vmem:[#allocation18_spill] sm:$0xff] %v9585_v46  ;;  %v9591_v27 = vld [vmem:[#allocation9 + $0x3f0] sm:$0xff]  ;;  %v9595_v57 = vld [vmem:[#allocation9 + $0x3c8] sm:$0xff] }
 0x762   :  { %2001 = vmatprep.subr.mxu0 %v1963_v52  ;;  %2078 = vmatprep.subr.mxu1 %v1965_v53  ;;  %v9597_v52 = vld [vmem:[#allocation9 + $0x3d8] sm:$0xff]  ;;  %v9601_v53 = vld [vmem:[#allocation9 + $0x3c0] sm:$0xff] }
 0x763   :  { %2002 = vmatpush1.msra.mxu0 %v1962_v3  ;;  %2079 = vmatpush1.msra.mxu1 %v1964_v54  ;;  %v9603_v3 = vld [vmem:[#allocation9 + $0x3d0] sm:$0xff]  ;;  %v9607_v54 = vld [vmem:[#allocation9 + $0x3a8] sm:$0xff] }
 0x764   :  { %2003 = vmatprep.subr.mxu0 %v1959_v5  ;;  %2080 = vmatprep.subr.mxu1 %v1961_v6  ;;  %v9609_v5 = vld [vmem:[#allocation9 + $0x3b8] sm:$0xff]  ;;  %v9613_v6 = vld [vmem:[#allocation9 + $0x3a0] sm:$0xff] }
 0x765   :  { %2004 = vmatpush1.msra.mxu0 %v1958_v7  ;;  %2081 = vmatpush1.msra.mxu1 %v1960_v8  ;;  %v9615_v7 = vld [vmem:[#allocation9 + $0x3b0] sm:$0xff]  ;;  %v9619_v8 = vld [vmem:[#allocation9 + $0x388] sm:$0xff] }
 0x766   :  { %2005 = vmatprep.subr.mxu0 %v1955_v9  ;;  %2082 = vmatprep.subr.mxu1 %v1957_v10  ;;  %v9621_v9 = vld [vmem:[#allocation9 + $0x398] sm:$0xff]  ;;  %v9625_v10 = vld [vmem:[#allocation9 + $0x380] sm:$0xff] }
 0x767   :  { %2006 = vmatpush1.msra.mxu0 %v1954_v11  ;;  %2083 = vmatpush1.msra.mxu1 %v1956_v12  ;;  %v9627_v11 = vld [vmem:[#allocation9 + $0x390] sm:$0xff]  ;;  %v9631_v12 = vld [vmem:[#allocation9 + $0x368] sm:$0xff] }
 0x768   :  { %2007 = vmatprep.subr.mxu0 %v1951_v13  ;;  %2084 = vmatprep.subr.mxu1 %v1953_v14  ;;  %v9633_v13 = vld [vmem:[#allocation9 + $0x378] sm:$0xff]  ;;  %v9637_v14 = vld [vmem:[#allocation9 + $0x360] sm:$0xff] }
 0x769   :  { %2008 = vmatpush1.msra.mxu0 %v1950_v15  ;;  %2085 = vmatpush1.msra.mxu1 %v1952_v16  ;;  %v9639_v15 = vld [vmem:[#allocation9 + $0x370] sm:$0xff]  ;;  %v9643_v16 = vld [vmem:[#allocation9 + $0x348] sm:$0xff] }
 0x76a   :  { %2009 = vmatprep.subr.mxu0 %v1947_v17  ;;  %2086 = vmatprep.subr.mxu1 %v1949_v18  ;;  %v9645_v17 = vld [vmem:[#allocation9 + $0x358] sm:$0xff]  ;;  %v9649_v18 = vld [vmem:[#allocation9 + $0x340] sm:$0xff] }
 0x76b   :  { %2010 = vmatpush1.msra.mxu0 %v1946_v19  ;;  %2087 = vmatpush1.msra.mxu1 %v1948_v21  ;;  %v9651_v19 = vld [vmem:[#allocation9 + $0x350] sm:$0xff]  ;;  %v9655_v21 = vld [vmem:[#allocation9 + $0x328] sm:$0xff] }
 0x76c   :  { %2011 = vmatprep.subr.mxu0 %v1943_v22  ;;  %2088 = vmatprep.subr.mxu1 %v1945_v23  ;;  %v9657_v22 = vld [vmem:[#allocation9 + $0x338] sm:$0xff]  ;;  %v9661_v23 = vld [vmem:[#allocation9 + $0x320] sm:$0xff] }
 0x76d   :  { %2012 = vmatpush1.msra.mxu0 %v1942_v25  ;;  %2089 = vmatpush1.msra.mxu1 %v1944_v28  ;;  %v9663_v25 = vld [vmem:[#allocation9 + $0x330] sm:$0xff]  ;;  %v9667_v28 = vld [vmem:[#allocation9 + $0x308] sm:$0xff] }
 0x76e   :  { %2013 = vmatprep.subr.mxu0 %v1939_v29  ;;  %2090 = vmatprep.subr.mxu1 %v1941_v30  ;;  %v9669_v29 = vld [vmem:[#allocation9 + $0x318] sm:$0xff]  ;;  %v9673_v30 = vld [vmem:[#allocation9 + $0x300] sm:$0xff] }
 0x76f   :  { %2014 = vmatpush1.msra.mxu0 %v1938_v31  ;;  %2091 = vmatpush1.msra.mxu1 %v1940_v32  ;;  %v9675_v31 = vld [vmem:[#allocation9 + $0x310] sm:$0xff]  ;;  %v9679_v32 = vld [vmem:[#allocation9 + $0x2e8] sm:$0xff] }
 0x770   :  { %2015 = vmatprep.subr.mxu0 %v1935_v33  ;;  %2092 = vmatprep.subr.mxu1 %v1937_v34  ;;  %v9681_v33 = vld [vmem:[#allocation9 + $0x2f8] sm:$0xff]  ;;  %v9685_v34 = vld [vmem:[#allocation9 + $0x2e0] sm:$0xff] }
 0x771   :  { %2016 = vmatpush1.msra.mxu0 %v1934_v35  ;;  %2093 = vmatpush1.msra.mxu1 %v1936_v36  ;;  %v9687_v35 = vld [vmem:[#allocation9 + $0x2f0] sm:$0xff]  ;;  %v9691_v36 = vld [vmem:[#allocation9 + $0x2c8] sm:$0xff] }
 0x772   :  { %2017 = vmatprep.subr.mxu0 %v1931_v37  ;;  %2094 = vmatprep.subr.mxu1 %v1933_v38  ;;  %v9693_v37 = vld [vmem:[#allocation9 + $0x2d8] sm:$0xff]  ;;  %v9695_v38 = vld [vmem:[#allocation9 + $0x2c0] sm:$0xff] }
 0x773   :  { %2018 = vmatpush1.msra.mxu0 %v1930_v39  ;;  %2095 = vmatpush1.msra.mxu1 %v1932_v40  ;;  %v9699_v39 = vld [vmem:[#allocation9 + $0x2d0] sm:$0xff]  ;;  %v9701_v40 = vld [vmem:[#allocation9 + $0x2a8] sm:$0xff] }
 0x774   :  { %2019 = vmatprep.subr.mxu0 %v1927_v41  ;;  %2096 = vmatprep.subr.mxu1 %v1929_v42  ;;  %v9703_v41 = vld [vmem:[#allocation9 + $0x2b8] sm:$0xff]  ;;  %v9707_v42 = vld [vmem:[#allocation9 + $0x2a0] sm:$0xff] }
 0x775   :  { %2020 = vmatpush1.msra.mxu0 %v1926_v43  ;;  %2097 = vmatpush1.msra.mxu1 %v1928_v44  ;;  %v9709_v43 = vld [vmem:[#allocation9 + $0x2b0] sm:$0xff]  ;;  %v9711_v44 = vld [vmem:[#allocation9 + $0x288] sm:$0xff] }
 0x776   :  { %2021 = vmatprep.subr.mxu0 %v1923_v47  ;;  %2098 = vmatprep.subr.mxu1 %v1925_v2  ;;  %12772 = vst [vmem:[#allocation19_spill] sm:$0xff] %v9709_v43  ;;  %12773 = vst [vmem:[#allocation20_spill] sm:$0xff] %v9711_v44  ;;  %v9715_v47 = vld [vmem:[#allocation9 + $0x298] sm:$0xff]  ;;  %v9717_v2 = vld [vmem:[#allocation9 + $0x280] sm:$0xff] }
 0x777   :  { %2022 = vmatpush1.msra.mxu0 %v1922_v24  ;;  %2099 = vmatpush1.msra.mxu1 %v1924_v60  ;;  %12774 = vst [vmem:[#allocation21_spill] sm:$0xff] %v9715_v47  ;;  %12775 = vst [vmem:[#allocation22_spill] sm:$0xff] %v9717_v2  ;;  %v9719_v24 = vld [vmem:[#allocation9 + $0x290] sm:$0xff]  ;;  %v9723_v60 = vld [vmem:[#allocation9 + $0x268] sm:$0xff] }
 0x778   :  { %2023 = vmatprep.subr.mxu0 %v1919_v49  ;;  %2100 = vmatprep.subr.mxu1 %v1921_v63  ;;  %12776 = vst [vmem:[#allocation23_spill] sm:$0xff] %v9719_v24  ;;  %12777 = vst [vmem:[#allocation24_spill] sm:$0xff] %v9723_v60  ;;  %v9725_v49 = vld [vmem:[#allocation9 + $0x278] sm:$0xff]  ;;  %v9729_v63 = vld [vmem:[#allocation9 + $0x260] sm:$0xff] }
 0x779   :  { %2024 = vmatpush1.msra.mxu0 %v1918_v62  ;;  %2101 = vmatpush1.msra.mxu1 %v1920_v58  ;;  %12778 = vst [vmem:[#allocation25_spill] sm:$0xff] %v9725_v49  ;;  %12779 = vst [vmem:[#allocation26_spill] sm:$0xff] %v9729_v63  ;;  %v9731_v62 = vld [vmem:[#allocation9 + $0x270] sm:$0xff]  ;;  %v9735_v58 = vld [vmem:[#allocation9 + $0x248] sm:$0xff] }
 0x77a   :  { %2025 = vmatprep.subr.mxu0 %v1915_v55  ;;  %2102 = vmatprep.subr.mxu1 %v1917_v56  ;;  %12780 = vst [vmem:[#allocation27_spill] sm:$0xff] %v9731_v62  ;;  %12781 = vst [vmem:[#allocation28_spill] sm:$0xff] %v9735_v58  ;;  %v9737_v55 = vld [vmem:[#allocation9 + $0x258] sm:$0xff]  ;;  %v9741_v56 = vld [vmem:[#allocation9 + $0x240] sm:$0xff] }
 0x77b   :  { %2026 = vmatpush1.msra.mxu0 %v1914_v0  ;;  %2103 = vmatpush1.msra.mxu1 %v1916_v61  ;;  %12782 = vst [vmem:[#allocation29_spill] sm:$0xff] %v9737_v55  ;;  %12783 = vst [vmem:[#allocation30_spill] sm:$0xff] %v9741_v56  ;;  %v9743_v0 = vld [vmem:[#allocation9 + $0x250] sm:$0xff]  ;;  %v9747_v61 = vld [vmem:[#allocation9 + $0x228] sm:$0xff] }
 0x77c   :  { %2027 = vmatprep.subr.mxu0 %v1911_v4  ;;  %2104 = vmatprep.subr.mxu1 %v1913_v59  ;;  %12784 = vst [vmem:[#allocation31_spill] sm:$0xff] %v9743_v0  ;;  %12785 = vst [vmem:[#allocation32_spill] sm:$0xff] %v9747_v61  ;;  %v9749_v4 = vld [vmem:[#allocation9 + $0x238] sm:$0xff]  ;;  %v9753_v59 = vld [vmem:[#allocation9 + $0x220] sm:$0xff] }
 0x77d   :  { %2028 = vmatpush1.msra.mxu0 %v1910_v48  ;;  %2061 = vmatprep.mubr.f32.mxu0 %v12769_v20  ;;  %12786 = vst [vmem:[#allocation33_spill] sm:$0xff] %v9749_v4  ;;  %12787 = vst [vmem:[#allocation34_spill] sm:$0xff] %v9753_v59  ;;  %v9755_v48 = vld [vmem:[#allocation9 + $0x230] sm:$0xff] }
 0x77e   :  { %2105 = vmatpush1.msra.mxu1 %v1912_v50  ;;  %2138 = vmatprep.mubr.f32.mxu1 %v12769_v20  ;;  %12788 = vst [vmem:[#allocation35_spill] sm:$0xff] %v9755_v48  ;;  %v9759_v50 = vld [vmem:[#allocation9 + $0x208] sm:$0xff] }
 0x77f   :  { %2062 = vmatmul.mubr.f32.vlgmr.msra.gmra.mxu0 %v1907_v1  ;;  %2139 = vmatmul.mubr.f32.vlgmr.msra.gmra.mxu1 %v1907_v1  ;;  %12789 = vst [vmem:[#allocation36_spill] sm:$0xff] %v9759_v50  ;;  %v9761_v1 = vld [vmem:[#allocation9 + $0x218] sm:$0xff] }
 0x780   :  { %2067 = vmatprep.mubr.f32.mxu0 %v12769_v20  ;;  %2144 = vmatprep.mubr.f32.mxu1 %v12769_v20  ;;  %12790 = vst [vmem:[#allocation37_spill] sm:$0xff] %v9761_v1 }
 0x781   :  { %2228 = vmatprep.subr.mxu0 %v9583_v26  ;;  %2299 = vmatprep.subr.mxu1 %v9585_v46 }
 0x782   :  { %2229 = vmatpush1.msra.mxu0 %v9589_v45  ;;  %2300 = vmatpush1.msra.mxu1 %v9591_v27 }
 0x783   :  { %2230 = vmatprep.subr.mxu0 %v9595_v57  ;;  %2301 = vmatprep.subr.mxu1 %v9597_v52 }
 0x784   :  { %2231 = vmatpush1.msra.mxu0 %v9601_v53  ;;  %2302 = vmatpush1.msra.mxu1 %v9603_v3 }
 0x785   :  { %2232 = vmatprep.subr.mxu0 %v9607_v54  ;;  %2303 = vmatprep.subr.mxu1 %v9609_v5 }
 0x786   :  { %2233 = vmatpush1.msra.mxu0 %v9613_v6  ;;  %2304 = vmatpush1.msra.mxu1 %v9615_v7 }
 0x787   :  { %2234 = vmatprep.subr.mxu0 %v9619_v8  ;;  %2305 = vmatprep.subr.mxu1 %v9621_v9 }
 0x788   :  { %2235 = vmatpush1.msra.mxu0 %v9625_v10  ;;  %2306 = vmatpush1.msra.mxu1 %v9627_v11 }
 0x789   :  { %2236 = vmatprep.subr.mxu0 %v9631_v12  ;;  %2307 = vmatprep.subr.mxu1 %v9633_v13 }
 0x78a   :  { %2237 = vmatpush1.msra.mxu0 %v9637_v14  ;;  %2308 = vmatpush1.msra.mxu1 %v9639_v15 }
 0x78b   :  { %2238 = vmatprep.subr.mxu0 %v9643_v16  ;;  %2309 = vmatprep.subr.mxu1 %v9645_v17 }
 0x78c   :  { %2239 = vmatpush1.msra.mxu0 %v9649_v18  ;;  %2310 = vmatpush1.msra.mxu1 %v9651_v19 }
 0x78d   :  { %2240 = vmatprep.subr.mxu0 %v9655_v21  ;;  %2311 = vmatprep.subr.mxu1 %v9657_v22 }
 0x78e   :  { %2241 = vmatpush1.msra.mxu0 %v9661_v23  ;;  %2312 = vmatpush1.msra.mxu1 %v9663_v25 }
 0x78f   :  { %2242 = vmatprep.subr.mxu0 %v9667_v28  ;;  %2313 = vmatprep.subr.mxu1 %v9669_v29 }
 0x790   :  { %2243 = vmatpush1.msra.mxu0 %v9673_v30  ;;  %2314 = vmatpush1.msra.mxu1 %v9675_v31 }
 0x791   :  { %2244 = vmatprep.subr.mxu0 %v9679_v32  ;;  %2315 = vmatprep.subr.mxu1 %v9681_v33 }
 0x792   :  { %2245 = vmatpush1.msra.mxu0 %v9685_v34  ;;  %2316 = vmatpush1.msra.mxu1 %v9687_v35 }
 0x793   :  { %2246 = vmatprep.subr.mxu0 %v9691_v36  ;;  %2317 = vmatprep.subr.mxu1 %v9693_v37 }
 0x794   :  { %2247 = vmatpush1.msra.mxu0 %v9695_v38  ;;  %2318 = vmatpush1.msra.mxu1 %v9699_v39 }
 0x795   :  { %2248 = vmatprep.subr.mxu0 %v9701_v40  ;;  %2319 = vmatprep.subr.mxu1 %v9703_v41 }
 0x796   :  { %2249 = vmatpush1.msra.mxu0 %v9707_v42  ;;  %2320 = vmatpush1.msra.mxu1 %v9709_v43 }
 0x797   :  { %2250 = vmatprep.subr.mxu0 %v9711_v44  ;;  %2321 = vmatprep.subr.mxu1 %v9715_v47 }
 0x798   :  { %2251 = vmatpush1.msra.mxu0 %v9717_v2  ;;  %2322 = vmatpush1.msra.mxu1 %v9719_v24 }
 0x799   :  { %2252 = vmatprep.subr.mxu0 %v9723_v60  ;;  %2323 = vmatprep.subr.mxu1 %v9725_v49  ;;  %v1716_v60 = vld [vmem:[#allocation3 + $0x30] sm:$0xc0] }
 0x79a   :  { %2253 = vmatpush1.msra.mxu0 %v9729_v63  ;;  %2324 = vmatpush1.msra.mxu1 %v9731_v62  ;;  %v9765_v62 = vld [vmem:[#allocation9 + $0x200] sm:$0xff]  ;;  %v1715_v63 = vld [vmem:[#allocation3 + $0x38] sm:$0xc0] }
 0x79b   :  { %2254 = vmatprep.subr.mxu0 %v9735_v58  ;;  %2325 = vmatprep.subr.mxu1 %v9737_v55  ;;  %12791 = vst [vmem:[#allocation38_spill] sm:$0xff] %v9765_v62  ;;  %v9767_v58 = vld [vmem:[#allocation9 + $0x210] sm:$0xff] }
 0x79c   :  { %2255 = vmatpush1.msra.mxu0 %v9741_v56  ;;  %2326 = vmatpush1.msra.mxu1 %v9743_v0  ;;  %12792 = vst [vmem:[#allocation43_spill] sm:$0xff] %v9767_v58  ;;  %v1714_v0 = vld [vmem:[#allocation3 + $0x20] sm:$0xc0] }
 0x79d   :  { %2256 = vmatprep.subr.mxu0 %v9747_v61  ;;  %2327 = vmatprep.subr.mxu1 %v9749_v4 }
 0x79e   :  { %2257 = vmatpush1.msra.mxu0 %v9753_v59  ;;  %2328 = vmatpush1.msra.mxu1 %v9755_v48 }
 0x79f   :  { %2258 = vmatprep.subr.mxu0 %v9759_v50  ;;  %2329 = vmatprep.subr.mxu1 %v9761_v1 }
 0x7a0   :  { %2259 = vmatpush1.msra.mxu0 %v9765_v62  ;;  %2330 = vmatpush1.msra.mxu1 %v9767_v58 }
 0x7a1   :  { %2403 = vmatprep.subr.mxu0 %v9583_v26  ;;  %2474 = vmatprep.subr.mxu1 %v9585_v46  ;;  %v1717_v46 = vld [vmem:[#allocation3] sm:$0xc0] }
 0x81e   :  { %v1787_v4 = vpop.f32.mrf.mxu0  ;;  %v1858_v50 = vpop.f32.mrf.mxu1 }
 0x81f   :  { %v1867_v61 = vrot.slane %v1787_v4, 2  ;;  %v1869_v62 = vrot.slane %v1858_v50, 2 }
 0x820   :  { %v1789_v56 = vpop.f32.mrf.mxu0  ;;  %v1860_v58 = vpop.f32.mrf.mxu1 }
 0x821   :  { %v1875_v55 = vadd.f32 %v1867_v61, %v1714_v0  ;;  %v1868_v59 = vrot.slane %v1789_v56, 2  ;;  %v1877_v24 = vadd.f32 %v1869_v62, %v1716_v60  ;;  %v1870_v26 = vrot.slane %v1860_v58, 2  ;;  %v12794_v0 = vld [vmem:[#allocation40_spill] sm:$0xff]  ;;  %v12795_v60 = vld [vmem:[#allocation41_spill] sm:$0xff] }
 0x823   :  { %v7604_v48 = vmul.f32 -1.442695, %v1875_v55  ;;  %v1876_v49 = vadd.f32 %v1868_v59, %v1715_v63  ;;  %v7606_v2 = vmul.f32 -1.442695, %v1877_v24  ;;  %v1878_v4 = vadd.f32 %v1870_v26, %v1717_v46  ;;  %v1975_v63 = vld [vmem:[#allocation10 + $0x4] sm:$0xf] }
 0x824   :  { %v12793_v55 = vld [vmem:[#allocation39_spill] sm:$0xff]  ;;  %v9781_v61 = vrot.slane %v1975_v63, %v12794_v0  ;;  %v9784_v62 = vrot.slane %v1975_v63, %v12795_v60  ;;  %v12796_v24 = vld [vmem:[#allocation42_spill] sm:$0xff] }
 0x825   :  { %7910 = vpow2.f32 %v7604_v48  ;;  %v7605_v1 = vmul.f32 -1.442695, %v1876_v49  ;;  %v9778_v49 = vrot.slane %v1975_v63, %v12793_v55  ;;  %v9787_v58 = vrot.slane %v1975_v63, %v12796_v24 }
 0x827   :  { %7912 = vpow2.f32 %v7605_v1 }
 0x828   :  { %7914 = vpow2.f32 %v7606_v2 }
 0x832   :  { %v7911_v47 = vpop.eup %7910 }
 0x833   :  { %v1888_v44 = vadd.f32 1.0, %v7911_v47 }
 0x834   :  { %v7913_v43 = vpop.eup %7912 }
 0x835   :  { %7916 = vrcp.f32 %v1888_v44  ;;  %v1889_v56 = vadd.f32 1.0, %v7913_v43  ;;  %v7915_v47 = vpop.eup %7914 }
 0x836   :  { %7918 = vtanh.f32 %v1878_v4  ;;  %v1890_v24 = vadd.f32 1.0, %v7915_v47  ;;  %v12802_v47 = vld [vmem:[#allocation24_spill] sm:$0xff] }
 0x837   :  { %7920 = vrcp.f32 %v1889_v56  ;;  %v1899_v56 = vrot.slane %v9576_v51, 6  ;;  %v12797_v51 = vld [vmem:[#allocation19_spill] sm:$0xff] }
 0x838   :  { %7922 = vrcp.f32 %v1890_v24  ;;  %v12801_v24 = vld [vmem:[#allocation23_spill] sm:$0xff] }
 0x83f   :  { %v2063_v26 = vpop.f32.mrf.mxu0  ;;  %v2140_v46 = vpop.f32.mrf.mxu1 }
 0x840   :  { %v2064_v44 = vadd.f32 %v2063_v26, %v9778_v49  ;;  %v2141_v43 = vadd.f32 %v2140_v46, %v9781_v61 }
 0x841   :  { %v2065_v2 = vpop.f32.mrf.mxu0  ;;  %v2142_v59 = vpop.f32.mrf.mxu1 }
 0x842   :  { %v7917_v48 = vpop.eup %7916  ;;  %2151 = vst [vmem:[#allocation3 + $0x28] sm:$0xff] %v2064_v44  ;;  %2153 = vst [vmem:[#allocation3 + $0x8] sm:$0xff] %v2141_v43  ;;  %v2066_v50 = vadd.f32 %v2065_v2, %v9784_v62  ;;  %v2143_v1 = vadd.f32 %v2142_v59, %v9787_v58  ;;  %v12803_v2 = vld [vmem:[#allocation25_spill] sm:$0xff]  ;;  %v12804_v59 = vld [vmem:[#allocation26_spill] sm:$0xff] }
 0x843   :  { %v7919_v4 = vpop.eup %7918 }
 0x844   :  { %v7921_v63 = vpop.eup %7920  ;;  %2152 = vst [vmem:[#allocation3 + $0x10] sm:$0xff] %v2066_v50  ;;  %2154 = vst [vmem:[#allocation3 + $0x18] sm:$0xff] %v2143_v1  ;;  %v1902_v60 = vmul.f32 %v7919_v4, %v7917_v48  ;;  %v12805_v48 = vld [vmem:[#allocation27_spill] sm:$0xff]  ;;  %v12806_v50 = vld [vmem:[#allocation28_spill] sm:$0xff] }
 0x845   :  { %v1901_v26 = vmul.f32 %v7921_v63, %v1899_v56  ;;  %v7923_v0 = vpop.eup %7922  ;;  %v12807_v1 = vld [vmem:[#allocation29_spill] sm:$0xff]  ;;  %v12808_v4 = vld [vmem:[#allocation30_spill] sm:$0xff]  ;;  %v12809_v56 = vld [vmem:[#allocation31_spill] sm:$0xff] }
 0x846   :  { %v12810_v63 = vld [vmem:[#allocation32_spill] sm:$0xff] }
 0x847   :  { %v1903_v46 = vadd.f32 %v1902_v60, %v1901_v26  ;;  %v12800_v60 = vld [vmem:[#allocation22_spill] sm:$0xff]  ;;  %v12811_v26 = vld [vmem:[#allocation33_spill] sm:$0xff] }
 0x849   :  { %7924 = vtanh.f32 %v1903_v46  ;;  %v12812_v46 = vld [vmem:[#allocation34_spill] sm:$0xff] }
 0x856   :  { %v7925_v55 = vpop.eup %7924 }
 0x857   :  { %v1905_v44 = vmul.f32 %v7925_v55, %v7923_v0  ;;  %v12798_v55 = vld [vmem:[#allocation20_spill] sm:$0xff]  ;;  %v12799_v0 = vld [vmem:[#allocation21_spill] sm:$0xff] }
 0x859   :  { %1906 = vst [vmem:[#allocation2 + $0x8] sm:$0xc0] %v1905_v44  ;;  %v12813_v44 = vld [vmem:[#allocation35_spill] sm:$0xff] }
 0x860   :  { %v1908_v43 = vld [vmem:[#allocation2 + $0x8] sm:$0xff] }
 0x861   :  { %2068 = vmatmul.mubr.f32.gmra.mxu0 %v1908_v43  ;;  %2145 = vmatmul.mubr.f32.gmra.mxu1 %v1908_v43  ;;  %v12814_v43 = vld [vmem:[#allocation36_spill] sm:$0xff] }
 0x862   :  { %2292 = vmatprep.mubr.f32.mxu0 %v12769_v20  ;;  %2363 = vmatprep.mubr.f32.mxu1 %v12769_v20 }
 0x865   :  { %2293 = vmatmul.mubr.f32.vlgmr.msra.gmra.mxu0 %v12769_v20  ;;  %2364 = vmatmul.mubr.f32.vlgmr.msra.gmra.mxu1 %v12769_v20 }
 0x866   :  { %2404 = vmatpush1.msra.mxu0 %v9589_v45  ;;  %2475 = vmatpush1.msra.mxu1 %v9591_v27 }
 0x867   :  { %2405 = vmatprep.subr.mxu0 %v9595_v57  ;;  %2476 = vmatprep.subr.mxu1 %v9597_v52 }
 0x868   :  { %2406 = vmatpush1.msra.mxu0 %v9601_v53  ;;  %2477 = vmatpush1.msra.mxu1 %v9603_v3 }
 0x869   :  { %2407 = vmatprep.subr.mxu0 %v9607_v54  ;;  %2478 = vmatprep.subr.mxu1 %v9609_v5 }
 0x86a   :  { %2408 = vmatpush1.msra.mxu0 %v9613_v6  ;;  %2479 = vmatpush1.msra.mxu1 %v9615_v7 }
 0x86b   :  { %2409 = vmatprep.subr.mxu0 %v9619_v8  ;;  %2480 = vmatprep.subr.mxu1 %v9621_v9 }
 0x86c   :  { %2410 = vmatpush1.msra.mxu0 %v9625_v10  ;;  %2481 = vmatpush1.msra.mxu1 %v9627_v11 }
 0x86d   :  { %2411 = vmatprep.subr.mxu0 %v9631_v12  ;;  %2482 = vmatprep.subr.mxu1 %v9633_v13 }
 0x86e   :  { %2412 = vmatpush1.msra.mxu0 %v9637_v14  ;;  %2483 = vmatpush1.msra.mxu1 %v9639_v15 }
 0x86f   :  { %2413 = vmatprep.subr.mxu0 %v9643_v16  ;;  %2484 = vmatprep.subr.mxu1 %v9645_v17 }
 0x870   :  { %2414 = vmatpush1.msra.mxu0 %v9649_v18  ;;  %2485 = vmatpush1.msra.mxu1 %v9651_v19 }
 0x871   :  { %2415 = vmatprep.subr.mxu0 %v9655_v21  ;;  %2486 = vmatprep.subr.mxu1 %v9657_v22 }
 0x872   :  { %2416 = vmatpush1.msra.mxu0 %v9661_v23  ;;  %2487 = vmatpush1.msra.mxu1 %v9663_v25 }
 0x873   :  { %2417 = vmatprep.subr.mxu0 %v9667_v28  ;;  %2488 = vmatprep.subr.mxu1 %v9669_v29 }
 0x874   :  { %2418 = vmatpush1.msra.mxu0 %v9673_v30  ;;  %2489 = vmatpush1.msra.mxu1 %v9675_v31 }
 0x875   :  { %2419 = vmatprep.subr.mxu0 %v9679_v32  ;;  %2490 = vmatprep.subr.mxu1 %v9681_v33 }
 0x876   :  { %2420 = vmatpush1.msra.mxu0 %v9685_v34  ;;  %2491 = vmatpush1.msra.mxu1 %v9687_v35 }
 0x877   :  { %2421 = vmatprep.subr.mxu0 %v9691_v36  ;;  %2492 = vmatprep.subr.mxu1 %v9693_v37 }
 0x878   :  { %2422 = vmatpush1.msra.mxu0 %v9695_v38  ;;  %2493 = vmatpush1.msra.mxu1 %v9699_v39 }
 0x879   :  { %2423 = vmatprep.subr.mxu0 %v9701_v40  ;;  %2494 = vmatprep.subr.mxu1 %v9703_v41 }
 0x87a   :  { %2424 = vmatpush1.msra.mxu0 %v9707_v42  ;;  %2495 = vmatpush1.msra.mxu1 %v12797_v51 }
 0x87b   :  { %2425 = vmatprep.subr.mxu0 %v12798_v55  ;;  %2496 = vmatprep.subr.mxu1 %v12799_v0 }
 0x87c   :  { %2426 = vmatpush1.msra.mxu0 %v12800_v60  ;;  %2497 = vmatpush1.msra.mxu1 %v12801_v24 }
 0x87d   :  { %2427 = vmatprep.subr.mxu0 %v12802_v47  ;;  %2498 = vmatprep.subr.mxu1 %v12803_v2 }
 0x87e   :  { %2428 = vmatpush1.msra.mxu0 %v12804_v59  ;;  %2499 = vmatpush1.msra.mxu1 %v12805_v48  ;;  %v12815_v59 = vld [vmem:[#allocation37_spill] sm:$0xff]  ;;  %v12816_v48 = vld [vmem:[#allocation38_spill] sm:$0xff] }
 0x87f   :  { %2429 = vmatprep.subr.mxu0 %v12806_v50  ;;  %2500 = vmatprep.subr.mxu1 %v12807_v1  ;;  %v12817_v1 = vld [vmem:[#allocation43_spill] sm:$0xff]  ;;  %v2224_v50 = vld [vmem:[#allocation3 + $0x28] sm:$0x3] }
 0x880   :  { %2430 = vmatpush1.msra.mxu0 %v12808_v4  ;;  %2501 = vmatpush1.msra.mxu1 %v12809_v56  ;;  %v12818_v56 = vld [vmem:[#allocation17_spill] sm:$0xff] }
 0x881   :  { %2431 = vmatprep.subr.mxu0 %v12810_v63  ;;  %2502 = vmatprep.subr.mxu1 %v12811_v26  ;;  %v12819_v63 = vld [vmem:[#allocation18_spill] sm:$0xff] }
 0x882   :  { %2432 = vmatpush1.msra.mxu0 %v12812_v46  ;;  %2503 = vmatpush1.msra.mxu1 %v12813_v44 }
 0x883   :  { %2433 = vmatprep.subr.mxu0 %v12814_v43  ;;  %2504 = vmatprep.subr.mxu1 %v12815_v59 }
 0x884   :  { %2434 = vmatpush1.msra.mxu0 %v12816_v48  ;;  %2467 = vmatprep.mubr.f32.mxu0 %v12769_v20 }
 0x885   :  { %2505 = vmatpush1.msra.mxu1 %v12817_v1  ;;  %2538 = vmatprep.mubr.f32.mxu1 %v12769_v20 }
 0x886   :  { %2596 = vmatprep.subr.mxu0 %v12818_v56  ;;  %2667 = vmatprep.subr.mxu1 %v12819_v63  ;;  %v2225_v63 = vld [vmem:[#allocation3 + $0x10] sm:$0x3] }
 0x921   :  { %v2069_v26 = vpop.f32.mrf.mxu0  ;;  %v2146_v46 = vpop.f32.mrf.mxu1 }
 0x922   :  { %v2070_v44 = vadd.f32 %v2069_v26, %v9778_v49  ;;  %v2147_v43 = vadd.f32 %v2146_v46, %v9781_v61  ;;  %v2226_v26 = vld [vmem:[#allocation3 + $0x8] sm:$0x3] }
 0x923   :  { %v2071_v4 = vpop.f32.mrf.mxu0  ;;  %v2148_v59 = vpop.f32.mrf.mxu1 }
 0x924   :  { %2155 = vst [vmem:[#allocation3 + $0x20] sm:$0xff] %v2070_v44  ;;  %2157 = vst [vmem:[#allocation3 + $0x30] sm:$0xff] %v2147_v43  ;;  %v2072_v48 = vadd.f32 %v2071_v4, %v9784_v62  ;;  %v2149_v1 = vadd.f32 %v2148_v59, %v9787_v58  ;;  %v2227_v62 = vld [vmem:[#allocation3 + $0x18] sm:$0x3] }
 0x925   :  { %v2294_v20 = vpop.f32.mrf.mxu0  ;;  %v2365_v61 = vpop.f32.mrf.mxu1 }
 0x926   :  { %2156 = vst [vmem:[#allocation3 + $0x38] sm:$0xff] %v2072_v48  ;;  %2158 = vst [vmem:[#allocation3] sm:$0xff] %v2149_v1  ;;  %v2370_v56 = vadd.f32 %v2294_v20, %v2224_v50  ;;  %v2372_v46 = vadd.f32 %v2365_v61, %v2226_v26 }
 0x927   :  { %v2296_v2 = vpop.f32.mrf.mxu0  ;;  %v2367_v44 = vpop.f32.mrf.mxu1 }
 0x928   :  { %v7607_v47 = vmul.f32 -1.442695, %v2370_v56  ;;  %v2371_v24 = vadd.f32 %v2296_v2, %v2225_v63  ;;  %v7609_v43 = vmul.f32 -1.442695, %v2372_v46  ;;  %v2373_v58 = vadd.f32 %v2367_v44, %v2227_v62  ;;  %v12821_v46 = vld [vmem:[#allocation23_spill] sm:$0xff]  ;;  %v12822_v44 = vld [vmem:[#allocation24_spill] sm:$0xff] }
 0x929   :  { %v12824_v62 = vld [vmem:[#allocation26_spill] sm:$0xff] }
 0x92a   :  { %7926 = vpow2.f32 %v7607_v47  ;;  %v7608_v49 = vmul.f32 -1.442695, %v2371_v24 }
 0x92c   :  { %7928 = vpow2.f32 %v7608_v49 }
 0x92d   :  { %7930 = vpow2.f32 %v7609_v43  ;;  %v12823_v43 = vld [vmem:[#allocation25_spill] sm:$0xff] }
 0x937   :  { %v7927_v4 = vpop.eup %7926 }
 0x938   :  { %v2383_v59 = vadd.f32 1.0, %v7927_v4  ;;  %v12825_v4 = vld [vmem:[#allocation27_spill] sm:$0xff] }
 0x939   :  { %v7929_v60 = vpop.eup %7928 }
 0x93a   :  { %7932 = vrcp.f32 %v2383_v59  ;;  %v2384_v20 = vadd.f32 1.0, %v7929_v60  ;;  %v7931_v48 = vpop.eup %7930  ;;  %v12820_v60 = vld [vmem:[#allocation22_spill] sm:$0xff]  ;;  %v12827_v59 = vld [vmem:[#allocation29_spill] sm:$0xff] }
 0x93b   :  { %7934 = vtanh.f32 %v2373_v58  ;;  %v2385_v50 = vadd.f32 1.0, %v7931_v48  ;;  %v12826_v58 = vld [vmem:[#allocation28_spill] sm:$0xff]  ;;  %v12829_v48 = vld [vmem:[#allocation31_spill] sm:$0xff] }
 0x93c   :  { %7936 = vrcp.f32 %v2384_v20  ;;  %v12828_v20 = vld [vmem:[#allocation30_spill] sm:$0xff] }
 0x93d   :  { %7938 = vrcp.f32 %v2385_v50  ;;  %v12833_v50 = vld [vmem:[#allocation35_spill] sm:$0xff] }
 0x947   :  { %v7933_v2 = vpop.eup %7932 }
 0x948   :  { %v7935_v47 = vpop.eup %7934 }
 0x949   :  { %v7937_v24 = vpop.eup %7936  ;;  %v2394_v56 = vmul.f32 %v7935_v47, %v7933_v2  ;;  %v12830_v2 = vld [vmem:[#allocation32_spill] sm:$0xff]  ;;  %v12831_v47 = vld [vmem:[#allocation33_spill] sm:$0xff] }
 0x94a   :  { %v2393_v1 = vmul.f32 0.0, %v7937_v24  ;;  %v7939_v49 = vpop.eup %7938  ;;  %v12832_v24 = vld [vmem:[#allocation34_spill] sm:$0xff] }
 0x94c   :  { %v9868_v63 = vadd.f32 %v2394_v56, %v2393_v1  ;;  %v12834_v1 = vld [vmem:[#allocation36_spill] sm:$0xff]  ;;  %v12835_v56 = vld [vmem:[#allocation37_spill] sm:$0xff] }
 0x94e   :  { %7940 = vtanh.f32 %v9868_v63 }
 0x95b   :  { %v7941_v61 = vpop.eup %7940 }
 0x95c   :  { %v2397_v26 = vmul.f32 %v7941_v61, %v7939_v49  ;;  %v12836_v49 = vld [vmem:[#allocation38_spill] sm:$0xff]  ;;  %v12837_v61 = vmov 0.0  }
 0x95e   :  { %2398 = vst [vmem:[#allocation2] sm:$0x3] %v2397_v26  ;;  %2468 = vmatmul.mubr.f32.vlgmr.msra.gmra.mxu0 %v2397_v26  ;;  %2539 = vmatmul.mubr.f32.vlgmr.msra.gmra.mxu1 %v2397_v26  ;;  %v12838_v26 = vld [vmem:[#allocation43_spill] sm:$0xff] }
 0x95f   :  { %2597 = vmatpush1.msra.mxu0 %v9589_v45  ;;  %2668 = vmatpush1.msra.mxu1 %v9591_v27 }
 0x960   :  { %2598 = vmatprep.subr.mxu0 %v9595_v57  ;;  %2669 = vmatprep.subr.mxu1 %v9597_v52 }
 0x961   :  { %2599 = vmatpush1.msra.mxu0 %v9601_v53  ;;  %2670 = vmatpush1.msra.mxu1 %v9603_v3 }
 0x962   :  { %2600 = vmatprep.subr.mxu0 %v9607_v54  ;;  %2671 = vmatprep.subr.mxu1 %v9609_v5 }
 0x963   :  { %2601 = vmatpush1.msra.mxu0 %v9613_v6  ;;  %2672 = vmatpush1.msra.mxu1 %v9615_v7 }
 0x964   :  { %2602 = vmatprep.subr.mxu0 %v9619_v8  ;;  %2673 = vmatprep.subr.mxu1 %v9621_v9 }
 0x965   :  { %2603 = vmatpush1.msra.mxu0 %v9625_v10  ;;  %2674 = vmatpush1.msra.mxu1 %v9627_v11 }
 0x966   :  { %2604 = vmatprep.subr.mxu0 %v9631_v12  ;;  %2675 = vmatprep.subr.mxu1 %v9633_v13 }
 0x967   :  { %2605 = vmatpush1.msra.mxu0 %v9637_v14  ;;  %2676 = vmatpush1.msra.mxu1 %v9639_v15 }
 0x968   :  { %2606 = vmatprep.subr.mxu0 %v9643_v16  ;;  %2677 = vmatprep.subr.mxu1 %v9645_v17 }
 0x969   :  { %2607 = vmatpush1.msra.mxu0 %v9649_v18  ;;  %2678 = vmatpush1.msra.mxu1 %v9651_v19 }
 0x96a   :  { %2608 = vmatprep.subr.mxu0 %v9655_v21  ;;  %2679 = vmatprep.subr.mxu1 %v9657_v22 }
 0x96b   :  { %2609 = vmatpush1.msra.mxu0 %v9661_v23  ;;  %2680 = vmatpush1.msra.mxu1 %v9663_v25 }
 0x96c   :  { %2610 = vmatprep.subr.mxu0 %v9667_v28  ;;  %2681 = vmatprep.subr.mxu1 %v9669_v29 }
 0x96d   :  { %2611 = vmatpush1.msra.mxu0 %v9673_v30  ;;  %2682 = vmatpush1.msra.mxu1 %v9675_v31 }
 0x96e   :  { %2612 = vmatprep.subr.mxu0 %v9679_v32  ;;  %2683 = vmatprep.subr.mxu1 %v9681_v33 }
 0x96f   :  { %2613 = vmatpush1.msra.mxu0 %v9685_v34  ;;  %2684 = vmatpush1.msra.mxu1 %v9687_v35 }
 0x970   :  { %2614 = vmatprep.subr.mxu0 %v9691_v36  ;;  %2685 = vmatprep.subr.mxu1 %v9693_v37 }
 0x971   :  { %2615 = vmatpush1.msra.mxu0 %v9695_v38  ;;  %2686 = vmatpush1.msra.mxu1 %v9699_v39 }
 0x972   :  { %2616 = vmatprep.subr.mxu0 %v9701_v40  ;;  %2687 = vmatprep.subr.mxu1 %v9703_v41 }
 0x973   :  { %2617 = vmatpush1.msra.mxu0 %v9707_v42  ;;  %2688 = vmatpush1.msra.mxu1 %v12797_v51 }
 0x974   :  { %2618 = vmatprep.subr.mxu0 %v12798_v55  ;;  %2689 = vmatprep.subr.mxu1 %v12799_v0 }
 0x975   :  { %2619 = vmatpush1.msra.mxu0 %v12820_v60  ;;  %2690 = vmatpush1.msra.mxu1 %v12821_v46 }
 0x976   :  { %2620 = vmatprep.subr.mxu0 %v12822_v44  ;;  %2691 = vmatprep.subr.mxu1 %v12823_v43  ;;  %v2401_v43 = vld [vmem:[#allocation3 + $0x8] sm:$0xc] }
 0x977   :  { %2621 = vmatpush1.msra.mxu0 %v12824_v62  ;;  %2692 = vmatpush1.msra.mxu1 %v12825_v4 }
 0x978   :  { %2622 = vmatprep.subr.mxu0 %v12826_v58  ;;  %2693 = vmatprep.subr.mxu1 %v12827_v59  ;;  %v2400_v58 = vld [vmem:[#allocation3 + $0x10] sm:$0xc] }
 0x979   :  { %2623 = vmatpush1.msra.mxu0 %v12828_v20  ;;  %2694 = vmatpush1.msra.mxu1 %v12829_v48  ;;  %v12839_v48 = vld [vmem:[#allocation17_spill] sm:$0xff]  ;;  %v2399_v20 = vld [vmem:[#allocation3 + $0x28] sm:$0xc] }
 0x97a   :  { %2624 = vmatprep.subr.mxu0 %v12830_v2  ;;  %2695 = vmatprep.subr.mxu1 %v12831_v47  ;;  %v12840_v2 = vld [vmem:[#allocation18_spill] sm:$0xff] }
 0x97b   :  { %2625 = vmatpush1.msra.mxu0 %v12832_v24  ;;  %2696 = vmatpush1.msra.mxu1 %v12833_v50 }
 0x97c   :  { %2626 = vmatprep.subr.mxu0 %v12834_v1  ;;  %2697 = vmatprep.subr.mxu1 %v12835_v56 }
 0x97d   :  { %2627 = vmatpush1.msra.mxu0 %v12836_v49  ;;  %2660 = vmatprep.mubr.f32.mxu0 %v12837_v61 }
 0x97e   :  { %2698 = vmatpush1.msra.mxu1 %v12838_v26  ;;  %2731 = vmatprep.mubr.f32.mxu1 %v12837_v61 }
 0x97f   :  { %2789 = vmatprep.subr.mxu0 %v12839_v48  ;;  %2860 = vmatprep.subr.mxu1 %v12840_v2  ;;  %v2402_v2 = vld [vmem:[#allocation3 + $0x18] sm:$0xc] }
 0xa1e   :  { %v2469_v47 = vpop.f32.mrf.mxu0  ;;  %v2540_v49 = vpop.f32.mrf.mxu1 }
 0xa1f   :  { %v2549_v24 = vrot.slane %v2469_v47, 6  ;;  %v2551_v26 = vrot.slane %v2540_v49, 6 }
 0xa20   :  { %v2471_v50 = vpop.f32.mrf.mxu0  ;;  %v2542_v61 = vpop.f32.mrf.mxu1 }
 0xa21   :  { %v2557_v59 = vadd.f32 %v2549_v24, %v2399_v20  ;;  %v2550_v1 = vrot.slane %v2471_v50, 6  ;;  %v2559_v44 = vadd.f32 %v2551_v26, %v2401_v43  ;;  %v2552_v48 = vrot.slane %v2542_v61, 6 }
 0xa23   :  { %v7610_v56 = vmul.f32 -1.442695, %v2557_v59  ;;  %v2558_v4 = vadd.f32 %v2550_v1, %v2400_v58  ;;  %v7612_v46 = vmul.f32 -1.442695, %v2559_v44  ;;  %v2560_v47 = vadd.f32 %v2552_v48, %v2402_v2  ;;  %v2590_v48 = vld [vmem:[#allocation3 + $0x10] sm:$0x30] }
 0xa25   :  { %7942 = vpow2.f32 %v7610_v56  ;;  %v7611_v62 = vmul.f32 -1.442695, %v2558_v4 }
 0xa27   :  { %7944 = vpow2.f32 %v7611_v62  ;;  %v2581_v62 = vrot.slane %v9868_v63, 6 }
 0xa28   :  { %7946 = vpow2.f32 %v7612_v46 }
 0xa32   :  { %v7943_v60 = vpop.eup %7942 }
 0xa33   :  { %v2570_v0 = vadd.f32 1.0, %v7943_v60 }
 0xa34   :  { %v7945_v55 = vpop.eup %7944 }
 0xa35   :  { %7948 = vrcp.f32 %v2570_v0  ;;  %v2571_v20 = vadd.f32 1.0, %v7945_v55  ;;  %v7947_v58 = vpop.eup %7946 }
 0xa36   :  { %7950 = vtanh.f32 %v2560_v47  ;;  %v2572_v50 = vadd.f32 1.0, %v7947_v58  ;;  %v2591_v47 = vld [vmem:[#allocation3 + $0x8] sm:$0x30] }
 0xa37   :  { %7952 = vrcp.f32 %v2571_v20 }
 0xa38   :  { %7954 = vrcp.f32 %v2572_v50 }
 0xa42   :  { %v7949_v59 = vpop.eup %7948 }
 0xa43   :  { %v7951_v4 = vpop.eup %7950 }
 0xa44   :  { %v7953_v24 = vpop.eup %7952  ;;  %v2584_v1 = vmul.f32 %v7951_v4, %v7949_v59 }
 0xa45   :  { %v2583_v43 = vmul.f32 %v7953_v24, %v2581_v62  ;;  %v7955_v60 = vpop.eup %7954  ;;  %v2592_v62 = vld [vmem:[#allocation3 + $0x18] sm:$0x30] }
 0xa47   :  { %v9938_v44 = vadd.f32 %v2584_v1, %v2583_v43 }
 0xa49   :  { %7956 = vtanh.f32 %v9938_v44 }
 0xa56   :  { %v7957_v46 = vpop.eup %7956 }
 0xa57   :  { %v2587_v0 = vmul.f32 %v7957_v46, %v7955_v60 }
 0xa59   :  { %2588 = vst [vmem:[#allocation2] sm:$0xc] %v2587_v0  ;;  %v2594_v55 = vrot.slane %v2587_v0, 2 }
 0xa5b   :  { %2661 = vmatmul.mubr.f32.vlgmr.msra.gmra.mxu0 %v2594_v55  ;;  %2732 = vmatmul.mubr.f32.vlgmr.msra.gmra.mxu1 %v2594_v55 }
 0xa5c   :  { %2790 = vmatpush1.msra.mxu0 %v9589_v45  ;;  %2861 = vmatpush1.msra.mxu1 %v9591_v27  ;;  %v12841_v45 = vld [vmem:[#allocation20_spill] sm:$0xff]  ;;  %v12842_v27 = vld [vmem:[#allocation21_spill] sm:$0xff] }
 0xa5d   :  { %2791 = vmatprep.subr.mxu0 %v9595_v57  ;;  %2862 = vmatprep.subr.mxu1 %v9597_v52  ;;  %v12843_v57 = vld [vmem:[#allocation22_spill] sm:$0xff]  ;;  %v12844_v52 = vld [vmem:[#allocation23_spill] sm:$0xff] }
 0xa5e   :  { %2792 = vmatpush1.msra.mxu0 %v9601_v53  ;;  %2863 = vmatpush1.msra.mxu1 %v9603_v3  ;;  %v12845_v53 = vld [vmem:[#allocation24_spill] sm:$0xff]  ;;  %v12846_v3 = vld [vmem:[#allocation25_spill] sm:$0xff] }
 0xa5f   :  { %2793 = vmatprep.subr.mxu0 %v9607_v54  ;;  %2864 = vmatprep.subr.mxu1 %v9609_v5  ;;  %v12847_v54 = vld [vmem:[#allocation26_spill] sm:$0xff]  ;;  %v12848_v5 = vld [vmem:[#allocation27_spill] sm:$0xff] }
 0xa60   :  { %2794 = vmatpush1.msra.mxu0 %v9613_v6  ;;  %2865 = vmatpush1.msra.mxu1 %v9615_v7  ;;  %v12849_v6 = vld [vmem:[#allocation28_spill] sm:$0xff]  ;;  %v12850_v7 = vld [vmem:[#allocation29_spill] sm:$0xff] }
 0xa61   :  { %2795 = vmatprep.subr.mxu0 %v9619_v8  ;;  %2866 = vmatprep.subr.mxu1 %v9621_v9  ;;  %v12851_v8 = vld [vmem:[#allocation30_spill] sm:$0xff]  ;;  %v12852_v9 = vld [vmem:[#allocation31_spill] sm:$0xff] }
 0xa62   :  { %2796 = vmatpush1.msra.mxu0 %v9625_v10  ;;  %2867 = vmatpush1.msra.mxu1 %v9627_v11  ;;  %v12853_v10 = vld [vmem:[#allocation32_spill] sm:$0xff]  ;;  %v12854_v11 = vld [vmem:[#allocation33_spill] sm:$0xff] }
 0xa63   :  { %2797 = vmatprep.subr.mxu0 %v9631_v12  ;;  %2868 = vmatprep.subr.mxu1 %v9633_v13  ;;  %v12855_v12 = vld [vmem:[#allocation34_spill] sm:$0xff]  ;;  %v12856_v13 = vld [vmem:[#allocation35_spill] sm:$0xff] }
 0xa64   :  { %2798 = vmatpush1.msra.mxu0 %v9637_v14  ;;  %2869 = vmatpush1.msra.mxu1 %v9639_v15  ;;  %v12857_v14 = vld [vmem:[#allocation36_spill] sm:$0xff]  ;;  %v12858_v15 = vld [vmem:[#allocation37_spill] sm:$0xff] }
 0xa65   :  { %2799 = vmatprep.subr.mxu0 %v9643_v16  ;;  %2870 = vmatprep.subr.mxu1 %v9645_v17  ;;  %v12859_v16 = vld [vmem:[#allocation38_spill] sm:$0xff]  ;;  %v12860_v17 = vmov 0.0  }
 0xa66   :  { %2800 = vmatpush1.msra.mxu0 %v9649_v18  ;;  %2871 = vmatpush1.msra.mxu1 %v9651_v19  ;;  %v12861_v18 = vld [vmem:[#allocation43_spill] sm:$0xff]  ;;  %v12862_v19 = vld [vmem:[#allocation17_spill] sm:$0xff] }
 0xa67   :  { %2801 = vmatprep.subr.mxu0 %v9655_v21  ;;  %2872 = vmatprep.subr.mxu1 %v9657_v22  ;;  %v12863_v21 = vld [vmem:[#allocation18_spill] sm:$0xff] }
 0xa68   :  { %2802 = vmatpush1.msra.mxu0 %v9661_v23  ;;  %2873 = vmatpush1.msra.mxu1 %v9663_v25  ;;  %v2589_v25 = vld [vmem:[#allocation3 + $0x28] sm:$0x30] }
 0xa69   :  { %2803 = vmatprep.subr.mxu0 %v9667_v28  ;;  %2874 = vmatprep.subr.mxu1 %v9669_v29 }
 0xa6a   :  { %2804 = vmatpush1.msra.mxu0 %v9673_v30  ;;  %2875 = vmatpush1.msra.mxu1 %v9675_v31 }
 0xa6b   :  { %2805 = vmatprep.subr.mxu0 %v9679_v32  ;;  %2876 = vmatprep.subr.mxu1 %v9681_v33 }
 0xa6c   :  { %2806 = vmatpush1.msra.mxu0 %v9685_v34  ;;  %2877 = vmatpush1.msra.mxu1 %v9687_v35 }
 0xa6d   :  { %2807 = vmatprep.subr.mxu0 %v9691_v36  ;;  %2878 = vmatprep.subr.mxu1 %v9693_v37 }
 0xa6e   :  { %2808 = vmatpush1.msra.mxu0 %v9695_v38  ;;  %2879 = vmatpush1.msra.mxu1 %v9699_v39 }
 0xa6f   :  { %2809 = vmatprep.subr.mxu0 %v9701_v40  ;;  %2880 = vmatprep.subr.mxu1 %v9703_v41 }
 0xa70   :  { %2810 = vmatpush1.msra.mxu0 %v9707_v42  ;;  %2881 = vmatpush1.msra.mxu1 %v12797_v51 }
 0xa71   :  { %2811 = vmatprep.subr.mxu0 %v12841_v45  ;;  %2882 = vmatprep.subr.mxu1 %v12842_v27 }
 0xa72   :  { %2812 = vmatpush1.msra.mxu0 %v12843_v57  ;;  %2883 = vmatpush1.msra.mxu1 %v12844_v52 }
 0xa73   :  { %2813 = vmatprep.subr.mxu0 %v12845_v53  ;;  %2884 = vmatprep.subr.mxu1 %v12846_v3 }
 0xa74   :  { %2814 = vmatpush1.msra.mxu0 %v12847_v54  ;;  %2885 = vmatpush1.msra.mxu1 %v12848_v5 }
 0xa75   :  { %2815 = vmatprep.subr.mxu0 %v12849_v6  ;;  %2886 = vmatprep.subr.mxu1 %v12850_v7 }
 0xa76   :  { %2816 = vmatpush1.msra.mxu0 %v12851_v8  ;;  %2887 = vmatpush1.msra.mxu1 %v12852_v9 }
 0xa77   :  { %2817 = vmatprep.subr.mxu0 %v12853_v10  ;;  %2888 = vmatprep.subr.mxu1 %v12854_v11 }
 0xa78   :  { %2818 = vmatpush1.msra.mxu0 %v12855_v12  ;;  %2889 = vmatpush1.msra.mxu1 %v12856_v13 }
 0xa79   :  { %2819 = vmatprep.subr.mxu0 %v12857_v14  ;;  %2890 = vmatprep.subr.mxu1 %v12858_v15 }
 0xa7a   :  { %2820 = vmatpush1.msra.mxu0 %v12859_v16  ;;  %2853 = vmatprep.mubr.f32.mxu0 %v12860_v17 }
 0xa7b   :  { %2891 = vmatpush1.msra.mxu1 %v12861_v18  ;;  %2924 = vmatprep.mubr.f32.mxu1 %v12860_v17 }
 0xa7c   :  { %2982 = vmatprep.subr.mxu0 %v12862_v19  ;;  %3053 = vmatprep.subr.mxu1 %v12863_v21  ;;  %v2774_v19 = vrot.slane %v9938_v44, 6  ;;  %v10014_v44 = vld [vmem:[#allocation9 + $0x3f0] sm:$0xff] }
 0xb1b   :  { %v2662_v22 = vpop.f32.mrf.mxu0  ;;  %v2733_v49 = vpop.f32.mrf.mxu1 }
 0xb1c   :  { %v2742_v23 = vrot.slane %v2662_v22, 4  ;;  %v2744_v26 = vrot.slane %v2733_v49, 4  ;;  %v10017_v49 = vld [vmem:[#allocation9 + $0x3c8] sm:$0xff] }
 0xb1d   :  { %v2664_v28 = vpop.f32.mrf.mxu0  ;;  %v2735_v20 = vpop.f32.mrf.mxu1 }
 0xb1e   :  { %v2750_v29 = vadd.f32 %v2742_v23, %v2589_v25  ;;  %v2743_v63 = vrot.slane %v2664_v28, 4  ;;  %v2752_v58 = vadd.f32 %v2744_v26, %v2591_v47  ;;  %v2745_v59 = vrot.slane %v2735_v20, 4  ;;  %v10023_v26 = vld [vmem:[#allocation9 + $0x3c0] sm:$0xff]  ;;  %v10026_v47 = vld [vmem:[#allocation9 + $0x3d0] sm:$0xff]  ;;  %v10029_v20 = vld [vmem:[#allocation9 + $0x3a8] sm:$0xff] }
 0xb20   :  { %v7613_v2 = vmul.f32 -1.442695, %v2750_v29  ;;  %v2751_v56 = vadd.f32 %v2743_v63, %v2590_v48  ;;  %v7615_v4 = vmul.f32 -1.442695, %v2752_v58  ;;  %v2753_v50 = vadd.f32 %v2745_v59, %v2592_v62  ;;  %v10032_v58 = vld [vmem:[#allocation9 + $0x3b8] sm:$0xff]  ;;  %v10035_v59 = vld [vmem:[#allocation9 + $0x3a0] sm:$0xff] }
 0xb21   :  { %v10041_v62 = vld [vmem:[#allocation9 + $0x388] sm:$0xff] }
 0xb22   :  { %7958 = vpow2.f32 %v7613_v2  ;;  %v7614_v61 = vmul.f32 -1.442695, %v2751_v56  ;;  %v10011_v56 = vld [vmem:[#allocation9 + $0x3e0] sm:$0xff] }
 0xb24   :  { %7960 = vpow2.f32 %v7614_v61  ;;  %v10020_v61 = vld [vmem:[#allocation9 + $0x3d8] sm:$0xff] }
 0xb25   :  { %7962 = vpow2.f32 %v7615_v4  ;;  %v10038_v4 = vld [vmem:[#allocation9 + $0x3b0] sm:$0xff] }
 0xb2f   :  { %v7959_v24 = vpop.eup %7958 }
 0xb30   :  { %v2763_v43 = vadd.f32 1.0, %v7959_v24  ;;  %v10044_v24 = vld [vmem:[#allocation9 + $0x398] sm:$0xff] }
 0xb31   :  { %v7961_v1 = vpop.eup %7960 }
 0xb32   :  { %7964 = vrcp.f32 %v2763_v43  ;;  %v2764_v60 = vadd.f32 1.0, %v7961_v1  ;;  %v7963_v46 = vpop.eup %7962  ;;  %v10050_v43 = vld [vmem:[#allocation9 + $0x390] sm:$0xff]  ;;  %v10053_v1 = vld [vmem:[#allocation9 + $0x368] sm:$0xff] }
 0xb33   :  { %7966 = vtanh.f32 %v2753_v50  ;;  %v2765_v22 = vadd.f32 1.0, %v7963_v46  ;;  %v10047_v50 = vld [vmem:[#allocation9 + $0x380] sm:$0xff] }
 0xb34   :  { %7968 = vrcp.f32 %v2764_v60  ;;  %v10056_v60 = vld [vmem:[#allocation9 + $0x378] sm:$0xff]  ;;  %v10059_v46 = vld [vmem:[#allocation9 + $0x360] sm:$0xff] }
 0xb35   :  { %7970 = vrcp.f32 %v2765_v22  ;;  %v10074_v22 = vld [vmem:[#allocation9 + $0x350] sm:$0xff] }
 0xb3f   :  { %v7965_v0 = vpop.eup %7964 }
 0xb40   :  { %v7967_v55 = vpop.eup %7966 }
 0xb41   :  { %v7969_v21 = vpop.eup %7968  ;;  %v2777_v25 = vmul.f32 %v7967_v55, %v7965_v0  ;;  %v10062_v0 = vld [vmem:[#allocation9 + $0x370] sm:$0xff]  ;;  %v10065_v55 = vld [vmem:[#allocation9 + $0x348] sm:$0xff] }
 0xb42   :  { %v2776_v23 = vmul.f32 %v7969_v21, %v2774_v19  ;;  %v7971_v29 = vpop.eup %7970  ;;  %v10068_v19 = vld [vmem:[#allocation9 + $0x358] sm:$0xff]  ;;  %v10071_v21 = vld [vmem:[#allocation9 + $0x340] sm:$0xff] }
 0xb44   :  { %v10008_v28 = vadd.f32 %v2777_v25, %v2776_v23  ;;  %v10077_v23 = vld [vmem:[#allocation9 + $0x328] sm:$0xff]  ;;  %v10080_v25 = vld [vmem:[#allocation9 + $0x338] sm:$0xff] }
 0xb46   :  { %7972 = vtanh.f32 %v10008_v28 }
 0xb53   :  { %v7973_v63 = vpop.eup %7972 }
 0xb54   :  { %v2780_v48 = vmul.f32 %v7973_v63, %v7971_v29  ;;  %v10083_v29 = vld [vmem:[#allocation9 + $0x320] sm:$0xff]  ;;  %v10086_v63 = vld [vmem:[#allocation9 + $0x330] sm:$0xff] }
 0xb56   :  { %2781 = vst [vmem:[#allocation2] sm:$0x30] %v2780_v48  ;;  %v2787_v2 = vrot.slane %v2780_v48, 4  ;;  %v10089_v48 = vld [vmem:[#allocation9 + $0x308] sm:$0xff] }
 0xb58   :  { %2854 = vmatmul.mubr.f32.vlgmr.msra.gmra.mxu0 %v2787_v2  ;;  %2925 = vmatmul.mubr.f32.vlgmr.msra.gmra.mxu1 %v2787_v2  ;;  %v10092_v2 = vld [vmem:[#allocation9 + $0x318] sm:$0xff] }
 0xb59   :  { %2983 = vmatpush1.msra.mxu0 %v10011_v56  ;;  %3054 = vmatpush1.msra.mxu1 %v10014_v44 }
 0xb5a   :  { %2984 = vmatprep.subr.mxu0 %v10017_v49  ;;  %3055 = vmatprep.subr.mxu1 %v10020_v61 }
 0xb5b   :  { %2985 = vmatpush1.msra.mxu0 %v10023_v26  ;;  %3056 = vmatpush1.msra.mxu1 %v10026_v47 }
 0xb5c   :  { %2986 = vmatprep.subr.mxu0 %v10029_v20  ;;  %3057 = vmatprep.subr.mxu1 %v10032_v58 }
 0xb5d   :  { %2987 = vmatpush1.msra.mxu0 %v10035_v59  ;;  %3058 = vmatpush1.msra.mxu1 %v10038_v4 }
 0xb5e   :  { %2988 = vmatprep.subr.mxu0 %v10041_v62  ;;  %3059 = vmatprep.subr.mxu1 %v10044_v24 }
 0xb5f   :  { %2989 = vmatpush1.msra.mxu0 %v10047_v50  ;;  %3060 = vmatpush1.msra.mxu1 %v10050_v43 }
 0xb60   :  { %2990 = vmatprep.subr.mxu0 %v10053_v1  ;;  %3061 = vmatprep.subr.mxu1 %v10056_v60 }
 0xb61   :  { %2991 = vmatpush1.msra.mxu0 %v10059_v46  ;;  %3062 = vmatpush1.msra.mxu1 %v10062_v0 }
 0xb62   :  { %2992 = vmatprep.subr.mxu0 %v10065_v55  ;;  %3063 = vmatprep.subr.mxu1 %v10068_v19 }
 0xb63   :  { %2993 = vmatpush1.msra.mxu0 %v10071_v21  ;;  %3064 = vmatpush1.msra.mxu1 %v10074_v22 }
 0xb64   :  { %2994 = vmatprep.subr.mxu0 %v10077_v23  ;;  %3065 = vmatprep.subr.mxu1 %v10080_v25 }
 0xb65   :  { %2995 = vmatpush1.msra.mxu0 %v10083_v29  ;;  %3066 = vmatpush1.msra.mxu1 %v10086_v63 }
 0xb66   :  { %2996 = vmatprep.subr.mxu0 %v10089_v48  ;;  %3067 = vmatprep.subr.mxu1 %v10092_v2 }
 0xb67   :  { %2997 = vmatpush1.msra.mxu0 %v9673_v30  ;;  %3068 = vmatpush1.msra.mxu1 %v9675_v31  ;;  %v10131_v30 = vld [vmem:[#allocation9 + $0x3e8] sm:$0xff]  ;;  %v10134_v31 = vld [vmem:[#allocation9 + $0x3f8] sm:$0xff] }
 0xb68   :  { %2998 = vmatprep.subr.mxu0 %v9679_v32  ;;  %3069 = vmatprep.subr.mxu1 %v9681_v33  ;;  %12864 = vst [vmem:[#allocation19_spill] sm:$0xff] %v10131_v30  ;;  %12865 = vst [vmem:[#allocation20_spill] sm:$0xff] %v10134_v31 }
 0xb69   :  { %2999 = vmatpush1.msra.mxu0 %v9685_v34  ;;  %3070 = vmatpush1.msra.mxu1 %v9687_v35  ;;  %v2782_v34 = vld [vmem:[#allocation3 + $0x28] sm:$0xc0] }
 0xb6a   :  { %3000 = vmatprep.subr.mxu0 %v9691_v36  ;;  %3071 = vmatprep.subr.mxu1 %v9693_v37 }
 0xb6b   :  { %3001 = vmatpush1.msra.mxu0 %v9695_v38  ;;  %3072 = vmatpush1.msra.mxu1 %v9699_v39  ;;  %v2783_v38 = vld [vmem:[#allocation3 + $0x10] sm:$0xc0] }
 0xb6c   :  { %3002 = vmatprep.subr.mxu0 %v9701_v40  ;;  %3073 = vmatprep.subr.mxu1 %v9703_v41 }
 0xb6d   :  { %3003 = vmatpush1.msra.mxu0 %v9707_v42  ;;  %3074 = vmatpush1.msra.mxu1 %v12797_v51 }
 0xb6e   :  { %3004 = vmatprep.subr.mxu0 %v12841_v45  ;;  %3075 = vmatprep.subr.mxu1 %v12842_v27  ;;  %v2784_v45 = vld [vmem:[#allocation3 + $0x8] sm:$0xc0] }
 0xb6f   :  { %3005 = vmatpush1.msra.mxu0 %v12843_v57  ;;  %3076 = vmatpush1.msra.mxu1 %v12844_v52 }
 0xb70   :  { %3006 = vmatprep.subr.mxu0 %v12845_v53  ;;  %3077 = vmatprep.subr.mxu1 %v12846_v3  ;;  %v2785_v3 = vld [vmem:[#allocation3 + $0x18] sm:$0xc0] }
 0xb71   :  { %3007 = vmatpush1.msra.mxu0 %v12847_v54  ;;  %3078 = vmatpush1.msra.mxu1 %v12848_v5 }
 0xb72   :  { %3008 = vmatprep.subr.mxu0 %v12849_v6  ;;  %3079 = vmatprep.subr.mxu1 %v12850_v7 }
 0xb73   :  { %3009 = vmatpush1.msra.mxu0 %v12851_v8  ;;  %3080 = vmatpush1.msra.mxu1 %v12852_v9 }
 0xb74   :  { %3010 = vmatprep.subr.mxu0 %v12853_v10  ;;  %3081 = vmatprep.subr.mxu1 %v12854_v11 }
 0xb75   :  { %3011 = vmatpush1.msra.mxu0 %v12855_v12  ;;  %3082 = vmatpush1.msra.mxu1 %v12856_v13  ;;  %v2967_v12 = vrot.slane %v10008_v28, 6  ;;  %v10169_v28 = vld [vmem:[#allocation9 + $0x300] sm:$0xff] }
 0xb76   :  { %3012 = vmatprep.subr.mxu0 %v12857_v14  ;;  %3083 = vmatprep.subr.mxu1 %v12858_v15 }
 0xb77   :  { %3013 = vmatpush1.msra.mxu0 %v12859_v16  ;;  %3046 = vmatprep.mubr.f32.mxu0 %v12860_v17 }
 0xb78   :  { %3084 = vmatpush1.msra.mxu1 %v12861_v18  ;;  %3117 = vmatprep.mubr.f32.mxu1 %v12860_v17 }
 0xb79   :  { %3160 = vmatprep.subr.mxu0 %v10131_v30  ;;  %3231 = vmatprep.subr.mxu1 %v10134_v31 }
 0xc18   :  { %v2855_v32 = vpop.f32.mrf.mxu0  ;;  %v2926_v41 = vpop.f32.mrf.mxu1 }
 0xc19   :  { %v2935_v33 = vrot.slane %v2855_v32, 2  ;;  %v2937_v51 = vrot.slane %v2926_v41, 2  ;;  %v10187_v41 = vld [vmem:[#allocation9 + $0x2c8] sm:$0xff] }
 0xc1a   :  { %v2857_v35 = vpop.f32.mrf.mxu0  ;;  %v2928_v27 = vpop.f32.mrf.mxu1 }
 0xc1b   :  { %v2943_v36 = vadd.f32 %v2935_v33, %v2782_v34  ;;  %v2936_v37 = vrot.slane %v2857_v35, 2  ;;  %v2945_v57 = vadd.f32 %v2937_v51, %v2784_v45  ;;  %v2938_v52 = vrot.slane %v2928_v27, 2  ;;  %v10193_v51 = vld [vmem:[#allocation9 + $0x2c0] sm:$0xff]  ;;  %v10196_v45 = vld [vmem:[#allocation9 + $0x2d0] sm:$0xff]  ;;  %v10199_v27 = vld [vmem:[#allocation9 + $0x2a8] sm:$0xff] }
 0xc1d   :  { %v7616_v39 = vmul.f32 -1.442695, %v2943_v36  ;;  %v2944_v40 = vadd.f32 %v2936_v37, %v2783_v38  ;;  %v7618_v53 = vmul.f32 -1.442695, %v2945_v57  ;;  %v2946_v5 = vadd.f32 %v2938_v52, %v2785_v3  ;;  %v10172_v36 = vld [vmem:[#allocation9 + $0x310] sm:$0xff]  ;;  %v10175_v37 = vld [vmem:[#allocation9 + $0x2e8] sm:$0xff] }
 0xc1e   :  { %v10178_v38 = vld [vmem:[#allocation9 + $0x2f8] sm:$0xff]  ;;  %v10205_v52 = vld [vmem:[#allocation9 + $0x2a0] sm:$0xff]  ;;  %v10211_v3 = vld [vmem:[#allocation9 + $0x288] sm:$0xff] }
 0xc1f   :  { %7974 = vpow2.f32 %v7616_v39  ;;  %v7617_v42 = vmul.f32 -1.442695, %v2944_v40  ;;  %v10181_v39 = vld [vmem:[#allocation9 + $0x2e0] sm:$0xff]  ;;  %v10184_v40 = vld [vmem:[#allocation9 + $0x2f0] sm:$0xff]  ;;  %v10202_v57 = vld [vmem:[#allocation9 + $0x2b8] sm:$0xff]  ;;  %12866 = vst [vmem:[#allocation21_spill] sm:$0xff] %v10211_v3 }
 0xc21   :  { %7976 = vpow2.f32 %v7617_v42  ;;  %v10190_v42 = vld [vmem:[#allocation9 + $0x2d8] sm:$0xff] }
 0xc22   :  { %7978 = vpow2.f32 %v7618_v53  ;;  %v10208_v53 = vld [vmem:[#allocation9 + $0x2b0] sm:$0xff] }
 0xc2c   :  { %v7975_v54 = vpop.eup %7974 }
 0xc2d   :  { %v2956_v6 = vadd.f32 1.0, %v7975_v54  ;;  %v10214_v54 = vld [vmem:[#allocation9 + $0x298] sm:$0xff] }
 0xc2e   :  { %v7977_v7 = vpop.eup %7976  ;;  %12867 = vst [vmem:[#allocation22_spill] sm:$0xff] %v10214_v54 }
 0xc2f   :  { %7980 = vrcp.f32 %v2956_v6  ;;  %v2957_v8 = vadd.f32 1.0, %v7977_v7  ;;  %v7979_v9 = vpop.eup %7978  ;;  %v10220_v6 = vld [vmem:[#allocation9 + $0x290] sm:$0xff]  ;;  %v10223_v7 = vld [vmem:[#allocation9 + $0x268] sm:$0xff] }
 0xc30   :  { %7982 = vtanh.f32 %v2946_v5  ;;  %v2958_v14 = vadd.f32 1.0, %v7979_v9  ;;  %v10217_v5 = vld [vmem:[#allocation9 + $0x280] sm:$0xff]  ;;  %12869 = vst [vmem:[#allocation24_spill] sm:$0xff] %v10220_v6  ;;  %12870 = vst [vmem:[#allocation25_spill] sm:$0xff] %v10223_v7 }
 0xc31   :  { %7984 = vrcp.f32 %v2957_v8  ;;  %12868 = vst [vmem:[#allocation23_spill] sm:$0xff] %v10217_v5  ;;  %v10226_v8 = vld [vmem:[#allocation9 + $0x278] sm:$0xff]  ;;  %v10229_v9 = vld [vmem:[#allocation9 + $0x260] sm:$0xff] }
 0xc32   :  { %7986 = vrcp.f32 %v2958_v14  ;;  %12871 = vst [vmem:[#allocation26_spill] sm:$0xff] %v10226_v8  ;;  %12872 = vst [vmem:[#allocation27_spill] sm:$0xff] %v10229_v9  ;;  %v10244_v14 = vld [vmem:[#allocation9 + $0x250] sm:$0xff] }
 0xc33   :  { %12877 = vst [vmem:[#allocation32_spill] sm:$0xff] %v10244_v14 }
 0xc3c   :  { %v7981_v10 = vpop.eup %7980 }
 0xc3d   :  { %v7983_v11 = vpop.eup %7982 }
 0xc3e   :  { %v7985_v13 = vpop.eup %7984  ;;  %v2970_v16 = vmul.f32 %v7983_v11, %v7981_v10  ;;  %v10232_v10 = vld [vmem:[#allocation9 + $0x270] sm:$0xff]  ;;  %v10235_v11 = vld [vmem:[#allocation9 + $0x248] sm:$0xff] }
 0xc3f   :  { %v2969_v15 = vmul.f32 %v7985_v13, %v2967_v12  ;;  %v7987_v32 = vpop.eup %7986  ;;  %12873 = vst [vmem:[#allocation28_spill] sm:$0xff] %v10232_v10  ;;  %12874 = vst [vmem:[#allocation29_spill] sm:$0xff] %v10235_v11  ;;  %v10238_v12 = vld [vmem:[#allocation9 + $0x258] sm:$0xff]  ;;  %v10241_v13 = vld [vmem:[#allocation9 + $0x240] sm:$0xff] }
 0xc40   :  { %12875 = vst [vmem:[#allocation30_spill] sm:$0xff] %v10238_v12  ;;  %12876 = vst [vmem:[#allocation31_spill] sm:$0xff] %v10241_v13 }
 0xc41   :  { %v10138_v18 = vadd.f32 %v2970_v16, %v2969_v15  ;;  %v10247_v15 = vld [vmem:[#allocation9 + $0x228] sm:$0xff]  ;;  %v10250_v16 = vld [vmem:[#allocation9 + $0x238] sm:$0xff] }
 0xc42   :  { %12878 = vst [vmem:[#allocation33_spill] sm:$0xff] %v10247_v15  ;;  %12879 = vst [vmem:[#allocation34_spill] sm:$0xff] %v10250_v16 }
 0xc43   :  { %7988 = vtanh.f32 %v10138_v18 }
 0xc50   :  { %v7989_v33 = vpop.eup %7988 }
 0xc51   :  { %v2973_v34 = vmul.f32 %v7989_v33, %v7987_v32  ;;  %v10253_v32 = vld [vmem:[#allocation9 + $0x220] sm:$0xff]  ;;  %v10256_v33 = vld [vmem:[#allocation9 + $0x230] sm:$0xff] }
 0xc52   :  { %12880 = vst [vmem:[#allocation35_spill] sm:$0xff] %v10253_v32  ;;  %12881 = vst [vmem:[#allocation36_spill] sm:$0xff] %v10256_v33 }
 0xc53   :  { %2974 = vst [vmem:[#allocation2] sm:$0xc0] %v2973_v34  ;;  %v2980_v35 = vrot.slane %v2973_v34, 6  ;;  %v10259_v34 = vld [vmem:[#allocation9 + $0x208] sm:$0xff] }
 0xc54   :  { %12882 = vst [vmem:[#allocation37_spill] sm:$0xff] %v10259_v34 }
 0xc55   :  { %3047 = vmatmul.mubr.f32.vlgmr.msra.gmra.mxu0 %v2980_v35  ;;  %3118 = vmatmul.mubr.f32.vlgmr.msra.gmra.mxu1 %v2980_v35  ;;  %v10262_v35 = vld [vmem:[#allocation9 + $0x218] sm:$0xff] }
 0xc56   :  { %3161 = vmatpush1.msra.mxu0 %v10011_v56  ;;  %3232 = vmatpush1.msra.mxu1 %v10014_v44  ;;  %12883 = vst [vmem:[#allocation38_spill] sm:$0xff] %v10262_v35 }
 0xc57   :  { %3162 = vmatprep.subr.mxu0 %v10017_v49  ;;  %3233 = vmatprep.subr.mxu1 %v10020_v61 }
 0xc58   :  { %3163 = vmatpush1.msra.mxu0 %v10023_v26  ;;  %3234 = vmatpush1.msra.mxu1 %v10026_v47 }
 0xc59   :  { %3164 = vmatprep.subr.mxu0 %v10029_v20  ;;  %3235 = vmatprep.subr.mxu1 %v10032_v58 }
 0xc5a   :  { %3165 = vmatpush1.msra.mxu0 %v10035_v59  ;;  %3236 = vmatpush1.msra.mxu1 %v10038_v4 }
 0xc5b   :  { %3166 = vmatprep.subr.mxu0 %v10041_v62  ;;  %3237 = vmatprep.subr.mxu1 %v10044_v24 }
 0xc5c   :  { %3167 = vmatpush1.msra.mxu0 %v10047_v50  ;;  %3238 = vmatpush1.msra.mxu1 %v10050_v43 }
 0xc5d   :  { %3168 = vmatprep.subr.mxu0 %v10053_v1  ;;  %3239 = vmatprep.subr.mxu1 %v10056_v60 }
 0xc5e   :  { %3169 = vmatpush1.msra.mxu0 %v10059_v46  ;;  %3240 = vmatpush1.msra.mxu1 %v10062_v0 }
 0xc5f   :  { %3170 = vmatprep.subr.mxu0 %v10065_v55  ;;  %3241 = vmatprep.subr.mxu1 %v10068_v19 }
 0xc60   :  { %3171 = vmatpush1.msra.mxu0 %v10071_v21  ;;  %3242 = vmatpush1.msra.mxu1 %v10074_v22 }
 0xc61   :  { %3172 = vmatprep.subr.mxu0 %v10077_v23  ;;  %3243 = vmatprep.subr.mxu1 %v10080_v25 }
 0xc62   :  { %3173 = vmatpush1.msra.mxu0 %v10083_v29  ;;  %3244 = vmatpush1.msra.mxu1 %v10086_v63 }
 0xc63   :  { %3174 = vmatprep.subr.mxu0 %v10089_v48  ;;  %3245 = vmatprep.subr.mxu1 %v10092_v2 }
 0xc64   :  { %3175 = vmatpush1.msra.mxu0 %v10169_v28  ;;  %3246 = vmatpush1.msra.mxu1 %v10172_v36 }
 0xc65   :  { %3176 = vmatprep.subr.mxu0 %v10175_v37  ;;  %3247 = vmatprep.subr.mxu1 %v10178_v38 }
 0xc66   :  { %3177 = vmatpush1.msra.mxu0 %v10181_v39  ;;  %3248 = vmatpush1.msra.mxu1 %v10184_v40 }
 0xc67   :  { %3178 = vmatprep.subr.mxu0 %v10187_v41  ;;  %3249 = vmatprep.subr.mxu1 %v10190_v42 }
 0xc68   :  { %3179 = vmatpush1.msra.mxu0 %v10193_v51  ;;  %3250 = vmatpush1.msra.mxu1 %v10196_v45 }
 0xc69   :  { %3180 = vmatprep.subr.mxu0 %v10199_v27  ;;  %3251 = vmatprep.subr.mxu1 %v10202_v57 }
 0xc6a   :  { %3181 = vmatpush1.msra.mxu0 %v10205_v52  ;;  %3252 = vmatpush1.msra.mxu1 %v10208_v53 }
 0xc6b   :  { %3182 = vmatprep.subr.mxu0 %v10211_v3  ;;  %3253 = vmatprep.subr.mxu1 %v10214_v54 }
 0xc6c   :  { %3183 = vmatpush1.msra.mxu0 %v10217_v5  ;;  %3254 = vmatpush1.msra.mxu1 %v10220_v6 }
 0xc6d   :  { %3184 = vmatprep.subr.mxu0 %v10223_v7  ;;  %3255 = vmatprep.subr.mxu1 %v10226_v8 }
 0xc6e   :  { %3185 = vmatpush1.msra.mxu0 %v10229_v9  ;;  %3256 = vmatpush1.msra.mxu1 %v10232_v10  ;;  %v2977_v10 = vld [vmem:[#allocation3 + $0x30] sm:$0x3] }
 0xc6f   :  { %3186 = vmatprep.subr.mxu0 %v10235_v11  ;;  %3257 = vmatprep.subr.mxu1 %v10238_v12 }
 0xc70   :  { %3187 = vmatpush1.msra.mxu0 %v10241_v13  ;;  %3258 = vmatpush1.msra.mxu1 %v10244_v14 }
 0xc71   :  { %3188 = vmatprep.subr.mxu0 %v10247_v15  ;;  %3259 = vmatprep.subr.mxu1 %v10250_v16  ;;  %v10265_v15 = vld [vmem:[#allocation9 + $0x200] sm:$0xff]  ;;  %v10269_v16 = vld [vmem:[#allocation9 + $0x210] sm:$0xff] }
 0xc72   :  { %3189 = vmatpush1.msra.mxu0 %v10253_v32  ;;  %3260 = vmatpush1.msra.mxu1 %v10256_v33  ;;  %12884 = vst [vmem:[#allocation43_spill] sm:$0xff] %v10265_v15  ;;  %12885 = vst [vmem:[#allocation17_spill] sm:$0xff] %v10269_v16 }
 0xc73   :  { %3190 = vmatprep.subr.mxu0 %v10259_v34  ;;  %3261 = vmatprep.subr.mxu1 %v10262_v35  ;;  %v2975_v34 = vld [vmem:[#allocation3 + $0x20] sm:$0x3]  ;;  %v2976_v35 = vld [vmem:[#allocation3 + $0x38] sm:$0x3] }
 0xc74   :  { %3191 = vmatpush1.msra.mxu0 %v10265_v15  ;;  %3224 = vmatprep.mubr.f32.mxu0 %v12860_v17 }
 0xc75   :  { %3262 = vmatpush1.msra.mxu1 %v10269_v16  ;;  %3295 = vmatprep.mubr.f32.mxu1 %v12860_v17  ;;  %v2978_v17 = vld [vmem:[#allocation3] sm:$0x3] }
 0xc76   :  { %3353 = vmatprep.subr.mxu0 %v10131_v30  ;;  %3424 = vmatprep.subr.mxu1 %v10134_v31 }
 0xd15   :  { %v3048_v33 = vpop.f32.mrf.mxu0  ;;  %v3119_v11 = vpop.f32.mrf.mxu1 }
 0xd16   :  { %v3124_v32 = vadd.f32 %v3048_v33, %v2975_v34  ;;  %v3126_v9 = vadd.f32 %v3119_v11, %v2977_v10 }
 0xd17   :  { %v3050_v14 = vpop.f32.mrf.mxu0  ;;  %v3121_v16 = vpop.f32.mrf.mxu1 }
 0xd18   :  { %v7619_v13 = vmul.f32 -1.442695, %v3124_v32  ;;  %v3125_v12 = vadd.f32 %v3050_v14, %v2976_v35  ;;  %v7621_v8 = vmul.f32 -1.442695, %v3126_v9  ;;  %v3127_v30 = vadd.f32 %v3121_v16, %v2978_v17  ;;  %v12890_v16 = vld [vmem:[#allocation28_spill] sm:$0xff]  ;;  %v12891_v35 = vld [vmem:[#allocation29_spill] sm:$0xff] }
 0xd1a   :  { %7990 = vpow2.f32 %v7619_v13  ;;  %v7620_v15 = vmul.f32 -1.442695, %v3125_v12  ;;  %v3148_v12 = vrot.slane %v10138_v18, 6  ;;  %v12888_v18 = vld [vmem:[#allocation26_spill] sm:$0xff] }
 0xd1c   :  { %7992 = vpow2.f32 %v7620_v15 }
 0xd1d   :  { %7994 = vpow2.f32 %v7621_v8  ;;  %v12889_v8 = vld [vmem:[#allocation27_spill] sm:$0xff] }
 0xd27   :  { %v7991_v7 = vpop.eup %7990 }
 0xd28   :  { %v3137_v6 = vadd.f32 1.0, %v7991_v7 }
 0xd29   :  { %v7993_v31 = vpop.eup %7992 }
 0xd2a   :  { %7996 = vrcp.f32 %v3137_v6  ;;  %v3138_v33 = vadd.f32 1.0, %v7993_v31  ;;  %v7995_v32 = vpop.eup %7994  ;;  %v12887_v31 = vld [vmem:[#allocation25_spill] sm:$0xff] }
 0xd2b   :  { %7998 = vtanh.f32 %v3127_v30  ;;  %v3139_v34 = vadd.f32 1.0, %v7995_v32  ;;  %v12886_v30 = vld [vmem:[#allocation24_spill] sm:$0xff]  ;;  %v12893_v32 = vld [vmem:[#allocation31_spill] sm:$0xff] }
 0xd2c   :  { %8000 = vrcp.f32 %v3138_v33  ;;  %v12892_v33 = vld [vmem:[#allocation30_spill] sm:$0xff] }
 0xd2d   :  { %8002 = vrcp.f32 %v3139_v34  ;;  %v12898_v34 = vld [vmem:[#allocation36_spill] sm:$0xff] }
 0xd37   :  { %v7997_v14 = vpop.eup %7996 }
 0xd38   :  { %v7999_v13 = vpop.eup %7998 }
 0xd39   :  { %v8001_v15 = vpop.eup %8000  ;;  %v3151_v11 = vmul.f32 %v7999_v13, %v7997_v14  ;;  %v12894_v14 = vld [vmem:[#allocation32_spill] sm:$0xff]  ;;  %v12895_v13 = vld [vmem:[#allocation33_spill] sm:$0xff] }
 0xd3a   :  { %v3150_v10 = vmul.f32 %v8001_v15, %v3148_v12  ;;  %v8003_v17 = vpop.eup %8002  ;;  %v12896_v12 = vld [vmem:[#allocation34_spill] sm:$0xff]  ;;  %v12897_v15 = vld [vmem:[#allocation35_spill] sm:$0xff] }
 0xd3c   :  { %v10276_v9 = vadd.f32 %v3151_v11, %v3150_v10  ;;  %v12899_v10 = vld [vmem:[#allocation37_spill] sm:$0xff]  ;;  %v12900_v11 = vld [vmem:[#allocation38_spill] sm:$0xff] }
 0xd3e   :  { %8004 = vtanh.f32 %v10276_v9 }
 0xd4b   :  { %v8005_v7 = vpop.eup %8004 }
 0xd4c   :  { %v3154_v6 = vmul.f32 %v8005_v7, %v8003_v17  ;;  %v12901_v17 = vld [vmem:[#allocation43_spill] sm:$0xff]  ;;  %v12902_v7 = vmov 0.0  }
 0xd4e   :  { %3155 = vst [vmem:[#allocation2 + $0x8] sm:$0x3] %v3154_v6  ;;  %3225 = vmatmul.mubr.f32.vlgmr.msra.gmra.mxu0 %v3154_v6  ;;  %3296 = vmatmul.mubr.f32.vlgmr.msra.gmra.mxu1 %v3154_v6  ;;  %v12903_v6 = vld [vmem:[#allocation17_spill] sm:$0xff] }
 0xd4f   :  { %3354 = vmatpush1.msra.mxu0 %v10011_v56  ;;  %3425 = vmatpush1.msra.mxu1 %v10014_v44 }
 0xd50   :  { %3355 = vmatprep.subr.mxu0 %v10017_v49  ;;  %3426 = vmatprep.subr.mxu1 %v10020_v61 }
 0xd51   :  { %3356 = vmatpush1.msra.mxu0 %v10023_v26  ;;  %3427 = vmatpush1.msra.mxu1 %v10026_v47 }
 0xd52   :  { %3357 = vmatprep.subr.mxu0 %v10029_v20  ;;  %3428 = vmatprep.subr.mxu1 %v10032_v58 }
 0xd53   :  { %3358 = vmatpush1.msra.mxu0 %v10035_v59  ;;  %3429 = vmatpush1.msra.mxu1 %v10038_v4 }
 0xd54   :  { %3359 = vmatprep.subr.mxu0 %v10041_v62  ;;  %3430 = vmatprep.subr.mxu1 %v10044_v24 }
 0xd55   :  { %3360 = vmatpush1.msra.mxu0 %v10047_v50  ;;  %3431 = vmatpush1.msra.mxu1 %v10050_v43 }
 0xd56   :  { %3361 = vmatprep.subr.mxu0 %v10053_v1  ;;  %3432 = vmatprep.subr.mxu1 %v10056_v60 }
 0xd57   :  { %3362 = vmatpush1.msra.mxu0 %v10059_v46  ;;  %3433 = vmatpush1.msra.mxu1 %v10062_v0 }
 0xd58   :  { %3363 = vmatprep.subr.mxu0 %v10065_v55  ;;  %3434 = vmatprep.subr.mxu1 %v10068_v19 }
 0xd59   :  { %3364 = vmatpush1.msra.mxu0 %v10071_v21  ;;  %3435 = vmatpush1.msra.mxu1 %v10074_v22 }
 0xd5a   :  { %3365 = vmatprep.subr.mxu0 %v10077_v23  ;;  %3436 = vmatprep.subr.mxu1 %v10080_v25 }
 0xd5b   :  { %3366 = vmatpush1.msra.mxu0 %v10083_v29  ;;  %3437 = vmatpush1.msra.mxu1 %v10086_v63 }
 0xd5c   :  { %3367 = vmatprep.subr.mxu0 %v10089_v48  ;;  %3438 = vmatprep.subr.mxu1 %v10092_v2 }
 0xd5d   :  { %3368 = vmatpush1.msra.mxu0 %v10169_v28  ;;  %3439 = vmatpush1.msra.mxu1 %v10172_v36 }
 0xd5e   :  { %3369 = vmatprep.subr.mxu0 %v10175_v37  ;;  %3440 = vmatprep.subr.mxu1 %v10178_v38 }
 0xd5f   :  { %3370 = vmatpush1.msra.mxu0 %v10181_v39  ;;  %3441 = vmatpush1.msra.mxu1 %v10184_v40 }
 0xd60   :  { %3371 = vmatprep.subr.mxu0 %v10187_v41  ;;  %3442 = vmatprep.subr.mxu1 %v10190_v42 }
 0xd61   :  { %3372 = vmatpush1.msra.mxu0 %v10193_v51  ;;  %3443 = vmatpush1.msra.mxu1 %v10196_v45 }
 0xd62   :  { %3373 = vmatprep.subr.mxu0 %v10199_v27  ;;  %3444 = vmatprep.subr.mxu1 %v10202_v57 }
 0xd63   :  { %3374 = vmatpush1.msra.mxu0 %v10205_v52  ;;  %3445 = vmatpush1.msra.mxu1 %v10208_v53 }
 0xd64   :  { %3375 = vmatprep.subr.mxu0 %v10211_v3  ;;  %3446 = vmatprep.subr.mxu1 %v10214_v54 }
 0xd65   :  { %3376 = vmatpush1.msra.mxu0 %v10217_v5  ;;  %3447 = vmatpush1.msra.mxu1 %v12886_v30 }
 0xd66   :  { %3377 = vmatprep.subr.mxu0 %v12887_v31  ;;  %3448 = vmatprep.subr.mxu1 %v12888_v18  ;;  %v3158_v18 = vld [vmem:[#allocation3 + $0x30] sm:$0xc] }
 0xd67   :  { %3378 = vmatpush1.msra.mxu0 %v12889_v8  ;;  %3449 = vmatpush1.msra.mxu1 %v12890_v16 }
 0xd68   :  { %3379 = vmatprep.subr.mxu0 %v12891_v35  ;;  %3450 = vmatprep.subr.mxu1 %v12892_v33  ;;  %v3157_v35 = vld [vmem:[#allocation3 + $0x38] sm:$0xc] }
 0xd69   :  { %3380 = vmatpush1.msra.mxu0 %v12893_v32  ;;  %3451 = vmatpush1.msra.mxu1 %v12894_v14  ;;  %v12904_v14 = vld [vmem:[#allocation19_spill] sm:$0xff]  ;;  %v3156_v32 = vld [vmem:[#allocation3 + $0x20] sm:$0xc] }
 0xd6a   :  { %3381 = vmatprep.subr.mxu0 %v12895_v13  ;;  %3452 = vmatprep.subr.mxu1 %v12896_v12  ;;  %v12905_v13 = vld [vmem:[#allocation20_spill] sm:$0xff] }
 0xd6b   :  { %3382 = vmatpush1.msra.mxu0 %v12897_v15  ;;  %3453 = vmatpush1.msra.mxu1 %v12898_v34 }
 0xd6c   :  { %3383 = vmatprep.subr.mxu0 %v12899_v10  ;;  %3454 = vmatprep.subr.mxu1 %v12900_v11 }
 0xd6d   :  { %3384 = vmatpush1.msra.mxu0 %v12901_v17  ;;  %3417 = vmatprep.mubr.f32.mxu0 %v12902_v7 }
 0xd6e   :  { %3455 = vmatpush1.msra.mxu1 %v12903_v6  ;;  %3488 = vmatprep.mubr.f32.mxu1 %v12902_v7 }
 0xd6f   :  { %3546 = vmatprep.subr.mxu0 %v12904_v14  ;;  %3617 = vmatprep.subr.mxu1 %v12905_v13  ;;  %v3159_v13 = vld [vmem:[#allocation3] sm:$0xc] }
 0xe0e   :  { %v3226_v12 = vpop.f32.mrf.mxu0  ;;  %v3297_v17 = vpop.f32.mrf.mxu1 }
 0xe0f   :  { %v3306_v15 = vrot.slane %v3226_v12, 6  ;;  %v3308_v6 = vrot.slane %v3297_v17, 6 }
 0xe10   :  { %v3228_v34 = vpop.f32.mrf.mxu0  ;;  %v3299_v7 = vpop.f32.mrf.mxu1 }
 0xe11   :  { %v3314_v33 = vadd.f32 %v3306_v15, %v3156_v32  ;;  %v3307_v10 = vrot.slane %v3228_v34, 6  ;;  %v3316_v31 = vadd.f32 %v3308_v6, %v3158_v18  ;;  %v3309_v14 = vrot.slane %v3299_v7, 6 }
 0xe13   :  { %v7622_v11 = vmul.f32 -1.442695, %v3314_v33  ;;  %v3315_v16 = vadd.f32 %v3307_v10, %v3157_v35  ;;  %v7624_v30 = vmul.f32 -1.442695, %v3316_v31  ;;  %v3317_v12 = vadd.f32 %v3309_v14, %v3159_v13 }
 0xe15   :  { %8006 = vpow2.f32 %v7622_v11  ;;  %v7623_v8 = vmul.f32 -1.442695, %v3315_v16 }
 0xe17   :  { %8008 = vpow2.f32 %v7623_v8  ;;  %v3338_v8 = vrot.slane %v10276_v9, 6 }
 0xe18   :  { %8010 = vpow2.f32 %v7624_v30 }
 0xe22   :  { %v8007_v5 = vpop.eup %8006 }
 0xe23   :  { %v3327_v54 = vadd.f32 1.0, %v8007_v5 }
 0xe24   :  { %v8009_v3 = vpop.eup %8008 }
 0xe25   :  { %8012 = vrcp.f32 %v3327_v54  ;;  %v3328_v32 = vadd.f32 1.0, %v8009_v3  ;;  %v8011_v35 = vpop.eup %8010 }
 0xe26   :  { %8014 = vtanh.f32 %v3317_v12  ;;  %v3329_v34 = vadd.f32 1.0, %v8011_v35 }
 0xe27   :  { %8016 = vrcp.f32 %v3328_v32 }
 0xe28   :  { %8018 = vrcp.f32 %v3329_v34 }
 0xe32   :  { %v8013_v33 = vpop.eup %8012 }
 0xe33   :  { %v8015_v16 = vpop.eup %8014 }
 0xe34   :  { %v8017_v15 = vpop.eup %8016  ;;  %v3341_v10 = vmul.f32 %v8015_v16, %v8013_v33 }
 0xe35   :  { %v3340_v18 = vmul.f32 %v8017_v15, %v3338_v8  ;;  %v8019_v5 = vpop.eup %8018 }
 0xe37   :  { %v10346_v31 = vadd.f32 %v3341_v10, %v3340_v18 }
 0xe39   :  { %8020 = vtanh.f32 %v10346_v31  ;;  %v3531_v12 = vrot.slane %v10346_v31, 6  ;;  %v3791_v31 = vld [vmem:[#allocation7 + $0x5c0] sm:$0xff] }
 0xe46   :  { %v8021_v30 = vpop.eup %8020 }
 0xe47   :  { %v3344_v54 = vmul.f32 %v8021_v30, %v8019_v5  ;;  %v3795_v5 = vld [vmem:[#allocation7 + $0x5e0] sm:$0xff]  ;;  %v3797_v30 = vld [vmem:[#allocation7 + $0x5f0] sm:$0xff] }
 0xe49   :  { %3345 = vst [vmem:[#allocation2 + $0x8] sm:$0xc] %v3344_v54  ;;  %v3351_v3 = vrot.slane %v3344_v54, 2  ;;  %v3792_v54 = vld [vmem:[#allocation7 + $0x5c8] sm:$0xff] }
 0xe4b   :  { %3418 = vmatmul.mubr.f32.vlgmr.msra.gmra.mxu0 %v3351_v3  ;;  %3489 = vmatmul.mubr.f32.vlgmr.msra.gmra.mxu1 %v3351_v3  ;;  %v3794_v3 = vld [vmem:[#allocation7 + $0x5d8] sm:$0xff] }
 0xe4c   :  { %3547 = vmatpush1.msra.mxu0 %v10011_v56  ;;  %3618 = vmatpush1.msra.mxu1 %v10014_v44  ;;  %v12906_v56 = vld [vmem:[#allocation21_spill] sm:$0xff]  ;;  %v12907_v44 = vld [vmem:[#allocation22_spill] sm:$0xff] }
 0xe4d   :  { %3548 = vmatprep.subr.mxu0 %v10017_v49  ;;  %3619 = vmatprep.subr.mxu1 %v10020_v61  ;;  %v12908_v49 = vld [vmem:[#allocation23_spill] sm:$0xff]  ;;  %v12909_v61 = vld [vmem:[#allocation24_spill] sm:$0xff] }
 0xe4e   :  { %3549 = vmatpush1.msra.mxu0 %v10023_v26  ;;  %3620 = vmatpush1.msra.mxu1 %v10026_v47  ;;  %v12910_v26 = vld [vmem:[#allocation25_spill] sm:$0xff]  ;;  %v12911_v47 = vld [vmem:[#allocation26_spill] sm:$0xff] }
 0xe4f   :  { %3550 = vmatprep.subr.mxu0 %v10029_v20  ;;  %3621 = vmatprep.subr.mxu1 %v10032_v58  ;;  %v12912_v20 = vld [vmem:[#allocation27_spill] sm:$0xff]  ;;  %v12913_v58 = vld [vmem:[#allocation28_spill] sm:$0xff] }
 0xe50   :  { %3551 = vmatpush1.msra.mxu0 %v10035_v59  ;;  %3622 = vmatpush1.msra.mxu1 %v10038_v4  ;;  %v12914_v59 = vld [vmem:[#allocation29_spill] sm:$0xff]  ;;  %v12915_v4 = vld [vmem:[#allocation30_spill] sm:$0xff] }
 0xe51   :  { %3552 = vmatprep.subr.mxu0 %v10041_v62  ;;  %3623 = vmatprep.subr.mxu1 %v10044_v24  ;;  %v12916_v62 = vld [vmem:[#allocation31_spill] sm:$0xff]  ;;  %v12917_v24 = vld [vmem:[#allocation32_spill] sm:$0xff] }
 0xe52   :  { %3553 = vmatpush1.msra.mxu0 %v10047_v50  ;;  %3624 = vmatpush1.msra.mxu1 %v10050_v43  ;;  %v12918_v50 = vld [vmem:[#allocation33_spill] sm:$0xff]  ;;  %v12919_v43 = vld [vmem:[#allocation34_spill] sm:$0xff] }
 0xe53   :  { %3554 = vmatprep.subr.mxu0 %v10053_v1  ;;  %3625 = vmatprep.subr.mxu1 %v10056_v60  ;;  %v12920_v1 = vld [vmem:[#allocation35_spill] sm:$0xff]  ;;  %v12921_v60 = vld [vmem:[#allocation36_spill] sm:$0xff] }
 0xe54   :  { %3555 = vmatpush1.msra.mxu0 %v10059_v46  ;;  %3626 = vmatpush1.msra.mxu1 %v10062_v0  ;;  %v12922_v46 = vld [vmem:[#allocation37_spill] sm:$0xff]  ;;  %v12923_v0 = vld [vmem:[#allocation38_spill] sm:$0xff] }
 0xe55   :  { %3556 = vmatprep.subr.mxu0 %v10065_v55  ;;  %3627 = vmatprep.subr.mxu1 %v10068_v19  ;;  %v12924_v55 = vld [vmem:[#allocation43_spill] sm:$0xff]  ;;  %v12925_v19 = vld [vmem:[#allocation17_spill] sm:$0xff] }
 0xe56   :  { %3557 = vmatpush1.msra.mxu0 %v10071_v21  ;;  %3628 = vmatpush1.msra.mxu1 %v10074_v22  ;;  %v12926_v21 = vmov 0.0   ;;  %v3796_v22 = vld [vmem:[#allocation7 + $0x5e8] sm:$0xff] }
 0xe57   :  { %3558 = vmatprep.subr.mxu0 %v10077_v23  ;;  %3629 = vmatprep.subr.mxu1 %v10080_v25  ;;  %v3798_v23 = vld [vmem:[#allocation7 + $0x5f8] sm:$0xff] }
 0xe58   :  { %3559 = vmatpush1.msra.mxu0 %v10083_v29  ;;  %3630 = vmatpush1.msra.mxu1 %v10086_v63  ;;  %v3346_v63 = vld [vmem:[#allocation3 + $0x20] sm:$0x30] }
 0xe59   :  { %3560 = vmatprep.subr.mxu0 %v10089_v48  ;;  %3631 = vmatprep.subr.mxu1 %v10092_v2 }
 0xe5a   :  { %3561 = vmatpush1.msra.mxu0 %v10169_v28  ;;  %3632 = vmatpush1.msra.mxu1 %v10172_v36  ;;  %v3347_v36 = vld [vmem:[#allocation3 + $0x38] sm:$0x30] }
 0xe5b   :  { %3562 = vmatprep.subr.mxu0 %v10175_v37  ;;  %3633 = vmatprep.subr.mxu1 %v10178_v38 }
 0xe5c   :  { %3563 = vmatpush1.msra.mxu0 %v10181_v39  ;;  %3634 = vmatpush1.msra.mxu1 %v10184_v40 }
 0xe5d   :  { %3564 = vmatprep.subr.mxu0 %v10187_v41  ;;  %3635 = vmatprep.subr.mxu1 %v10190_v42  ;;  %v3348_v42 = vld [vmem:[#allocation3 + $0x30] sm:$0x30] }
 0xe5e   :  { %3565 = vmatpush1.msra.mxu0 %v10193_v51  ;;  %3636 = vmatpush1.msra.mxu1 %v10196_v45 }
 0xe5f   :  { %3566 = vmatprep.subr.mxu0 %v10199_v27  ;;  %3637 = vmatprep.subr.mxu1 %v10202_v57 }
 0xe60   :  { %3567 = vmatpush1.msra.mxu0 %v10205_v52  ;;  %3638 = vmatpush1.msra.mxu1 %v10208_v53  ;;  %v3349_v52 = vld [vmem:[#allocation3] sm:$0x30] }
 0xe61   :  { %3568 = vmatprep.subr.mxu0 %v12906_v56  ;;  %3639 = vmatprep.subr.mxu1 %v12907_v44  ;;  %v3793_v56 = vld [vmem:[#allocation7 + $0x5d0] sm:$0xff]  ;;  %v3788_v44 = vld [vmem:[#allocation7 + $0x5a8] sm:$0xff] }
 0xe62   :  { %3569 = vmatpush1.msra.mxu0 %v12908_v49  ;;  %3640 = vmatpush1.msra.mxu1 %v12909_v61  ;;  %v3790_v49 = vld [vmem:[#allocation7 + $0x5b8] sm:$0xff]  ;;  %v3787_v61 = vld [vmem:[#allocation7 + $0x5a0] sm:$0xff] }
 0xe63   :  { %3570 = vmatprep.subr.mxu0 %v12910_v26  ;;  %3641 = vmatprep.subr.mxu1 %v12911_v47  ;;  %v3789_v26 = vld [vmem:[#allocation7 + $0x5b0] sm:$0xff]  ;;  %v3784_v47 = vld [vmem:[#allocation7 + $0x588] sm:$0xff] }
 0xe64   :  { %3571 = vmatpush1.msra.mxu0 %v12912_v20  ;;  %3642 = vmatpush1.msra.mxu1 %v12913_v58  ;;  %v3786_v20 = vld [vmem:[#allocation7 + $0x598] sm:$0xff]  ;;  %v3783_v58 = vld [vmem:[#allocation7 + $0x580] sm:$0xff] }
 0xe65   :  { %3572 = vmatprep.subr.mxu0 %v12914_v59  ;;  %3643 = vmatprep.subr.mxu1 %v12915_v4  ;;  %v3785_v59 = vld [vmem:[#allocation7 + $0x590] sm:$0xff]  ;;  %v3780_v4 = vld [vmem:[#allocation7 + $0x568] sm:$0xff] }
 0xe66   :  { %3573 = vmatpush1.msra.mxu0 %v12916_v62  ;;  %3644 = vmatpush1.msra.mxu1 %v12917_v24  ;;  %v3782_v62 = vld [vmem:[#allocation7 + $0x578] sm:$0xff]  ;;  %v3779_v24 = vld [vmem:[#allocation7 + $0x560] sm:$0xff] }
 0xe67   :  { %3574 = vmatprep.subr.mxu0 %v12918_v50  ;;  %3645 = vmatprep.subr.mxu1 %v12919_v43  ;;  %v3781_v50 = vld [vmem:[#allocation7 + $0x570] sm:$0xff]  ;;  %v3776_v43 = vld [vmem:[#allocation7 + $0x548] sm:$0xff] }
 0xe68   :  { %3575 = vmatpush1.msra.mxu0 %v12920_v1  ;;  %3646 = vmatpush1.msra.mxu1 %v12921_v60  ;;  %v3778_v1 = vld [vmem:[#allocation7 + $0x558] sm:$0xff]  ;;  %v3775_v60 = vld [vmem:[#allocation7 + $0x540] sm:$0xff] }
 0xe69   :  { %3576 = vmatprep.subr.mxu0 %v12922_v46  ;;  %3647 = vmatprep.subr.mxu1 %v12923_v0  ;;  %v3777_v46 = vld [vmem:[#allocation7 + $0x550] sm:$0xff]  ;;  %v3772_v0 = vld [vmem:[#allocation7 + $0x528] sm:$0xff] }
 0xe6a   :  { %3577 = vmatpush1.msra.mxu0 %v12924_v55  ;;  %3648 = vmatpush1.msra.mxu1 %v12925_v19  ;;  %v3774_v55 = vld [vmem:[#allocation7 + $0x538] sm:$0xff]  ;;  %v3771_v19 = vld [vmem:[#allocation7 + $0x520] sm:$0xff] }
 0xe6b   :  { %3610 = vmatprep.mubr.f32.mxu0 %v12926_v21  ;;  %3681 = vmatprep.mubr.f32.mxu1 %v12926_v21 }
 0xe6c   :  { %3822 = vmatprep.subr.mxu0 %v3796_v22  ;;  %3899 = vmatprep.subr.mxu1 %v3798_v23  ;;  %v3773_v22 = vld [vmem:[#allocation7 + $0x530] sm:$0xff]  ;;  %v3768_v23 = vld [vmem:[#allocation7 + $0x508] sm:$0xff] }
 0xf0b   :  { %v3419_v25 = vpop.f32.mrf.mxu0  ;;  %v3490_v39 = vpop.f32.mrf.mxu1 }
 0xf0c   :  { %v3499_v29 = vrot.slane %v3419_v25, 4  ;;  %v3501_v41 = vrot.slane %v3490_v39, 4  ;;  %v3770_v25 = vld [vmem:[#allocation7 + $0x518] sm:$0xff]  ;;  %v3759_v39 = vld [vmem:[#allocation7 + $0x4c0] sm:$0xff] }
 0xf0d   :  { %v3421_v48 = vpop.f32.mrf.mxu0  ;;  %v3492_v51 = vpop.f32.mrf.mxu1 }
 0xf0e   :  { %v3507_v2 = vadd.f32 %v3499_v29, %v3346_v63  ;;  %v3500_v28 = vrot.slane %v3421_v48, 4  ;;  %v3509_v45 = vadd.f32 %v3501_v41, %v3348_v42  ;;  %v3502_v27 = vrot.slane %v3492_v51, 4  ;;  %v3767_v29 = vld [vmem:[#allocation7 + $0x500] sm:$0xff]  ;;  %v3769_v63 = vld [vmem:[#allocation7 + $0x510] sm:$0xff]  ;;  %v3764_v48 = vld [vmem:[#allocation7 + $0x4e8] sm:$0xff] }
 0xf0f   :  { %v3756_v41 = vld [vmem:[#allocation7 + $0x4a8] sm:$0xff]  ;;  %v3758_v42 = vld [vmem:[#allocation7 + $0x4b8] sm:$0xff]  ;;  %v3755_v51 = vld [vmem:[#allocation7 + $0x4a0] sm:$0xff] }
 0xf10   :  { %v7625_v37 = vmul.f32 -1.442695, %v3507_v2  ;;  %v3508_v38 = vadd.f32 %v3500_v28, %v3347_v36  ;;  %v7627_v57 = vmul.f32 -1.442695, %v3509_v45  ;;  %v3510_v9 = vadd.f32 %v3502_v27, %v3349_v52  ;;  %v3766_v2 = vld [vmem:[#allocation7 + $0x4f8] sm:$0xff]  ;;  %v3763_v28 = vld [vmem:[#allocation7 + $0x4e0] sm:$0xff] }
 0xf11   :  { %v3765_v36 = vld [vmem:[#allocation7 + $0x4f0] sm:$0xff]  ;;  %v3752_v27 = vld [vmem:[#allocation7 + $0x488] sm:$0xff]  ;;  %v3751_v52 = vld [vmem:[#allocation7 + $0x480] sm:$0xff] }
 0xf12   :  { %8022 = vpow2.f32 %v7625_v37  ;;  %v7626_v40 = vmul.f32 -1.442695, %v3508_v38  ;;  %v3760_v37 = vld [vmem:[#allocation7 + $0x4c8] sm:$0xff]  ;;  %v3762_v38 = vld [vmem:[#allocation7 + $0x4d8] sm:$0xff]  ;;  %v3757_v45 = vld [vmem:[#allocation7 + $0x4b0] sm:$0xff] }
 0xf14   :  { %8024 = vpow2.f32 %v7626_v40  ;;  %v3761_v40 = vld [vmem:[#allocation7 + $0x4d0] sm:$0xff] }
 0xf15   :  { %8026 = vpow2.f32 %v7627_v57  ;;  %v3754_v57 = vld [vmem:[#allocation7 + $0x498] sm:$0xff] }
 0xf1f   :  { %v8023_v53 = vpop.eup %8022 }
 0xf20   :  { %v3520_v11 = vadd.f32 1.0, %v8023_v53  ;;  %v3753_v53 = vld [vmem:[#allocation7 + $0x490] sm:$0xff] }
 0xf21   :  { %v8025_v17 = vpop.eup %8024 }
 0xf22   :  { %8028 = vrcp.f32 %v3520_v11  ;;  %v3521_v7 = vadd.f32 1.0, %v8025_v17  ;;  %v8027_v6 = vpop.eup %8026  ;;  %v3750_v11 = vld [vmem:[#allocation7 + $0x478] sm:$0xff]  ;;  %v3747_v17 = vld [vmem:[#allocation7 + $0x460] sm:$0xff] }
 0xf23   :  { %8030 = vtanh.f32 %v3510_v9  ;;  %v3522_v35 = vadd.f32 1.0, %v8027_v6  ;;  %v3748_v9 = vld [vmem:[#allocation7 + $0x468] sm:$0xff] }
 0xf24   :  { %8032 = vrcp.f32 %v3521_v7  ;;  %v3749_v7 = vld [vmem:[#allocation7 + $0x470] sm:$0xff]  ;;  %v3744_v6 = vld [vmem:[#allocation7 + $0x448] sm:$0xff] }
 0xf25   :  { %8034 = vrcp.f32 %v3522_v35  ;;  %v3742_v35 = vld [vmem:[#allocation7 + $0x438] sm:$0xff] }
 0xf2f   :  { %v8029_v14 = vpop.eup %8028 }
 0xf30   :  { %v8031_v13 = vpop.eup %8030 }
 0xf31   :  { %v8033_v32 = vpop.eup %8032  ;;  %v3534_v16 = vmul.f32 %v8031_v13, %v8029_v14  ;;  %v3746_v14 = vld [vmem:[#allocation7 + $0x458] sm:$0xff]  ;;  %v3743_v13 = vld [vmem:[#allocation7 + $0x440] sm:$0xff] }
 0xf32   :  { %v3533_v33 = vmul.f32 %v8033_v32, %v3531_v12  ;;  %v8035_v15 = vpop.eup %8034  ;;  %v3745_v12 = vld [vmem:[#allocation7 + $0x450] sm:$0xff]  ;;  %v3740_v32 = vld [vmem:[#allocation7 + $0x428] sm:$0xff] }
 0xf34   :  { %v10414_v8 = vadd.f32 %v3534_v16, %v3533_v33  ;;  %v3739_v33 = vld [vmem:[#allocation7 + $0x420] sm:$0xff]  ;;  %v3741_v16 = vld [vmem:[#allocation7 + $0x430] sm:$0xff] }
 0xf36   :  { %8036 = vtanh.f32 %v10414_v8 }
 0xf43   :  { %v8037_v34 = vpop.eup %8036 }
 0xf44   :  { %v3537_v18 = vmul.f32 %v8037_v34, %v8035_v15  ;;  %v3736_v15 = vld [vmem:[#allocation7 + $0x408] sm:$0xff]  ;;  %v3738_v34 = vld [vmem:[#allocation7 + $0x418] sm:$0xff] }
 0xf46   :  { %3538 = vst [vmem:[#allocation2 + $0x8] sm:$0x30] %v3537_v18  ;;  %v3544_v10 = vrot.slane %v3537_v18, 4  ;;  %v3735_v18 = vld [vmem:[#allocation7 + $0x400] sm:$0xff] }
 0xf48   :  { %3611 = vmatmul.mubr.f32.vlgmr.msra.gmra.mxu0 %v3544_v10  ;;  %3682 = vmatmul.mubr.f32.vlgmr.msra.gmra.mxu1 %v3544_v10  ;;  %v3737_v10 = vld [vmem:[#allocation7 + $0x410] sm:$0xff] }
 0xf49   :  { %3823 = vmatpush1.msra.mxu0 %v3795_v5  ;;  %3900 = vmatpush1.msra.mxu1 %v3797_v30  ;;  %v3732_v5 = vld [vmem:[#allocation2] sm:$0xff]  ;;  %v10421_v30 = vld [vmem:[#allocation9 + $0x5e8] sm:$0xff] }
 0xf4a   :  { %3824 = vmatprep.subr.mxu0 %v3792_v54  ;;  %3901 = vmatprep.subr.mxu1 %v3794_v3  ;;  %12927 = vst [vmem:[#allocation18_spill] sm:$0xff] %v10421_v30  ;;  %v10423_v54 = vld [vmem:[#allocation9 + $0x5f8] sm:$0xff]  ;;  %v10427_v3 = vld [vmem:[#allocation9 + $0x5e0] sm:$0xff] }
 0xf4b   :  { %3825 = vmatpush1.msra.mxu0 %v3791_v31  ;;  %3902 = vmatpush1.msra.mxu1 %v3793_v56  ;;  %12928 = vst [vmem:[#allocation19_spill] sm:$0xff] %v10423_v54  ;;  %v10429_v31 = vld [vmem:[#allocation9 + $0x5f0] sm:$0xff]  ;;  %v10433_v56 = vld [vmem:[#allocation9 + $0x5c8] sm:$0xff] }
 0xf4c   :  { %3826 = vmatprep.subr.mxu0 %v3788_v44  ;;  %3903 = vmatprep.subr.mxu1 %v3790_v49  ;;  %v10435_v44 = vld [vmem:[#allocation9 + $0x5d8] sm:$0xff]  ;;  %v10439_v49 = vld [vmem:[#allocation9 + $0x5c0] sm:$0xff] }
 0xf4d   :  { %3827 = vmatpush1.msra.mxu0 %v3787_v61  ;;  %3904 = vmatpush1.msra.mxu1 %v3789_v26  ;;  %v10441_v61 = vld [vmem:[#allocation9 + $0x5d0] sm:$0xff]  ;;  %v10445_v26 = vld [vmem:[#allocation9 + $0x5a8] sm:$0xff] }
 0xf4e   :  { %3828 = vmatprep.subr.mxu0 %v3784_v47  ;;  %3905 = vmatprep.subr.mxu1 %v3786_v20  ;;  %v10447_v47 = vld [vmem:[#allocation9 + $0x5b8] sm:$0xff]  ;;  %v10451_v20 = vld [vmem:[#allocation9 + $0x5a0] sm:$0xff] }
 0xf4f   :  { %3829 = vmatpush1.msra.mxu0 %v3783_v58  ;;  %3906 = vmatpush1.msra.mxu1 %v3785_v59  ;;  %v10453_v58 = vld [vmem:[#allocation9 + $0x5b0] sm:$0xff]  ;;  %v10457_v59 = vld [vmem:[#allocation9 + $0x588] sm:$0xff] }
 0xf50   :  { %3830 = vmatprep.subr.mxu0 %v3780_v4  ;;  %3907 = vmatprep.subr.mxu1 %v3782_v62  ;;  %v10459_v4 = vld [vmem:[#allocation9 + $0x598] sm:$0xff]  ;;  %v10463_v62 = vld [vmem:[#allocation9 + $0x580] sm:$0xff] }
 0xf51   :  { %3831 = vmatpush1.msra.mxu0 %v3779_v24  ;;  %3908 = vmatpush1.msra.mxu1 %v3781_v50  ;;  %v10465_v24 = vld [vmem:[#allocation9 + $0x590] sm:$0xff]  ;;  %v10469_v50 = vld [vmem:[#allocation9 + $0x568] sm:$0xff] }
 0xf52   :  { %3832 = vmatprep.subr.mxu0 %v3776_v43  ;;  %3909 = vmatprep.subr.mxu1 %v3778_v1  ;;  %v10471_v43 = vld [vmem:[#allocation9 + $0x578] sm:$0xff]  ;;  %v10475_v1 = vld [vmem:[#allocation9 + $0x560] sm:$0xff] }
 0xf53   :  { %3833 = vmatpush1.msra.mxu0 %v3775_v60  ;;  %3910 = vmatpush1.msra.mxu1 %v3777_v46  ;;  %v10477_v60 = vld [vmem:[#allocation9 + $0x570] sm:$0xff]  ;;  %v10481_v46 = vld [vmem:[#allocation9 + $0x548] sm:$0xff] }
 0xf54   :  { %3834 = vmatprep.subr.mxu0 %v3772_v0  ;;  %3911 = vmatprep.subr.mxu1 %v3774_v55  ;;  %v10483_v0 = vld [vmem:[#allocation9 + $0x558] sm:$0xff]  ;;  %v10487_v55 = vld [vmem:[#allocation9 + $0x540] sm:$0xff] }
 0xf55   :  { %3835 = vmatpush1.msra.mxu0 %v3771_v19  ;;  %3912 = vmatpush1.msra.mxu1 %v3773_v22  ;;  %v10489_v19 = vld [vmem:[#allocation9 + $0x550] sm:$0xff]  ;;  %v10493_v22 = vld [vmem:[#allocation9 + $0x528] sm:$0xff] }
 0xf56   :  { %3836 = vmatprep.subr.mxu0 %v3768_v23  ;;  %3913 = vmatprep.subr.mxu1 %v3770_v25  ;;  %v10495_v23 = vld [vmem:[#allocation9 + $0x538] sm:$0xff]  ;;  %v10499_v25 = vld [vmem:[#allocation9 + $0x520] sm:$0xff] }
 0xf57   :  { %3837 = vmatpush1.msra.mxu0 %v3767_v29  ;;  %3914 = vmatpush1.msra.mxu1 %v3769_v63  ;;  %v10501_v29 = vld [vmem:[#allocation9 + $0x530] sm:$0xff]  ;;  %v10505_v63 = vld [vmem:[#allocation9 + $0x508] sm:$0xff] }
 0xf58   :  { %3838 = vmatprep.subr.mxu0 %v3764_v48  ;;  %3915 = vmatprep.subr.mxu1 %v3766_v2  ;;  %v10507_v48 = vld [vmem:[#allocation9 + $0x518] sm:$0xff]  ;;  %v10511_v2 = vld [vmem:[#allocation9 + $0x500] sm:$0xff] }
 0xf59   :  { %3839 = vmatpush1.msra.mxu0 %v3763_v28  ;;  %3916 = vmatpush1.msra.mxu1 %v3765_v36  ;;  %v10513_v28 = vld [vmem:[#allocation9 + $0x510] sm:$0xff]  ;;  %v10515_v36 = vld [vmem:[#allocation9 + $0x4e8] sm:$0xff] }
 0xf5a   :  { %3840 = vmatprep.subr.mxu0 %v3760_v37  ;;  %3917 = vmatprep.subr.mxu1 %v3762_v38  ;;  %v10519_v37 = vld [vmem:[#allocation9 + $0x4f8] sm:$0xff]  ;;  %v10521_v38 = vld [vmem:[#allocation9 + $0x4e0] sm:$0xff] }
 0xf5b   :  { %3841 = vmatpush1.msra.mxu0 %v3759_v39  ;;  %3918 = vmatpush1.msra.mxu1 %v3761_v40  ;;  %v10523_v39 = vld [vmem:[#allocation9 + $0x4f0] sm:$0xff]  ;;  %v10527_v40 = vld [vmem:[#allocation9 + $0x4c8] sm:$0xff] }
 0xf5c   :  { %3842 = vmatprep.subr.mxu0 %v3756_v41  ;;  %3919 = vmatprep.subr.mxu1 %v3758_v42  ;;  %v10529_v41 = vld [vmem:[#allocation9 + $0x4d8] sm:$0xff]  ;;  %v10531_v42 = vld [vmem:[#allocation9 + $0x4c0] sm:$0xff] }
 0xf5d   :  { %3843 = vmatpush1.msra.mxu0 %v3755_v51  ;;  %3920 = vmatpush1.msra.mxu1 %v3757_v45  ;;  %v10535_v51 = vld [vmem:[#allocation9 + $0x4d0] sm:$0xff]  ;;  %v10537_v45 = vld [vmem:[#allocation9 + $0x4a8] sm:$0xff] }
 0xf5e   :  { %3844 = vmatprep.subr.mxu0 %v3752_v27  ;;  %3921 = vmatprep.subr.mxu1 %v3754_v57  ;;  %v10539_v27 = vld [vmem:[#allocation9 + $0x4b8] sm:$0xff]  ;;  %v10543_v57 = vld [vmem:[#allocation9 + $0x4a0] sm:$0xff] }
 0xf5f   :  { %3845 = vmatpush1.msra.mxu0 %v3751_v52  ;;  %3922 = vmatpush1.msra.mxu1 %v3753_v53  ;;  %v10545_v52 = vld [vmem:[#allocation9 + $0x4b0] sm:$0xff]  ;;  %v10549_v53 = vld [vmem:[#allocation9 + $0x488] sm:$0xff] }
 0xf60   :  { %3846 = vmatprep.subr.mxu0 %v3748_v9  ;;  %3923 = vmatprep.subr.mxu1 %v3750_v11  ;;  %12929 = vst [vmem:[#allocation20_spill] sm:$0xff] %v10545_v52  ;;  %12930 = vst [vmem:[#allocation21_spill] sm:$0xff] %v10549_v53  ;;  %v10551_v9 = vld [vmem:[#allocation9 + $0x498] sm:$0xff]  ;;  %v10555_v11 = vld [vmem:[#allocation9 + $0x480] sm:$0xff] }
 0xf61   :  { %3847 = vmatpush1.msra.mxu0 %v3747_v17  ;;  %3924 = vmatpush1.msra.mxu1 %v3749_v7  ;;  %12931 = vst [vmem:[#allocation22_spill] sm:$0xff] %v10551_v9  ;;  %12932 = vst [vmem:[#allocation23_spill] sm:$0xff] %v10555_v11  ;;  %v10557_v17 = vld [vmem:[#allocation9 + $0x490] sm:$0xff]  ;;  %v10561_v7 = vld [vmem:[#allocation9 + $0x468] sm:$0xff] }
 0xf62   :  { %3848 = vmatprep.subr.mxu0 %v3744_v6  ;;  %3925 = vmatprep.subr.mxu1 %v3746_v14  ;;  %12933 = vst [vmem:[#allocation24_spill] sm:$0xff] %v10557_v17  ;;  %12934 = vst [vmem:[#allocation25_spill] sm:$0xff] %v10561_v7  ;;  %v10563_v6 = vld [vmem:[#allocation9 + $0x478] sm:$0xff]  ;;  %v10567_v14 = vld [vmem:[#allocation9 + $0x460] sm:$0xff] }
 0xf63   :  { %3849 = vmatpush1.msra.mxu0 %v3743_v13  ;;  %3926 = vmatpush1.msra.mxu1 %v3745_v12  ;;  %12935 = vst [vmem:[#allocation26_spill] sm:$0xff] %v10563_v6  ;;  %12936 = vst [vmem:[#allocation27_spill] sm:$0xff] %v10567_v14  ;;  %v10569_v13 = vld [vmem:[#allocation9 + $0x470] sm:$0xff]  ;;  %v10573_v12 = vld [vmem:[#allocation9 + $0x448] sm:$0xff] }
 0xf64   :  { %3850 = vmatprep.subr.mxu0 %v3740_v32  ;;  %3927 = vmatprep.subr.mxu1 %v3742_v35  ;;  %12937 = vst [vmem:[#allocation28_spill] sm:$0xff] %v10569_v13  ;;  %12938 = vst [vmem:[#allocation29_spill] sm:$0xff] %v10573_v12  ;;  %v10575_v32 = vld [vmem:[#allocation9 + $0x458] sm:$0xff]  ;;  %v10579_v35 = vld [vmem:[#allocation9 + $0x440] sm:$0xff] }
 0xf65   :  { %3851 = vmatpush1.msra.mxu0 %v3739_v33  ;;  %3928 = vmatpush1.msra.mxu1 %v3741_v16  ;;  %12939 = vst [vmem:[#allocation30_spill] sm:$0xff] %v10575_v32  ;;  %12940 = vst [vmem:[#allocation31_spill] sm:$0xff] %v10579_v35  ;;  %v10581_v33 = vld [vmem:[#allocation9 + $0x450] sm:$0xff]  ;;  %v10585_v16 = vld [vmem:[#allocation9 + $0x428] sm:$0xff] }
 0xf66   :  { %3852 = vmatprep.subr.mxu0 %v3736_v15  ;;  %3929 = vmatprep.subr.mxu1 %v3738_v34  ;;  %12941 = vst [vmem:[#allocation32_spill] sm:$0xff] %v10581_v33  ;;  %12942 = vst [vmem:[#allocation33_spill] sm:$0xff] %v10585_v16  ;;  %v10587_v15 = vld [vmem:[#allocation9 + $0x438] sm:$0xff]  ;;  %v10591_v34 = vld [vmem:[#allocation9 + $0x420] sm:$0xff] }
 0xf67   :  { %3853 = vmatpush1.msra.mxu0 %v3735_v18  ;;  %3886 = vmatprep.mubr.f32.mxu0 %v12926_v21  ;;  %12943 = vst [vmem:[#allocation34_spill] sm:$0xff] %v10587_v15  ;;  %12944 = vst [vmem:[#allocation35_spill] sm:$0xff] %v10591_v34  ;;  %v10593_v18 = vld [vmem:[#allocation9 + $0x430] sm:$0xff] }
 0xf68   :  { %3930 = vmatpush1.msra.mxu1 %v3737_v10  ;;  %3963 = vmatprep.mubr.f32.mxu1 %v12926_v21  ;;  %12945 = vst [vmem:[#allocation36_spill] sm:$0xff] %v10593_v18  ;;  %v10597_v10 = vld [vmem:[#allocation9 + $0x408] sm:$0xff] }
 0xf69   :  { %3887 = vmatmul.mubr.f32.vlgmr.msra.gmra.mxu0 %v3732_v5  ;;  %3964 = vmatmul.mubr.f32.vlgmr.msra.gmra.mxu1 %v3732_v5  ;;  %12946 = vst [vmem:[#allocation37_spill] sm:$0xff] %v10597_v10  ;;  %v10599_v5 = vld [vmem:[#allocation9 + $0x418] sm:$0xff] }
 0xf6a   :  { %3892 = vmatprep.mubr.f32.mxu0 %v12926_v21  ;;  %3969 = vmatprep.mubr.f32.mxu1 %v12926_v21  ;;  %12947 = vst [vmem:[#allocation38_spill] sm:$0xff] %v10599_v5 }
 0xf6b   :  { %4053 = vmatprep.subr.mxu0 %v10421_v30  ;;  %4124 = vmatprep.subr.mxu1 %v10423_v54 }
 0xf6c   :  { %4054 = vmatpush1.msra.mxu0 %v10427_v3  ;;  %4125 = vmatpush1.msra.mxu1 %v10429_v31 }
 0xf6d   :  { %4055 = vmatprep.subr.mxu0 %v10433_v56  ;;  %4126 = vmatprep.subr.mxu1 %v10435_v44 }
 0xf6e   :  { %4056 = vmatpush1.msra.mxu0 %v10439_v49  ;;  %4127 = vmatpush1.msra.mxu1 %v10441_v61 }
 0xf6f   :  { %4057 = vmatprep.subr.mxu0 %v10445_v26  ;;  %4128 = vmatprep.subr.mxu1 %v10447_v47 }
 0xf70   :  { %4058 = vmatpush1.msra.mxu0 %v10451_v20  ;;  %4129 = vmatpush1.msra.mxu1 %v10453_v58 }
 0xf71   :  { %4059 = vmatprep.subr.mxu0 %v10457_v59  ;;  %4130 = vmatprep.subr.mxu1 %v10459_v4 }
 0xf72   :  { %4060 = vmatpush1.msra.mxu0 %v10463_v62  ;;  %4131 = vmatpush1.msra.mxu1 %v10465_v24 }
 0xf73   :  { %4061 = vmatprep.subr.mxu0 %v10469_v50  ;;  %4132 = vmatprep.subr.mxu1 %v10471_v43 }
 0xf74   :  { %4062 = vmatpush1.msra.mxu0 %v10475_v1  ;;  %4133 = vmatpush1.msra.mxu1 %v10477_v60 }
 0xf75   :  { %4063 = vmatprep.subr.mxu0 %v10481_v46  ;;  %4134 = vmatprep.subr.mxu1 %v10483_v0 }
 0xf76   :  { %4064 = vmatpush1.msra.mxu0 %v10487_v55  ;;  %4135 = vmatpush1.msra.mxu1 %v10489_v19 }
 0xf77   :  { %4065 = vmatprep.subr.mxu0 %v10493_v22  ;;  %4136 = vmatprep.subr.mxu1 %v10495_v23 }
 0xf78   :  { %4066 = vmatpush1.msra.mxu0 %v10499_v25  ;;  %4137 = vmatpush1.msra.mxu1 %v10501_v29 }
 0xf79   :  { %4067 = vmatprep.subr.mxu0 %v10505_v63  ;;  %4138 = vmatprep.subr.mxu1 %v10507_v48 }
 0xf7a   :  { %4068 = vmatpush1.msra.mxu0 %v10511_v2  ;;  %4139 = vmatpush1.msra.mxu1 %v10513_v28 }
 0xf7b   :  { %4069 = vmatprep.subr.mxu0 %v10515_v36  ;;  %4140 = vmatprep.subr.mxu1 %v10519_v37 }
 0xf7c   :  { %4070 = vmatpush1.msra.mxu0 %v10521_v38  ;;  %4141 = vmatpush1.msra.mxu1 %v10523_v39 }
 0xf7d   :  { %4071 = vmatprep.subr.mxu0 %v10527_v40  ;;  %4142 = vmatprep.subr.mxu1 %v10529_v41 }
 0xf7e   :  { %4072 = vmatpush1.msra.mxu0 %v10531_v42  ;;  %4143 = vmatpush1.msra.mxu1 %v10535_v51 }
 0xf7f   :  { %4073 = vmatprep.subr.mxu0 %v10537_v45  ;;  %4144 = vmatprep.subr.mxu1 %v10539_v27 }
 0xf80   :  { %4074 = vmatpush1.msra.mxu0 %v10543_v57  ;;  %4145 = vmatpush1.msra.mxu1 %v10545_v52 }
 0xf81   :  { %4075 = vmatprep.subr.mxu0 %v10549_v53  ;;  %4146 = vmatprep.subr.mxu1 %v10551_v9 }
 0xf82   :  { %4076 = vmatpush1.msra.mxu0 %v10555_v11  ;;  %4147 = vmatpush1.msra.mxu1 %v10557_v17 }
 0xf83   :  { %4077 = vmatprep.subr.mxu0 %v10561_v7  ;;  %4148 = vmatprep.subr.mxu1 %v10563_v6  ;;  %v3541_v7 = vld [vmem:[#allocation3 + $0x30] sm:$0xc0] }
 0xf84   :  { %4078 = vmatpush1.msra.mxu0 %v10567_v14  ;;  %4149 = vmatpush1.msra.mxu1 %v10569_v13  ;;  %v10603_v13 = vld [vmem:[#allocation9 + $0x400] sm:$0xff]  ;;  %v3540_v14 = vld [vmem:[#allocation3 + $0x38] sm:$0xc0] }
 0xf85   :  { %4079 = vmatprep.subr.mxu0 %v10573_v12  ;;  %4150 = vmatprep.subr.mxu1 %v10575_v32  ;;  %12948 = vst [vmem:[#allocation43_spill] sm:$0xff] %v10603_v13  ;;  %v10605_v12 = vld [vmem:[#allocation9 + $0x410] sm:$0xff] }
 0xf86   :  { %4080 = vmatpush1.msra.mxu0 %v10579_v35  ;;  %4151 = vmatpush1.msra.mxu1 %v10581_v33  ;;  %12949 = vst [vmem:[#allocation17_spill] sm:$0xff] %v10605_v12  ;;  %v3539_v33 = vld [vmem:[#allocation3 + $0x20] sm:$0xc0] }
 0xf87   :  { %4081 = vmatprep.subr.mxu0 %v10585_v16  ;;  %4152 = vmatprep.subr.mxu1 %v10587_v15 }
 0xf88   :  { %4082 = vmatpush1.msra.mxu0 %v10591_v34  ;;  %4153 = vmatpush1.msra.mxu1 %v10593_v18 }
 0xf89   :  { %4083 = vmatprep.subr.mxu0 %v10597_v10  ;;  %4154 = vmatprep.subr.mxu1 %v10599_v5 }
 0xf8a   :  { %4084 = vmatpush1.msra.mxu0 %v10603_v13  ;;  %4155 = vmatpush1.msra.mxu1 %v10605_v12 }
 0xf8b   :  { %4228 = vmatprep.subr.mxu0 %v10421_v30  ;;  %4299 = vmatprep.subr.mxu1 %v10423_v54  ;;  %v3542_v54 = vld [vmem:[#allocation3] sm:$0xc0] }
0x1008   :  { %v3612_v15 = vpop.f32.mrf.mxu0  ;;  %v3683_v10 = vpop.f32.mrf.mxu1 }
0x1009   :  { %v3692_v16 = vrot.slane %v3612_v15, 2  ;;  %v3694_v13 = vrot.slane %v3683_v10, 2 }
0x100a   :  { %v3614_v35 = vpop.f32.mrf.mxu0  ;;  %v3685_v12 = vpop.f32.mrf.mxu1 }
0x100b   :  { %v3700_v32 = vadd.f32 %v3692_v16, %v3539_v33  ;;  %v3693_v34 = vrot.slane %v3614_v35, 2  ;;  %v3702_v17 = vadd.f32 %v3694_v13, %v3541_v7  ;;  %v3695_v30 = vrot.slane %v3685_v12, 2  ;;  %v12951_v33 = vld [vmem:[#allocation40_spill] sm:$0xff]  ;;  %v12952_v7 = vld [vmem:[#allocation41_spill] sm:$0xff] }
0x100d   :  { %v7628_v18 = vmul.f32 -1.442695, %v3700_v32  ;;  %v3701_v6 = vadd.f32 %v3693_v34, %v3540_v14  ;;  %v7630_v11 = vmul.f32 -1.442695, %v3702_v17  ;;  %v3703_v15 = vadd.f32 %v3695_v30, %v3542_v54  ;;  %v3800_v14 = vld [vmem:[#allocation10 + $0x8] sm:$0xf] }
0x100e   :  { %v12950_v32 = vld [vmem:[#allocation39_spill] sm:$0xff]  ;;  %v10619_v16 = vrot.slane %v3800_v14, %v12951_v33  ;;  %v10622_v13 = vrot.slane %v3800_v14, %v12952_v7  ;;  %v12953_v17 = vld [vmem:[#allocation42_spill] sm:$0xff] }
0x100f   :  { %8038 = vpow2.f32 %v7628_v18  ;;  %v7629_v5 = vmul.f32 -1.442695, %v3701_v6  ;;  %v10616_v6 = vrot.slane %v3800_v14, %v12950_v32  ;;  %v10625_v12 = vrot.slane %v3800_v14, %v12953_v17 }
0x1011   :  { %8040 = vpow2.f32 %v7629_v5 }
0x1012   :  { %8042 = vpow2.f32 %v7630_v11 }
0x101c   :  { %v8039_v9 = vpop.eup %8038 }
0x101d   :  { %v3713_v53 = vadd.f32 1.0, %v8039_v9 }
0x101e   :  { %v8041_v52 = vpop.eup %8040 }
0x101f   :  { %8044 = vrcp.f32 %v3713_v53  ;;  %v3714_v35 = vadd.f32 1.0, %v8041_v52  ;;  %v8043_v9 = vpop.eup %8042 }
0x1020   :  { %8046 = vtanh.f32 %v3703_v15  ;;  %v3715_v17 = vadd.f32 1.0, %v8043_v9  ;;  %v12959_v9 = vld [vmem:[#allocation25_spill] sm:$0xff] }
0x1021   :  { %8048 = vrcp.f32 %v3714_v35  ;;  %v3724_v35 = vrot.slane %v10414_v8, 6  ;;  %v12954_v8 = vld [vmem:[#allocation20_spill] sm:$0xff] }
0x1022   :  { %8050 = vrcp.f32 %v3715_v17  ;;  %v12958_v17 = vld [vmem:[#allocation24_spill] sm:$0xff] }
0x1029   :  { %v3888_v30 = vpop.f32.mrf.mxu0  ;;  %v3965_v54 = vpop.f32.mrf.mxu1 }
0x102a   :  { %v3889_v53 = vadd.f32 %v3888_v30, %v10616_v6  ;;  %v3966_v52 = vadd.f32 %v3965_v54, %v10619_v16 }
0x102b   :  { %v3890_v11 = vpop.f32.mrf.mxu0  ;;  %v3967_v34 = vpop.f32.mrf.mxu1 }
0x102c   :  { %v8045_v18 = vpop.eup %8044  ;;  %3976 = vst [vmem:[#allocation3 + $0x28] sm:$0xff] %v3889_v53  ;;  %3978 = vst [vmem:[#allocation3 + $0x8] sm:$0xff] %v3966_v52  ;;  %v3891_v10 = vadd.f32 %v3890_v11, %v10622_v13  ;;  %v3968_v5 = vadd.f32 %v3967_v34, %v10625_v12  ;;  %v12960_v11 = vld [vmem:[#allocation26_spill] sm:$0xff]  ;;  %v12961_v34 = vld [vmem:[#allocation27_spill] sm:$0xff] }
0x102d   :  { %v8047_v15 = vpop.eup %8046 }
0x102e   :  { %v8049_v14 = vpop.eup %8048  ;;  %3977 = vst [vmem:[#allocation3 + $0x10] sm:$0xff] %v3891_v10  ;;  %3979 = vst [vmem:[#allocation3 + $0x18] sm:$0xff] %v3968_v5  ;;  %v3727_v7 = vmul.f32 %v8047_v15, %v8045_v18  ;;  %v12962_v18 = vld [vmem:[#allocation28_spill] sm:$0xff]  ;;  %v12963_v10 = vld [vmem:[#allocation29_spill] sm:$0xff] }
0x102f   :  { %v3726_v30 = vmul.f32 %v8049_v14, %v3724_v35  ;;  %v8051_v33 = vpop.eup %8050  ;;  %v12964_v5 = vld [vmem:[#allocation30_spill] sm:$0xff]  ;;  %v12965_v15 = vld [vmem:[#allocation31_spill] sm:$0xff]  ;;  %v12966_v35 = vld [vmem:[#allocation32_spill] sm:$0xff] }
0x1030   :  { %v12967_v14 = vld [vmem:[#allocation33_spill] sm:$0xff] }
0x1031   :  { %v3728_v54 = vadd.f32 %v3727_v7, %v3726_v30  ;;  %v12957_v7 = vld [vmem:[#allocation23_spill] sm:$0xff]  ;;  %v12968_v30 = vld [vmem:[#allocation34_spill] sm:$0xff] }
0x1033   :  { %8052 = vtanh.f32 %v3728_v54  ;;  %v12969_v54 = vld [vmem:[#allocation35_spill] sm:$0xff] }
0x1040   :  { %v8053_v32 = vpop.eup %8052 }
0x1041   :  { %v3730_v53 = vmul.f32 %v8053_v32, %v8051_v33  ;;  %v12955_v32 = vld [vmem:[#allocation21_spill] sm:$0xff]  ;;  %v12956_v33 = vld [vmem:[#allocation22_spill] sm:$0xff] }
0x1043   :  { %3731 = vst [vmem:[#allocation2 + $0x8] sm:$0xc0] %v3730_v53  ;;  %v12970_v53 = vld [vmem:[#allocation36_spill] sm:$0xff] }
0x104a   :  { %v3733_v52 = vld [vmem:[#allocation2 + $0x8] sm:$0xff] }
0x104b   :  { %3893 = vmatmul.mubr.f32.gmra.mxu0 %v3733_v52  ;;  %3970 = vmatmul.mubr.f32.gmra.mxu1 %v3733_v52  ;;  %v12971_v52 = vld [vmem:[#allocation37_spill] sm:$0xff] }
0x104c   :  { %4117 = vmatprep.mubr.f32.mxu0 %v12926_v21  ;;  %4188 = vmatprep.mubr.f32.mxu1 %v12926_v21 }
0x104f   :  { %4118 = vmatmul.mubr.f32.vlgmr.msra.gmra.mxu0 %v12926_v21  ;;  %4189 = vmatmul.mubr.f32.vlgmr.msra.gmra.mxu1 %v12926_v21 }
0x1050   :  { %4229 = vmatpush1.msra.mxu0 %v10427_v3  ;;  %4300 = vmatpush1.msra.mxu1 %v10429_v31 }
0x1051   :  { %4230 = vmatprep.subr.mxu0 %v10433_v56  ;;  %4301 = vmatprep.subr.mxu1 %v10435_v44 }
0x1052   :  { %4231 = vmatpush1.msra.mxu0 %v10439_v49  ;;  %4302 = vmatpush1.msra.mxu1 %v10441_v61 }
0x1053   :  { %4232 = vmatprep.subr.mxu0 %v10445_v26  ;;  %4303 = vmatprep.subr.mxu1 %v10447_v47 }
0x1054   :  { %4233 = vmatpush1.msra.mxu0 %v10451_v20  ;;  %4304 = vmatpush1.msra.mxu1 %v10453_v58 }
0x1055   :  { %4234 = vmatprep.subr.mxu0 %v10457_v59  ;;  %4305 = vmatprep.subr.mxu1 %v10459_v4 }
0x1056   :  { %4235 = vmatpush1.msra.mxu0 %v10463_v62  ;;  %4306 = vmatpush1.msra.mxu1 %v10465_v24 }
0x1057   :  { %4236 = vmatprep.subr.mxu0 %v10469_v50  ;;  %4307 = vmatprep.subr.mxu1 %v10471_v43 }
0x1058   :  { %4237 = vmatpush1.msra.mxu0 %v10475_v1  ;;  %4308 = vmatpush1.msra.mxu1 %v10477_v60 }
0x1059   :  { %4238 = vmatprep.subr.mxu0 %v10481_v46  ;;  %4309 = vmatprep.subr.mxu1 %v10483_v0 }
0x105a   :  { %4239 = vmatpush1.msra.mxu0 %v10487_v55  ;;  %4310 = vmatpush1.msra.mxu1 %v10489_v19 }
0x105b   :  { %4240 = vmatprep.subr.mxu0 %v10493_v22  ;;  %4311 = vmatprep.subr.mxu1 %v10495_v23 }
0x105c   :  { %4241 = vmatpush1.msra.mxu0 %v10499_v25  ;;  %4312 = vmatpush1.msra.mxu1 %v10501_v29 }
0x105d   :  { %4242 = vmatprep.subr.mxu0 %v10505_v63  ;;  %4313 = vmatprep.subr.mxu1 %v10507_v48 }
0x105e   :  { %4243 = vmatpush1.msra.mxu0 %v10511_v2  ;;  %4314 = vmatpush1.msra.mxu1 %v10513_v28 }
0x105f   :  { %4244 = vmatprep.subr.mxu0 %v10515_v36  ;;  %4315 = vmatprep.subr.mxu1 %v10519_v37 }
0x1060   :  { %4245 = vmatpush1.msra.mxu0 %v10521_v38  ;;  %4316 = vmatpush1.msra.mxu1 %v10523_v39 }
0x1061   :  { %4246 = vmatprep.subr.mxu0 %v10527_v40  ;;  %4317 = vmatprep.subr.mxu1 %v10529_v41 }
0x1062   :  { %4247 = vmatpush1.msra.mxu0 %v10531_v42  ;;  %4318 = vmatpush1.msra.mxu1 %v10535_v51 }
0x1063   :  { %4248 = vmatprep.subr.mxu0 %v10537_v45  ;;  %4319 = vmatprep.subr.mxu1 %v10539_v27 }
0x1064   :  { %4249 = vmatpush1.msra.mxu0 %v10543_v57  ;;  %4320 = vmatpush1.msra.mxu1 %v12954_v8 }
0x1065   :  { %4250 = vmatprep.subr.mxu0 %v12955_v32  ;;  %4321 = vmatprep.subr.mxu1 %v12956_v33 }
0x1066   :  { %4251 = vmatpush1.msra.mxu0 %v12957_v7  ;;  %4322 = vmatpush1.msra.mxu1 %v12958_v17 }
0x1067   :  { %4252 = vmatprep.subr.mxu0 %v12959_v9  ;;  %4323 = vmatprep.subr.mxu1 %v12960_v11 }
0x1068   :  { %4253 = vmatpush1.msra.mxu0 %v12961_v34  ;;  %4324 = vmatpush1.msra.mxu1 %v12962_v18  ;;  %v12972_v34 = vld [vmem:[#allocation38_spill] sm:$0xff]  ;;  %v12973_v18 = vld [vmem:[#allocation43_spill] sm:$0xff] }
0x1069   :  { %4254 = vmatprep.subr.mxu0 %v12963_v10  ;;  %4325 = vmatprep.subr.mxu1 %v12964_v5  ;;  %v12974_v5 = vld [vmem:[#allocation17_spill] sm:$0xff] }
0x106a   :  { %4255 = vmatpush1.msra.mxu0 %v12965_v15  ;;  %4326 = vmatpush1.msra.mxu1 %v12966_v35  ;;  %v12975_v35 = vld [vmem:[#allocation18_spill] sm:$0xff]  ;;  %v4049_v10 = vld [vmem:[#allocation3 + $0x28] sm:$0x3] }
0x106b   :  { %4256 = vmatprep.subr.mxu0 %v12967_v14  ;;  %4327 = vmatprep.subr.mxu1 %v12968_v30  ;;  %v12976_v14 = vld [vmem:[#allocation19_spill] sm:$0xff] }
0x106c   :  { %4257 = vmatpush1.msra.mxu0 %v12969_v54  ;;  %4328 = vmatpush1.msra.mxu1 %v12970_v53 }
0x106d   :  { %4258 = vmatprep.subr.mxu0 %v12971_v52  ;;  %4329 = vmatprep.subr.mxu1 %v12972_v34 }
0x106e   :  { %4259 = vmatpush1.msra.mxu0 %v12973_v18  ;;  %4292 = vmatprep.mubr.f32.mxu0 %v12926_v21 }
0x106f   :  { %4330 = vmatpush1.msra.mxu1 %v12974_v5  ;;  %4363 = vmatprep.mubr.f32.mxu1 %v12926_v21 }
0x1070   :  { %4421 = vmatprep.subr.mxu0 %v12975_v35  ;;  %4492 = vmatprep.subr.mxu1 %v12976_v14  ;;  %v4050_v14 = vld [vmem:[#allocation3 + $0x10] sm:$0x3] }
0x110b   :  { %v3894_v30 = vpop.f32.mrf.mxu0  ;;  %v3971_v54 = vpop.f32.mrf.mxu1 }
0x110c   :  { %v3895_v53 = vadd.f32 %v3894_v30, %v10616_v6  ;;  %v3972_v52 = vadd.f32 %v3971_v54, %v10619_v16  ;;  %v4051_v30 = vld [vmem:[#allocation3 + $0x8] sm:$0x3] }
0x110d   :  { %v3896_v15 = vpop.f32.mrf.mxu0  ;;  %v3973_v34 = vpop.f32.mrf.mxu1 }
0x110e   :  { %3980 = vst [vmem:[#allocation3 + $0x20] sm:$0xff] %v3895_v53  ;;  %3982 = vst [vmem:[#allocation3 + $0x30] sm:$0xff] %v3972_v52  ;;  %v3897_v18 = vadd.f32 %v3896_v15, %v10622_v13  ;;  %v3974_v5 = vadd.f32 %v3973_v34, %v10625_v12  ;;  %v4052_v13 = vld [vmem:[#allocation3 + $0x18] sm:$0x3] }
0x110f   :  { %v4119_v21 = vpop.f32.mrf.mxu0  ;;  %v4190_v16 = vpop.f32.mrf.mxu1 }
0x1110   :  { %3981 = vst [vmem:[#allocation3 + $0x38] sm:$0xff] %v3897_v18  ;;  %3983 = vst [vmem:[#allocation3] sm:$0xff] %v3974_v5  ;;  %v4195_v35 = vadd.f32 %v4119_v21, %v4049_v10  ;;  %v4197_v54 = vadd.f32 %v4190_v16, %v4051_v30 }
0x1111   :  { %v4121_v11 = vpop.f32.mrf.mxu0  ;;  %v4192_v53 = vpop.f32.mrf.mxu1 }
0x1112   :  { %v7631_v9 = vmul.f32 -1.442695, %v4195_v35  ;;  %v4196_v17 = vadd.f32 %v4121_v11, %v4050_v14  ;;  %v7633_v52 = vmul.f32 -1.442695, %v4197_v54  ;;  %v4198_v12 = vadd.f32 %v4192_v53, %v4052_v13  ;;  %v12978_v54 = vld [vmem:[#allocation24_spill] sm:$0xff]  ;;  %v12979_v53 = vld [vmem:[#allocation25_spill] sm:$0xff] }
0x1113   :  { %v12981_v13 = vld [vmem:[#allocation27_spill] sm:$0xff] }
0x1114   :  { %8054 = vpow2.f32 %v7631_v9  ;;  %v7632_v6 = vmul.f32 -1.442695, %v4196_v17 }
0x1116   :  { %8056 = vpow2.f32 %v7632_v6 }
0x1117   :  { %8058 = vpow2.f32 %v7633_v52  ;;  %v12980_v52 = vld [vmem:[#allocation26_spill] sm:$0xff] }
0x1121   :  { %v8055_v15 = vpop.eup %8054 }
0x1122   :  { %v4208_v34 = vadd.f32 1.0, %v8055_v15  ;;  %v12982_v15 = vld [vmem:[#allocation28_spill] sm:$0xff] }
0x1123   :  { %v8057_v7 = vpop.eup %8056 }
0x1124   :  { %8060 = vrcp.f32 %v4208_v34  ;;  %v4209_v21 = vadd.f32 1.0, %v8057_v7  ;;  %v8059_v18 = vpop.eup %8058  ;;  %v12977_v7 = vld [vmem:[#allocation23_spill] sm:$0xff]  ;;  %v12984_v34 = vld [vmem:[#allocation30_spill] sm:$0xff] }
0x1125   :  { %8062 = vtanh.f32 %v4198_v12  ;;  %v4210_v10 = vadd.f32 1.0, %v8059_v18  ;;  %v12983_v12 = vld [vmem:[#allocation29_spill] sm:$0xff]  ;;  %v12986_v18 = vld [vmem:[#allocation32_spill] sm:$0xff] }
0x1126   :  { %8064 = vrcp.f32 %v4209_v21  ;;  %v12985_v21 = vld [vmem:[#allocation31_spill] sm:$0xff] }
0x1127   :  { %8066 = vrcp.f32 %v4210_v10  ;;  %v12990_v10 = vld [vmem:[#allocation36_spill] sm:$0xff] }
0x1131   :  { %v8061_v11 = vpop.eup %8060 }
0x1132   :  { %v8063_v9 = vpop.eup %8062 }
0x1133   :  { %v8065_v17 = vpop.eup %8064  ;;  %v4219_v35 = vmul.f32 %v8063_v9, %v8061_v11  ;;  %v12987_v11 = vld [vmem:[#allocation33_spill] sm:$0xff]  ;;  %v12988_v9 = vld [vmem:[#allocation34_spill] sm:$0xff] }
0x1134   :  { %v4218_v5 = vmul.f32 0.0, %v8065_v17  ;;  %v8067_v6 = vpop.eup %8066  ;;  %v12989_v17 = vld [vmem:[#allocation35_spill] sm:$0xff] }
0x1136   :  { %v10706_v14 = vadd.f32 %v4219_v35, %v4218_v5  ;;  %v12991_v5 = vld [vmem:[#allocation37_spill] sm:$0xff]  ;;  %v12992_v35 = vld [vmem:[#allocation38_spill] sm:$0xff] }
0x1138   :  { %8068 = vtanh.f32 %v10706_v14 }
0x1145   :  { %v8069_v16 = vpop.eup %8068 }
0x1146   :  { %v4222_v30 = vmul.f32 %v8069_v16, %v8067_v6  ;;  %v12993_v6 = vld [vmem:[#allocation43_spill] sm:$0xff]  ;;  %v12994_v16 = vmov 0.0  }
0x1148   :  { %4223 = vst [vmem:[#allocation2] sm:$0x3] %v4222_v30  ;;  %4293 = vmatmul.mubr.f32.vlgmr.msra.gmra.mxu0 %v4222_v30  ;;  %4364 = vmatmul.mubr.f32.vlgmr.msra.gmra.mxu1 %v4222_v30  ;;  %v12995_v30 = vld [vmem:[#allocation17_spill] sm:$0xff] }
0x1149   :  { %4422 = vmatpush1.msra.mxu0 %v10427_v3  ;;  %4493 = vmatpush1.msra.mxu1 %v10429_v31 }
0x114a   :  { %4423 = vmatprep.subr.mxu0 %v10433_v56  ;;  %4494 = vmatprep.subr.mxu1 %v10435_v44 }
0x114b   :  { %4424 = vmatpush1.msra.mxu0 %v10439_v49  ;;  %4495 = vmatpush1.msra.mxu1 %v10441_v61 }
0x114c   :  { %4425 = vmatprep.subr.mxu0 %v10445_v26  ;;  %4496 = vmatprep.subr.mxu1 %v10447_v47 }
0x114d   :  { %4426 = vmatpush1.msra.mxu0 %v10451_v20  ;;  %4497 = vmatpush1.msra.mxu1 %v10453_v58 }
0x114e   :  { %4427 = vmatprep.subr.mxu0 %v10457_v59  ;;  %4498 = vmatprep.subr.mxu1 %v10459_v4 }
0x114f   :  { %4428 = vmatpush1.msra.mxu0 %v10463_v62  ;;  %4499 = vmatpush1.msra.mxu1 %v10465_v24 }
0x1150   :  { %4429 = vmatprep.subr.mxu0 %v10469_v50  ;;  %4500 = vmatprep.subr.mxu1 %v10471_v43 }
0x1151   :  { %4430 = vmatpush1.msra.mxu0 %v10475_v1  ;;  %4501 = vmatpush1.msra.mxu1 %v10477_v60 }
0x1152   :  { %4431 = vmatprep.subr.mxu0 %v10481_v46  ;;  %4502 = vmatprep.subr.mxu1 %v10483_v0 }
0x1153   :  { %4432 = vmatpush1.msra.mxu0 %v10487_v55  ;;  %4503 = vmatpush1.msra.mxu1 %v10489_v19 }
0x1154   :  { %4433 = vmatprep.subr.mxu0 %v10493_v22  ;;  %4504 = vmatprep.subr.mxu1 %v10495_v23 }
0x1155   :  { %4434 = vmatpush1.msra.mxu0 %v10499_v25  ;;  %4505 = vmatpush1.msra.mxu1 %v10501_v29 }
0x1156   :  { %4435 = vmatprep.subr.mxu0 %v10505_v63  ;;  %4506 = vmatprep.subr.mxu1 %v10507_v48 }
0x1157   :  { %4436 = vmatpush1.msra.mxu0 %v10511_v2  ;;  %4507 = vmatpush1.msra.mxu1 %v10513_v28 }
0x1158   :  { %4437 = vmatprep.subr.mxu0 %v10515_v36  ;;  %4508 = vmatprep.subr.mxu1 %v10519_v37 }
0x1159   :  { %4438 = vmatpush1.msra.mxu0 %v10521_v38  ;;  %4509 = vmatpush1.msra.mxu1 %v10523_v39 }
0x115a   :  { %4439 = vmatprep.subr.mxu0 %v10527_v40  ;;  %4510 = vmatprep.subr.mxu1 %v10529_v41 }
0x115b   :  { %4440 = vmatpush1.msra.mxu0 %v10531_v42  ;;  %4511 = vmatpush1.msra.mxu1 %v10535_v51 }
0x115c   :  { %4441 = vmatprep.subr.mxu0 %v10537_v45  ;;  %4512 = vmatprep.subr.mxu1 %v10539_v27 }
0x115d   :  { %4442 = vmatpush1.msra.mxu0 %v10543_v57  ;;  %4513 = vmatpush1.msra.mxu1 %v12954_v8 }
0x115e   :  { %4443 = vmatprep.subr.mxu0 %v12955_v32  ;;  %4514 = vmatprep.subr.mxu1 %v12956_v33 }
0x115f   :  { %4444 = vmatpush1.msra.mxu0 %v12977_v7  ;;  %4515 = vmatpush1.msra.mxu1 %v12978_v54 }
0x1160   :  { %4445 = vmatprep.subr.mxu0 %v12979_v53  ;;  %4516 = vmatprep.subr.mxu1 %v12980_v52  ;;  %v4226_v52 = vld [vmem:[#allocation3 + $0x8] sm:$0xc] }
0x1161   :  { %4446 = vmatpush1.msra.mxu0 %v12981_v13  ;;  %4517 = vmatpush1.msra.mxu1 %v12982_v15 }
0x1162   :  { %4447 = vmatprep.subr.mxu0 %v12983_v12  ;;  %4518 = vmatprep.subr.mxu1 %v12984_v34  ;;  %v4225_v12 = vld [vmem:[#allocation3 + $0x10] sm:$0xc] }
0x1163   :  { %4448 = vmatpush1.msra.mxu0 %v12985_v21  ;;  %4519 = vmatpush1.msra.mxu1 %v12986_v18  ;;  %v12996_v18 = vld [vmem:[#allocation18_spill] sm:$0xff] }
0x1164   :  { %4449 = vmatprep.subr.mxu0 %v12987_v11  ;;  %4520 = vmatprep.subr.mxu1 %v12988_v9  ;;  %v12997_v11 = vld [vmem:[#allocation19_spill] sm:$0xff]  ;;  %v4224_v21 = vld [vmem:[#allocation3 + $0x28] sm:$0xc] }
0x1165   :  { %4450 = vmatpush1.msra.mxu0 %v12989_v17  ;;  %4521 = vmatpush1.msra.mxu1 %v12990_v10 }
0x1166   :  { %4451 = vmatprep.subr.mxu0 %v12991_v5  ;;  %4522 = vmatprep.subr.mxu1 %v12992_v35 }
0x1167   :  { %4452 = vmatpush1.msra.mxu0 %v12993_v6  ;;  %4485 = vmatprep.mubr.f32.mxu0 %v12994_v16 }
0x1168   :  { %4523 = vmatpush1.msra.mxu1 %v12995_v30  ;;  %4556 = vmatprep.mubr.f32.mxu1 %v12994_v16 }
0x1169   :  { %4614 = vmatprep.subr.mxu0 %v12996_v18  ;;  %4685 = vmatprep.subr.mxu1 %v12997_v11  ;;  %v4227_v11 = vld [vmem:[#allocation3 + $0x18] sm:$0xc] }
0x1208   :  { %v4294_v9 = vpop.f32.mrf.mxu0  ;;  %v4365_v6 = vpop.f32.mrf.mxu1 }
0x1209   :  { %v4374_v17 = vrot.slane %v4294_v9, 6  ;;  %v4376_v30 = vrot.slane %v4365_v6, 6 }
0x120a   :  { %v4296_v10 = vpop.f32.mrf.mxu0  ;;  %v4367_v16 = vpop.f32.mrf.mxu1 }
0x120b   :  { %v4382_v34 = vadd.f32 %v4374_v17, %v4224_v21  ;;  %v4375_v5 = vrot.slane %v4296_v10, 6  ;;  %v4384_v53 = vadd.f32 %v4376_v30, %v4226_v52  ;;  %v4377_v18 = vrot.slane %v4367_v16, 6 }
0x120d   :  { %v7634_v35 = vmul.f32 -1.442695, %v4382_v34  ;;  %v4383_v15 = vadd.f32 %v4375_v5, %v4225_v12  ;;  %v7636_v54 = vmul.f32 -1.442695, %v4384_v53  ;;  %v4385_v9 = vadd.f32 %v4377_v18, %v4227_v11  ;;  %v4415_v18 = vld [vmem:[#allocation3 + $0x10] sm:$0x30] }
0x120f   :  { %8070 = vpow2.f32 %v7634_v35  ;;  %v7635_v13 = vmul.f32 -1.442695, %v4383_v15 }
0x1211   :  { %8072 = vpow2.f32 %v7635_v13  ;;  %v4406_v13 = vrot.slane %v10706_v14, 6 }
0x1212   :  { %8074 = vpow2.f32 %v7636_v54 }
0x121c   :  { %v8071_v7 = vpop.eup %8070 }
0x121d   :  { %v4395_v33 = vadd.f32 1.0, %v8071_v7 }
0x121e   :  { %v8073_v32 = vpop.eup %8072 }
0x121f   :  { %8076 = vrcp.f32 %v4395_v33  ;;  %v4396_v21 = vadd.f32 1.0, %v8073_v32  ;;  %v8075_v12 = vpop.eup %8074 }
0x1220   :  { %8078 = vtanh.f32 %v4385_v9  ;;  %v4397_v10 = vadd.f32 1.0, %v8075_v12  ;;  %v4416_v9 = vld [vmem:[#allocation3 + $0x8] sm:$0x30] }
0x1221   :  { %8080 = vrcp.f32 %v4396_v21 }
0x1222   :  { %8082 = vrcp.f32 %v4397_v10 }
0x122c   :  { %v8077_v34 = vpop.eup %8076 }
0x122d   :  { %v8079_v15 = vpop.eup %8078 }
0x122e   :  { %v8081_v17 = vpop.eup %8080  ;;  %v4409_v5 = vmul.f32 %v8079_v15, %v8077_v34 }
0x122f   :  { %v4408_v52 = vmul.f32 %v8081_v17, %v4406_v13  ;;  %v8083_v7 = vpop.eup %8082  ;;  %v4417_v13 = vld [vmem:[#allocation3 + $0x18] sm:$0x30] }
0x1231   :  { %v10776_v53 = vadd.f32 %v4409_v5, %v4408_v52 }
0x1233   :  { %8084 = vtanh.f32 %v10776_v53 }
0x1240   :  { %v8085_v54 = vpop.eup %8084 }
0x1241   :  { %v4412_v33 = vmul.f32 %v8085_v54, %v8083_v7 }
0x1243   :  { %4413 = vst [vmem:[#allocation2] sm:$0xc] %v4412_v33  ;;  %v4419_v32 = vrot.slane %v4412_v33, 2 }
0x1245   :  { %4486 = vmatmul.mubr.f32.vlgmr.msra.gmra.mxu0 %v4419_v32  ;;  %4557 = vmatmul.mubr.f32.vlgmr.msra.gmra.mxu1 %v4419_v32 }
0x1246   :  { %4615 = vmatpush1.msra.mxu0 %v10427_v3  ;;  %4686 = vmatpush1.msra.mxu1 %v10429_v31  ;;  %v12998_v3 = vld [vmem:[#allocation21_spill] sm:$0xff]  ;;  %v12999_v31 = vld [vmem:[#allocation22_spill] sm:$0xff] }
0x1247   :  { %4616 = vmatprep.subr.mxu0 %v10433_v56  ;;  %4687 = vmatprep.subr.mxu1 %v10435_v44  ;;  %v13000_v56 = vld [vmem:[#allocation23_spill] sm:$0xff]  ;;  %v13001_v44 = vld [vmem:[#allocation24_spill] sm:$0xff] }
0x1248   :  { %4617 = vmatpush1.msra.mxu0 %v10439_v49  ;;  %4688 = vmatpush1.msra.mxu1 %v10441_v61  ;;  %v13002_v49 = vld [vmem:[#allocation25_spill] sm:$0xff]  ;;  %v13003_v61 = vld [vmem:[#allocation26_spill] sm:$0xff] }
0x1249   :  { %4618 = vmatprep.subr.mxu0 %v10445_v26  ;;  %4689 = vmatprep.subr.mxu1 %v10447_v47  ;;  %v13004_v26 = vld [vmem:[#allocation27_spill] sm:$0xff]  ;;  %v13005_v47 = vld [vmem:[#allocation28_spill] sm:$0xff] }
0x124a   :  { %4619 = vmatpush1.msra.mxu0 %v10451_v20  ;;  %4690 = vmatpush1.msra.mxu1 %v10453_v58  ;;  %v13006_v20 = vld [vmem:[#allocation29_spill] sm:$0xff]  ;;  %v13007_v58 = vld [vmem:[#allocation30_spill] sm:$0xff] }
0x124b   :  { %4620 = vmatprep.subr.mxu0 %v10457_v59  ;;  %4691 = vmatprep.subr.mxu1 %v10459_v4  ;;  %v13008_v59 = vld [vmem:[#allocation31_spill] sm:$0xff]  ;;  %v13009_v4 = vld [vmem:[#allocation32_spill] sm:$0xff] }
0x124c   :  { %4621 = vmatpush1.msra.mxu0 %v10463_v62  ;;  %4692 = vmatpush1.msra.mxu1 %v10465_v24  ;;  %v13010_v62 = vld [vmem:[#allocation33_spill] sm:$0xff]  ;;  %v13011_v24 = vld [vmem:[#allocation34_spill] sm:$0xff] }
0x124d   :  { %4622 = vmatprep.subr.mxu0 %v10469_v50  ;;  %4693 = vmatprep.subr.mxu1 %v10471_v43  ;;  %v13012_v50 = vld [vmem:[#allocation35_spill] sm:$0xff]  ;;  %v13013_v43 = vld [vmem:[#allocation36_spill] sm:$0xff] }
0x124e   :  { %4623 = vmatpush1.msra.mxu0 %v10475_v1  ;;  %4694 = vmatpush1.msra.mxu1 %v10477_v60  ;;  %v13014_v1 = vld [vmem:[#allocation37_spill] sm:$0xff]  ;;  %v13015_v60 = vld [vmem:[#allocation38_spill] sm:$0xff] }
0x124f   :  { %4624 = vmatprep.subr.mxu0 %v10481_v46  ;;  %4695 = vmatprep.subr.mxu1 %v10483_v0  ;;  %v13016_v46 = vld [vmem:[#allocation43_spill] sm:$0xff]  ;;  %v13017_v0 = vmov 0.0  }
0x1250   :  { %4625 = vmatpush1.msra.mxu0 %v10487_v55  ;;  %4696 = vmatpush1.msra.mxu1 %v10489_v19  ;;  %v13018_v55 = vld [vmem:[#allocation17_spill] sm:$0xff]  ;;  %v13019_v19 = vld [vmem:[#allocation18_spill] sm:$0xff] }
0x1251   :  { %4626 = vmatprep.subr.mxu0 %v10493_v22  ;;  %4697 = vmatprep.subr.mxu1 %v10495_v23  ;;  %v13020_v22 = vld [vmem:[#allocation19_spill] sm:$0xff] }
0x1252   :  { %4627 = vmatpush1.msra.mxu0 %v10499_v25  ;;  %4698 = vmatpush1.msra.mxu1 %v10501_v29  ;;  %v4414_v29 = vld [vmem:[#allocation3 + $0x28] sm:$0x30] }
0x1253   :  { %4628 = vmatprep.subr.mxu0 %v10505_v63  ;;  %4699 = vmatprep.subr.mxu1 %v10507_v48 }
0x1254   :  { %4629 = vmatpush1.msra.mxu0 %v10511_v2  ;;  %4700 = vmatpush1.msra.mxu1 %v10513_v28 }
0x1255   :  { %4630 = vmatprep.subr.mxu0 %v10515_v36  ;;  %4701 = vmatprep.subr.mxu1 %v10519_v37 }
0x1256   :  { %4631 = vmatpush1.msra.mxu0 %v10521_v38  ;;  %4702 = vmatpush1.msra.mxu1 %v10523_v39 }
0x1257   :  { %4632 = vmatprep.subr.mxu0 %v10527_v40  ;;  %4703 = vmatprep.subr.mxu1 %v10529_v41 }
0x1258   :  { %4633 = vmatpush1.msra.mxu0 %v10531_v42  ;;  %4704 = vmatpush1.msra.mxu1 %v10535_v51 }
0x1259   :  { %4634 = vmatprep.subr.mxu0 %v10537_v45  ;;  %4705 = vmatprep.subr.mxu1 %v10539_v27 }
0x125a   :  { %4635 = vmatpush1.msra.mxu0 %v10543_v57  ;;  %4706 = vmatpush1.msra.mxu1 %v12954_v8 }
0x125b   :  { %4636 = vmatprep.subr.mxu0 %v12998_v3  ;;  %4707 = vmatprep.subr.mxu1 %v12999_v31 }
0x125c   :  { %4637 = vmatpush1.msra.mxu0 %v13000_v56  ;;  %4708 = vmatpush1.msra.mxu1 %v13001_v44 }
0x125d   :  { %4638 = vmatprep.subr.mxu0 %v13002_v49  ;;  %4709 = vmatprep.subr.mxu1 %v13003_v61 }
0x125e   :  { %4639 = vmatpush1.msra.mxu0 %v13004_v26  ;;  %4710 = vmatpush1.msra.mxu1 %v13005_v47 }
0x125f   :  { %4640 = vmatprep.subr.mxu0 %v13006_v20  ;;  %4711 = vmatprep.subr.mxu1 %v13007_v58 }
0x1260   :  { %4641 = vmatpush1.msra.mxu0 %v13008_v59  ;;  %4712 = vmatpush1.msra.mxu1 %v13009_v4 }
0x1261   :  { %4642 = vmatprep.subr.mxu0 %v13010_v62  ;;  %4713 = vmatprep.subr.mxu1 %v13011_v24 }
0x1262   :  { %4643 = vmatpush1.msra.mxu0 %v13012_v50  ;;  %4714 = vmatpush1.msra.mxu1 %v13013_v43 }
0x1263   :  { %4644 = vmatprep.subr.mxu0 %v13014_v1  ;;  %4715 = vmatprep.subr.mxu1 %v13015_v60 }
0x1264   :  { %4645 = vmatpush1.msra.mxu0 %v13016_v46  ;;  %4678 = vmatprep.mubr.f32.mxu0 %v13017_v0 }
0x1265   :  { %4716 = vmatpush1.msra.mxu1 %v13018_v55  ;;  %4749 = vmatprep.mubr.f32.mxu1 %v13017_v0 }
0x1266   :  { %4807 = vmatprep.subr.mxu0 %v13019_v19  ;;  %4878 = vmatprep.subr.mxu1 %v13020_v22  ;;  %v4599_v19 = vrot.slane %v10776_v53, 6  ;;  %v10852_v53 = vld [vmem:[#allocation9 + $0x5f0] sm:$0xff] }
0x1305   :  { %v4487_v23 = vpop.f32.mrf.mxu0  ;;  %v4558_v6 = vpop.f32.mrf.mxu1 }
0x1306   :  { %v4567_v25 = vrot.slane %v4487_v23, 4  ;;  %v4569_v30 = vrot.slane %v4558_v6, 4  ;;  %v10855_v6 = vld [vmem:[#allocation9 + $0x5c8] sm:$0xff] }
0x1307   :  { %v4489_v63 = vpop.f32.mrf.mxu0  ;;  %v4560_v21 = vpop.f32.mrf.mxu1 }
0x1308   :  { %v4575_v48 = vadd.f32 %v4567_v25, %v4414_v29  ;;  %v4568_v14 = vrot.slane %v4489_v63, 4  ;;  %v4577_v12 = vadd.f32 %v4569_v30, %v4416_v9  ;;  %v4570_v34 = vrot.slane %v4560_v21, 4  ;;  %v10861_v30 = vld [vmem:[#allocation9 + $0x5c0] sm:$0xff]  ;;  %v10864_v9 = vld [vmem:[#allocation9 + $0x5d0] sm:$0xff]  ;;  %v10867_v21 = vld [vmem:[#allocation9 + $0x5a8] sm:$0xff] }
0x130a   :  { %v7637_v11 = vmul.f32 -1.442695, %v4575_v48  ;;  %v4576_v35 = vadd.f32 %v4568_v14, %v4415_v18  ;;  %v7639_v15 = vmul.f32 -1.442695, %v4577_v12  ;;  %v4578_v10 = vadd.f32 %v4570_v34, %v4417_v13  ;;  %v10870_v12 = vld [vmem:[#allocation9 + $0x5b8] sm:$0xff]  ;;  %v10873_v34 = vld [vmem:[#allocation9 + $0x5a0] sm:$0xff] }
0x130b   :  { %v10879_v13 = vld [vmem:[#allocation9 + $0x588] sm:$0xff] }
0x130c   :  { %8086 = vpow2.f32 %v7637_v11  ;;  %v7638_v16 = vmul.f32 -1.442695, %v4576_v35  ;;  %v10849_v35 = vld [vmem:[#allocation9 + $0x5e0] sm:$0xff] }
0x130e   :  { %8088 = vpow2.f32 %v7638_v16  ;;  %v10858_v16 = vld [vmem:[#allocation9 + $0x5d8] sm:$0xff] }
0x130f   :  { %8090 = vpow2.f32 %v7639_v15  ;;  %v10876_v15 = vld [vmem:[#allocation9 + $0x5b0] sm:$0xff] }
0x1319   :  { %v8087_v17 = vpop.eup %8086 }
0x131a   :  { %v4588_v52 = vadd.f32 1.0, %v8087_v17  ;;  %v10882_v17 = vld [vmem:[#allocation9 + $0x598] sm:$0xff] }
0x131b   :  { %v8089_v5 = vpop.eup %8088 }
0x131c   :  { %8092 = vrcp.f32 %v4588_v52  ;;  %v4589_v7 = vadd.f32 1.0, %v8089_v5  ;;  %v8091_v54 = vpop.eup %8090  ;;  %v10888_v52 = vld [vmem:[#allocation9 + $0x590] sm:$0xff]  ;;  %v10891_v5 = vld [vmem:[#allocation9 + $0x568] sm:$0xff] }
0x131d   :  { %8094 = vtanh.f32 %v4578_v10  ;;  %v4590_v23 = vadd.f32 1.0, %v8091_v54  ;;  %v10885_v10 = vld [vmem:[#allocation9 + $0x580] sm:$0xff] }
0x131e   :  { %8096 = vrcp.f32 %v4589_v7  ;;  %v10894_v7 = vld [vmem:[#allocation9 + $0x578] sm:$0xff]  ;;  %v10897_v54 = vld [vmem:[#allocation9 + $0x560] sm:$0xff] }
0x131f   :  { %8098 = vrcp.f32 %v4590_v23  ;;  %v10912_v23 = vld [vmem:[#allocation9 + $0x550] sm:$0xff] }
0x1329   :  { %v8093_v33 = vpop.eup %8092 }
0x132a   :  { %v8095_v32 = vpop.eup %8094 }
0x132b   :  { %v8097_v22 = vpop.eup %8096  ;;  %v4602_v29 = vmul.f32 %v8095_v32, %v8093_v33  ;;  %v10900_v33 = vld [vmem:[#allocation9 + $0x570] sm:$0xff]  ;;  %v10903_v32 = vld [vmem:[#allocation9 + $0x548] sm:$0xff] }
0x132c   :  { %v4601_v25 = vmul.f32 %v8097_v22, %v4599_v19  ;;  %v8099_v48 = vpop.eup %8098  ;;  %v10906_v19 = vld [vmem:[#allocation9 + $0x558] sm:$0xff]  ;;  %v10909_v22 = vld [vmem:[#allocation9 + $0x540] sm:$0xff] }
0x132e   :  { %v10846_v63 = vadd.f32 %v4602_v29, %v4601_v25  ;;  %v10915_v25 = vld [vmem:[#allocation9 + $0x528] sm:$0xff]  ;;  %v10918_v29 = vld [vmem:[#allocation9 + $0x538] sm:$0xff] }
0x1330   :  { %8100 = vtanh.f32 %v10846_v63 }
0x133d   :  { %v8101_v14 = vpop.eup %8100 }
0x133e   :  { %v4605_v18 = vmul.f32 %v8101_v14, %v8099_v48  ;;  %v10921_v48 = vld [vmem:[#allocation9 + $0x520] sm:$0xff]  ;;  %v10924_v14 = vld [vmem:[#allocation9 + $0x530] sm:$0xff] }
0x1340   :  { %4606 = vst [vmem:[#allocation2] sm:$0x30] %v4605_v18  ;;  %v4612_v11 = vrot.slane %v4605_v18, 4  ;;  %v10927_v18 = vld [vmem:[#allocation9 + $0x508] sm:$0xff] }
0x1342   :  { %4679 = vmatmul.mubr.f32.vlgmr.msra.gmra.mxu0 %v4612_v11  ;;  %4750 = vmatmul.mubr.f32.vlgmr.msra.gmra.mxu1 %v4612_v11  ;;  %v10930_v11 = vld [vmem:[#allocation9 + $0x518] sm:$0xff] }
0x1343   :  { %4808 = vmatpush1.msra.mxu0 %v10849_v35  ;;  %4879 = vmatpush1.msra.mxu1 %v10852_v53 }
0x1344   :  { %4809 = vmatprep.subr.mxu0 %v10855_v6  ;;  %4880 = vmatprep.subr.mxu1 %v10858_v16 }
0x1345   :  { %4810 = vmatpush1.msra.mxu0 %v10861_v30  ;;  %4881 = vmatpush1.msra.mxu1 %v10864_v9 }
0x1346   :  { %4811 = vmatprep.subr.mxu0 %v10867_v21  ;;  %4882 = vmatprep.subr.mxu1 %v10870_v12 }
0x1347   :  { %4812 = vmatpush1.msra.mxu0 %v10873_v34  ;;  %4883 = vmatpush1.msra.mxu1 %v10876_v15 }
0x1348   :  { %4813 = vmatprep.subr.mxu0 %v10879_v13  ;;  %4884 = vmatprep.subr.mxu1 %v10882_v17 }
0x1349   :  { %4814 = vmatpush1.msra.mxu0 %v10885_v10  ;;  %4885 = vmatpush1.msra.mxu1 %v10888_v52 }
0x134a   :  { %4815 = vmatprep.subr.mxu0 %v10891_v5  ;;  %4886 = vmatprep.subr.mxu1 %v10894_v7 }
0x134b   :  { %4816 = vmatpush1.msra.mxu0 %v10897_v54  ;;  %4887 = vmatpush1.msra.mxu1 %v10900_v33 }
0x134c   :  { %4817 = vmatprep.subr.mxu0 %v10903_v32  ;;  %4888 = vmatprep.subr.mxu1 %v10906_v19 }
0x134d   :  { %4818 = vmatpush1.msra.mxu0 %v10909_v22  ;;  %4889 = vmatpush1.msra.mxu1 %v10912_v23 }
0x134e   :  { %4819 = vmatprep.subr.mxu0 %v10915_v25  ;;  %4890 = vmatprep.subr.mxu1 %v10918_v29 }
0x134f   :  { %4820 = vmatpush1.msra.mxu0 %v10921_v48  ;;  %4891 = vmatpush1.msra.mxu1 %v10924_v14 }
0x1350   :  { %4821 = vmatprep.subr.mxu0 %v10927_v18  ;;  %4892 = vmatprep.subr.mxu1 %v10930_v11 }
0x1351   :  { %4822 = vmatpush1.msra.mxu0 %v10511_v2  ;;  %4893 = vmatpush1.msra.mxu1 %v10513_v28  ;;  %v10969_v2 = vld [vmem:[#allocation9 + $0x5e8] sm:$0xff]  ;;  %v10972_v28 = vld [vmem:[#allocation9 + $0x5f8] sm:$0xff] }
0x1352   :  { %4823 = vmatprep.subr.mxu0 %v10515_v36  ;;  %4894 = vmatprep.subr.mxu1 %v10519_v37  ;;  %13021 = vst [vmem:[#allocation20_spill] sm:$0xff] %v10969_v2  ;;  %13022 = vst [vmem:[#allocation21_spill] sm:$0xff] %v10972_v28 }
0x1353   :  { %4824 = vmatpush1.msra.mxu0 %v10521_v38  ;;  %4895 = vmatpush1.msra.mxu1 %v10523_v39  ;;  %v4607_v38 = vld [vmem:[#allocation3 + $0x28] sm:$0xc0] }
0x1354   :  { %4825 = vmatprep.subr.mxu0 %v10527_v40  ;;  %4896 = vmatprep.subr.mxu1 %v10529_v41 }
0x1355   :  { %4826 = vmatpush1.msra.mxu0 %v10531_v42  ;;  %4897 = vmatpush1.msra.mxu1 %v10535_v51  ;;  %v4608_v42 = vld [vmem:[#allocation3 + $0x10] sm:$0xc0] }
0x1356   :  { %4827 = vmatprep.subr.mxu0 %v10537_v45  ;;  %4898 = vmatprep.subr.mxu1 %v10539_v27 }
0x1357   :  { %4828 = vmatpush1.msra.mxu0 %v10543_v57  ;;  %4899 = vmatpush1.msra.mxu1 %v12954_v8 }
0x1358   :  { %4829 = vmatprep.subr.mxu0 %v12998_v3  ;;  %4900 = vmatprep.subr.mxu1 %v12999_v31  ;;  %v4609_v3 = vld [vmem:[#allocation3 + $0x8] sm:$0xc0] }
0x1359   :  { %4830 = vmatpush1.msra.mxu0 %v13000_v56  ;;  %4901 = vmatpush1.msra.mxu1 %v13001_v44 }
0x135a   :  { %4831 = vmatprep.subr.mxu0 %v13002_v49  ;;  %4902 = vmatprep.subr.mxu1 %v13003_v61  ;;  %v4610_v61 = vld [vmem:[#allocation3 + $0x18] sm:$0xc0] }
0x135b   :  { %4832 = vmatpush1.msra.mxu0 %v13004_v26  ;;  %4903 = vmatpush1.msra.mxu1 %v13005_v47 }
0x135c   :  { %4833 = vmatprep.subr.mxu0 %v13006_v20  ;;  %4904 = vmatprep.subr.mxu1 %v13007_v58 }
0x135d   :  { %4834 = vmatpush1.msra.mxu0 %v13008_v59  ;;  %4905 = vmatpush1.msra.mxu1 %v13009_v4 }
0x135e   :  { %4835 = vmatprep.subr.mxu0 %v13010_v62  ;;  %4906 = vmatprep.subr.mxu1 %v13011_v24 }
0x135f   :  { %4836 = vmatpush1.msra.mxu0 %v13012_v50  ;;  %4907 = vmatpush1.msra.mxu1 %v13013_v43  ;;  %v4792_v50 = vrot.slane %v10846_v63, 6  ;;  %v11007_v63 = vld [vmem:[#allocation9 + $0x500] sm:$0xff] }
0x1360   :  { %4837 = vmatprep.subr.mxu0 %v13014_v1  ;;  %4908 = vmatprep.subr.mxu1 %v13015_v60 }
0x1361   :  { %4838 = vmatpush1.msra.mxu0 %v13016_v46  ;;  %4871 = vmatprep.mubr.f32.mxu0 %v13017_v0 }
0x1362   :  { %4909 = vmatpush1.msra.mxu1 %v13018_v55  ;;  %4942 = vmatprep.mubr.f32.mxu1 %v13017_v0 }
0x1363   :  { %4985 = vmatprep.subr.mxu0 %v10969_v2  ;;  %5056 = vmatprep.subr.mxu1 %v10972_v28 }
0x1402   :  { %v4680_v36 = vpop.f32.mrf.mxu0  ;;  %v4751_v27 = vpop.f32.mrf.mxu1 }
0x1403   :  { %v4760_v37 = vrot.slane %v4680_v36, 2  ;;  %v4762_v8 = vrot.slane %v4751_v27, 2  ;;  %v11025_v27 = vld [vmem:[#allocation9 + $0x4c8] sm:$0xff] }
0x1404   :  { %v4682_v39 = vpop.f32.mrf.mxu0  ;;  %v4753_v31 = vpop.f32.mrf.mxu1 }
0x1405   :  { %v4768_v40 = vadd.f32 %v4760_v37, %v4607_v38  ;;  %v4761_v41 = vrot.slane %v4682_v39, 2  ;;  %v4770_v56 = vadd.f32 %v4762_v8, %v4609_v3  ;;  %v4763_v44 = vrot.slane %v4753_v31, 2  ;;  %v11031_v8 = vld [vmem:[#allocation9 + $0x4c0] sm:$0xff]  ;;  %v11034_v3 = vld [vmem:[#allocation9 + $0x4d0] sm:$0xff]  ;;  %v11037_v31 = vld [vmem:[#allocation9 + $0x4a8] sm:$0xff] }
0x1407   :  { %v7640_v51 = vmul.f32 -1.442695, %v4768_v40  ;;  %v4769_v45 = vadd.f32 %v4761_v41, %v4608_v42  ;;  %v7642_v49 = vmul.f32 -1.442695, %v4770_v56  ;;  %v4771_v47 = vadd.f32 %v4763_v44, %v4610_v61  ;;  %v11010_v40 = vld [vmem:[#allocation9 + $0x510] sm:$0xff]  ;;  %v11013_v41 = vld [vmem:[#allocation9 + $0x4e8] sm:$0xff] }
0x1408   :  { %v11016_v42 = vld [vmem:[#allocation9 + $0x4f8] sm:$0xff]  ;;  %v11043_v44 = vld [vmem:[#allocation9 + $0x4a0] sm:$0xff]  ;;  %v11049_v61 = vld [vmem:[#allocation9 + $0x488] sm:$0xff] }
0x1409   :  { %8102 = vpow2.f32 %v7640_v51  ;;  %v7641_v57 = vmul.f32 -1.442695, %v4769_v45  ;;  %v11019_v51 = vld [vmem:[#allocation9 + $0x4e0] sm:$0xff]  ;;  %v11022_v45 = vld [vmem:[#allocation9 + $0x4f0] sm:$0xff]  ;;  %v11040_v56 = vld [vmem:[#allocation9 + $0x4b8] sm:$0xff]  ;;  %13023 = vst [vmem:[#allocation22_spill] sm:$0xff] %v11049_v61 }
0x140b   :  { %8104 = vpow2.f32 %v7641_v57  ;;  %v11028_v57 = vld [vmem:[#allocation9 + $0x4d8] sm:$0xff] }
0x140c   :  { %8106 = vpow2.f32 %v7642_v49  ;;  %v11046_v49 = vld [vmem:[#allocation9 + $0x4b0] sm:$0xff] }
0x1416   :  { %v8103_v26 = vpop.eup %8102 }
0x1417   :  { %v4781_v20 = vadd.f32 1.0, %v8103_v26  ;;  %v11052_v26 = vld [vmem:[#allocation9 + $0x498] sm:$0xff] }
0x1418   :  { %v8105_v58 = vpop.eup %8104  ;;  %13024 = vst [vmem:[#allocation23_spill] sm:$0xff] %v11052_v26 }
0x1419   :  { %8108 = vrcp.f32 %v4781_v20  ;;  %v4782_v59 = vadd.f32 1.0, %v8105_v58  ;;  %v8107_v4 = vpop.eup %8106  ;;  %v11058_v20 = vld [vmem:[#allocation9 + $0x490] sm:$0xff]  ;;  %v11061_v58 = vld [vmem:[#allocation9 + $0x468] sm:$0xff] }
0x141a   :  { %8110 = vtanh.f32 %v4771_v47  ;;  %v4783_v1 = vadd.f32 1.0, %v8107_v4  ;;  %v11055_v47 = vld [vmem:[#allocation9 + $0x480] sm:$0xff]  ;;  %13026 = vst [vmem:[#allocation25_spill] sm:$0xff] %v11058_v20  ;;  %13027 = vst [vmem:[#allocation26_spill] sm:$0xff] %v11061_v58 }
0x141b   :  { %8112 = vrcp.f32 %v4782_v59  ;;  %13025 = vst [vmem:[#allocation24_spill] sm:$0xff] %v11055_v47  ;;  %v11064_v59 = vld [vmem:[#allocation9 + $0x478] sm:$0xff]  ;;  %v11067_v4 = vld [vmem:[#allocation9 + $0x460] sm:$0xff] }
0x141c   :  { %8114 = vrcp.f32 %v4783_v1  ;;  %13028 = vst [vmem:[#allocation27_spill] sm:$0xff] %v11064_v59  ;;  %13029 = vst [vmem:[#allocation28_spill] sm:$0xff] %v11067_v4  ;;  %v11082_v1 = vld [vmem:[#allocation9 + $0x450] sm:$0xff] }
0x141d   :  { %13034 = vst [vmem:[#allocation33_spill] sm:$0xff] %v11082_v1 }
0x1426   :  { %v8109_v62 = vpop.eup %8108 }
0x1427   :  { %v8111_v24 = vpop.eup %8110 }
0x1428   :  { %v8113_v43 = vpop.eup %8112  ;;  %v4795_v46 = vmul.f32 %v8111_v24, %v8109_v62  ;;  %v11070_v62 = vld [vmem:[#allocation9 + $0x470] sm:$0xff]  ;;  %v11073_v24 = vld [vmem:[#allocation9 + $0x448] sm:$0xff] }
0x1429   :  { %v4794_v60 = vmul.f32 %v8113_v43, %v4792_v50  ;;  %v8115_v36 = vpop.eup %8114  ;;  %13030 = vst [vmem:[#allocation29_spill] sm:$0xff] %v11070_v62  ;;  %13031 = vst [vmem:[#allocation30_spill] sm:$0xff] %v11073_v24  ;;  %v11076_v50 = vld [vmem:[#allocation9 + $0x458] sm:$0xff]  ;;  %v11079_v43 = vld [vmem:[#allocation9 + $0x440] sm:$0xff] }
0x142a   :  { %13032 = vst [vmem:[#allocation31_spill] sm:$0xff] %v11076_v50  ;;  %13033 = vst [vmem:[#allocation32_spill] sm:$0xff] %v11079_v43 }
0x142b   :  { %v10976_v55 = vadd.f32 %v4795_v46, %v4794_v60  ;;  %v11085_v60 = vld [vmem:[#allocation9 + $0x428] sm:$0xff]  ;;  %v11088_v46 = vld [vmem:[#allocation9 + $0x438] sm:$0xff] }
0x142c   :  { %13035 = vst [vmem:[#allocation34_spill] sm:$0xff] %v11085_v60  ;;  %13036 = vst [vmem:[#allocation35_spill] sm:$0xff] %v11088_v46 }
0x142d   :  { %8116 = vtanh.f32 %v10976_v55 }
0x143a   :  { %v8117_v37 = vpop.eup %8116 }
0x143b   :  { %v4798_v38 = vmul.f32 %v8117_v37, %v8115_v36  ;;  %v11091_v36 = vld [vmem:[#allocation9 + $0x420] sm:$0xff]  ;;  %v11094_v37 = vld [vmem:[#allocation9 + $0x430] sm:$0xff] }
0x143c   :  { %13037 = vst [vmem:[#allocation36_spill] sm:$0xff] %v11091_v36  ;;  %13038 = vst [vmem:[#allocation37_spill] sm:$0xff] %v11094_v37 }
0x143d   :  { %4799 = vst [vmem:[#allocation2] sm:$0xc0] %v4798_v38  ;;  %v4805_v39 = vrot.slane %v4798_v38, 6  ;;  %v11097_v38 = vld [vmem:[#allocation9 + $0x408] sm:$0xff] }
0x143e   :  { %13039 = vst [vmem:[#allocation38_spill] sm:$0xff] %v11097_v38 }
0x143f   :  { %4872 = vmatmul.mubr.f32.vlgmr.msra.gmra.mxu0 %v4805_v39  ;;  %4943 = vmatmul.mubr.f32.vlgmr.msra.gmra.mxu1 %v4805_v39  ;;  %v11100_v39 = vld [vmem:[#allocation9 + $0x418] sm:$0xff] }
0x1440   :  { %4986 = vmatpush1.msra.mxu0 %v10849_v35  ;;  %5057 = vmatpush1.msra.mxu1 %v10852_v53  ;;  %13040 = vst [vmem:[#allocation43_spill] sm:$0xff] %v11100_v39 }
0x1441   :  { %4987 = vmatprep.subr.mxu0 %v10855_v6  ;;  %5058 = vmatprep.subr.mxu1 %v10858_v16 }
0x1442   :  { %4988 = vmatpush1.msra.mxu0 %v10861_v30  ;;  %5059 = vmatpush1.msra.mxu1 %v10864_v9 }
0x1443   :  { %4989 = vmatprep.subr.mxu0 %v10867_v21  ;;  %5060 = vmatprep.subr.mxu1 %v10870_v12 }
0x1444   :  { %4990 = vmatpush1.msra.mxu0 %v10873_v34  ;;  %5061 = vmatpush1.msra.mxu1 %v10876_v15 }
0x1445   :  { %4991 = vmatprep.subr.mxu0 %v10879_v13  ;;  %5062 = vmatprep.subr.mxu1 %v10882_v17 }
0x1446   :  { %4992 = vmatpush1.msra.mxu0 %v10885_v10  ;;  %5063 = vmatpush1.msra.mxu1 %v10888_v52 }
0x1447   :  { %4993 = vmatprep.subr.mxu0 %v10891_v5  ;;  %5064 = vmatprep.subr.mxu1 %v10894_v7 }
0x1448   :  { %4994 = vmatpush1.msra.mxu0 %v10897_v54  ;;  %5065 = vmatpush1.msra.mxu1 %v10900_v33 }
0x1449   :  { %4995 = vmatprep.subr.mxu0 %v10903_v32  ;;  %5066 = vmatprep.subr.mxu1 %v10906_v19 }
0x144a   :  { %4996 = vmatpush1.msra.mxu0 %v10909_v22  ;;  %5067 = vmatpush1.msra.mxu1 %v10912_v23 }
0x144b   :  { %4997 = vmatprep.subr.mxu0 %v10915_v25  ;;  %5068 = vmatprep.subr.mxu1 %v10918_v29 }
0x144c   :  { %4998 = vmatpush1.msra.mxu0 %v10921_v48  ;;  %5069 = vmatpush1.msra.mxu1 %v10924_v14 }
0x144d   :  { %4999 = vmatprep.subr.mxu0 %v10927_v18  ;;  %5070 = vmatprep.subr.mxu1 %v10930_v11 }
0x144e   :  { %5000 = vmatpush1.msra.mxu0 %v11007_v63  ;;  %5071 = vmatpush1.msra.mxu1 %v11010_v40 }
0x144f   :  { %5001 = vmatprep.subr.mxu0 %v11013_v41  ;;  %5072 = vmatprep.subr.mxu1 %v11016_v42 }
0x1450   :  { %5002 = vmatpush1.msra.mxu0 %v11019_v51  ;;  %5073 = vmatpush1.msra.mxu1 %v11022_v45 }
0x1451   :  { %5003 = vmatprep.subr.mxu0 %v11025_v27  ;;  %5074 = vmatprep.subr.mxu1 %v11028_v57 }
0x1452   :  { %5004 = vmatpush1.msra.mxu0 %v11031_v8  ;;  %5075 = vmatpush1.msra.mxu1 %v11034_v3 }
0x1453   :  { %5005 = vmatprep.subr.mxu0 %v11037_v31  ;;  %5076 = vmatprep.subr.mxu1 %v11040_v56 }
0x1454   :  { %5006 = vmatpush1.msra.mxu0 %v11043_v44  ;;  %5077 = vmatpush1.msra.mxu1 %v11046_v49 }
0x1455   :  { %5007 = vmatprep.subr.mxu0 %v11049_v61  ;;  %5078 = vmatprep.subr.mxu1 %v11052_v26 }
0x1456   :  { %5008 = vmatpush1.msra.mxu0 %v11055_v47  ;;  %5079 = vmatpush1.msra.mxu1 %v11058_v20 }
0x1457   :  { %5009 = vmatprep.subr.mxu0 %v11061_v58  ;;  %5080 = vmatprep.subr.mxu1 %v11064_v59 }
0x1458   :  { %5010 = vmatpush1.msra.mxu0 %v11067_v4  ;;  %5081 = vmatpush1.msra.mxu1 %v11070_v62  ;;  %v4802_v62 = vld [vmem:[#allocation3 + $0x30] sm:$0x3] }
0x1459   :  { %5011 = vmatprep.subr.mxu0 %v11073_v24  ;;  %5082 = vmatprep.subr.mxu1 %v11076_v50 }
0x145a   :  { %5012 = vmatpush1.msra.mxu0 %v11079_v43  ;;  %5083 = vmatpush1.msra.mxu1 %v11082_v1 }
0x145b   :  { %5013 = vmatprep.subr.mxu0 %v11085_v60  ;;  %5084 = vmatprep.subr.mxu1 %v11088_v46  ;;  %v11103_v60 = vld [vmem:[#allocation9 + $0x400] sm:$0xff]  ;;  %v11107_v46 = vld [vmem:[#allocation9 + $0x410] sm:$0xff] }
0x145c   :  { %5014 = vmatpush1.msra.mxu0 %v11091_v36  ;;  %5085 = vmatpush1.msra.mxu1 %v11094_v37  ;;  %13041 = vst [vmem:[#allocation17_spill] sm:$0xff] %v11103_v60  ;;  %13042 = vst [vmem:[#allocation18_spill] sm:$0xff] %v11107_v46 }
0x145d   :  { %5015 = vmatprep.subr.mxu0 %v11097_v38  ;;  %5086 = vmatprep.subr.mxu1 %v11100_v39  ;;  %v4800_v38 = vld [vmem:[#allocation3 + $0x20] sm:$0x3]  ;;  %v4801_v39 = vld [vmem:[#allocation3 + $0x38] sm:$0x3] }
0x145e   :  { %5016 = vmatpush1.msra.mxu0 %v11103_v60  ;;  %5049 = vmatprep.mubr.f32.mxu0 %v13017_v0 }
0x145f   :  { %5087 = vmatpush1.msra.mxu1 %v11107_v46  ;;  %5120 = vmatprep.mubr.f32.mxu1 %v13017_v0  ;;  %v4803_v0 = vld [vmem:[#allocation3] sm:$0x3] }
0x1460   :  { %5178 = vmatprep.subr.mxu0 %v10969_v2  ;;  %5249 = vmatprep.subr.mxu1 %v10972_v28 }
0x14ff   :  { %v4873_v37 = vpop.f32.mrf.mxu0  ;;  %v4944_v24 = vpop.f32.mrf.mxu1 }
0x1500   :  { %v4949_v36 = vadd.f32 %v4873_v37, %v4800_v38  ;;  %v4951_v4 = vadd.f32 %v4944_v24, %v4802_v62 }
0x1501   :  { %v4875_v1 = vpop.f32.mrf.mxu0  ;;  %v4946_v46 = vpop.f32.mrf.mxu1 }
0x1502   :  { %v7643_v43 = vmul.f32 -1.442695, %v4949_v36  ;;  %v4950_v50 = vadd.f32 %v4875_v1, %v4801_v39  ;;  %v7645_v59 = vmul.f32 -1.442695, %v4951_v4  ;;  %v4952_v2 = vadd.f32 %v4946_v46, %v4803_v0  ;;  %v13047_v46 = vld [vmem:[#allocation29_spill] sm:$0xff]  ;;  %v13048_v39 = vld [vmem:[#allocation30_spill] sm:$0xff] }
0x1504   :  { %8118 = vpow2.f32 %v7643_v43  ;;  %v7644_v60 = vmul.f32 -1.442695, %v4950_v50  ;;  %v4973_v50 = vrot.slane %v10976_v55, 6  ;;  %v13045_v55 = vld [vmem:[#allocation27_spill] sm:$0xff] }
0x1506   :  { %8120 = vpow2.f32 %v7644_v60 }
0x1507   :  { %8122 = vpow2.f32 %v7645_v59  ;;  %v13046_v59 = vld [vmem:[#allocation28_spill] sm:$0xff] }
0x1511   :  { %v8119_v58 = vpop.eup %8118 }
0x1512   :  { %v4962_v20 = vadd.f32 1.0, %v8119_v58 }
0x1513   :  { %v8121_v28 = vpop.eup %8120 }
0x1514   :  { %8124 = vrcp.f32 %v4962_v20  ;;  %v4963_v37 = vadd.f32 1.0, %v8121_v28  ;;  %v8123_v36 = vpop.eup %8122  ;;  %v13044_v28 = vld [vmem:[#allocation26_spill] sm:$0xff] }
0x1515   :  { %8126 = vtanh.f32 %v4952_v2  ;;  %v4964_v38 = vadd.f32 1.0, %v8123_v36  ;;  %v13043_v2 = vld [vmem:[#allocation25_spill] sm:$0xff]  ;;  %v13050_v36 = vld [vmem:[#allocation32_spill] sm:$0xff] }
0x1516   :  { %8128 = vrcp.f32 %v4963_v37  ;;  %v13049_v37 = vld [vmem:[#allocation31_spill] sm:$0xff] }
0x1517   :  { %8130 = vrcp.f32 %v4964_v38  ;;  %v13055_v38 = vld [vmem:[#allocation37_spill] sm:$0xff] }
0x1521   :  { %v8125_v1 = vpop.eup %8124 }
0x1522   :  { %v8127_v43 = vpop.eup %8126 }
0x1523   :  { %v8129_v60 = vpop.eup %8128  ;;  %v4976_v24 = vmul.f32 %v8127_v43, %v8125_v1  ;;  %v13051_v1 = vld [vmem:[#allocation33_spill] sm:$0xff]  ;;  %v13052_v43 = vld [vmem:[#allocation34_spill] sm:$0xff] }
0x1524   :  { %v4975_v62 = vmul.f32 %v8129_v60, %v4973_v50  ;;  %v8131_v0 = vpop.eup %8130  ;;  %v13053_v50 = vld [vmem:[#allocation35_spill] sm:$0xff]  ;;  %v13054_v60 = vld [vmem:[#allocation36_spill] sm:$0xff] }
0x1526   :  { %v11114_v4 = vadd.f32 %v4976_v24, %v4975_v62  ;;  %v13056_v62 = vld [vmem:[#allocation38_spill] sm:$0xff]  ;;  %v13057_v24 = vld [vmem:[#allocation43_spill] sm:$0xff] }
0x1528   :  { %8132 = vtanh.f32 %v11114_v4 }
0x1535   :  { %v8133_v58 = vpop.eup %8132 }
0x1536   :  { %v4979_v20 = vmul.f32 %v8133_v58, %v8131_v0  ;;  %v13058_v0 = vld [vmem:[#allocation17_spill] sm:$0xff]  ;;  %v13059_v58 = vmov 0.0  }
0x1538   :  { %4980 = vst [vmem:[#allocation2 + $0x8] sm:$0x3] %v4979_v20  ;;  %5050 = vmatmul.mubr.f32.vlgmr.msra.gmra.mxu0 %v4979_v20  ;;  %5121 = vmatmul.mubr.f32.vlgmr.msra.gmra.mxu1 %v4979_v20  ;;  %v13060_v20 = vld [vmem:[#allocation18_spill] sm:$0xff] }
0x1539   :  { %5179 = vmatpush1.msra.mxu0 %v10849_v35  ;;  %5250 = vmatpush1.msra.mxu1 %v10852_v53 }
0x153a   :  { %5180 = vmatprep.subr.mxu0 %v10855_v6  ;;  %5251 = vmatprep.subr.mxu1 %v10858_v16 }
0x153b   :  { %5181 = vmatpush1.msra.mxu0 %v10861_v30  ;;  %5252 = vmatpush1.msra.mxu1 %v10864_v9 }
0x153c   :  { %5182 = vmatprep.subr.mxu0 %v10867_v21  ;;  %5253 = vmatprep.subr.mxu1 %v10870_v12 }
0x153d   :  { %5183 = vmatpush1.msra.mxu0 %v10873_v34  ;;  %5254 = vmatpush1.msra.mxu1 %v10876_v15 }
0x153e   :  { %5184 = vmatprep.subr.mxu0 %v10879_v13  ;;  %5255 = vmatprep.subr.mxu1 %v10882_v17 }
0x153f   :  { %5185 = vmatpush1.msra.mxu0 %v10885_v10  ;;  %5256 = vmatpush1.msra.mxu1 %v10888_v52 }
0x1540   :  { %5186 = vmatprep.subr.mxu0 %v10891_v5  ;;  %5257 = vmatprep.subr.mxu1 %v10894_v7 }
0x1541   :  { %5187 = vmatpush1.msra.mxu0 %v10897_v54  ;;  %5258 = vmatpush1.msra.mxu1 %v10900_v33 }
0x1542   :  { %5188 = vmatprep.subr.mxu0 %v10903_v32  ;;  %5259 = vmatprep.subr.mxu1 %v10906_v19 }
0x1543   :  { %5189 = vmatpush1.msra.mxu0 %v10909_v22  ;;  %5260 = vmatpush1.msra.mxu1 %v10912_v23 }
0x1544   :  { %5190 = vmatprep.subr.mxu0 %v10915_v25  ;;  %5261 = vmatprep.subr.mxu1 %v10918_v29 }
0x1545   :  { %5191 = vmatpush1.msra.mxu0 %v10921_v48  ;;  %5262 = vmatpush1.msra.mxu1 %v10924_v14 }
0x1546   :  { %5192 = vmatprep.subr.mxu0 %v10927_v18  ;;  %5263 = vmatprep.subr.mxu1 %v10930_v11 }
0x1547   :  { %5193 = vmatpush1.msra.mxu0 %v11007_v63  ;;  %5264 = vmatpush1.msra.mxu1 %v11010_v40 }
0x1548   :  { %5194 = vmatprep.subr.mxu0 %v11013_v41  ;;  %5265 = vmatprep.subr.mxu1 %v11016_v42 }
0x1549   :  { %5195 = vmatpush1.msra.mxu0 %v11019_v51  ;;  %5266 = vmatpush1.msra.mxu1 %v11022_v45 }
0x154a   :  { %5196 = vmatprep.subr.mxu0 %v11025_v27  ;;  %5267 = vmatprep.subr.mxu1 %v11028_v57 }
0x154b   :  { %5197 = vmatpush1.msra.mxu0 %v11031_v8  ;;  %5268 = vmatpush1.msra.mxu1 %v11034_v3 }
0x154c   :  { %5198 = vmatprep.subr.mxu0 %v11037_v31  ;;  %5269 = vmatprep.subr.mxu1 %v11040_v56 }
0x154d   :  { %5199 = vmatpush1.msra.mxu0 %v11043_v44  ;;  %5270 = vmatpush1.msra.mxu1 %v11046_v49 }
0x154e   :  { %5200 = vmatprep.subr.mxu0 %v11049_v61  ;;  %5271 = vmatprep.subr.mxu1 %v11052_v26 }
0x154f   :  { %5201 = vmatpush1.msra.mxu0 %v11055_v47  ;;  %5272 = vmatpush1.msra.mxu1 %v13043_v2 }
0x1550   :  { %5202 = vmatprep.subr.mxu0 %v13044_v28  ;;  %5273 = vmatprep.subr.mxu1 %v13045_v55  ;;  %v4983_v55 = vld [vmem:[#allocation3 + $0x30] sm:$0xc] }
0x1551   :  { %5203 = vmatpush1.msra.mxu0 %v13046_v59  ;;  %5274 = vmatpush1.msra.mxu1 %v13047_v46 }
0x1552   :  { %5204 = vmatprep.subr.mxu0 %v13048_v39  ;;  %5275 = vmatprep.subr.mxu1 %v13049_v37  ;;  %v4982_v39 = vld [vmem:[#allocation3 + $0x38] sm:$0xc] }
0x1553   :  { %5205 = vmatpush1.msra.mxu0 %v13050_v36  ;;  %5276 = vmatpush1.msra.mxu1 %v13051_v1  ;;  %v13061_v1 = vld [vmem:[#allocation20_spill] sm:$0xff]  ;;  %v4981_v36 = vld [vmem:[#allocation3 + $0x20] sm:$0xc] }
0x1554   :  { %5206 = vmatprep.subr.mxu0 %v13052_v43  ;;  %5277 = vmatprep.subr.mxu1 %v13053_v50  ;;  %v13062_v43 = vld [vmem:[#allocation21_spill] sm:$0xff] }
0x1555   :  { %5207 = vmatpush1.msra.mxu0 %v13054_v60  ;;  %5278 = vmatpush1.msra.mxu1 %v13055_v38 }
0x1556   :  { %5208 = vmatprep.subr.mxu0 %v13056_v62  ;;  %5279 = vmatprep.subr.mxu1 %v13057_v24 }
0x1557   :  { %5209 = vmatpush1.msra.mxu0 %v13058_v0  ;;  %5242 = vmatprep.mubr.f32.mxu0 %v13059_v58 }
0x1558   :  { %5280 = vmatpush1.msra.mxu1 %v13060_v20  ;;  %5313 = vmatprep.mubr.f32.mxu1 %v13059_v58 }
0x1559   :  { %5371 = vmatprep.subr.mxu0 %v13061_v1  ;;  %5442 = vmatprep.subr.mxu1 %v13062_v43  ;;  %v4984_v43 = vld [vmem:[#allocation3] sm:$0xc] }
0x15f8   :  { %v5051_v50 = vpop.f32.mrf.mxu0  ;;  %v5122_v0 = vpop.f32.mrf.mxu1 }
0x15f9   :  { %v5131_v60 = vrot.slane %v5051_v50, 6  ;;  %v5133_v20 = vrot.slane %v5122_v0, 6 }
0x15fa   :  { %v5053_v38 = vpop.f32.mrf.mxu0  ;;  %v5124_v58 = vpop.f32.mrf.mxu1 }
0x15fb   :  { %v5139_v37 = vadd.f32 %v5131_v60, %v4981_v36  ;;  %v5132_v62 = vrot.slane %v5053_v38, 6  ;;  %v5141_v28 = vadd.f32 %v5133_v20, %v4983_v55  ;;  %v5134_v1 = vrot.slane %v5124_v58, 6 }
0x15fd   :  { %v7646_v24 = vmul.f32 -1.442695, %v5139_v37  ;;  %v5140_v46 = vadd.f32 %v5132_v62, %v4982_v39  ;;  %v7648_v2 = vmul.f32 -1.442695, %v5141_v28  ;;  %v5142_v50 = vadd.f32 %v5134_v1, %v4984_v43 }
0x15ff   :  { %8134 = vpow2.f32 %v7646_v24  ;;  %v7647_v59 = vmul.f32 -1.442695, %v5140_v46 }
0x1601   :  { %8136 = vpow2.f32 %v7647_v59  ;;  %v5163_v59 = vrot.slane %v11114_v4, 6 }
0x1602   :  { %8138 = vpow2.f32 %v7648_v2 }
0x160c   :  { %v8135_v47 = vpop.eup %8134 }
0x160d   :  { %v5152_v26 = vadd.f32 1.0, %v8135_v47 }
0x160e   :  { %v8137_v61 = vpop.eup %8136 }
0x160f   :  { %8140 = vrcp.f32 %v5152_v26  ;;  %v5153_v36 = vadd.f32 1.0, %v8137_v61  ;;  %v8139_v39 = vpop.eup %8138 }
0x1610   :  { %8142 = vtanh.f32 %v5142_v50  ;;  %v5154_v38 = vadd.f32 1.0, %v8139_v39 }
0x1611   :  { %8144 = vrcp.f32 %v5153_v36 }
0x1612   :  { %8146 = vrcp.f32 %v5154_v38 }
0x161c   :  { %v8141_v37 = vpop.eup %8140 }
0x161d   :  { %v8143_v46 = vpop.eup %8142 }
0x161e   :  { %v8145_v60 = vpop.eup %8144  ;;  %v5166_v62 = vmul.f32 %v8143_v46, %v8141_v37 }
0x161f   :  { %v5165_v55 = vmul.f32 %v8145_v60, %v5163_v59  ;;  %v8147_v47 = vpop.eup %8146 }
0x1621   :  { %v11184_v28 = vadd.f32 %v5166_v62, %v5165_v55 }
0x1623   :  { %8148 = vtanh.f32 %v11184_v28  ;;  %v5356_v50 = vrot.slane %v11184_v28, 6  ;;  %v5616_v28 = vld [vmem:[#allocation7 + $0x7c0] sm:$0xff] }
0x1630   :  { %v8149_v2 = vpop.eup %8148 }
0x1631   :  { %v5169_v26 = vmul.f32 %v8149_v2, %v8147_v47  ;;  %v5620_v47 = vld [vmem:[#allocation7 + $0x7e0] sm:$0xff]  ;;  %v5622_v2 = vld [vmem:[#allocation7 + $0x7f0] sm:$0xff] }
0x1633   :  { %5170 = vst [vmem:[#allocation2 + $0x8] sm:$0xc] %v5169_v26  ;;  %v5176_v61 = vrot.slane %v5169_v26, 2  ;;  %v5617_v26 = vld [vmem:[#allocation7 + $0x7c8] sm:$0xff] }
0x1635   :  { %5243 = vmatmul.mubr.f32.vlgmr.msra.gmra.mxu0 %v5176_v61  ;;  %5314 = vmatmul.mubr.f32.vlgmr.msra.gmra.mxu1 %v5176_v61  ;;  %v5619_v61 = vld [vmem:[#allocation7 + $0x7d8] sm:$0xff] }
0x1636   :  { %5372 = vmatpush1.msra.mxu0 %v10849_v35  ;;  %5443 = vmatpush1.msra.mxu1 %v10852_v53  ;;  %v13063_v35 = vld [vmem:[#allocation22_spill] sm:$0xff]  ;;  %v13064_v53 = vld [vmem:[#allocation23_spill] sm:$0xff] }
0x1637   :  { %5373 = vmatprep.subr.mxu0 %v10855_v6  ;;  %5444 = vmatprep.subr.mxu1 %v10858_v16  ;;  %v13065_v6 = vld [vmem:[#allocation24_spill] sm:$0xff]  ;;  %v13066_v16 = vld [vmem:[#allocation25_spill] sm:$0xff] }
0x1638   :  { %5374 = vmatpush1.msra.mxu0 %v10861_v30  ;;  %5445 = vmatpush1.msra.mxu1 %v10864_v9  ;;  %v13067_v30 = vld [vmem:[#allocation26_spill] sm:$0xff]  ;;  %v13068_v9 = vld [vmem:[#allocation27_spill] sm:$0xff] }
0x1639   :  { %5375 = vmatprep.subr.mxu0 %v10867_v21  ;;  %5446 = vmatprep.subr.mxu1 %v10870_v12  ;;  %v13069_v21 = vld [vmem:[#allocation28_spill] sm:$0xff]  ;;  %v13070_v12 = vld [vmem:[#allocation29_spill] sm:$0xff] }
0x163a   :  { %5376 = vmatpush1.msra.mxu0 %v10873_v34  ;;  %5447 = vmatpush1.msra.mxu1 %v10876_v15  ;;  %v13071_v34 = vld [vmem:[#allocation30_spill] sm:$0xff]  ;;  %v13072_v15 = vld [vmem:[#allocation31_spill] sm:$0xff] }
0x163b   :  { %5377 = vmatprep.subr.mxu0 %v10879_v13  ;;  %5448 = vmatprep.subr.mxu1 %v10882_v17  ;;  %v13073_v13 = vld [vmem:[#allocation32_spill] sm:$0xff]  ;;  %v13074_v17 = vld [vmem:[#allocation33_spill] sm:$0xff] }
0x163c   :  { %5378 = vmatpush1.msra.mxu0 %v10885_v10  ;;  %5449 = vmatpush1.msra.mxu1 %v10888_v52  ;;  %v13075_v10 = vld [vmem:[#allocation34_spill] sm:$0xff]  ;;  %v13076_v52 = vld [vmem:[#allocation35_spill] sm:$0xff] }
0x163d   :  { %5379 = vmatprep.subr.mxu0 %v10891_v5  ;;  %5450 = vmatprep.subr.mxu1 %v10894_v7  ;;  %v13077_v5 = vld [vmem:[#allocation36_spill] sm:$0xff]  ;;  %v13078_v7 = vld [vmem:[#allocation37_spill] sm:$0xff] }
0x163e   :  { %5380 = vmatpush1.msra.mxu0 %v10897_v54  ;;  %5451 = vmatpush1.msra.mxu1 %v10900_v33  ;;  %v13079_v54 = vld [vmem:[#allocation38_spill] sm:$0xff]  ;;  %v13080_v33 = vld [vmem:[#allocation43_spill] sm:$0xff] }
0x163f   :  { %5381 = vmatprep.subr.mxu0 %v10903_v32  ;;  %5452 = vmatprep.subr.mxu1 %v10906_v19  ;;  %v13081_v32 = vld [vmem:[#allocation17_spill] sm:$0xff]  ;;  %v13082_v19 = vld [vmem:[#allocation18_spill] sm:$0xff] }
0x1640   :  { %5382 = vmatpush1.msra.mxu0 %v10909_v22  ;;  %5453 = vmatpush1.msra.mxu1 %v10912_v23  ;;  %v13083_v22 = vmov 0.0   ;;  %v5621_v23 = vld [vmem:[#allocation7 + $0x7e8] sm:$0xff] }
0x1641   :  { %5383 = vmatprep.subr.mxu0 %v10915_v25  ;;  %5454 = vmatprep.subr.mxu1 %v10918_v29  ;;  %v5623_v25 = vld [vmem:[#allocation7 + $0x7f8] sm:$0xff] }
0x1642   :  { %5384 = vmatpush1.msra.mxu0 %v10921_v48  ;;  %5455 = vmatpush1.msra.mxu1 %v10924_v14  ;;  %v5171_v14 = vld [vmem:[#allocation3 + $0x20] sm:$0x30] }
0x1643   :  { %5385 = vmatprep.subr.mxu0 %v10927_v18  ;;  %5456 = vmatprep.subr.mxu1 %v10930_v11 }
0x1644   :  { %5386 = vmatpush1.msra.mxu0 %v11007_v63  ;;  %5457 = vmatpush1.msra.mxu1 %v11010_v40  ;;  %v5172_v40 = vld [vmem:[#allocation3 + $0x38] sm:$0x30] }
0x1645   :  { %5387 = vmatprep.subr.mxu0 %v11013_v41  ;;  %5458 = vmatprep.subr.mxu1 %v11016_v42 }
0x1646   :  { %5388 = vmatpush1.msra.mxu0 %v11019_v51  ;;  %5459 = vmatpush1.msra.mxu1 %v11022_v45 }
0x1647   :  { %5389 = vmatprep.subr.mxu0 %v11025_v27  ;;  %5460 = vmatprep.subr.mxu1 %v11028_v57  ;;  %v5173_v57 = vld [vmem:[#allocation3 + $0x30] sm:$0x30] }
0x1648   :  { %5390 = vmatpush1.msra.mxu0 %v11031_v8  ;;  %5461 = vmatpush1.msra.mxu1 %v11034_v3 }
0x1649   :  { %5391 = vmatprep.subr.mxu0 %v11037_v31  ;;  %5462 = vmatprep.subr.mxu1 %v11040_v56 }
0x164a   :  { %5392 = vmatpush1.msra.mxu0 %v11043_v44  ;;  %5463 = vmatpush1.msra.mxu1 %v11046_v49  ;;  %v5174_v44 = vld [vmem:[#allocation3] sm:$0x30] }
0x164b   :  { %5393 = vmatprep.subr.mxu0 %v13063_v35  ;;  %5464 = vmatprep.subr.mxu1 %v13064_v53  ;;  %v5618_v35 = vld [vmem:[#allocation7 + $0x7d0] sm:$0xff]  ;;  %v5613_v53 = vld [vmem:[#allocation7 + $0x7a8] sm:$0xff] }
0x164c   :  { %5394 = vmatpush1.msra.mxu0 %v13065_v6  ;;  %5465 = vmatpush1.msra.mxu1 %v13066_v16  ;;  %v5615_v6 = vld [vmem:[#allocation7 + $0x7b8] sm:$0xff]  ;;  %v5612_v16 = vld [vmem:[#allocation7 + $0x7a0] sm:$0xff] }
0x164d   :  { %5395 = vmatprep.subr.mxu0 %v13067_v30  ;;  %5466 = vmatprep.subr.mxu1 %v13068_v9  ;;  %v5614_v30 = vld [vmem:[#allocation7 + $0x7b0] sm:$0xff]  ;;  %v5609_v9 = vld [vmem:[#allocation7 + $0x788] sm:$0xff] }
0x164e   :  { %5396 = vmatpush1.msra.mxu0 %v13069_v21  ;;  %5467 = vmatpush1.msra.mxu1 %v13070_v12  ;;  %v5611_v21 = vld [vmem:[#allocation7 + $0x798] sm:$0xff]  ;;  %v5608_v12 = vld [vmem:[#allocation7 + $0x780] sm:$0xff] }
0x164f   :  { %5397 = vmatprep.subr.mxu0 %v13071_v34  ;;  %5468 = vmatprep.subr.mxu1 %v13072_v15  ;;  %v5610_v34 = vld [vmem:[#allocation7 + $0x790] sm:$0xff]  ;;  %v5605_v15 = vld [vmem:[#allocation7 + $0x768] sm:$0xff] }
0x1650   :  { %5398 = vmatpush1.msra.mxu0 %v13073_v13  ;;  %5469 = vmatpush1.msra.mxu1 %v13074_v17  ;;  %v5607_v13 = vld [vmem:[#allocation7 + $0x778] sm:$0xff]  ;;  %v5604_v17 = vld [vmem:[#allocation7 + $0x760] sm:$0xff] }
0x1651   :  { %5399 = vmatprep.subr.mxu0 %v13075_v10  ;;  %5470 = vmatprep.subr.mxu1 %v13076_v52  ;;  %v5606_v10 = vld [vmem:[#allocation7 + $0x770] sm:$0xff]  ;;  %v5601_v52 = vld [vmem:[#allocation7 + $0x748] sm:$0xff] }
0x1652   :  { %5400 = vmatpush1.msra.mxu0 %v13077_v5  ;;  %5471 = vmatpush1.msra.mxu1 %v13078_v7  ;;  %v5603_v5 = vld [vmem:[#allocation7 + $0x758] sm:$0xff]  ;;  %v5600_v7 = vld [vmem:[#allocation7 + $0x740] sm:$0xff] }
0x1653   :  { %5401 = vmatprep.subr.mxu0 %v13079_v54  ;;  %5472 = vmatprep.subr.mxu1 %v13080_v33  ;;  %v5602_v54 = vld [vmem:[#allocation7 + $0x750] sm:$0xff]  ;;  %v5597_v33 = vld [vmem:[#allocation7 + $0x728] sm:$0xff] }
0x1654   :  { %5402 = vmatpush1.msra.mxu0 %v13081_v32  ;;  %5473 = vmatpush1.msra.mxu1 %v13082_v19  ;;  %v5599_v32 = vld [vmem:[#allocation7 + $0x738] sm:$0xff]  ;;  %v5596_v19 = vld [vmem:[#allocation7 + $0x720] sm:$0xff] }
0x1655   :  { %5435 = vmatprep.mubr.f32.mxu0 %v13083_v22  ;;  %5506 = vmatprep.mubr.f32.mxu1 %v13083_v22 }
0x1656   :  { %5647 = vmatprep.subr.mxu0 %v5621_v23  ;;  %5724 = vmatprep.subr.mxu1 %v5623_v25  ;;  %v5598_v23 = vld [vmem:[#allocation7 + $0x730] sm:$0xff]  ;;  %v5593_v25 = vld [vmem:[#allocation7 + $0x708] sm:$0xff] }
0x16f5   :  { %v5244_v29 = vpop.f32.mrf.mxu0  ;;  %v5315_v51 = vpop.f32.mrf.mxu1 }
0x16f6   :  { %v5324_v48 = vrot.slane %v5244_v29, 4  ;;  %v5326_v27 = vrot.slane %v5315_v51, 4  ;;  %v5595_v29 = vld [vmem:[#allocation7 + $0x718] sm:$0xff]  ;;  %v5584_v51 = vld [vmem:[#allocation7 + $0x6c0] sm:$0xff] }
0x16f7   :  { %v5246_v18 = vpop.f32.mrf.mxu0  ;;  %v5317_v8 = vpop.f32.mrf.mxu1 }
0x16f8   :  { %v5332_v11 = vadd.f32 %v5324_v48, %v5171_v14  ;;  %v5325_v63 = vrot.slane %v5246_v18, 4  ;;  %v5334_v3 = vadd.f32 %v5326_v27, %v5173_v57  ;;  %v5327_v31 = vrot.slane %v5317_v8, 4  ;;  %v5592_v48 = vld [vmem:[#allocation7 + $0x700] sm:$0xff]  ;;  %v5594_v14 = vld [vmem:[#allocation7 + $0x710] sm:$0xff]  ;;  %v5589_v18 = vld [vmem:[#allocation7 + $0x6e8] sm:$0xff] }
0x16f9   :  { %v5581_v27 = vld [vmem:[#allocation7 + $0x6a8] sm:$0xff]  ;;  %v5583_v57 = vld [vmem:[#allocation7 + $0x6b8] sm:$0xff]  ;;  %v5580_v8 = vld [vmem:[#allocation7 + $0x6a0] sm:$0xff] }
0x16fa   :  { %v7649_v41 = vmul.f32 -1.442695, %v5332_v11  ;;  %v5333_v42 = vadd.f32 %v5325_v63, %v5172_v40  ;;  %v7651_v56 = vmul.f32 -1.442695, %v5334_v3  ;;  %v5335_v4 = vadd.f32 %v5327_v31, %v5174_v44  ;;  %v5591_v11 = vld [vmem:[#allocation7 + $0x6f8] sm:$0xff]  ;;  %v5588_v63 = vld [vmem:[#allocation7 + $0x6e0] sm:$0xff] }
0x16fb   :  { %v5590_v40 = vld [vmem:[#allocation7 + $0x6f0] sm:$0xff]  ;;  %v5577_v31 = vld [vmem:[#allocation7 + $0x688] sm:$0xff]  ;;  %v5576_v44 = vld [vmem:[#allocation7 + $0x680] sm:$0xff] }
0x16fc   :  { %8150 = vpow2.f32 %v7649_v41  ;;  %v7650_v45 = vmul.f32 -1.442695, %v5333_v42  ;;  %v5585_v41 = vld [vmem:[#allocation7 + $0x6c8] sm:$0xff]  ;;  %v5587_v42 = vld [vmem:[#allocation7 + $0x6d8] sm:$0xff]  ;;  %v5582_v3 = vld [vmem:[#allocation7 + $0x6b0] sm:$0xff] }
0x16fe   :  { %8152 = vpow2.f32 %v7650_v45  ;;  %v5586_v45 = vld [vmem:[#allocation7 + $0x6d0] sm:$0xff] }
0x16ff   :  { %8154 = vpow2.f32 %v7651_v56  ;;  %v5579_v56 = vld [vmem:[#allocation7 + $0x698] sm:$0xff] }
0x1709   :  { %v8151_v49 = vpop.eup %8150 }
0x170a   :  { %v5345_v24 = vadd.f32 1.0, %v8151_v49  ;;  %v5578_v49 = vld [vmem:[#allocation7 + $0x690] sm:$0xff] }
0x170b   :  { %v8153_v0 = vpop.eup %8152 }
0x170c   :  { %8156 = vrcp.f32 %v5345_v24  ;;  %v5346_v58 = vadd.f32 1.0, %v8153_v0  ;;  %v8155_v20 = vpop.eup %8154  ;;  %v5575_v24 = vld [vmem:[#allocation7 + $0x678] sm:$0xff]  ;;  %v5572_v0 = vld [vmem:[#allocation7 + $0x660] sm:$0xff] }
0x170d   :  { %8158 = vtanh.f32 %v5335_v4  ;;  %v5347_v39 = vadd.f32 1.0, %v8155_v20  ;;  %v5573_v4 = vld [vmem:[#allocation7 + $0x668] sm:$0xff] }
0x170e   :  { %8160 = vrcp.f32 %v5346_v58  ;;  %v5574_v58 = vld [vmem:[#allocation7 + $0x670] sm:$0xff]  ;;  %v5569_v20 = vld [vmem:[#allocation7 + $0x648] sm:$0xff] }
0x170f   :  { %8162 = vrcp.f32 %v5347_v39  ;;  %v5567_v39 = vld [vmem:[#allocation7 + $0x638] sm:$0xff] }
0x1719   :  { %v8157_v1 = vpop.eup %8156 }
0x171a   :  { %v8159_v43 = vpop.eup %8158 }
0x171b   :  { %v8161_v36 = vpop.eup %8160  ;;  %v5359_v46 = vmul.f32 %v8159_v43, %v8157_v1  ;;  %v5571_v1 = vld [vmem:[#allocation7 + $0x658] sm:$0xff]  ;;  %v5568_v43 = vld [vmem:[#allocation7 + $0x640] sm:$0xff] }
0x171c   :  { %v5358_v37 = vmul.f32 %v8161_v36, %v5356_v50  ;;  %v8163_v60 = vpop.eup %8162  ;;  %v5570_v50 = vld [vmem:[#allocation7 + $0x650] sm:$0xff]  ;;  %v5565_v36 = vld [vmem:[#allocation7 + $0x628] sm:$0xff] }
0x171e   :  { %v11252_v59 = vadd.f32 %v5359_v46, %v5358_v37  ;;  %v5564_v37 = vld [vmem:[#allocation7 + $0x620] sm:$0xff]  ;;  %v5566_v46 = vld [vmem:[#allocation7 + $0x630] sm:$0xff] }
0x1720   :  { %8164 = vtanh.f32 %v11252_v59 }
0x172d   :  { %v8165_v38 = vpop.eup %8164 }
0x172e   :  { %v5362_v55 = vmul.f32 %v8165_v38, %v8163_v60  ;;  %v5561_v60 = vld [vmem:[#allocation7 + $0x608] sm:$0xff]  ;;  %v5563_v38 = vld [vmem:[#allocation7 + $0x618] sm:$0xff] }
0x1730   :  { %5363 = vst [vmem:[#allocation2 + $0x8] sm:$0x30] %v5362_v55  ;;  %v5369_v62 = vrot.slane %v5362_v55, 4  ;;  %v5560_v55 = vld [vmem:[#allocation7 + $0x600] sm:$0xff] }
0x1732   :  { %5436 = vmatmul.mubr.f32.vlgmr.msra.gmra.mxu0 %v5369_v62  ;;  %5507 = vmatmul.mubr.f32.vlgmr.msra.gmra.mxu1 %v5369_v62  ;;  %v5562_v62 = vld [vmem:[#allocation7 + $0x610] sm:$0xff] }
0x1733   :  { %5648 = vmatpush1.msra.mxu0 %v5620_v47  ;;  %5725 = vmatpush1.msra.mxu1 %v5622_v2  ;;  %v5557_v47 = vld [vmem:[#allocation2] sm:$0xff]  ;;  %v11259_v2 = vld [vmem:[#allocation9 + $0x7e8] sm:$0xff] }
0x1734   :  { %5649 = vmatprep.subr.mxu0 %v5617_v26  ;;  %5726 = vmatprep.subr.mxu1 %v5619_v61  ;;  %13084 = vst [vmem:[#allocation19_spill] sm:$0xff] %v11259_v2  ;;  %v11261_v26 = vld [vmem:[#allocation9 + $0x7f8] sm:$0xff]  ;;  %v11265_v61 = vld [vmem:[#allocation9 + $0x7e0] sm:$0xff] }
0x1735   :  { %5650 = vmatpush1.msra.mxu0 %v5616_v28  ;;  %5727 = vmatpush1.msra.mxu1 %v5618_v35  ;;  %13085 = vst [vmem:[#allocation20_spill] sm:$0xff] %v11261_v26  ;;  %v11267_v28 = vld [vmem:[#allocation9 + $0x7f0] sm:$0xff]  ;;  %v11271_v35 = vld [vmem:[#allocation9 + $0x7c8] sm:$0xff] }
0x1736   :  { %5651 = vmatprep.subr.mxu0 %v5613_v53  ;;  %5728 = vmatprep.subr.mxu1 %v5615_v6  ;;  %v11273_v53 = vld [vmem:[#allocation9 + $0x7d8] sm:$0xff]  ;;  %v11277_v6 = vld [vmem:[#allocation9 + $0x7c0] sm:$0xff] }
0x1737   :  { %5652 = vmatpush1.msra.mxu0 %v5612_v16  ;;  %5729 = vmatpush1.msra.mxu1 %v5614_v30  ;;  %v11279_v16 = vld [vmem:[#allocation9 + $0x7d0] sm:$0xff]  ;;  %v11283_v30 = vld [vmem:[#allocation9 + $0x7a8] sm:$0xff] }
0x1738   :  { %5653 = vmatprep.subr.mxu0 %v5609_v9  ;;  %5730 = vmatprep.subr.mxu1 %v5611_v21  ;;  %v11285_v9 = vld [vmem:[#allocation9 + $0x7b8] sm:$0xff]  ;;  %v11289_v21 = vld [vmem:[#allocation9 + $0x7a0] sm:$0xff] }
0x1739   :  { %5654 = vmatpush1.msra.mxu0 %v5608_v12  ;;  %5731 = vmatpush1.msra.mxu1 %v5610_v34  ;;  %v11291_v12 = vld [vmem:[#allocation9 + $0x7b0] sm:$0xff]  ;;  %v11295_v34 = vld [vmem:[#allocation9 + $0x788] sm:$0xff] }
0x173a   :  { %5655 = vmatprep.subr.mxu0 %v5605_v15  ;;  %5732 = vmatprep.subr.mxu1 %v5607_v13  ;;  %v11297_v15 = vld [vmem:[#allocation9 + $0x798] sm:$0xff]  ;;  %v11301_v13 = vld [vmem:[#allocation9 + $0x780] sm:$0xff] }
0x173b   :  { %5656 = vmatpush1.msra.mxu0 %v5604_v17  ;;  %5733 = vmatpush1.msra.mxu1 %v5606_v10  ;;  %v11303_v17 = vld [vmem:[#allocation9 + $0x790] sm:$0xff]  ;;  %v11307_v10 = vld [vmem:[#allocation9 + $0x768] sm:$0xff] }
0x173c   :  { %5657 = vmatprep.subr.mxu0 %v5601_v52  ;;  %5734 = vmatprep.subr.mxu1 %v5603_v5  ;;  %v11309_v52 = vld [vmem:[#allocation9 + $0x778] sm:$0xff]  ;;  %v11313_v5 = vld [vmem:[#allocation9 + $0x760] sm:$0xff] }
0x173d   :  { %5658 = vmatpush1.msra.mxu0 %v5600_v7  ;;  %5735 = vmatpush1.msra.mxu1 %v5602_v54  ;;  %v11315_v7 = vld [vmem:[#allocation9 + $0x770] sm:$0xff]  ;;  %v11319_v54 = vld [vmem:[#allocation9 + $0x748] sm:$0xff] }
0x173e   :  { %5659 = vmatprep.subr.mxu0 %v5597_v33  ;;  %5736 = vmatprep.subr.mxu1 %v5599_v32  ;;  %v11321_v33 = vld [vmem:[#allocation9 + $0x758] sm:$0xff]  ;;  %v11325_v32 = vld [vmem:[#allocation9 + $0x740] sm:$0xff] }
0x173f   :  { %5660 = vmatpush1.msra.mxu0 %v5596_v19  ;;  %5737 = vmatpush1.msra.mxu1 %v5598_v23  ;;  %v11327_v19 = vld [vmem:[#allocation9 + $0x750] sm:$0xff]  ;;  %v11331_v23 = vld [vmem:[#allocation9 + $0x728] sm:$0xff] }
0x1740   :  { %5661 = vmatprep.subr.mxu0 %v5593_v25  ;;  %5738 = vmatprep.subr.mxu1 %v5595_v29  ;;  %v11333_v25 = vld [vmem:[#allocation9 + $0x738] sm:$0xff]  ;;  %v11337_v29 = vld [vmem:[#allocation9 + $0x720] sm:$0xff] }
0x1741   :  { %5662 = vmatpush1.msra.mxu0 %v5592_v48  ;;  %5739 = vmatpush1.msra.mxu1 %v5594_v14  ;;  %v11339_v48 = vld [vmem:[#allocation9 + $0x730] sm:$0xff]  ;;  %v11343_v14 = vld [vmem:[#allocation9 + $0x708] sm:$0xff] }
0x1742   :  { %5663 = vmatprep.subr.mxu0 %v5589_v18  ;;  %5740 = vmatprep.subr.mxu1 %v5591_v11  ;;  %v11345_v18 = vld [vmem:[#allocation9 + $0x718] sm:$0xff]  ;;  %v11349_v11 = vld [vmem:[#allocation9 + $0x700] sm:$0xff] }
0x1743   :  { %5664 = vmatpush1.msra.mxu0 %v5588_v63  ;;  %5741 = vmatpush1.msra.mxu1 %v5590_v40  ;;  %v11351_v63 = vld [vmem:[#allocation9 + $0x710] sm:$0xff]  ;;  %v11353_v40 = vld [vmem:[#allocation9 + $0x6e8] sm:$0xff] }
0x1744   :  { %5665 = vmatprep.subr.mxu0 %v5585_v41  ;;  %5742 = vmatprep.subr.mxu1 %v5587_v42  ;;  %v11357_v41 = vld [vmem:[#allocation9 + $0x6f8] sm:$0xff]  ;;  %v11359_v42 = vld [vmem:[#allocation9 + $0x6e0] sm:$0xff] }
0x1745   :  { %5666 = vmatpush1.msra.mxu0 %v5584_v51  ;;  %5743 = vmatpush1.msra.mxu1 %v5586_v45  ;;  %v11361_v51 = vld [vmem:[#allocation9 + $0x6f0] sm:$0xff]  ;;  %v11365_v45 = vld [vmem:[#allocation9 + $0x6c8] sm:$0xff] }
0x1746   :  { %5667 = vmatprep.subr.mxu0 %v5581_v27  ;;  %5744 = vmatprep.subr.mxu1 %v5583_v57  ;;  %v11367_v27 = vld [vmem:[#allocation9 + $0x6d8] sm:$0xff]  ;;  %v11369_v57 = vld [vmem:[#allocation9 + $0x6c0] sm:$0xff] }
0x1747   :  { %5668 = vmatpush1.msra.mxu0 %v5580_v8  ;;  %5745 = vmatpush1.msra.mxu1 %v5582_v3  ;;  %v11373_v8 = vld [vmem:[#allocation9 + $0x6d0] sm:$0xff]  ;;  %v11375_v3 = vld [vmem:[#allocation9 + $0x6a8] sm:$0xff] }
0x1748   :  { %5669 = vmatprep.subr.mxu0 %v5577_v31  ;;  %5746 = vmatprep.subr.mxu1 %v5579_v56  ;;  %v11377_v31 = vld [vmem:[#allocation9 + $0x6b8] sm:$0xff]  ;;  %v11381_v56 = vld [vmem:[#allocation9 + $0x6a0] sm:$0xff] }
0x1749   :  { %5670 = vmatpush1.msra.mxu0 %v5576_v44  ;;  %5747 = vmatpush1.msra.mxu1 %v5578_v49  ;;  %v11383_v44 = vld [vmem:[#allocation9 + $0x6b0] sm:$0xff]  ;;  %v11387_v49 = vld [vmem:[#allocation9 + $0x688] sm:$0xff] }
0x174a   :  { %5671 = vmatprep.subr.mxu0 %v5573_v4  ;;  %5748 = vmatprep.subr.mxu1 %v5575_v24  ;;  %13086 = vst [vmem:[#allocation21_spill] sm:$0xff] %v11383_v44  ;;  %13087 = vst [vmem:[#allocation22_spill] sm:$0xff] %v11387_v49  ;;  %v11389_v4 = vld [vmem:[#allocation9 + $0x698] sm:$0xff]  ;;  %v11393_v24 = vld [vmem:[#allocation9 + $0x680] sm:$0xff] }
0x174b   :  { %5672 = vmatpush1.msra.mxu0 %v5572_v0  ;;  %5749 = vmatpush1.msra.mxu1 %v5574_v58  ;;  %13088 = vst [vmem:[#allocation23_spill] sm:$0xff] %v11389_v4  ;;  %13089 = vst [vmem:[#allocation24_spill] sm:$0xff] %v11393_v24  ;;  %v11395_v0 = vld [vmem:[#allocation9 + $0x690] sm:$0xff]  ;;  %v11399_v58 = vld [vmem:[#allocation9 + $0x668] sm:$0xff] }
0x174c   :  { %5673 = vmatprep.subr.mxu0 %v5569_v20  ;;  %5750 = vmatprep.subr.mxu1 %v5571_v1  ;;  %13090 = vst [vmem:[#allocation25_spill] sm:$0xff] %v11395_v0  ;;  %13091 = vst [vmem:[#allocation26_spill] sm:$0xff] %v11399_v58  ;;  %v11401_v20 = vld [vmem:[#allocation9 + $0x678] sm:$0xff]  ;;  %v11405_v1 = vld [vmem:[#allocation9 + $0x660] sm:$0xff] }
0x174d   :  { %5674 = vmatpush1.msra.mxu0 %v5568_v43  ;;  %5751 = vmatpush1.msra.mxu1 %v5570_v50  ;;  %13092 = vst [vmem:[#allocation27_spill] sm:$0xff] %v11401_v20  ;;  %13093 = vst [vmem:[#allocation28_spill] sm:$0xff] %v11405_v1  ;;  %v11407_v43 = vld [vmem:[#allocation9 + $0x670] sm:$0xff]  ;;  %v11411_v50 = vld [vmem:[#allocation9 + $0x648] sm:$0xff] }
0x174e   :  { %5675 = vmatprep.subr.mxu0 %v5565_v36  ;;  %5752 = vmatprep.subr.mxu1 %v5567_v39  ;;  %13094 = vst [vmem:[#allocation29_spill] sm:$0xff] %v11407_v43  ;;  %13095 = vst [vmem:[#allocation30_spill] sm:$0xff] %v11411_v50  ;;  %v11413_v36 = vld [vmem:[#allocation9 + $0x658] sm:$0xff]  ;;  %v11417_v39 = vld [vmem:[#allocation9 + $0x640] sm:$0xff] }
0x174f   :  { %5676 = vmatpush1.msra.mxu0 %v5564_v37  ;;  %5753 = vmatpush1.msra.mxu1 %v5566_v46  ;;  %13096 = vst [vmem:[#allocation31_spill] sm:$0xff] %v11413_v36  ;;  %13097 = vst [vmem:[#allocation32_spill] sm:$0xff] %v11417_v39  ;;  %v11419_v37 = vld [vmem:[#allocation9 + $0x650] sm:$0xff]  ;;  %v11423_v46 = vld [vmem:[#allocation9 + $0x628] sm:$0xff] }
0x1750   :  { %5677 = vmatprep.subr.mxu0 %v5561_v60  ;;  %5754 = vmatprep.subr.mxu1 %v5563_v38  ;;  %13098 = vst [vmem:[#allocation33_spill] sm:$0xff] %v11419_v37  ;;  %13099 = vst [vmem:[#allocation34_spill] sm:$0xff] %v11423_v46  ;;  %v11425_v60 = vld [vmem:[#allocation9 + $0x638] sm:$0xff]  ;;  %v11429_v38 = vld [vmem:[#allocation9 + $0x620] sm:$0xff] }
0x1751   :  { %5678 = vmatpush1.msra.mxu0 %v5560_v55  ;;  %5711 = vmatprep.mubr.f32.mxu0 %v13083_v22  ;;  %13100 = vst [vmem:[#allocation35_spill] sm:$0xff] %v11425_v60  ;;  %13101 = vst [vmem:[#allocation36_spill] sm:$0xff] %v11429_v38  ;;  %v11431_v55 = vld [vmem:[#allocation9 + $0x630] sm:$0xff] }
0x1752   :  { %5755 = vmatpush1.msra.mxu1 %v5562_v62  ;;  %5788 = vmatprep.mubr.f32.mxu1 %v13083_v22  ;;  %13102 = vst [vmem:[#allocation37_spill] sm:$0xff] %v11431_v55  ;;  %v11435_v62 = vld [vmem:[#allocation9 + $0x608] sm:$0xff] }
0x1753   :  { %5712 = vmatmul.mubr.f32.vlgmr.msra.gmra.mxu0 %v5557_v47  ;;  %5789 = vmatmul.mubr.f32.vlgmr.msra.gmra.mxu1 %v5557_v47  ;;  %13103 = vst [vmem:[#allocation38_spill] sm:$0xff] %v11435_v62  ;;  %v11437_v47 = vld [vmem:[#allocation9 + $0x618] sm:$0xff] }
0x1754   :  { %5717 = vmatprep.mubr.f32.mxu0 %v13083_v22  ;;  %5794 = vmatprep.mubr.f32.mxu1 %v13083_v22  ;;  %13104 = vst [vmem:[#allocation43_spill] sm:$0xff] %v11437_v47 }
0x1755   :  { %5878 = vmatprep.subr.mxu0 %v11259_v2  ;;  %5949 = vmatprep.subr.mxu1 %v11261_v26 }
0x1756   :  { %5879 = vmatpush1.msra.mxu0 %v11265_v61  ;;  %5950 = vmatpush1.msra.mxu1 %v11267_v28 }
0x1757   :  { %5880 = vmatprep.subr.mxu0 %v11271_v35  ;;  %5951 = vmatprep.subr.mxu1 %v11273_v53 }
0x1758   :  { %5881 = vmatpush1.msra.mxu0 %v11277_v6  ;;  %5952 = vmatpush1.msra.mxu1 %v11279_v16 }
0x1759   :  { %5882 = vmatprep.subr.mxu0 %v11283_v30  ;;  %5953 = vmatprep.subr.mxu1 %v11285_v9 }
0x175a   :  { %5883 = vmatpush1.msra.mxu0 %v11289_v21  ;;  %5954 = vmatpush1.msra.mxu1 %v11291_v12 }
0x175b   :  { %5884 = vmatprep.subr.mxu0 %v11295_v34  ;;  %5955 = vmatprep.subr.mxu1 %v11297_v15 }
0x175c   :  { %5885 = vmatpush1.msra.mxu0 %v11301_v13  ;;  %5956 = vmatpush1.msra.mxu1 %v11303_v17 }
0x175d   :  { %5886 = vmatprep.subr.mxu0 %v11307_v10  ;;  %5957 = vmatprep.subr.mxu1 %v11309_v52 }
0x175e   :  { %5887 = vmatpush1.msra.mxu0 %v11313_v5  ;;  %5958 = vmatpush1.msra.mxu1 %v11315_v7 }
0x175f   :  { %5888 = vmatprep.subr.mxu0 %v11319_v54  ;;  %5959 = vmatprep.subr.mxu1 %v11321_v33 }
0x1760   :  { %5889 = vmatpush1.msra.mxu0 %v11325_v32  ;;  %5960 = vmatpush1.msra.mxu1 %v11327_v19 }
0x1761   :  { %5890 = vmatprep.subr.mxu0 %v11331_v23  ;;  %5961 = vmatprep.subr.mxu1 %v11333_v25 }
0x1762   :  { %5891 = vmatpush1.msra.mxu0 %v11337_v29  ;;  %5962 = vmatpush1.msra.mxu1 %v11339_v48 }
0x1763   :  { %5892 = vmatprep.subr.mxu0 %v11343_v14  ;;  %5963 = vmatprep.subr.mxu1 %v11345_v18 }
0x1764   :  { %5893 = vmatpush1.msra.mxu0 %v11349_v11  ;;  %5964 = vmatpush1.msra.mxu1 %v11351_v63 }
0x1765   :  { %5894 = vmatprep.subr.mxu0 %v11353_v40  ;;  %5965 = vmatprep.subr.mxu1 %v11357_v41 }
0x1766   :  { %5895 = vmatpush1.msra.mxu0 %v11359_v42  ;;  %5966 = vmatpush1.msra.mxu1 %v11361_v51 }
0x1767   :  { %5896 = vmatprep.subr.mxu0 %v11365_v45  ;;  %5967 = vmatprep.subr.mxu1 %v11367_v27 }
0x1768   :  { %5897 = vmatpush1.msra.mxu0 %v11369_v57  ;;  %5968 = vmatpush1.msra.mxu1 %v11373_v8 }
0x1769   :  { %5898 = vmatprep.subr.mxu0 %v11375_v3  ;;  %5969 = vmatprep.subr.mxu1 %v11377_v31 }
0x176a   :  { %5899 = vmatpush1.msra.mxu0 %v11381_v56  ;;  %5970 = vmatpush1.msra.mxu1 %v11383_v44 }
0x176b   :  { %5900 = vmatprep.subr.mxu0 %v11387_v49  ;;  %5971 = vmatprep.subr.mxu1 %v11389_v4 }
0x176c   :  { %5901 = vmatpush1.msra.mxu0 %v11393_v24  ;;  %5972 = vmatpush1.msra.mxu1 %v11395_v0 }
0x176d   :  { %5902 = vmatprep.subr.mxu0 %v11399_v58  ;;  %5973 = vmatprep.subr.mxu1 %v11401_v20  ;;  %v5366_v58 = vld [vmem:[#allocation3 + $0x30] sm:$0xc0] }
0x176e   :  { %5903 = vmatpush1.msra.mxu0 %v11405_v1  ;;  %5974 = vmatpush1.msra.mxu1 %v11407_v43  ;;  %v11441_v43 = vld [vmem:[#allocation9 + $0x600] sm:$0xff]  ;;  %v5365_v1 = vld [vmem:[#allocation3 + $0x38] sm:$0xc0] }
0x176f   :  { %5904 = vmatprep.subr.mxu0 %v11411_v50  ;;  %5975 = vmatprep.subr.mxu1 %v11413_v36  ;;  %13105 = vst [vmem:[#allocation17_spill] sm:$0xff] %v11441_v43  ;;  %v11443_v50 = vld [vmem:[#allocation9 + $0x610] sm:$0xff] }
0x1770   :  { %5905 = vmatpush1.msra.mxu0 %v11417_v39  ;;  %5976 = vmatpush1.msra.mxu1 %v11419_v37  ;;  %13106 = vst [vmem:[#allocation18_spill] sm:$0xff] %v11443_v50  ;;  %v5364_v37 = vld [vmem:[#allocation3 + $0x20] sm:$0xc0] }
0x1771   :  { %5906 = vmatprep.subr.mxu0 %v11423_v46  ;;  %5977 = vmatprep.subr.mxu1 %v11425_v60 }
0x1772   :  { %5907 = vmatpush1.msra.mxu0 %v11429_v38  ;;  %5978 = vmatpush1.msra.mxu1 %v11431_v55 }
0x1773   :  { %5908 = vmatprep.subr.mxu0 %v11435_v62  ;;  %5979 = vmatprep.subr.mxu1 %v11437_v47 }
0x1774   :  { %5909 = vmatpush1.msra.mxu0 %v11441_v43  ;;  %5980 = vmatpush1.msra.mxu1 %v11443_v50 }
0x1775   :  { %6052 = vmatprep.subr.mxu0 %v11259_v2  ;;  %6123 = vmatprep.subr.mxu1 %v11261_v26  ;;  %v5367_v26 = vld [vmem:[#allocation3] sm:$0xc0] }
0x17f2   :  { %v5437_v60 = vpop.f32.mrf.mxu0  ;;  %v5508_v62 = vpop.f32.mrf.mxu1 }
0x17f3   :  { %v5517_v46 = vrot.slane %v5437_v60, 2  ;;  %v5519_v43 = vrot.slane %v5508_v62, 2 }
0x17f4   :  { %v5439_v39 = vpop.f32.mrf.mxu0  ;;  %v5510_v50 = vpop.f32.mrf.mxu1 }
0x17f5   :  { %v5525_v36 = vadd.f32 %v5517_v46, %v5364_v37  ;;  %v5518_v38 = vrot.slane %v5439_v39, 2  ;;  %v5527_v0 = vadd.f32 %v5519_v43, %v5366_v58  ;;  %v5520_v2 = vrot.slane %v5510_v50, 2  ;;  %v13108_v37 = vld [vmem:[#allocation40_spill] sm:$0xff]  ;;  %v13109_v58 = vld [vmem:[#allocation41_spill] sm:$0xff] }
0x17f7   :  { %v7652_v55 = vmul.f32 -1.442695, %v5525_v36  ;;  %v5526_v20 = vadd.f32 %v5518_v38, %v5365_v1  ;;  %v7654_v24 = vmul.f32 -1.442695, %v5527_v0  ;;  %v5528_v60 = vadd.f32 %v5520_v2, %v5367_v26  ;;  %v5625_v1 = vld [vmem:[#allocation10 + $0xc] sm:$0xf] }
0x17f8   :  { %v13107_v36 = vld [vmem:[#allocation39_spill] sm:$0xff]  ;;  %v11457_v46 = vrot.slane %v5625_v1, %v13108_v37  ;;  %v11460_v43 = vrot.slane %v5625_v1, %v13109_v58  ;;  %v13110_v0 = vld [vmem:[#allocation42_spill] sm:$0xff] }
0x17f9   :  { %8166 = vpow2.f32 %v7652_v55  ;;  %v7653_v47 = vmul.f32 -1.442695, %v5526_v20  ;;  %v11454_v20 = vrot.slane %v5625_v1, %v13107_v36  ;;  %v11463_v50 = vrot.slane %v5625_v1, %v13110_v0 }
0x17fb   :  { %8168 = vpow2.f32 %v7653_v47 }
0x17fc   :  { %8170 = vpow2.f32 %v7654_v24 }
0x1806   :  { %v8167_v4 = vpop.eup %8166 }
0x1807   :  { %v5538_v49 = vadd.f32 1.0, %v8167_v4 }
0x1808   :  { %v8169_v44 = vpop.eup %8168 }
0x1809   :  { %8172 = vrcp.f32 %v5538_v49  ;;  %v5539_v39 = vadd.f32 1.0, %v8169_v44  ;;  %v8171_v4 = vpop.eup %8170 }
0x180a   :  { %8174 = vtanh.f32 %v5528_v60  ;;  %v5540_v36 = vadd.f32 1.0, %v8171_v4  ;;  %v13112_v4 = vld [vmem:[#allocation22_spill] sm:$0xff] }
0x180b   :  { %8176 = vrcp.f32 %v5539_v39  ;;  %v5549_v39 = vrot.slane %v11252_v59, 6  ;;  %v13111_v59 = vld [vmem:[#allocation21_spill] sm:$0xff] }
0x180c   :  { %8178 = vrcp.f32 %v5540_v36  ;;  %v13121_v36 = vld [vmem:[#allocation31_spill] sm:$0xff] }
0x1813   :  { %v5713_v2 = vpop.f32.mrf.mxu0  ;;  %v5790_v26 = vpop.f32.mrf.mxu1 }
0x1814   :  { %v5714_v49 = vadd.f32 %v5713_v2, %v11454_v20  ;;  %v5791_v44 = vadd.f32 %v5790_v26, %v11457_v46 }
0x1815   :  { %v5715_v24 = vpop.f32.mrf.mxu0  ;;  %v5792_v38 = vpop.f32.mrf.mxu1 }
0x1816   :  { %v8173_v55 = vpop.eup %8172  ;;  %5801 = vst [vmem:[#allocation3 + $0x28] sm:$0xff] %v5714_v49  ;;  %5803 = vst [vmem:[#allocation3 + $0x8] sm:$0xff] %v5791_v44  ;;  %v5716_v62 = vadd.f32 %v5715_v24, %v11460_v43  ;;  %v5793_v47 = vadd.f32 %v5792_v38, %v11463_v50  ;;  %v13113_v24 = vld [vmem:[#allocation23_spill] sm:$0xff]  ;;  %v13114_v38 = vld [vmem:[#allocation24_spill] sm:$0xff] }
0x1817   :  { %v8175_v60 = vpop.eup %8174 }
0x1818   :  { %v8177_v1 = vpop.eup %8176  ;;  %5802 = vst [vmem:[#allocation3 + $0x10] sm:$0xff] %v5716_v62  ;;  %5804 = vst [vmem:[#allocation3 + $0x18] sm:$0xff] %v5793_v47  ;;  %v5552_v58 = vmul.f32 %v8175_v60, %v8173_v55  ;;  %v13115_v55 = vld [vmem:[#allocation25_spill] sm:$0xff]  ;;  %v13116_v62 = vld [vmem:[#allocation26_spill] sm:$0xff] }
0x1819   :  { %v5551_v37 = vmul.f32 %v8177_v1, %v5549_v39  ;;  %v8179_v2 = vpop.eup %8178  ;;  %v13117_v47 = vld [vmem:[#allocation27_spill] sm:$0xff]  ;;  %v13118_v60 = vld [vmem:[#allocation28_spill] sm:$0xff]  ;;  %v13119_v39 = vld [vmem:[#allocation29_spill] sm:$0xff] }
0x181a   :  { %v13120_v1 = vld [vmem:[#allocation30_spill] sm:$0xff] }
0x181b   :  { %v5553_v0 = vadd.f32 %v5552_v58, %v5551_v37  ;;  %v13122_v37 = vld [vmem:[#allocation32_spill] sm:$0xff]  ;;  %v13123_v58 = vld [vmem:[#allocation33_spill] sm:$0xff] }
0x181d   :  { %8180 = vtanh.f32 %v5553_v0  ;;  %v13124_v0 = vld [vmem:[#allocation34_spill] sm:$0xff] }
0x182a   :  { %v8181_v26 = vpop.eup %8180 }
0x182b   :  { %v5555_v49 = vmul.f32 %v8181_v26, %v8179_v2  ;;  %v13125_v2 = vld [vmem:[#allocation35_spill] sm:$0xff]  ;;  %v13126_v26 = vld [vmem:[#allocation36_spill] sm:$0xff] }
0x182d   :  { %5556 = vst [vmem:[#allocation2 + $0x8] sm:$0xc0] %v5555_v49  ;;  %v13127_v49 = vld [vmem:[#allocation37_spill] sm:$0xff] }
0x1834   :  { %v5558_v44 = vld [vmem:[#allocation2 + $0x8] sm:$0xff] }
0x1835   :  { %5718 = vmatmul.mubr.f32.gmra.mxu0 %v5558_v44  ;;  %5795 = vmatmul.mubr.f32.gmra.mxu1 %v5558_v44  ;;  %v13128_v44 = vld [vmem:[#allocation38_spill] sm:$0xff] }
0x1836   :  { %5942 = vmatprep.mubr.f32.mxu0 %v13083_v22  ;;  %6013 = vmatprep.mubr.f32.mxu1 %v13083_v22 }
0x1839   :  { %5943 = vmatmul.mubr.f32.vlgmr.msra.gmra.mxu0 %v13083_v22  ;;  %6014 = vmatmul.mubr.f32.vlgmr.msra.gmra.mxu1 %v13083_v22 }
0x183a   :  { %6053 = vmatpush1.msra.mxu0 %v11265_v61  ;;  %6124 = vmatpush1.msra.mxu1 %v11267_v28 }
0x183b   :  { %6054 = vmatprep.subr.mxu0 %v11271_v35  ;;  %6125 = vmatprep.subr.mxu1 %v11273_v53 }
0x183c   :  { %6055 = vmatpush1.msra.mxu0 %v11277_v6  ;;  %6126 = vmatpush1.msra.mxu1 %v11279_v16 }
0x183d   :  { %6056 = vmatprep.subr.mxu0 %v11283_v30  ;;  %6127 = vmatprep.subr.mxu1 %v11285_v9 }
0x183e   :  { %6057 = vmatpush1.msra.mxu0 %v11289_v21  ;;  %6128 = vmatpush1.msra.mxu1 %v11291_v12 }
0x183f   :  { %6058 = vmatprep.subr.mxu0 %v11295_v34  ;;  %6129 = vmatprep.subr.mxu1 %v11297_v15 }
0x1840   :  { %6059 = vmatpush1.msra.mxu0 %v11301_v13  ;;  %6130 = vmatpush1.msra.mxu1 %v11303_v17 }
0x1841   :  { %6060 = vmatprep.subr.mxu0 %v11307_v10  ;;  %6131 = vmatprep.subr.mxu1 %v11309_v52 }
0x1842   :  { %6061 = vmatpush1.msra.mxu0 %v11313_v5  ;;  %6132 = vmatpush1.msra.mxu1 %v11315_v7 }
0x1843   :  { %6062 = vmatprep.subr.mxu0 %v11319_v54  ;;  %6133 = vmatprep.subr.mxu1 %v11321_v33 }
0x1844   :  { %6063 = vmatpush1.msra.mxu0 %v11325_v32  ;;  %6134 = vmatpush1.msra.mxu1 %v11327_v19 }
0x1845   :  { %6064 = vmatprep.subr.mxu0 %v11331_v23  ;;  %6135 = vmatprep.subr.mxu1 %v11333_v25 }
0x1846   :  { %6065 = vmatpush1.msra.mxu0 %v11337_v29  ;;  %6136 = vmatpush1.msra.mxu1 %v11339_v48 }
0x1847   :  { %6066 = vmatprep.subr.mxu0 %v11343_v14  ;;  %6137 = vmatprep.subr.mxu1 %v11345_v18 }
0x1848   :  { %6067 = vmatpush1.msra.mxu0 %v11349_v11  ;;  %6138 = vmatpush1.msra.mxu1 %v11351_v63 }
0x1849   :  { %6068 = vmatprep.subr.mxu0 %v11353_v40  ;;  %6139 = vmatprep.subr.mxu1 %v11357_v41 }
0x184a   :  { %6069 = vmatpush1.msra.mxu0 %v11359_v42  ;;  %6140 = vmatpush1.msra.mxu1 %v11361_v51 }
0x184b   :  { %6070 = vmatprep.subr.mxu0 %v11365_v45  ;;  %6141 = vmatprep.subr.mxu1 %v11367_v27 }
0x184c   :  { %6071 = vmatpush1.msra.mxu0 %v11369_v57  ;;  %6142 = vmatpush1.msra.mxu1 %v11373_v8 }
0x184d   :  { %6072 = vmatprep.subr.mxu0 %v11375_v3  ;;  %6143 = vmatprep.subr.mxu1 %v11377_v31 }
0x184e   :  { %6073 = vmatpush1.msra.mxu0 %v11381_v56  ;;  %6144 = vmatpush1.msra.mxu1 %v13111_v59 }
0x184f   :  { %6074 = vmatprep.subr.mxu0 %v13112_v4  ;;  %6145 = vmatprep.subr.mxu1 %v13113_v24 }
0x1850   :  { %6075 = vmatpush1.msra.mxu0 %v13114_v38  ;;  %6146 = vmatpush1.msra.mxu1 %v13115_v55 }
0x1851   :  { %6076 = vmatprep.subr.mxu0 %v13116_v62  ;;  %6147 = vmatprep.subr.mxu1 %v13117_v47 }
0x1852   :  { %6077 = vmatpush1.msra.mxu0 %v13118_v60  ;;  %6148 = vmatpush1.msra.mxu1 %v13119_v39  ;;  %v13129_v60 = vld [vmem:[#allocation43_spill] sm:$0xff]  ;;  %v13130_v39 = vld [vmem:[#allocation17_spill] sm:$0xff] }
0x1853   :  { %6078 = vmatprep.subr.mxu0 %v13120_v1  ;;  %6149 = vmatprep.subr.mxu1 %v13121_v36  ;;  %v13131_v36 = vld [vmem:[#allocation18_spill] sm:$0xff]  ;;  %v5874_v1 = vld [vmem:[#allocation3 + $0x28] sm:$0x3] }
0x1854   :  { %6079 = vmatpush1.msra.mxu0 %v13122_v37  ;;  %6150 = vmatpush1.msra.mxu1 %v13123_v58  ;;  %v13132_v58 = vld [vmem:[#allocation19_spill] sm:$0xff] }
0x1855   :  { %6080 = vmatprep.subr.mxu0 %v13124_v0  ;;  %6151 = vmatprep.subr.mxu1 %v13125_v2  ;;  %v13133_v0 = vld [vmem:[#allocation20_spill] sm:$0xff] }
0x1856   :  { %6081 = vmatpush1.msra.mxu0 %v13126_v26  ;;  %6152 = vmatpush1.msra.mxu1 %v13127_v49 }
0x1857   :  { %6082 = vmatprep.subr.mxu0 %v13128_v44  ;;  %6153 = vmatprep.subr.mxu1 %v13129_v60 }
0x1858   :  { %6083 = vmatpush1.msra.mxu0 %v13130_v39  ;;  %6116 = vmatprep.mubr.f32.mxu0 %v13083_v22 }
0x1859   :  { %6154 = vmatpush1.msra.mxu1 %v13131_v36  ;;  %6187 = vmatprep.mubr.f32.mxu1 %v13083_v22 }
0x185a   :  { %6244 = vmatprep.subr.mxu0 %v13132_v58  ;;  %6315 = vmatprep.subr.mxu1 %v13133_v0  ;;  %v5875_v0 = vld [vmem:[#allocation3 + $0x10] sm:$0x3] }
0x18f5   :  { %v5719_v2 = vpop.f32.mrf.mxu0  ;;  %v5796_v26 = vpop.f32.mrf.mxu1 }
0x18f6   :  { %v5720_v49 = vadd.f32 %v5719_v2, %v11454_v20  ;;  %v5797_v44 = vadd.f32 %v5796_v26, %v11457_v46  ;;  %v5876_v2 = vld [vmem:[#allocation3 + $0x8] sm:$0x3] }
0x18f7   :  { %v5721_v37 = vpop.f32.mrf.mxu0  ;;  %v5798_v60 = vpop.f32.mrf.mxu1 }
0x18f8   :  { %5805 = vst [vmem:[#allocation3 + $0x20] sm:$0xff] %v5720_v49  ;;  %5807 = vst [vmem:[#allocation3 + $0x30] sm:$0xff] %v5797_v44  ;;  %v5722_v39 = vadd.f32 %v5721_v37, %v11460_v43  ;;  %v5799_v36 = vadd.f32 %v5798_v60, %v11463_v50  ;;  %v5877_v43 = vld [vmem:[#allocation3 + $0x18] sm:$0x3] }
0x18f9   :  { %v5944_v22 = vpop.f32.mrf.mxu0  ;;  %v6015_v46 = vpop.f32.mrf.mxu1 }
0x18fa   :  { %5806 = vst [vmem:[#allocation3 + $0x38] sm:$0xff] %v5722_v39  ;;  %5808 = vst [vmem:[#allocation3] sm:$0xff] %v5799_v36  ;;  %v6020_v58 = vadd.f32 %v5944_v22, %v5874_v1  ;;  %v6022_v26 = vadd.f32 %v6015_v46, %v5876_v2 }
0x18fb   :  { %v5946_v47 = vpop.f32.mrf.mxu0  ;;  %v6017_v49 = vpop.f32.mrf.mxu1 }
0x18fc   :  { %v7655_v62 = vmul.f32 -1.442695, %v6020_v58  ;;  %v6021_v55 = vadd.f32 %v5946_v47, %v5875_v0  ;;  %v7657_v44 = vmul.f32 -1.442695, %v6022_v26  ;;  %v6023_v50 = vadd.f32 %v6017_v49, %v5877_v43  ;;  %v13135_v26 = vld [vmem:[#allocation25_spill] sm:$0xff]  ;;  %v13136_v49 = vld [vmem:[#allocation26_spill] sm:$0xff] }
0x18fd   :  { %v13138_v43 = vld [vmem:[#allocation28_spill] sm:$0xff] }
0x18fe   :  { %8182 = vpow2.f32 %v7655_v62  ;;  %v7656_v20 = vmul.f32 -1.442695, %v6021_v55 }
0x1900   :  { %8184 = vpow2.f32 %v7656_v20 }
0x1901   :  { %8186 = vpow2.f32 %v7657_v44  ;;  %v13137_v44 = vld [vmem:[#allocation27_spill] sm:$0xff] }
0x190b   :  { %v8183_v37 = vpop.eup %8182 }
0x190c   :  { %v6033_v60 = vadd.f32 1.0, %v8183_v37  ;;  %v13139_v37 = vld [vmem:[#allocation29_spill] sm:$0xff] }
0x190d   :  { %v8185_v38 = vpop.eup %8184 }
0x190e   :  { %8188 = vrcp.f32 %v6033_v60  ;;  %v6034_v22 = vadd.f32 1.0, %v8185_v38  ;;  %v8187_v39 = vpop.eup %8186  ;;  %v13134_v38 = vld [vmem:[#allocation24_spill] sm:$0xff]  ;;  %v13141_v60 = vld [vmem:[#allocation31_spill] sm:$0xff] }
0x190f   :  { %8190 = vtanh.f32 %v6023_v50  ;;  %v6035_v1 = vadd.f32 1.0, %v8187_v39  ;;  %v13140_v50 = vld [vmem:[#allocation30_spill] sm:$0xff]  ;;  %v13143_v39 = vld [vmem:[#allocation33_spill] sm:$0xff] }
0x1910   :  { %8192 = vrcp.f32 %v6034_v22  ;;  %v13142_v22 = vld [vmem:[#allocation32_spill] sm:$0xff] }
0x1911   :  { %8194 = vrcp.f32 %v6035_v1  ;;  %v13147_v1 = vld [vmem:[#allocation37_spill] sm:$0xff] }
0x191b   :  { %v8189_v47 = vpop.eup %8188 }
0x191c   :  { %v8191_v62 = vpop.eup %8190 }
0x191d   :  { %v8193_v55 = vpop.eup %8192  ;;  %v6044_v58 = vmul.f32 %v8191_v62, %v8189_v47  ;;  %v13144_v47 = vld [vmem:[#allocation34_spill] sm:$0xff]  ;;  %v13145_v62 = vld [vmem:[#allocation35_spill] sm:$0xff] }
0x191e   :  { %v6043_v36 = vmul.f32 0.0, %v8193_v55  ;;  %v8195_v20 = vpop.eup %8194  ;;  %v13146_v55 = vld [vmem:[#allocation36_spill] sm:$0xff] }
0x1920   :  { %v11544_v0 = vadd.f32 %v6044_v58, %v6043_v36  ;;  %v13148_v36 = vld [vmem:[#allocation38_spill] sm:$0xff]  ;;  %v13149_v58 = vld [vmem:[#allocation43_spill] sm:$0xff] }
0x1922   :  { %8196 = vtanh.f32 %v11544_v0 }
0x192f   :  { %v8197_v46 = vpop.eup %8196 }
0x1930   :  { %v6047_v2 = vmul.f32 %v8197_v46, %v8195_v20  ;;  %v13150_v20 = vld [vmem:[#allocation17_spill] sm:$0xff]  ;;  %v13151_v46 = vmov 0.0  }
0x1932   :  { %6117 = vmatmul.mubr.f32.vlgmr.msra.gmra.mxu0 %v6047_v2  ;;  %6188 = vmatmul.mubr.f32.vlgmr.msra.gmra.mxu1 %v6047_v2  ;;  %v13152_v2 = vld [vmem:[#allocation18_spill] sm:$0xff] }
0x1933   :  { %6245 = vmatpush1.msra.mxu0 %v11265_v61  ;;  %6316 = vmatpush1.msra.mxu1 %v11267_v28 }
0x1934   :  { %6246 = vmatprep.subr.mxu0 %v11271_v35  ;;  %6317 = vmatprep.subr.mxu1 %v11273_v53 }
0x1935   :  { %6247 = vmatpush1.msra.mxu0 %v11277_v6  ;;  %6318 = vmatpush1.msra.mxu1 %v11279_v16 }
0x1936   :  { %6248 = vmatprep.subr.mxu0 %v11283_v30  ;;  %6319 = vmatprep.subr.mxu1 %v11285_v9 }
0x1937   :  { %6249 = vmatpush1.msra.mxu0 %v11289_v21  ;;  %6320 = vmatpush1.msra.mxu1 %v11291_v12 }
0x1938   :  { %6250 = vmatprep.subr.mxu0 %v11295_v34  ;;  %6321 = vmatprep.subr.mxu1 %v11297_v15 }
0x1939   :  { %6251 = vmatpush1.msra.mxu0 %v11301_v13  ;;  %6322 = vmatpush1.msra.mxu1 %v11303_v17 }
0x193a   :  { %6252 = vmatprep.subr.mxu0 %v11307_v10  ;;  %6323 = vmatprep.subr.mxu1 %v11309_v52 }
0x193b   :  { %6253 = vmatpush1.msra.mxu0 %v11313_v5  ;;  %6324 = vmatpush1.msra.mxu1 %v11315_v7 }
0x193c   :  { %6254 = vmatprep.subr.mxu0 %v11319_v54  ;;  %6325 = vmatprep.subr.mxu1 %v11321_v33 }
0x193d   :  { %6255 = vmatpush1.msra.mxu0 %v11325_v32  ;;  %6326 = vmatpush1.msra.mxu1 %v11327_v19 }
0x193e   :  { %6256 = vmatprep.subr.mxu0 %v11331_v23  ;;  %6327 = vmatprep.subr.mxu1 %v11333_v25 }
0x193f   :  { %6257 = vmatpush1.msra.mxu0 %v11337_v29  ;;  %6328 = vmatpush1.msra.mxu1 %v11339_v48 }
0x1940   :  { %6258 = vmatprep.subr.mxu0 %v11343_v14  ;;  %6329 = vmatprep.subr.mxu1 %v11345_v18 }
0x1941   :  { %6259 = vmatpush1.msra.mxu0 %v11349_v11  ;;  %6330 = vmatpush1.msra.mxu1 %v11351_v63 }
0x1942   :  { %6260 = vmatprep.subr.mxu0 %v11353_v40  ;;  %6331 = vmatprep.subr.mxu1 %v11357_v41 }
0x1943   :  { %6261 = vmatpush1.msra.mxu0 %v11359_v42  ;;  %6332 = vmatpush1.msra.mxu1 %v11361_v51 }
0x1944   :  { %6262 = vmatprep.subr.mxu0 %v11365_v45  ;;  %6333 = vmatprep.subr.mxu1 %v11367_v27 }
0x1945   :  { %6263 = vmatpush1.msra.mxu0 %v11369_v57  ;;  %6334 = vmatpush1.msra.mxu1 %v11373_v8 }
0x1946   :  { %6264 = vmatprep.subr.mxu0 %v11375_v3  ;;  %6335 = vmatprep.subr.mxu1 %v11377_v31 }
0x1947   :  { %6265 = vmatpush1.msra.mxu0 %v11381_v56  ;;  %6336 = vmatpush1.msra.mxu1 %v13111_v59 }
0x1948   :  { %6266 = vmatprep.subr.mxu0 %v13112_v4  ;;  %6337 = vmatprep.subr.mxu1 %v13113_v24 }
0x1949   :  { %6267 = vmatpush1.msra.mxu0 %v13134_v38  ;;  %6338 = vmatpush1.msra.mxu1 %v13135_v26 }
0x194a   :  { %6268 = vmatprep.subr.mxu0 %v13136_v49  ;;  %6339 = vmatprep.subr.mxu1 %v13137_v44  ;;  %v6050_v44 = vld [vmem:[#allocation3 + $0x8] sm:$0xc] }
0x194b   :  { %6269 = vmatpush1.msra.mxu0 %v13138_v43  ;;  %6340 = vmatpush1.msra.mxu1 %v13139_v37 }
0x194c   :  { %6270 = vmatprep.subr.mxu0 %v13140_v50  ;;  %6341 = vmatprep.subr.mxu1 %v13141_v60  ;;  %v6049_v50 = vld [vmem:[#allocation3 + $0x10] sm:$0xc] }
0x194d   :  { %6271 = vmatpush1.msra.mxu0 %v13142_v22  ;;  %6342 = vmatpush1.msra.mxu1 %v13143_v39  ;;  %v13153_v39 = vld [vmem:[#allocation19_spill] sm:$0xff]  ;;  %v6048_v22 = vld [vmem:[#allocation3 + $0x28] sm:$0xc] }
0x194e   :  { %6272 = vmatprep.subr.mxu0 %v13144_v47  ;;  %6343 = vmatprep.subr.mxu1 %v13145_v62  ;;  %v13154_v47 = vld [vmem:[#allocation20_spill] sm:$0xff] }
0x194f   :  { %6273 = vmatpush1.msra.mxu0 %v13146_v55  ;;  %6344 = vmatpush1.msra.mxu1 %v13147_v1 }
0x1950   :  { %6274 = vmatprep.subr.mxu0 %v13148_v36  ;;  %6345 = vmatprep.subr.mxu1 %v13149_v58 }
0x1951   :  { %6275 = vmatpush1.msra.mxu0 %v13150_v20  ;;  %6308 = vmatprep.mubr.f32.mxu0 %v13151_v46 }
0x1952   :  { %6346 = vmatpush1.msra.mxu1 %v13152_v2  ;;  %6379 = vmatprep.mubr.f32.mxu1 %v13151_v46 }
0x1953   :  { %6436 = vmatprep.subr.mxu0 %v13153_v39  ;;  %6507 = vmatprep.subr.mxu1 %v13154_v47  ;;  %v6051_v47 = vld [vmem:[#allocation3 + $0x18] sm:$0xc] }
0x19f2   :  { %v6118_v62 = vpop.f32.mrf.mxu0  ;;  %v6189_v20 = vpop.f32.mrf.mxu1 }
0x19f3   :  { %v6198_v55 = vrot.slane %v6118_v62, 6  ;;  %v6200_v2 = vrot.slane %v6189_v20, 6 }
0x19f4   :  { %v6120_v1 = vpop.f32.mrf.mxu0  ;;  %v6191_v46 = vpop.f32.mrf.mxu1 }
0x19f5   :  { %v6206_v60 = vadd.f32 %v6198_v55, %v6048_v22  ;;  %v6199_v36 = vrot.slane %v6120_v1, 6  ;;  %v6208_v49 = vadd.f32 %v6200_v2, %v6050_v44  ;;  %v6201_v39 = vrot.slane %v6191_v46, 6 }
0x19f7   :  { %v7658_v58 = vmul.f32 -1.442695, %v6206_v60  ;;  %v6207_v37 = vadd.f32 %v6199_v36, %v6049_v50  ;;  %v7660_v26 = vmul.f32 -1.442695, %v6208_v49  ;;  %v6209_v62 = vadd.f32 %v6201_v39, %v6051_v47 }
0x19f9   :  { %8198 = vpow2.f32 %v7658_v58  ;;  %v7659_v43 = vmul.f32 -1.442695, %v6207_v37  ;;  %v6238_v58 = vld [vmem:[#allocation3 + $0x10] sm:$0x30] }
0x19fb   :  { %8200 = vpow2.f32 %v7659_v43  ;;  %v6230_v43 = vrot.slane %v11544_v0, 6 }
0x19fc   :  { %8202 = vpow2.f32 %v7660_v26 }
0x1a06   :  { %v8199_v38 = vpop.eup %8198 }
0x1a07   :  { %v6219_v24 = vadd.f32 1.0, %v8199_v38 }
0x1a08   :  { %v8201_v4 = vpop.eup %8200 }
0x1a09   :  { %8204 = vrcp.f32 %v6219_v24  ;;  %v6220_v22 = vadd.f32 1.0, %v8201_v4  ;;  %v8203_v50 = vpop.eup %8202 }
0x1a0a   :  { %8206 = vtanh.f32 %v6209_v62  ;;  %v6221_v1 = vadd.f32 1.0, %v8203_v50  ;;  %v6239_v50 = vld [vmem:[#allocation3 + $0x8] sm:$0x30] }
0x1a0b   :  { %8208 = vrcp.f32 %v6220_v22 }
0x1a0c   :  { %8210 = vrcp.f32 %v6221_v1  ;;  %v6240_v1 = vld [vmem:[#allocation3 + $0x18] sm:$0x30] }
0x1a16   :  { %v8205_v60 = vpop.eup %8204 }
0x1a17   :  { %v8207_v37 = vpop.eup %8206 }
0x1a18   :  { %v8209_v55 = vpop.eup %8208  ;;  %v6233_v36 = vmul.f32 %v8207_v37, %v8205_v60 }
0x1a19   :  { %v6232_v44 = vmul.f32 %v8209_v55, %v6230_v43  ;;  %v8211_v38 = vpop.eup %8210 }
0x1a1b   :  { %v11614_v49 = vadd.f32 %v6233_v36, %v6232_v44 }
0x1a1d   :  { %8212 = vtanh.f32 %v11614_v49 }
0x1a2a   :  { %v8213_v26 = vpop.eup %8212 }
0x1a2b   :  { %v6236_v24 = vmul.f32 %v8213_v26, %v8211_v38 }
0x1a2d   :  { %v6242_v4 = vrot.slane %v6236_v24, 2 }
0x1a2f   :  { %6309 = vmatmul.mubr.f32.vlgmr.msra.gmra.mxu0 %v6242_v4  ;;  %6380 = vmatmul.mubr.f32.vlgmr.msra.gmra.mxu1 %v6242_v4 }
0x1a30   :  { %6437 = vmatpush1.msra.mxu0 %v11265_v61  ;;  %6508 = vmatpush1.msra.mxu1 %v11267_v28  ;;  %v13155_v61 = vld [vmem:[#allocation22_spill] sm:$0xff]  ;;  %v13156_v28 = vld [vmem:[#allocation23_spill] sm:$0xff] }
0x1a31   :  { %6438 = vmatprep.subr.mxu0 %v11271_v35  ;;  %6509 = vmatprep.subr.mxu1 %v11273_v53  ;;  %v13157_v35 = vld [vmem:[#allocation24_spill] sm:$0xff]  ;;  %v13158_v53 = vld [vmem:[#allocation25_spill] sm:$0xff] }
0x1a32   :  { %6439 = vmatpush1.msra.mxu0 %v11277_v6  ;;  %6510 = vmatpush1.msra.mxu1 %v11279_v16  ;;  %v13159_v6 = vld [vmem:[#allocation26_spill] sm:$0xff]  ;;  %v13160_v16 = vld [vmem:[#allocation27_spill] sm:$0xff] }
0x1a33   :  { %6440 = vmatprep.subr.mxu0 %v11283_v30  ;;  %6511 = vmatprep.subr.mxu1 %v11285_v9  ;;  %v13161_v30 = vld [vmem:[#allocation28_spill] sm:$0xff]  ;;  %v13162_v9 = vld [vmem:[#allocation29_spill] sm:$0xff] }
0x1a34   :  { %6441 = vmatpush1.msra.mxu0 %v11289_v21  ;;  %6512 = vmatpush1.msra.mxu1 %v11291_v12  ;;  %v13163_v21 = vld [vmem:[#allocation30_spill] sm:$0xff]  ;;  %v13164_v12 = vld [vmem:[#allocation31_spill] sm:$0xff] }
0x1a35   :  { %6442 = vmatprep.subr.mxu0 %v11295_v34  ;;  %6513 = vmatprep.subr.mxu1 %v11297_v15  ;;  %v13165_v34 = vld [vmem:[#allocation32_spill] sm:$0xff]  ;;  %v13166_v15 = vld [vmem:[#allocation33_spill] sm:$0xff] }
0x1a36   :  { %6443 = vmatpush1.msra.mxu0 %v11301_v13  ;;  %6514 = vmatpush1.msra.mxu1 %v11303_v17  ;;  %v13167_v13 = vld [vmem:[#allocation34_spill] sm:$0xff]  ;;  %v13168_v17 = vld [vmem:[#allocation35_spill] sm:$0xff] }
0x1a37   :  { %6444 = vmatprep.subr.mxu0 %v11307_v10  ;;  %6515 = vmatprep.subr.mxu1 %v11309_v52  ;;  %v13169_v10 = vld [vmem:[#allocation36_spill] sm:$0xff]  ;;  %v13170_v52 = vld [vmem:[#allocation37_spill] sm:$0xff] }
0x1a38   :  { %6445 = vmatpush1.msra.mxu0 %v11313_v5  ;;  %6516 = vmatpush1.msra.mxu1 %v11315_v7  ;;  %v13171_v5 = vld [vmem:[#allocation38_spill] sm:$0xff]  ;;  %v13172_v7 = vld [vmem:[#allocation43_spill] sm:$0xff] }
0x1a39   :  { %6446 = vmatprep.subr.mxu0 %v11319_v54  ;;  %6517 = vmatprep.subr.mxu1 %v11321_v33  ;;  %v13173_v54 = vld [vmem:[#allocation17_spill] sm:$0xff]  ;;  %v13174_v33 = vmov 0.0  }
0x1a3a   :  { %6447 = vmatpush1.msra.mxu0 %v11325_v32  ;;  %6518 = vmatpush1.msra.mxu1 %v11327_v19  ;;  %v13175_v32 = vld [vmem:[#allocation18_spill] sm:$0xff]  ;;  %v13176_v19 = vld [vmem:[#allocation19_spill] sm:$0xff] }
0x1a3b   :  { %6448 = vmatprep.subr.mxu0 %v11331_v23  ;;  %6519 = vmatprep.subr.mxu1 %v11333_v25  ;;  %v13177_v23 = vld [vmem:[#allocation20_spill] sm:$0xff] }
0x1a3c   :  { %6449 = vmatpush1.msra.mxu0 %v11337_v29  ;;  %6520 = vmatpush1.msra.mxu1 %v11339_v48  ;;  %v6237_v48 = vld [vmem:[#allocation3 + $0x28] sm:$0x30] }
0x1a3d   :  { %6450 = vmatprep.subr.mxu0 %v11343_v14  ;;  %6521 = vmatprep.subr.mxu1 %v11345_v18 }
0x1a3e   :  { %6451 = vmatpush1.msra.mxu0 %v11349_v11  ;;  %6522 = vmatpush1.msra.mxu1 %v11351_v63 }
0x1a3f   :  { %6452 = vmatprep.subr.mxu0 %v11353_v40  ;;  %6523 = vmatprep.subr.mxu1 %v11357_v41 }
0x1a40   :  { %6453 = vmatpush1.msra.mxu0 %v11359_v42  ;;  %6524 = vmatpush1.msra.mxu1 %v11361_v51 }
0x1a41   :  { %6454 = vmatprep.subr.mxu0 %v11365_v45  ;;  %6525 = vmatprep.subr.mxu1 %v11367_v27 }
0x1a42   :  { %6455 = vmatpush1.msra.mxu0 %v11369_v57  ;;  %6526 = vmatpush1.msra.mxu1 %v11373_v8 }
0x1a43   :  { %6456 = vmatprep.subr.mxu0 %v11375_v3  ;;  %6527 = vmatprep.subr.mxu1 %v11377_v31 }
0x1a44   :  { %6457 = vmatpush1.msra.mxu0 %v11381_v56  ;;  %6528 = vmatpush1.msra.mxu1 %v13111_v59 }
0x1a45   :  { %6458 = vmatprep.subr.mxu0 %v13155_v61  ;;  %6529 = vmatprep.subr.mxu1 %v13156_v28 }
0x1a46   :  { %6459 = vmatpush1.msra.mxu0 %v13157_v35  ;;  %6530 = vmatpush1.msra.mxu1 %v13158_v53 }
0x1a47   :  { %6460 = vmatprep.subr.mxu0 %v13159_v6  ;;  %6531 = vmatprep.subr.mxu1 %v13160_v16 }
0x1a48   :  { %6461 = vmatpush1.msra.mxu0 %v13161_v30  ;;  %6532 = vmatpush1.msra.mxu1 %v13162_v9 }
0x1a49   :  { %6462 = vmatprep.subr.mxu0 %v13163_v21  ;;  %6533 = vmatprep.subr.mxu1 %v13164_v12 }
0x1a4a   :  { %6463 = vmatpush1.msra.mxu0 %v13165_v34  ;;  %6534 = vmatpush1.msra.mxu1 %v13166_v15 }
0x1a4b   :  { %6464 = vmatprep.subr.mxu0 %v13167_v13  ;;  %6535 = vmatprep.subr.mxu1 %v13168_v17 }
0x1a4c   :  { %6465 = vmatpush1.msra.mxu0 %v13169_v10  ;;  %6536 = vmatpush1.msra.mxu1 %v13170_v52 }
0x1a4d   :  { %6466 = vmatprep.subr.mxu0 %v13171_v5  ;;  %6537 = vmatprep.subr.mxu1 %v13172_v7 }
0x1a4e   :  { %6467 = vmatpush1.msra.mxu0 %v13173_v54  ;;  %6500 = vmatprep.mubr.f32.mxu0 %v13174_v33 }
0x1a4f   :  { %6538 = vmatpush1.msra.mxu1 %v13175_v32  ;;  %6571 = vmatprep.mubr.f32.mxu1 %v13174_v33 }
0x1a50   :  { %6628 = vmatprep.subr.mxu0 %v13176_v19  ;;  %6699 = vmatprep.subr.mxu1 %v13177_v23 }
0x1aef   :  { %v6310_v25 = vpop.f32.mrf.mxu0  ;;  %v6381_v2 = vpop.f32.mrf.mxu1 }
0x1af0   :  { %v6390_v29 = vrot.slane %v6310_v25, 4  ;;  %v6392_v22 = vrot.slane %v6381_v2, 4  ;;  %v6422_v25 = vrot.slane %v11614_v49, 6  ;;  %v11690_v49 = vld [vmem:[#allocation9 + $0x7f0] sm:$0xff] }
0x1af1   :  { %v6312_v0 = vpop.f32.mrf.mxu0  ;;  %v6383_v60 = vpop.f32.mrf.mxu1 }
0x1af2   :  { %v6398_v39 = vadd.f32 %v6390_v29, %v6237_v48  ;;  %v6391_v47 = vrot.slane %v6312_v0, 4  ;;  %v6400_v37 = vadd.f32 %v6392_v22, %v6239_v50  ;;  %v6393_v43 = vrot.slane %v6383_v60, 4  ;;  %v11693_v22 = vld [vmem:[#allocation9 + $0x7c8] sm:$0xff]  ;;  %v11696_v50 = vld [vmem:[#allocation9 + $0x7d8] sm:$0xff]  ;;  %v11699_v60 = vld [vmem:[#allocation9 + $0x7c0] sm:$0xff] }
0x1af4   :  { %v7661_v20 = vmul.f32 -1.442695, %v6398_v39  ;;  %v6399_v46 = vadd.f32 %v6391_v47, %v6238_v58  ;;  %v7663_v55 = vmul.f32 -1.442695, %v6400_v37  ;;  %v6401_v36 = vadd.f32 %v6393_v43, %v6240_v1  ;;  %v11702_v37 = vld [vmem:[#allocation9 + $0x7d0] sm:$0xff]  ;;  %v11705_v43 = vld [vmem:[#allocation9 + $0x7a8] sm:$0xff] }
0x1af5   :  { %v11711_v1 = vld [vmem:[#allocation9 + $0x7a0] sm:$0xff] }
0x1af6   :  { %8214 = vpow2.f32 %v7661_v20  ;;  %v7662_v62 = vmul.f32 -1.442695, %v6399_v46 }
0x1af8   :  { %8216 = vpow2.f32 %v7662_v62  ;;  %v11687_v62 = vld [vmem:[#allocation9 + $0x7e0] sm:$0xff] }
0x1af9   :  { %8218 = vpow2.f32 %v7663_v55  ;;  %v11708_v55 = vld [vmem:[#allocation9 + $0x7b8] sm:$0xff] }
0x1b03   :  { %v8215_v44 = vpop.eup %8214 }
0x1b04   :  { %v6411_v38 = vadd.f32 1.0, %v8215_v44  ;;  %v11714_v44 = vld [vmem:[#allocation9 + $0x7b0] sm:$0xff] }
0x1b05   :  { %v8217_v26 = vpop.eup %8216 }
0x1b06   :  { %8220 = vrcp.f32 %v6411_v38  ;;  %v6412_v24 = vadd.f32 1.0, %v8217_v26  ;;  %v8219_v4 = vpop.eup %8218  ;;  %v11720_v38 = vld [vmem:[#allocation9 + $0x798] sm:$0xff]  ;;  %v11723_v26 = vld [vmem:[#allocation9 + $0x780] sm:$0xff] }
0x1b07   :  { %8222 = vtanh.f32 %v6401_v36  ;;  %v6413_v48 = vadd.f32 1.0, %v8219_v4  ;;  %v11717_v36 = vld [vmem:[#allocation9 + $0x788] sm:$0xff] }
0x1b08   :  { %8224 = vrcp.f32 %v6412_v24  ;;  %v11726_v24 = vld [vmem:[#allocation9 + $0x790] sm:$0xff]  ;;  %v11729_v4 = vld [vmem:[#allocation9 + $0x768] sm:$0xff] }
0x1b09   :  { %8226 = vrcp.f32 %v6413_v48  ;;  %v11744_v48 = vld [vmem:[#allocation9 + $0x758] sm:$0xff] }
0x1b13   :  { %v8221_v19 = vpop.eup %8220 }
0x1b14   :  { %v8223_v23 = vpop.eup %8222 }
0x1b15   :  { %v8225_v29 = vpop.eup %8224  ;;  %v6425_v39 = vmul.f32 %v8223_v23, %v8221_v19  ;;  %v11732_v19 = vld [vmem:[#allocation9 + $0x778] sm:$0xff]  ;;  %v11735_v23 = vld [vmem:[#allocation9 + $0x760] sm:$0xff] }
0x1b16   :  { %v6424_v0 = vmul.f32 %v8225_v29, %v6422_v25  ;;  %v8227_v58 = vpop.eup %8226  ;;  %v11738_v25 = vld [vmem:[#allocation9 + $0x770] sm:$0xff]  ;;  %v11741_v29 = vld [vmem:[#allocation9 + $0x748] sm:$0xff] }
0x1b18   :  { %v11684_v47 = vadd.f32 %v6425_v39, %v6424_v0  ;;  %v11747_v0 = vld [vmem:[#allocation9 + $0x740] sm:$0xff]  ;;  %v11750_v39 = vld [vmem:[#allocation9 + $0x750] sm:$0xff] }
0x1b1a   :  { %8228 = vtanh.f32 %v11684_v47 }
0x1b27   :  { %v8229_v20 = vpop.eup %8228 }
0x1b28   :  { %v6428_v46 = vmul.f32 %v8229_v20, %v8227_v58  ;;  %v11753_v58 = vld [vmem:[#allocation9 + $0x728] sm:$0xff]  ;;  %v11756_v20 = vld [vmem:[#allocation9 + $0x738] sm:$0xff] }
0x1b2a   :  { %v6434_v2 = vrot.slane %v6428_v46, 4  ;;  %v11759_v46 = vld [vmem:[#allocation9 + $0x720] sm:$0xff] }
0x1b2c   :  { %6501 = vmatmul.mubr.f32.vlgmr.msra.gmra.mxu0 %v6434_v2  ;;  %6572 = vmatmul.mubr.f32.vlgmr.msra.gmra.mxu1 %v6434_v2  ;;  %v11762_v2 = vld [vmem:[#allocation9 + $0x730] sm:$0xff] }
0x1b2d   :  { %6629 = vmatpush1.msra.mxu0 %v11687_v62  ;;  %6700 = vmatpush1.msra.mxu1 %v11690_v49 }
0x1b2e   :  { %6630 = vmatprep.subr.mxu0 %v11693_v22  ;;  %6701 = vmatprep.subr.mxu1 %v11696_v50 }
0x1b2f   :  { %6631 = vmatpush1.msra.mxu0 %v11699_v60  ;;  %6702 = vmatpush1.msra.mxu1 %v11702_v37 }
0x1b30   :  { %6632 = vmatprep.subr.mxu0 %v11705_v43  ;;  %6703 = vmatprep.subr.mxu1 %v11708_v55 }
0x1b31   :  { %6633 = vmatpush1.msra.mxu0 %v11711_v1  ;;  %6704 = vmatpush1.msra.mxu1 %v11714_v44 }
0x1b32   :  { %6634 = vmatprep.subr.mxu0 %v11717_v36  ;;  %6705 = vmatprep.subr.mxu1 %v11720_v38 }
0x1b33   :  { %6635 = vmatpush1.msra.mxu0 %v11723_v26  ;;  %6706 = vmatpush1.msra.mxu1 %v11726_v24 }
0x1b34   :  { %6636 = vmatprep.subr.mxu0 %v11729_v4  ;;  %6707 = vmatprep.subr.mxu1 %v11732_v19 }
0x1b35   :  { %6637 = vmatpush1.msra.mxu0 %v11735_v23  ;;  %6708 = vmatpush1.msra.mxu1 %v11738_v25 }
0x1b36   :  { %6638 = vmatprep.subr.mxu0 %v11741_v29  ;;  %6709 = vmatprep.subr.mxu1 %v11744_v48 }
0x1b37   :  { %6639 = vmatpush1.msra.mxu0 %v11747_v0  ;;  %6710 = vmatpush1.msra.mxu1 %v11750_v39 }
0x1b38   :  { %6640 = vmatprep.subr.mxu0 %v11753_v58  ;;  %6711 = vmatprep.subr.mxu1 %v11756_v20 }
0x1b39   :  { %6641 = vmatpush1.msra.mxu0 %v11759_v46  ;;  %6712 = vmatpush1.msra.mxu1 %v11762_v2 }
0x1b3a   :  { %6642 = vmatprep.subr.mxu0 %v11343_v14  ;;  %6713 = vmatprep.subr.mxu1 %v11345_v18  ;;  %v11803_v14 = vld [vmem:[#allocation9 + $0x7e8] sm:$0xff]  ;;  %v11806_v18 = vld [vmem:[#allocation9 + $0x7f8] sm:$0xff] }
0x1b3b   :  { %6643 = vmatpush1.msra.mxu0 %v11349_v11  ;;  %6714 = vmatpush1.msra.mxu1 %v11351_v63  ;;  %13178 = vst [vmem:[#allocation39_spill] sm:$0xff] %v11803_v14  ;;  %13179 = vst [vmem:[#allocation40_spill] sm:$0xff] %v11806_v18 }
0x1b3c   :  { %6644 = vmatprep.subr.mxu0 %v11353_v40  ;;  %6715 = vmatprep.subr.mxu1 %v11357_v41  ;;  %v6429_v40 = vld [vmem:[#allocation3 + $0x28] sm:$0xc0] }
0x1b3d   :  { %6645 = vmatpush1.msra.mxu0 %v11359_v42  ;;  %6716 = vmatpush1.msra.mxu1 %v11361_v51 }
0x1b3e   :  { %6646 = vmatprep.subr.mxu0 %v11365_v45  ;;  %6717 = vmatprep.subr.mxu1 %v11367_v27  ;;  %v6430_v45 = vld [vmem:[#allocation3 + $0x10] sm:$0xc0] }
0x1b3f   :  { %6647 = vmatpush1.msra.mxu0 %v11369_v57  ;;  %6718 = vmatpush1.msra.mxu1 %v11373_v8 }
0x1b40   :  { %6648 = vmatprep.subr.mxu0 %v11375_v3  ;;  %6719 = vmatprep.subr.mxu1 %v11377_v31 }
0x1b41   :  { %6649 = vmatpush1.msra.mxu0 %v11381_v56  ;;  %6720 = vmatpush1.msra.mxu1 %v13111_v59  ;;  %v6431_v56 = vld [vmem:[#allocation3 + $0x8] sm:$0xc0] }
0x1b42   :  { %6650 = vmatprep.subr.mxu0 %v13155_v61  ;;  %6721 = vmatprep.subr.mxu1 %v13156_v28 }
0x1b43   :  { %6651 = vmatpush1.msra.mxu0 %v13157_v35  ;;  %6722 = vmatpush1.msra.mxu1 %v13158_v53  ;;  %v6432_v53 = vld [vmem:[#allocation3 + $0x18] sm:$0xc0] }
0x1b44   :  { %6652 = vmatprep.subr.mxu0 %v13159_v6  ;;  %6723 = vmatprep.subr.mxu1 %v13160_v16 }
0x1b45   :  { %6653 = vmatpush1.msra.mxu0 %v13161_v30  ;;  %6724 = vmatpush1.msra.mxu1 %v13162_v9 }
0x1b46   :  { %6654 = vmatprep.subr.mxu0 %v13163_v21  ;;  %6725 = vmatprep.subr.mxu1 %v13164_v12 }
0x1b47   :  { %6655 = vmatpush1.msra.mxu0 %v13165_v34  ;;  %6726 = vmatpush1.msra.mxu1 %v13166_v15 }
0x1b48   :  { %6656 = vmatprep.subr.mxu0 %v13167_v13  ;;  %6727 = vmatprep.subr.mxu1 %v13168_v17  ;;  %v6614_v13 = vrot.slane %v11684_v47, 6  ;;  %v11839_v47 = vld [vmem:[#allocation9 + $0x708] sm:$0xff] }
0x1b49   :  { %6657 = vmatpush1.msra.mxu0 %v13169_v10  ;;  %6728 = vmatpush1.msra.mxu1 %v13170_v52 }
0x1b4a   :  { %6658 = vmatprep.subr.mxu0 %v13171_v5  ;;  %6729 = vmatprep.subr.mxu1 %v13172_v7 }
0x1b4b   :  { %6659 = vmatpush1.msra.mxu0 %v13173_v54  ;;  %6692 = vmatprep.mubr.f32.mxu0 %v13174_v33 }
0x1b4c   :  { %6730 = vmatpush1.msra.mxu1 %v13175_v32  ;;  %6763 = vmatprep.mubr.f32.mxu1 %v13174_v33 }
0x1b4d   :  { %6805 = vmatprep.subr.mxu0 %v11803_v14  ;;  %6876 = vmatprep.subr.mxu1 %v11806_v18 }
0x1bec   :  { %v6502_v11 = vpop.f32.mrf.mxu0  ;;  %v6573_v8 = vpop.f32.mrf.mxu1 }
0x1bed   :  { %v6582_v63 = vrot.slane %v6502_v11, 2  ;;  %v6584_v31 = vrot.slane %v6573_v8, 2  ;;  %v11863_v8 = vld [vmem:[#allocation9 + $0x6c8] sm:$0xff] }
0x1bee   :  { %v6504_v41 = vpop.f32.mrf.mxu0  ;;  %v6575_v59 = vpop.f32.mrf.mxu1 }
0x1bef   :  { %v6590_v42 = vadd.f32 %v6582_v63, %v6429_v40  ;;  %v6583_v51 = vrot.slane %v6504_v41, 2  ;;  %v6592_v61 = vadd.f32 %v6584_v31, %v6431_v56  ;;  %v6585_v28 = vrot.slane %v6575_v59, 2  ;;  %v11842_v40 = vld [vmem:[#allocation9 + $0x718] sm:$0xff]  ;;  %v11845_v41 = vld [vmem:[#allocation9 + $0x700] sm:$0xff]  ;;  %v11872_v56 = vld [vmem:[#allocation9 + $0x6d0] sm:$0xff] }
0x1bf0   :  { %v11869_v31 = vld [vmem:[#allocation9 + $0x6c0] sm:$0xff]  ;;  %v11875_v59 = vld [vmem:[#allocation9 + $0x6a8] sm:$0xff] }
0x1bf1   :  { %v7664_v27 = vmul.f32 -1.442695, %v6590_v42  ;;  %v6591_v57 = vadd.f32 %v6583_v51, %v6430_v45  ;;  %v7666_v35 = vmul.f32 -1.442695, %v6592_v61  ;;  %v6593_v16 = vadd.f32 %v6585_v28, %v6432_v53  ;;  %v11848_v42 = vld [vmem:[#allocation9 + $0x710] sm:$0xff]  ;;  %v11851_v51 = vld [vmem:[#allocation9 + $0x6e8] sm:$0xff] }
0x1bf2   :  { %v11854_v45 = vld [vmem:[#allocation9 + $0x6f8] sm:$0xff]  ;;  %v11881_v28 = vld [vmem:[#allocation9 + $0x6a0] sm:$0xff]  ;;  %v11887_v53 = vld [vmem:[#allocation9 + $0x688] sm:$0xff] }
0x1bf3   :  { %8230 = vpow2.f32 %v7664_v27  ;;  %v7665_v3 = vmul.f32 -1.442695, %v6591_v57  ;;  %v11857_v27 = vld [vmem:[#allocation9 + $0x6e0] sm:$0xff]  ;;  %v11860_v57 = vld [vmem:[#allocation9 + $0x6f0] sm:$0xff]  ;;  %v11878_v61 = vld [vmem:[#allocation9 + $0x6b8] sm:$0xff]  ;;  %13180 = vst [vmem:[#allocation41_spill] sm:$0xff] %v11887_v53 }
0x1bf5   :  { %8232 = vpow2.f32 %v7665_v3  ;;  %v11866_v3 = vld [vmem:[#allocation9 + $0x6d8] sm:$0xff] }
0x1bf6   :  { %8234 = vpow2.f32 %v7666_v35  ;;  %v11884_v35 = vld [vmem:[#allocation9 + $0x6b0] sm:$0xff] }
0x1c00   :  { %v8231_v6 = vpop.eup %8230 }
0x1c01   :  { %v6603_v30 = vadd.f32 1.0, %v8231_v6  ;;  %v11890_v6 = vld [vmem:[#allocation9 + $0x698] sm:$0xff] }
0x1c02   :  { %v8233_v9 = vpop.eup %8232  ;;  %13181 = vst [vmem:[#allocation42_spill] sm:$0xff] %v11890_v6 }
0x1c03   :  { %8236 = vrcp.f32 %v6603_v30  ;;  %v6604_v21 = vadd.f32 1.0, %v8233_v9  ;;  %v8235_v12 = vpop.eup %8234  ;;  %v11896_v30 = vld [vmem:[#allocation9 + $0x690] sm:$0xff]  ;;  %v11899_v9 = vld [vmem:[#allocation9 + $0x668] sm:$0xff] }
0x1c04   :  { %8238 = vtanh.f32 %v6593_v16  ;;  %v6605_v10 = vadd.f32 1.0, %v8235_v12  ;;  %v11893_v16 = vld [vmem:[#allocation9 + $0x680] sm:$0xff]  ;;  %13183 = vst [vmem:[#allocation22_spill] sm:$0xff] %v11896_v30  ;;  %13184 = vst [vmem:[#allocation23_spill] sm:$0xff] %v11899_v9 }
0x1c05   :  { %8240 = vrcp.f32 %v6604_v21  ;;  %13182 = vst [vmem:[#allocation21_spill] sm:$0xff] %v11893_v16  ;;  %v11902_v21 = vld [vmem:[#allocation9 + $0x678] sm:$0xff]  ;;  %v11905_v12 = vld [vmem:[#allocation9 + $0x660] sm:$0xff] }
0x1c06   :  { %8242 = vrcp.f32 %v6605_v10  ;;  %13185 = vst [vmem:[#allocation24_spill] sm:$0xff] %v11902_v21  ;;  %13186 = vst [vmem:[#allocation25_spill] sm:$0xff] %v11905_v12  ;;  %v11920_v10 = vld [vmem:[#allocation9 + $0x650] sm:$0xff] }
0x1c07   :  { %13191 = vst [vmem:[#allocation30_spill] sm:$0xff] %v11920_v10 }
0x1c10   :  { %v8237_v34 = vpop.eup %8236 }
0x1c11   :  { %v8239_v15 = vpop.eup %8238 }
0x1c12   :  { %v8241_v17 = vpop.eup %8240  ;;  %v6617_v5 = vmul.f32 %v8239_v15, %v8237_v34  ;;  %v11908_v34 = vld [vmem:[#allocation9 + $0x670] sm:$0xff]  ;;  %v11911_v15 = vld [vmem:[#allocation9 + $0x648] sm:$0xff] }
0x1c13   :  { %v6616_v52 = vmul.f32 %v8241_v17, %v6614_v13  ;;  %v8243_v54 = vpop.eup %8242  ;;  %13187 = vst [vmem:[#allocation26_spill] sm:$0xff] %v11908_v34  ;;  %13188 = vst [vmem:[#allocation27_spill] sm:$0xff] %v11911_v15  ;;  %v11914_v13 = vld [vmem:[#allocation9 + $0x658] sm:$0xff]  ;;  %v11917_v17 = vld [vmem:[#allocation9 + $0x640] sm:$0xff] }
0x1c14   :  { %13189 = vst [vmem:[#allocation28_spill] sm:$0xff] %v11914_v13  ;;  %13190 = vst [vmem:[#allocation29_spill] sm:$0xff] %v11917_v17 }
0x1c15   :  { %v11810_v7 = vadd.f32 %v6617_v5, %v6616_v52  ;;  %v11923_v52 = vld [vmem:[#allocation9 + $0x628] sm:$0xff]  ;;  %v11926_v5 = vld [vmem:[#allocation9 + $0x638] sm:$0xff] }
0x1c16   :  { %13192 = vst [vmem:[#allocation31_spill] sm:$0xff] %v11923_v52  ;;  %13193 = vst [vmem:[#allocation32_spill] sm:$0xff] %v11926_v5 }
0x1c17   :  { %8244 = vtanh.f32 %v11810_v7 }
0x1c24   :  { %v8245_v32 = vpop.eup %8244 }
0x1c25   :  { %v6620_v11 = vmul.f32 %v8245_v32, %v8243_v54  ;;  %v11929_v54 = vld [vmem:[#allocation9 + $0x620] sm:$0xff]  ;;  %v11932_v32 = vld [vmem:[#allocation9 + $0x630] sm:$0xff] }
0x1c26   :  { %13194 = vst [vmem:[#allocation33_spill] sm:$0xff] %v11929_v54  ;;  %13195 = vst [vmem:[#allocation34_spill] sm:$0xff] %v11932_v32 }
0x1c27   :  { %v6626_v63 = vrot.slane %v6620_v11, 6  ;;  %v11935_v11 = vld [vmem:[#allocation9 + $0x608] sm:$0xff] }
0x1c28   :  { %13196 = vst [vmem:[#allocation35_spill] sm:$0xff] %v11935_v11 }
0x1c29   :  { %6693 = vmatmul.mubr.f32.vlgmr.msra.gmra.mxu0 %v6626_v63  ;;  %6764 = vmatmul.mubr.f32.vlgmr.msra.gmra.mxu1 %v6626_v63  ;;  %v11938_v63 = vld [vmem:[#allocation9 + $0x618] sm:$0xff] }
0x1c2a   :  { %6806 = vmatpush1.msra.mxu0 %v11687_v62  ;;  %6877 = vmatpush1.msra.mxu1 %v11690_v49  ;;  %13197 = vst [vmem:[#allocation36_spill] sm:$0xff] %v11938_v63 }
0x1c2b   :  { %6807 = vmatprep.subr.mxu0 %v11693_v22  ;;  %6878 = vmatprep.subr.mxu1 %v11696_v50 }
0x1c2c   :  { %6808 = vmatpush1.msra.mxu0 %v11699_v60  ;;  %6879 = vmatpush1.msra.mxu1 %v11702_v37 }
0x1c2d   :  { %6809 = vmatprep.subr.mxu0 %v11705_v43  ;;  %6880 = vmatprep.subr.mxu1 %v11708_v55 }
0x1c2e   :  { %6810 = vmatpush1.msra.mxu0 %v11711_v1  ;;  %6881 = vmatpush1.msra.mxu1 %v11714_v44 }
0x1c2f   :  { %6811 = vmatprep.subr.mxu0 %v11717_v36  ;;  %6882 = vmatprep.subr.mxu1 %v11720_v38 }
0x1c30   :  { %6812 = vmatpush1.msra.mxu0 %v11723_v26  ;;  %6883 = vmatpush1.msra.mxu1 %v11726_v24 }
0x1c31   :  { %6813 = vmatprep.subr.mxu0 %v11729_v4  ;;  %6884 = vmatprep.subr.mxu1 %v11732_v19 }
0x1c32   :  { %6814 = vmatpush1.msra.mxu0 %v11735_v23  ;;  %6885 = vmatpush1.msra.mxu1 %v11738_v25 }
0x1c33   :  { %6815 = vmatprep.subr.mxu0 %v11741_v29  ;;  %6886 = vmatprep.subr.mxu1 %v11744_v48 }
0x1c34   :  { %6816 = vmatpush1.msra.mxu0 %v11747_v0  ;;  %6887 = vmatpush1.msra.mxu1 %v11750_v39 }
0x1c35   :  { %6817 = vmatprep.subr.mxu0 %v11753_v58  ;;  %6888 = vmatprep.subr.mxu1 %v11756_v20 }
0x1c36   :  { %6818 = vmatpush1.msra.mxu0 %v11759_v46  ;;  %6889 = vmatpush1.msra.mxu1 %v11762_v2 }
0x1c37   :  { %6819 = vmatprep.subr.mxu0 %v11839_v47  ;;  %6890 = vmatprep.subr.mxu1 %v11842_v40 }
0x1c38   :  { %6820 = vmatpush1.msra.mxu0 %v11845_v41  ;;  %6891 = vmatpush1.msra.mxu1 %v11848_v42 }
0x1c39   :  { %6821 = vmatprep.subr.mxu0 %v11851_v51  ;;  %6892 = vmatprep.subr.mxu1 %v11854_v45 }
0x1c3a   :  { %6822 = vmatpush1.msra.mxu0 %v11857_v27  ;;  %6893 = vmatpush1.msra.mxu1 %v11860_v57 }
0x1c3b   :  { %6823 = vmatprep.subr.mxu0 %v11863_v8  ;;  %6894 = vmatprep.subr.mxu1 %v11866_v3 }
0x1c3c   :  { %6824 = vmatpush1.msra.mxu0 %v11869_v31  ;;  %6895 = vmatpush1.msra.mxu1 %v11872_v56 }
0x1c3d   :  { %6825 = vmatprep.subr.mxu0 %v11875_v59  ;;  %6896 = vmatprep.subr.mxu1 %v11878_v61 }
0x1c3e   :  { %6826 = vmatpush1.msra.mxu0 %v11881_v28  ;;  %6897 = vmatpush1.msra.mxu1 %v11884_v35 }
0x1c3f   :  { %6827 = vmatprep.subr.mxu0 %v11887_v53  ;;  %6898 = vmatprep.subr.mxu1 %v11890_v6 }
0x1c40   :  { %6828 = vmatpush1.msra.mxu0 %v11893_v16  ;;  %6899 = vmatpush1.msra.mxu1 %v11896_v30 }
0x1c41   :  { %6829 = vmatprep.subr.mxu0 %v11899_v9  ;;  %6900 = vmatprep.subr.mxu1 %v11902_v21 }
0x1c42   :  { %6830 = vmatpush1.msra.mxu0 %v11905_v12  ;;  %6901 = vmatpush1.msra.mxu1 %v11908_v34  ;;  %v6623_v34 = vld [vmem:[#allocation3 + $0x30] sm:$0x3] }
0x1c43   :  { %6831 = vmatprep.subr.mxu0 %v11911_v15  ;;  %6902 = vmatprep.subr.mxu1 %v11914_v13 }
0x1c44   :  { %6832 = vmatpush1.msra.mxu0 %v11917_v17  ;;  %6903 = vmatpush1.msra.mxu1 %v11920_v10 }
0x1c45   :  { %6833 = vmatprep.subr.mxu0 %v11923_v52  ;;  %6904 = vmatprep.subr.mxu1 %v11926_v5  ;;  %v11941_v52 = vld [vmem:[#allocation9 + $0x600] sm:$0xff]  ;;  %v11945_v5 = vld [vmem:[#allocation9 + $0x610] sm:$0xff] }
0x1c46   :  { %6834 = vmatpush1.msra.mxu0 %v11929_v54  ;;  %6905 = vmatpush1.msra.mxu1 %v11932_v32  ;;  %13198 = vst [vmem:[#allocation37_spill] sm:$0xff] %v11941_v52  ;;  %13199 = vst [vmem:[#allocation38_spill] sm:$0xff] %v11945_v5 }
0x1c47   :  { %6835 = vmatprep.subr.mxu0 %v11935_v11  ;;  %6906 = vmatprep.subr.mxu1 %v11938_v63  ;;  %v6621_v11 = vld [vmem:[#allocation3 + $0x20] sm:$0x3]  ;;  %v6622_v63 = vld [vmem:[#allocation3 + $0x38] sm:$0x3] }
0x1c48   :  { %6836 = vmatpush1.msra.mxu0 %v11941_v52  ;;  %6869 = vmatprep.mubr.f32.mxu0 %v13174_v33 }
0x1c49   :  { %6907 = vmatpush1.msra.mxu1 %v11945_v5  ;;  %6940 = vmatprep.mubr.f32.mxu1 %v13174_v33  ;;  %v6624_v33 = vld [vmem:[#allocation3] sm:$0x3] }
0x1c4a   :  { %6997 = vmatprep.subr.mxu0 %v11803_v14  ;;  %7068 = vmatprep.subr.mxu1 %v11806_v18 }
0x1ce9   :  { %v6694_v32 = vpop.f32.mrf.mxu0  ;;  %v6765_v15 = vpop.f32.mrf.mxu1 }
0x1cea   :  { %v6770_v54 = vadd.f32 %v6694_v32, %v6621_v11  ;;  %v6772_v12 = vadd.f32 %v6765_v15, %v6623_v34 }
0x1ceb   :  { %v6696_v10 = vpop.f32.mrf.mxu0  ;;  %v6767_v5 = vpop.f32.mrf.mxu1 }
0x1cec   :  { %v7667_v17 = vmul.f32 -1.442695, %v6770_v54  ;;  %v6771_v13 = vadd.f32 %v6696_v10, %v6622_v63  ;;  %v7669_v21 = vmul.f32 -1.442695, %v6772_v12  ;;  %v6773_v14 = vadd.f32 %v6767_v5, %v6624_v33  ;;  %v13204_v5 = vld [vmem:[#allocation26_spill] sm:$0xff]  ;;  %v13205_v63 = vld [vmem:[#allocation27_spill] sm:$0xff] }
0x1cee   :  { %8246 = vpow2.f32 %v7667_v17  ;;  %v7668_v52 = vmul.f32 -1.442695, %v6771_v13  ;;  %v6794_v13 = vrot.slane %v11810_v7, 6  ;;  %v13202_v7 = vld [vmem:[#allocation24_spill] sm:$0xff] }
0x1cf0   :  { %8248 = vpow2.f32 %v7668_v52 }
0x1cf1   :  { %8250 = vpow2.f32 %v7669_v21  ;;  %v13203_v21 = vld [vmem:[#allocation25_spill] sm:$0xff] }
0x1cfb   :  { %v8247_v9 = vpop.eup %8246 }
0x1cfc   :  { %v6783_v30 = vadd.f32 1.0, %v8247_v9 }
0x1cfd   :  { %v8249_v18 = vpop.eup %8248 }
0x1cfe   :  { %8252 = vrcp.f32 %v6783_v30  ;;  %v6784_v32 = vadd.f32 1.0, %v8249_v18  ;;  %v8251_v54 = vpop.eup %8250  ;;  %v13201_v18 = vld [vmem:[#allocation23_spill] sm:$0xff] }
0x1cff   :  { %8254 = vtanh.f32 %v6773_v14  ;;  %v6785_v11 = vadd.f32 1.0, %v8251_v54  ;;  %v13200_v14 = vld [vmem:[#allocation22_spill] sm:$0xff]  ;;  %v13207_v54 = vld [vmem:[#allocation29_spill] sm:$0xff] }
0x1d00   :  { %8256 = vrcp.f32 %v6784_v32  ;;  %v13206_v32 = vld [vmem:[#allocation28_spill] sm:$0xff] }
0x1d01   :  { %8258 = vrcp.f32 %v6785_v11  ;;  %v13212_v11 = vld [vmem:[#allocation34_spill] sm:$0xff] }
0x1d0b   :  { %v8253_v10 = vpop.eup %8252 }
0x1d0c   :  { %v8255_v17 = vpop.eup %8254 }
0x1d0d   :  { %v8257_v52 = vpop.eup %8256  ;;  %v6797_v15 = vmul.f32 %v8255_v17, %v8253_v10  ;;  %v13208_v10 = vld [vmem:[#allocation30_spill] sm:$0xff]  ;;  %v13209_v17 = vld [vmem:[#allocation31_spill] sm:$0xff] }
0x1d0e   :  { %v6796_v34 = vmul.f32 %v8257_v52, %v6794_v13  ;;  %v8259_v33 = vpop.eup %8258  ;;  %v13210_v13 = vld [vmem:[#allocation32_spill] sm:$0xff]  ;;  %v13211_v52 = vld [vmem:[#allocation33_spill] sm:$0xff] }
0x1d10   :  { %v11952_v12 = vadd.f32 %v6797_v15, %v6796_v34  ;;  %v13213_v34 = vld [vmem:[#allocation35_spill] sm:$0xff]  ;;  %v13214_v15 = vld [vmem:[#allocation36_spill] sm:$0xff] }
0x1d12   :  { %8260 = vtanh.f32 %v11952_v12 }
0x1d1f   :  { %v8261_v9 = vpop.eup %8260 }
0x1d20   :  { %v6800_v30 = vmul.f32 %v8261_v9, %v8259_v33  ;;  %v13215_v33 = vld [vmem:[#allocation37_spill] sm:$0xff]  ;;  %v13216_v9 = vmov 0.0  }
0x1d22   :  { %6870 = vmatmul.mubr.f32.vlgmr.msra.gmra.mxu0 %v6800_v30  ;;  %6941 = vmatmul.mubr.f32.vlgmr.msra.gmra.mxu1 %v6800_v30  ;;  %v13217_v30 = vld [vmem:[#allocation38_spill] sm:$0xff] }
0x1d23   :  { %6998 = vmatpush1.msra.mxu0 %v11687_v62  ;;  %7069 = vmatpush1.msra.mxu1 %v11690_v49 }
0x1d24   :  { %6999 = vmatprep.subr.mxu0 %v11693_v22  ;;  %7070 = vmatprep.subr.mxu1 %v11696_v50 }
0x1d25   :  { %7000 = vmatpush1.msra.mxu0 %v11699_v60  ;;  %7071 = vmatpush1.msra.mxu1 %v11702_v37 }
0x1d26   :  { %7001 = vmatprep.subr.mxu0 %v11705_v43  ;;  %7072 = vmatprep.subr.mxu1 %v11708_v55 }
0x1d27   :  { %7002 = vmatpush1.msra.mxu0 %v11711_v1  ;;  %7073 = vmatpush1.msra.mxu1 %v11714_v44 }
0x1d28   :  { %7003 = vmatprep.subr.mxu0 %v11717_v36  ;;  %7074 = vmatprep.subr.mxu1 %v11720_v38 }
0x1d29   :  { %7004 = vmatpush1.msra.mxu0 %v11723_v26  ;;  %7075 = vmatpush1.msra.mxu1 %v11726_v24 }
0x1d2a   :  { %7005 = vmatprep.subr.mxu0 %v11729_v4  ;;  %7076 = vmatprep.subr.mxu1 %v11732_v19 }
0x1d2b   :  { %7006 = vmatpush1.msra.mxu0 %v11735_v23  ;;  %7077 = vmatpush1.msra.mxu1 %v11738_v25 }
0x1d2c   :  { %7007 = vmatprep.subr.mxu0 %v11741_v29  ;;  %7078 = vmatprep.subr.mxu1 %v11744_v48 }
0x1d2d   :  { %7008 = vmatpush1.msra.mxu0 %v11747_v0  ;;  %7079 = vmatpush1.msra.mxu1 %v11750_v39 }
0x1d2e   :  { %7009 = vmatprep.subr.mxu0 %v11753_v58  ;;  %7080 = vmatprep.subr.mxu1 %v11756_v20 }
0x1d2f   :  { %7010 = vmatpush1.msra.mxu0 %v11759_v46  ;;  %7081 = vmatpush1.msra.mxu1 %v11762_v2 }
0x1d30   :  { %7011 = vmatprep.subr.mxu0 %v11839_v47  ;;  %7082 = vmatprep.subr.mxu1 %v11842_v40 }
0x1d31   :  { %7012 = vmatpush1.msra.mxu0 %v11845_v41  ;;  %7083 = vmatpush1.msra.mxu1 %v11848_v42 }
0x1d32   :  { %7013 = vmatprep.subr.mxu0 %v11851_v51  ;;  %7084 = vmatprep.subr.mxu1 %v11854_v45 }
0x1d33   :  { %7014 = vmatpush1.msra.mxu0 %v11857_v27  ;;  %7085 = vmatpush1.msra.mxu1 %v11860_v57 }
0x1d34   :  { %7015 = vmatprep.subr.mxu0 %v11863_v8  ;;  %7086 = vmatprep.subr.mxu1 %v11866_v3 }
0x1d35   :  { %7016 = vmatpush1.msra.mxu0 %v11869_v31  ;;  %7087 = vmatpush1.msra.mxu1 %v11872_v56 }
0x1d36   :  { %7017 = vmatprep.subr.mxu0 %v11875_v59  ;;  %7088 = vmatprep.subr.mxu1 %v11878_v61 }
0x1d37   :  { %7018 = vmatpush1.msra.mxu0 %v11881_v28  ;;  %7089 = vmatpush1.msra.mxu1 %v11884_v35 }
0x1d38   :  { %7019 = vmatprep.subr.mxu0 %v11887_v53  ;;  %7090 = vmatprep.subr.mxu1 %v11890_v6 }
0x1d39   :  { %7020 = vmatpush1.msra.mxu0 %v11893_v16  ;;  %7091 = vmatpush1.msra.mxu1 %v13200_v14 }
0x1d3a   :  { %7021 = vmatprep.subr.mxu0 %v13201_v18  ;;  %7092 = vmatprep.subr.mxu1 %v13202_v7  ;;  %v6803_v7 = vld [vmem:[#allocation3 + $0x30] sm:$0xc] }
0x1d3b   :  { %7022 = vmatpush1.msra.mxu0 %v13203_v21  ;;  %7093 = vmatpush1.msra.mxu1 %v13204_v5 }
0x1d3c   :  { %7023 = vmatprep.subr.mxu0 %v13205_v63  ;;  %7094 = vmatprep.subr.mxu1 %v13206_v32  ;;  %v6802_v63 = vld [vmem:[#allocation3 + $0x38] sm:$0xc] }
0x1d3d   :  { %7024 = vmatpush1.msra.mxu0 %v13207_v54  ;;  %7095 = vmatpush1.msra.mxu1 %v13208_v10  ;;  %v13218_v10 = vld [vmem:[#allocation39_spill] sm:$0xff]  ;;  %v6801_v54 = vld [vmem:[#allocation3 + $0x20] sm:$0xc] }
0x1d3e   :  { %7025 = vmatprep.subr.mxu0 %v13209_v17  ;;  %7096 = vmatprep.subr.mxu1 %v13210_v13  ;;  %v13219_v17 = vld [vmem:[#allocation40_spill] sm:$0xff] }
0x1d3f   :  { %7026 = vmatpush1.msra.mxu0 %v13211_v52  ;;  %7097 = vmatpush1.msra.mxu1 %v13212_v11 }
0x1d40   :  { %7027 = vmatprep.subr.mxu0 %v13213_v34  ;;  %7098 = vmatprep.subr.mxu1 %v13214_v15 }
0x1d41   :  { %7028 = vmatpush1.msra.mxu0 %v13215_v33  ;;  %7061 = vmatprep.mubr.f32.mxu0 %v13216_v9 }
0x1d42   :  { %7099 = vmatpush1.msra.mxu1 %v13217_v30  ;;  %7132 = vmatprep.mubr.f32.mxu1 %v13216_v9 }
0x1d43   :  { %7189 = vmatprep.subr.mxu0 %v13218_v10  ;;  %7260 = vmatprep.subr.mxu1 %v13219_v17  ;;  %v6804_v17 = vld [vmem:[#allocation3] sm:$0xc] }
0x1de2   :  { %v6871_v13 = vpop.f32.mrf.mxu0  ;;  %v6942_v33 = vpop.f32.mrf.mxu1 }
0x1de3   :  { %v6951_v52 = vrot.slane %v6871_v13, 6  ;;  %v6953_v30 = vrot.slane %v6942_v33, 6 }
0x1de4   :  { %v6873_v11 = vpop.f32.mrf.mxu0  ;;  %v6944_v9 = vpop.f32.mrf.mxu1 }
0x1de5   :  { %v6959_v32 = vadd.f32 %v6951_v52, %v6801_v54  ;;  %v6952_v34 = vrot.slane %v6873_v11, 6  ;;  %v6961_v18 = vadd.f32 %v6953_v30, %v6803_v7  ;;  %v6954_v10 = vrot.slane %v6944_v9, 6 }
0x1de7   :  { %v7670_v15 = vmul.f32 -1.442695, %v6959_v32  ;;  %v6960_v5 = vadd.f32 %v6952_v34, %v6802_v63  ;;  %v7672_v14 = vmul.f32 -1.442695, %v6961_v18  ;;  %v6962_v13 = vadd.f32 %v6954_v10, %v6804_v17 }
0x1de9   :  { %8262 = vpow2.f32 %v7670_v15  ;;  %v7671_v21 = vmul.f32 -1.442695, %v6960_v5 }
0x1deb   :  { %8264 = vpow2.f32 %v7671_v21  ;;  %v6983_v21 = vrot.slane %v11952_v12, 6 }
0x1dec   :  { %8266 = vpow2.f32 %v7672_v14 }
0x1df6   :  { %v8263_v16 = vpop.eup %8262 }
0x1df7   :  { %v6972_v6 = vadd.f32 1.0, %v8263_v16 }
0x1df8   :  { %v8265_v53 = vpop.eup %8264 }
0x1df9   :  { %8268 = vrcp.f32 %v6972_v6  ;;  %v6973_v54 = vadd.f32 1.0, %v8265_v53  ;;  %v8267_v63 = vpop.eup %8266 }
0x1dfa   :  { %8270 = vtanh.f32 %v6962_v13  ;;  %v6974_v11 = vadd.f32 1.0, %v8267_v63 }
0x1dfb   :  { %8272 = vrcp.f32 %v6973_v54 }
0x1dfc   :  { %8274 = vrcp.f32 %v6974_v11 }
0x1e06   :  { %v8269_v32 = vpop.eup %8268 }
0x1e07   :  { %v8271_v5 = vpop.eup %8270 }
0x1e08   :  { %v8273_v52 = vpop.eup %8272  ;;  %v6986_v34 = vmul.f32 %v8271_v5, %v8269_v32 }
0x1e09   :  { %v6985_v7 = vmul.f32 %v8273_v52, %v6983_v21  ;;  %v8275_v16 = vpop.eup %8274 }
0x1e0b   :  { %v12022_v18 = vadd.f32 %v6986_v34, %v6985_v7  ;;  %v7389_v7 = vld [vmem:[%s12237_s4 + $0x78] sm:$0xff]  ;;  %v7388_v34 = vld [vmem:[%s12237_s4 + $0x70] sm:$0xff] }
0x1e0d   :  { %8276 = vtanh.f32 %v12022_v18  ;;  %v7175_v10 = vrot.slane %v12022_v18, 6  ;;  %v7387_v18 = vld [vmem:[%s12237_s4 + $0x68] sm:$0xff] }
0x1e1a   :  { %v8277_v14 = vpop.eup %8276 }
0x1e1b   :  { %v6989_v6 = vmul.f32 %v8277_v14, %v8275_v16  ;;  %v7386_v16 = vld [vmem:[%s12237_s4 + $0x60] sm:$0xff]  ;;  %v7385_v14 = vld [vmem:[%s12237_s4 + $0x58] sm:$0xff] }
0x1e1d   :  { %v6995_v53 = vrot.slane %v6989_v6, 2  ;;  %v7384_v6 = vld [vmem:[%s12237_s4 + $0x50] sm:$0xff] }
0x1e1f   :  { %7062 = vmatmul.mubr.f32.vlgmr.msra.gmra.mxu0 %v6995_v53  ;;  %7133 = vmatmul.mubr.f32.vlgmr.msra.gmra.mxu1 %v6995_v53  ;;  %v7383_v53 = vld [vmem:[%s12237_s4 + $0x48] sm:$0xff] }
0x1e20   :  { %7190 = vmatpush1.msra.mxu0 %v11687_v62  ;;  %7261 = vmatpush1.msra.mxu1 %v11690_v49  ;;  %v13220_v62 = vld [vmem:[#allocation41_spill] sm:$0xff]  ;;  %v13221_v49 = vld [vmem:[#allocation42_spill] sm:$0xff] }
0x1e21   :  { %7191 = vmatprep.subr.mxu0 %v11693_v22  ;;  %7262 = vmatprep.subr.mxu1 %v11696_v50  ;;  %v13222_v22 = vld [vmem:[#allocation21_spill] sm:$0xff]  ;;  %v13223_v50 = vld [vmem:[#allocation22_spill] sm:$0xff] }
0x1e22   :  { %7192 = vmatpush1.msra.mxu0 %v11699_v60  ;;  %7263 = vmatpush1.msra.mxu1 %v11702_v37  ;;  %v13224_v60 = vld [vmem:[#allocation23_spill] sm:$0xff]  ;;  %v13225_v37 = vld [vmem:[#allocation24_spill] sm:$0xff] }
0x1e23   :  { %7193 = vmatprep.subr.mxu0 %v11705_v43  ;;  %7264 = vmatprep.subr.mxu1 %v11708_v55  ;;  %v13226_v43 = vld [vmem:[#allocation25_spill] sm:$0xff]  ;;  %v13227_v55 = vld [vmem:[#allocation26_spill] sm:$0xff] }
0x1e24   :  { %7194 = vmatpush1.msra.mxu0 %v11711_v1  ;;  %7265 = vmatpush1.msra.mxu1 %v11714_v44  ;;  %v13228_v1 = vld [vmem:[#allocation27_spill] sm:$0xff]  ;;  %v13229_v44 = vld [vmem:[#allocation28_spill] sm:$0xff] }
0x1e25   :  { %7195 = vmatprep.subr.mxu0 %v11717_v36  ;;  %7266 = vmatprep.subr.mxu1 %v11720_v38  ;;  %v13230_v36 = vld [vmem:[#allocation29_spill] sm:$0xff]  ;;  %v13231_v38 = vld [vmem:[#allocation30_spill] sm:$0xff] }
0x1e26   :  { %7196 = vmatpush1.msra.mxu0 %v11723_v26  ;;  %7267 = vmatpush1.msra.mxu1 %v11726_v24  ;;  %v13232_v26 = vld [vmem:[#allocation31_spill] sm:$0xff]  ;;  %v13233_v24 = vld [vmem:[#allocation32_spill] sm:$0xff] }
0x1e27   :  { %7197 = vmatprep.subr.mxu0 %v11729_v4  ;;  %7268 = vmatprep.subr.mxu1 %v11732_v19  ;;  %v13234_v4 = vld [vmem:[#allocation33_spill] sm:$0xff]  ;;  %v13235_v19 = vld [vmem:[#allocation34_spill] sm:$0xff] }
0x1e28   :  { %7198 = vmatpush1.msra.mxu0 %v11735_v23  ;;  %7269 = vmatpush1.msra.mxu1 %v11738_v25  ;;  %v13236_v23 = vld [vmem:[#allocation35_spill] sm:$0xff]  ;;  %v13237_v25 = vld [vmem:[#allocation36_spill] sm:$0xff] }
0x1e29   :  { %7199 = vmatprep.subr.mxu0 %v11741_v29  ;;  %7270 = vmatprep.subr.mxu1 %v11744_v48  ;;  %v13238_v29 = vld [vmem:[#allocation37_spill] sm:$0xff]  ;;  %v13239_v48 = vmov 0.0  }
0x1e2a   :  { %7200 = vmatpush1.msra.mxu0 %v11747_v0  ;;  %7271 = vmatpush1.msra.mxu1 %v11750_v39  ;;  %v13240_v0 = vld [vmem:[#allocation38_spill] sm:$0xff] }
0x1e2b   :  { %7201 = vmatprep.subr.mxu0 %v11753_v58  ;;  %7272 = vmatprep.subr.mxu1 %v11756_v20  ;;  %v6990_v20 = vld [vmem:[#allocation3 + $0x20] sm:$0x30] }
0x1e2c   :  { %7202 = vmatpush1.msra.mxu0 %v11759_v46  ;;  %7273 = vmatpush1.msra.mxu1 %v11762_v2 }
0x1e2d   :  { %7203 = vmatprep.subr.mxu0 %v11839_v47  ;;  %7274 = vmatprep.subr.mxu1 %v11842_v40  ;;  %v6991_v40 = vld [vmem:[#allocation3 + $0x38] sm:$0x30] }
0x1e2e   :  { %7204 = vmatpush1.msra.mxu0 %v11845_v41  ;;  %7275 = vmatpush1.msra.mxu1 %v11848_v42 }
0x1e2f   :  { %7205 = vmatprep.subr.mxu0 %v11851_v51  ;;  %7276 = vmatprep.subr.mxu1 %v11854_v45 }
0x1e30   :  { %7206 = vmatpush1.msra.mxu0 %v11857_v27  ;;  %7277 = vmatpush1.msra.mxu1 %v11860_v57  ;;  %v6992_v57 = vld [vmem:[#allocation3 + $0x30] sm:$0x30] }
0x1e31   :  { %7207 = vmatprep.subr.mxu0 %v11863_v8  ;;  %7278 = vmatprep.subr.mxu1 %v11866_v3 }
0x1e32   :  { %7208 = vmatpush1.msra.mxu0 %v11869_v31  ;;  %7279 = vmatpush1.msra.mxu1 %v11872_v56 }
0x1e33   :  { %7209 = vmatprep.subr.mxu0 %v11875_v59  ;;  %7280 = vmatprep.subr.mxu1 %v11878_v61  ;;  %v6993_v59 = vld [vmem:[#allocation3] sm:$0x30] }
0x1e34   :  { %7210 = vmatpush1.msra.mxu0 %v11881_v28  ;;  %7281 = vmatpush1.msra.mxu1 %v11884_v35 }
0x1e35   :  { %7211 = vmatprep.subr.mxu0 %v13220_v62  ;;  %7282 = vmatprep.subr.mxu1 %v13221_v49  ;;  %v7382_v62 = vld [vmem:[%s12237_s4 + $0x40] sm:$0xff]  ;;  %v7381_v49 = vld [vmem:[%s12237_s4 + $0x38] sm:$0xff] }
0x1e36   :  { %7212 = vmatpush1.msra.mxu0 %v13222_v22  ;;  %7283 = vmatpush1.msra.mxu1 %v13223_v50  ;;  %v7380_v22 = vld [vmem:[%s12237_s4 + $0x30] sm:$0xff]  ;;  %v7379_v50 = vld [vmem:[%s12237_s4 + $0x28] sm:$0xff] }
0x1e37   :  { %7213 = vmatprep.subr.mxu0 %v13224_v60  ;;  %7284 = vmatprep.subr.mxu1 %v13225_v37  ;;  %v7378_v60 = vld [vmem:[%s12237_s4 + $0x20] sm:$0xff]  ;;  %v7377_v37 = vld [vmem:[%s12237_s4 + $0x18] sm:$0xff] }
0x1e38   :  { %7214 = vmatpush1.msra.mxu0 %v13226_v43  ;;  %7285 = vmatpush1.msra.mxu1 %v13227_v55  ;;  %v7376_v43 = vld [vmem:[%s12237_s4 + $0x10] sm:$0xff]  ;;  %v7375_v55 = vld [vmem:[%s12237_s4 + $0x8] sm:$0xff] }
0x1e39   :  { %7215 = vmatprep.subr.mxu0 %v13228_v1  ;;  %7286 = vmatprep.subr.mxu1 %v13229_v44  ;;  %v7486_v1 = vld [vmem:[%s12239_s6 + $0x78] sm:$0xff]  ;;  %v7485_v44 = vld [vmem:[%s12239_s6 + $0x70] sm:$0xff] }
0x1e3a   :  { %7216 = vmatpush1.msra.mxu0 %v13230_v36  ;;  %7287 = vmatpush1.msra.mxu1 %v13231_v38  ;;  %v7374_v36 = vld [vmem:[%s12237_s4] sm:$0xff]  ;;  %v7484_v38 = vld [vmem:[%s12239_s6 + $0x68] sm:$0xff] }
0x1e3b   :  { %7217 = vmatprep.subr.mxu0 %v13232_v26  ;;  %7288 = vmatprep.subr.mxu1 %v13233_v24  ;;  %v7483_v26 = vld [vmem:[%s12239_s6 + $0x60] sm:$0xff]  ;;  %v7482_v24 = vld [vmem:[%s12239_s6 + $0x58] sm:$0xff] }
0x1e3c   :  { %7218 = vmatpush1.msra.mxu0 %v13234_v4  ;;  %7289 = vmatpush1.msra.mxu1 %v13235_v19  ;;  %v7481_v4 = vld [vmem:[%s12239_s6 + $0x50] sm:$0xff]  ;;  %v7480_v19 = vld [vmem:[%s12239_s6 + $0x48] sm:$0xff] }
0x1e3d   :  { %7219 = vmatprep.subr.mxu0 %v13236_v23  ;;  %7290 = vmatprep.subr.mxu1 %v13237_v25  ;;  %v7479_v23 = vld [vmem:[%s12239_s6 + $0x40] sm:$0xff]  ;;  %v7478_v25 = vld [vmem:[%s12239_s6 + $0x38] sm:$0xff] }
0x1e3e   :  { %7220 = vmatpush1.msra.mxu0 %v13238_v29  ;;  %7253 = vmatprep.mubr.f32.mxu0 %v13239_v48  ;;  %v7477_v29 = vld [vmem:[%s12239_s6 + $0x30] sm:$0xff] }
0x1e3f   :  { %7291 = vmatpush1.msra.mxu1 %v13240_v0  ;;  %7324 = vmatprep.mubr.f32.mxu1 %v13239_v48  ;;  %v7476_v0 = vld [vmem:[%s12239_s6 + $0x28] sm:$0xff] }
0x1e40   :  { %7715 = vmatprep.subr.mxu0 %v13239_v48  ;;  %7750 = vmatprep.subr.mxu1 %v13239_v48 }
0x1edf   :  { %v7063_v39 = vpop.f32.mrf.mxu0  ;;  %v7134_v51 = vpop.f32.mrf.mxu1 }
0x1ee0   :  { %v7143_v58 = vrot.slane %v7063_v39, 4  ;;  %v7145_v27 = vrot.slane %v7134_v51, 4  ;;  %v7475_v39 = vld [vmem:[%s12239_s6 + $0x20] sm:$0xff] }
0x1ee1   :  { %v7065_v46 = vpop.f32.mrf.mxu0  ;;  %v7136_v8 = vpop.f32.mrf.mxu1 }
0x1ee2   :  { %v7151_v2 = vadd.f32 %v7143_v58, %v6990_v20  ;;  %v7144_v47 = vrot.slane %v7065_v46, 4  ;;  %v7153_v3 = vadd.f32 %v7145_v27, %v6992_v57  ;;  %v7146_v31 = vrot.slane %v7136_v8, 4  ;;  %v7474_v58 = vld [vmem:[%s12239_s6 + $0x18] sm:$0xff] }
0x1ee4   :  { %v7673_v41 = vmul.f32 -1.442695, %v7151_v2  ;;  %v7152_v42 = vadd.f32 %v7144_v47, %v6991_v40  ;;  %v7675_v56 = vmul.f32 -1.442695, %v7153_v3  ;;  %v7154_v28 = vadd.f32 %v7146_v31, %v6993_v59  ;;  %v7182_v2 = vld [vmem:[#allocation3 + $0x20] sm:$0xc0] }
0x1ee5   :  { %v7184_v3 = vld [vmem:[#allocation3 + $0x30] sm:$0xc0] }
0x1ee6   :  { %8278 = vpow2.f32 %v7673_v41  ;;  %v7674_v45 = vmul.f32 -1.442695, %v7152_v42  ;;  %v7183_v42 = vld [vmem:[#allocation3 + $0x38] sm:$0xc0] }
0x1ee8   :  { %8280 = vpow2.f32 %v7674_v45 }
0x1ee9   :  { %8282 = vpow2.f32 %v7675_v56 }
0x1ef3   :  { %v8279_v61 = vpop.eup %8278 }
0x1ef4   :  { %v7164_v35 = vadd.f32 1.0, %v8279_v61 }
0x1ef5   :  { %v8281_v12 = vpop.eup %8280 }
0x1ef6   :  { %8284 = vrcp.f32 %v7164_v35  ;;  %v7165_v15 = vadd.f32 1.0, %v8281_v12  ;;  %v8283_v33 = vpop.eup %8282 }
0x1ef7   :  { %8286 = vtanh.f32 %v7154_v28  ;;  %v7166_v13 = vadd.f32 1.0, %v8283_v33  ;;  %v7185_v28 = vld [vmem:[#allocation3] sm:$0xc0] }
0x1ef8   :  { %8288 = vrcp.f32 %v7165_v15 }
0x1ef9   :  { %8290 = vrcp.f32 %v7166_v13 }
0x1f03   :  { %v8285_v9 = vpop.eup %8284 }
0x1f04   :  { %v8287_v30 = vpop.eup %8286 }
0x1f05   :  { %v8289_v17 = vpop.eup %8288  ;;  %v7178_v63 = vmul.f32 %v8287_v30, %v8285_v9 }
0x1f06   :  { %v7177_v54 = vmul.f32 %v8289_v17, %v7175_v10  ;;  %v8291_v5 = vpop.eup %8290 }
0x1f08   :  { %v12092_v32 = vadd.f32 %v7178_v63, %v7177_v54 }
0x1f0a   :  { %8292 = vtanh.f32 %v12092_v32  ;;  %v7367_v13 = vrot.slane %v12092_v32, 6  ;;  %v7472_v32 = vld [vmem:[%s12239_s6 + $0x8] sm:$0xff] }
0x1f17   :  { %v8293_v21 = vpop.eup %8292 }
0x1f18   :  { %v7181_v52 = vmul.f32 %v8293_v21, %v8291_v5 }
0x1f1a   :  { %v7187_v11 = vrot.slane %v7181_v52, 4 }
0x1f1c   :  { %7254 = vmatmul.mubr.f32.vlgmr.msra.gmra.mxu0 %v7187_v11  ;;  %7325 = vmatmul.mubr.f32.vlgmr.msra.gmra.mxu1 %v7187_v11 }
0x1f1d   :  { %7716 = vmatpush3.msra.mxu0 %v7389_v7  ;;  %7747 = vmatprep.mubr.msk.f32.mxu0 %vm8685_vm0, %v13239_v48 }
0x1f1e   :  { %7717 = vmatprep.subr.mxu0 %v13239_v48  ;;  %7782 = vmatprep.mubr.msk.f32.mxu1 %vm8685_vm0, %v13239_v48 }
0x1f1f   :  { %7718 = vmatpush3.msra.mxu0 %v7388_v34  ;;  %7751 = vmatpush3.msra.mxu1 %v7486_v1 }
0x1f20   :  { %7719 = vmatprep.subr.mxu0 %v13239_v48  ;;  %7752 = vmatprep.subr.mxu1 %v13239_v48 }
0x1f21   :  { %7720 = vmatpush3.msra.mxu0 %v7387_v18  ;;  %7753 = vmatpush3.msra.mxu1 %v7485_v44 }
0x1f22   :  { %7721 = vmatprep.subr.mxu0 %v13239_v48  ;;  %7754 = vmatprep.subr.mxu1 %v13239_v48 }
0x1f23   :  { %7722 = vmatpush3.msra.mxu0 %v7386_v16  ;;  %7755 = vmatpush3.msra.mxu1 %v7484_v38  ;;  %v7473_v16 = vld [vmem:[%s12239_s6 + $0x10] sm:$0xff] }
0x1f24   :  { %7723 = vmatprep.subr.mxu0 %v13239_v48  ;;  %7756 = vmatprep.subr.mxu1 %v13239_v48 }
0x1f25   :  { %7724 = vmatpush3.msra.mxu0 %v7385_v14  ;;  %7757 = vmatpush3.msra.mxu1 %v7483_v26  ;;  %v7471_v14 = vld [vmem:[%s12239_s6] sm:$0xff]  ;;  %s8646_s6 = scalar_lea.vmem %s7573_s20, 32 }
0x1f26   :  { %7725 = vmatprep.subr.mxu0 %v13239_v48  ;;  %7758 = vmatprep.subr.mxu1 %v13239_v48  ;;  %p8647_p6 = scmp.ne.s32.totalorder %s7573_s20, %s8646_s6  ;;  %p8652_p8 = scmp.lt.s32.totalorder %s8646_s6, %s8646_s6 }
0x1f27   :  { %7726 = vmatpush3.msra.mxu0 %v7384_v6  ;;  %7759 = vmatpush3.msra.mxu1 %v7482_v24  ;;  %v7679_v6 = vld [vmem:[%s12238_s5] ss:$0 sm:$0xff] }
0x1f28   :  { %7727 = vmatprep.subr.mxu0 %v13239_v48  ;;  %7760 = vmatprep.subr.mxu1 %v13239_v48  ;;  %p8653_p9 = por %p8652_p8, %p8651_p7 }
0x1f29   :  { %7728 = vmatpush3.msra.mxu0 %v7383_v53  ;;  %7761 = vmatpush3.msra.mxu1 %v7481_v4 }
0x1f2a   :  { %7729 = vmatprep.subr.mxu0 %v13239_v48  ;;  %7762 = vmatprep.subr.mxu1 %v13239_v48  ;;  %p8654_p10 = pnand %p8653_p9, %p8647_p6 }
0x1f2b   :  { %7730 = vmatpush3.msra.mxu0 %v7382_v62  ;;  %7763 = vmatpush3.msra.mxu1 %v7480_v19 }
0x1f2c   :  { %7731 = vmatprep.subr.mxu0 %v13239_v48  ;;  %7764 = vmatprep.subr.mxu1 %v13239_v48 }
0x1f2d   :  { %7732 = vmatpush3.msra.mxu0 %v7381_v49  ;;  %7765 = vmatpush3.msra.mxu1 %v7479_v23 }
0x1f2e   :  { %7733 = vmatprep.subr.mxu0 %v13239_v48  ;;  %7766 = vmatprep.subr.mxu1 %v13239_v48 }
0x1f2f   :  { %7734 = vmatpush3.msra.mxu0 %v7380_v22  ;;  %7767 = vmatpush3.msra.mxu1 %v7478_v25 }
0x1f30   :  { %7735 = vmatprep.subr.mxu0 %v13239_v48  ;;  %7768 = vmatprep.subr.mxu1 %v13239_v48 }
0x1f31   :  { %7736 = vmatpush3.msra.mxu0 %v7379_v50  ;;  %7769 = vmatpush3.msra.mxu1 %v7477_v29  ;;  %v7680_v50 = vld [vmem:[%s12240_s7] ss:$0 sm:$0xff] }
0x1f32   :  { %7737 = vmatprep.subr.mxu0 %v13239_v48  ;;  %7770 = vmatprep.subr.mxu1 %v13239_v48 }
0x1f33   :  { %7738 = vmatpush3.msra.mxu0 %v7378_v60  ;;  %7771 = vmatpush3.msra.mxu1 %v7476_v0 }
0x1f34   :  { %7739 = vmatprep.subr.mxu0 %v13239_v48  ;;  %7772 = vmatprep.subr.mxu1 %v13239_v48 }
0x1f35   :  { %7740 = vmatpush3.msra.mxu0 %v7377_v37  ;;  %7773 = vmatpush3.msra.mxu1 %v7475_v39 }
0x1f36   :  { %7741 = vmatprep.subr.mxu0 %v13239_v48  ;;  %7774 = vmatprep.subr.mxu1 %v13239_v48 }
0x1f37   :  { %7742 = vmatpush3.msra.mxu0 %v7376_v43  ;;  %7775 = vmatpush3.msra.mxu1 %v7474_v58 }
0x1f38   :  { %7743 = vmatprep.subr.mxu0 %v13239_v48  ;;  %7776 = vmatprep.subr.mxu1 %v13239_v48 }
0x1f39   :  { %7744 = vmatpush3.msra.mxu0 %v7375_v55  ;;  %7777 = vmatpush3.msra.mxu1 %v7473_v16 }
0x1f3a   :  { %7745 = vmatprep.subr.mxu0 %v13239_v48  ;;  %7778 = vmatprep.subr.mxu1 %v13239_v48 }
0x1f3b   :  { %7746 = vmatpush3.msra.mxu0 %v7374_v36  ;;  %7779 = vmatpush3.msra.mxu1 %v7472_v32 }
0x1f3c   :  { %7780 = vmatprep.subr.mxu1 %v13239_v48 }
0x1f3d   :  { %7781 = vmatpush3.msra.mxu1 %v7471_v14 }
0x1fdc   :  { %v7255_v20 = vpop.f32.mrf.mxu0  ;;  %v7326_v27 = vpop.f32.mrf.mxu1 }
0x1fdd   :  { %v7335_v46 = vrot.slane %v7255_v20, 2  ;;  %v7337_v8 = vrot.slane %v7326_v27, 2 }
0x1fde   :  { %v7257_v47 = vpop.f32.mrf.mxu0  ;;  %v7328_v31 = vpop.f32.mrf.mxu1 }
0x1fdf   :  { %v7343_v40 = vadd.f32 %v7335_v46, %v7182_v2  ;;  %v7336_v41 = vrot.slane %v7257_v47, 2  ;;  %v7345_v56 = vadd.f32 %v7337_v8, %v7184_v3  ;;  %v7338_v59 = vrot.slane %v7328_v31, 2 }
0x1fe1   :  { %v7676_v51 = vmul.f32 -1.442695, %v7343_v40  ;;  %v7344_v45 = vadd.f32 %v7336_v41, %v7183_v42  ;;  %v7678_v61 = vmul.f32 -1.442695, %v7345_v56  ;;  %v7346_v12 = vadd.f32 %v7338_v59, %v7185_v28 }
0x1fe3   :  { %8294 = vpow2.f32 %v7676_v51  ;;  %v7677_v57 = vmul.f32 -1.442695, %v7344_v45 }
0x1fe5   :  { %8296 = vpow2.f32 %v7677_v57 }
0x1fe6   :  { %8298 = vpow2.f32 %v7678_v61 }
0x1ff0   :  { %v8295_v35 = vpop.eup %8294 }
0x1ff1   :  { %v7356_v15 = vadd.f32 1.0, %v8295_v35 }
0x1ff2   :  { %v8297_v33 = vpop.eup %8296 }
0x1ff3   :  { %8300 = vrcp.f32 %v7356_v15  ;;  %v7357_v9 = vadd.f32 1.0, %v8297_v33  ;;  %v8299_v30 = vpop.eup %8298 }
0x1ff4   :  { %8302 = vtanh.f32 %v7346_v12  ;;  %v7358_v63 = vadd.f32 1.0, %v8299_v30 }
0x1ff5   :  { %8304 = vrcp.f32 %v7357_v9 }
0x1ff6   :  { %8306 = vrcp.f32 %v7358_v63 }
0x2000   :  { %v8301_v10 = vpop.eup %8300 }
0x2001   :  { %v8303_v17 = vpop.eup %8302 }
0x2002   :  { %v8305_v54 = vpop.eup %8304  ;;  %v7370_v21 = vmul.f32 %v8303_v17, %v8301_v10 }
0x2003   :  { %v7369_v5 = vmul.f32 %v8305_v54, %v7367_v13  ;;  %v8307_v11 = vpop.eup %8306 }
0x2005   :  { %v7371_v52 = vadd.f32 %v7370_v21, %v7369_v5 }
0x2007   :  { %8308 = vtanh.f32 %v7371_v52 }
0x2014   :  { %v8309_v7 = vpop.eup %8308 }
0x2015   :  { %v7373_v34 = vmul.f32 %v8309_v7, %v8307_v11 }
0x2017   :  { %v7398_v18 = vrot.slane %v7373_v34, 6 }
0x2019   :  { %7748 = vmatmul.mubr.f32.vlgmr.msra.gmra.mxu0 %v7398_v18 }
0x20d9   :  { %v7466_v53 = vpop.f32.mrf.mxu0 }
0x20da   :  { %v7467_v62 = vadd.f32 %v7679_v6, %v7466_v53 }
0x20db   :  { %v7749_v49 = vpop.f32.mrf.mxu0 }
0x20dc   :  { %v7470_v22 = vmax.f32 %v7467_v62, 0.0 }
0x20de   :  { %7783 = vmatmul.mubr.f32.vlgmr.msra.gmra.mxu1 %v7470_v22 }
0x219e   :  { %v7560_v60 = vpop.f32.mrf.mxu1 }
0x219f   :  { %v7561_v37 = vadd.f32 %v7680_v50, %v7560_v60 }
0x21a0   :  { %v7784_v48 = vpop.f32.mrf.mxu1 }
0x21a1   :  { %7565 = vst.msk [vmem:[#allocation12] sm:$0x3] %vm7564_vm1, %v7561_v37 }
0x21a2   :  { %8657 = shalt.err (!%p8654_p10)
}
0x21a3   :  { %7575 = dma.vmem_to_hbm [thread:$0]  %s7573_s20, 32, %s12241_s8, [#allocation6]  }
0x21a4   :  { %8672 = dma.done.wait [#allocation6], 32  }
0x21a5   :  { %8673 = vsyncadd [#allocation6], 4294967264 }
0x21a6   :  { %7579 = vsyncpa [#allocation5], 1 }
0x21a7   :  { %7580 = vsyncpa [#allocation8], 1 }
0x21a8   :  { %7581 = vsyncpa [#allocation11], 1 }
0x21a9   :  { %7582 = vsyncpa [#allocation6], 1 }

</bundles_post_ra>
